<compile_context>
chip_gen: v5e
topology: v5e:2x2
jax: 0.10.0
libtpu: 0.0.40
codegen_flags: <defaults>
</compile_context>

<pallas_src>
import functools

import jax
import jax.numpy as jnp
from jax import lax
from jax.experimental import pallas as pl
from jax.experimental.pallas import tpu as pltpu

F32 = jnp.float32
BN_EPS = 1e-5


def _softplus(x):
    # Matches torch.nn.functional.softplus (threshold=20).
    return jnp.where(x > 20.0, x, jnp.log1p(jnp.exp(jnp.minimum(x, 20.0))))


def _dot(a, b):
    return jnp.dot(a, b, preferred_element_type=F32)


def _dot_t_lhs(a, b):
    # a: (K, M), b: (K, N) -> (M, N). Contract over the leading dim without an
    # explicit transpose.
    return lax.dot_general(a, b, (((0,), (0,)), ((), ())),
                           preferred_element_type=F32)


# ---------------------------------------------------------------------------
# Fused kernel
# ---------------------------------------------------------------------------
def _fused_cgnet_kernel(
    node_x_ref, src_ref, dst_ref, ea_ref, batch_ref, nw_ref,
    emb_w_ref, emb_b_ref,
    wig_ref, wjg_ref, weg_ref, bg_ref,
    wic_ref, wjc_ref, wec_ref, bc_ref,
    fc1_w_ref, fc1_b_ref, fc2_w_ref, fc2_b_ref, out_w_ref, out_b_ref,
    o_ref,
):
    n_nodes = node_x_ref.shape[0]
    n_conv = wig_ref.shape[0]
    batch_size = o_ref.shape[0]

    # ---- Embedding --------------------------------------------------------
    x = _dot(node_x_ref[...], emb_w_ref[...]) + emb_b_ref[...]        # (N, H)

    # ---- One-hot gather/scatter operators (built once, reused per layer) --
    src = src_ref[...]                                                # (E, 1)
    dst = dst_ref[...]                                                # (E, 1)
    n_edges = src.shape[0]
    node_iota = lax.broadcasted_iota(jnp.int32, (n_edges, n_nodes), 1)
    onehot_src = (node_iota == src).astype(F32)                       # (E, N)
    onehot_dst = (node_iota == dst).astype(F32)                       # (E, N)

    edge_attr = ea_ref[...]                                           # (E, Ed)

    # ---- CG-NET message-passing layers ------------------------------------
    for l in range(n_conv):
        x_j = _dot(onehot_src, x)                                     # x[src]
        x_i = _dot(onehot_dst, x)                                     # x[dst]

        # Split (and BN-folded) conv linear: gate half and core half, each as
        # three lane-clean matmuls accumulated in f32.
        z_gate = (_dot(x_i, wig_ref[l]) + _dot(x_j, wjg_ref[l])
                  + _dot(edge_attr, weg_ref[l]) + bg_ref[l])
        z_core = (_dot(x_i, wic_ref[l]) + _dot(x_j, wjc_ref[l])
                  + _dot(edge_attr, wec_ref[l]) + bc_ref[l])

        messages = jax.nn.sigmoid(z_gate) * _softplus(z_core)         # (E, H)

        # scatter_add onto target nodes (contract over E) + residual.
        aggr = _dot_t_lhs(onehot_dst, messages)                       # (N, H)
        x = x + aggr

    # ---- Weighted global pool + softplus -----------------------------------
    b = batch_ref[...]                                                # (N, 1)
    w = nw_ref[...]                                                   # (N, 1)
    graph_iota = lax.broadcasted_iota(jnp.int32, (n_nodes, batch_size), 1)
    onehot_g = (graph_iota == b).astype(F32)                          # (N, B)

    weight_sums = _dot_t_lhs(onehot_g, w)                             # (B, 1)
    inv_sums = pl.reciprocal(weight_sums, approx=True)                # (B, 1)
    per_node_inv = _dot(onehot_g, inv_sums)                           # (N, 1)
    pooled = _dot_t_lhs(onehot_g, x * (w * per_node_inv))             # (B, H)
    g = _softplus(pooled)

    # ---- MLP predictor (n_h = 2) + output head ------------------------------
    h = _softplus(_dot(g, fc1_w_ref[...]) + fc1_b_ref[...])
    h = _softplus(_dot(h, fc2_w_ref[...]) + fc2_b_ref[...])
    o_ref[...] = _dot(h, out_w_ref[...]) + out_b_ref[...]


# ---------------------------------------------------------------------------
# Host-side parameter prep (BN fold + weight split), init, forward wrapper
# ---------------------------------------------------------------------------
def _linear_init(key, in_dim, out_dim):
    kw, kb = jax.random.split(key)
    bound = 1.0 / jnp.sqrt(jnp.asarray(in_dim, F32))
    w = jax.random.uniform(kw, (in_dim, out_dim), F32, -bound, bound)
    b = jax.random.uniform(kb, (1, out_dim), F32, -bound, bound)
    return w, b


def init_params(key, in_node_dim, hidden, edge_dim, pred_hidden, n_conv, n_tasks):
    keys = jax.random.split(key, 2 + n_conv + 2)
    params = {}
    params["emb_w"], params["emb_b"] = _linear_init(keys[0], in_node_dim, hidden)

    convs = []
    z_dim = 2 * hidden + edge_dim
    for i in range(n_conv):
        w, b = _linear_init(keys[1 + i], z_dim, 2 * hidden)
        convs.append(dict(
            w=w, b=b,
            gamma=jnp.ones((1, 2 * hidden), F32),
            beta=jnp.zeros((1, 2 * hidden), F32),
            mean=jnp.zeros((1, 2 * hidden), F32),
            var=jnp.ones((1, 2 * hidden), F32),
        ))
    params["convs"] = convs

    params["fc1_w"], params["fc1_b"] = _linear_init(keys[1 + n_conv], hidden, pred_hidden)
    params["fc2_w"], params["fc2_b"] = _linear_init(keys[2 + n_conv], pred_hidden, pred_hidden)
    params["out_w"], params["out_b"] = _linear_init(keys[3 + n_conv], pred_hidden, n_tasks)
    return params


def _fold_and_split_conv_params(convs, hidden):
    """Fold eval-mode BN into the conv linear and split it into
    (x_i / x_j / edge) x (gate / core) blocks, stacked over layers."""
    wig, wjg, weg, bg = [], [], [], []
    wic, wjc, wec, bc = [], [], [], []
    for cp in convs:
        scale = cp["gamma"] / jnp.sqrt(cp["var"] + BN_EPS)            # (1, 2H)
        w = cp["w"] * scale                                           # (2H+Ed, 2H)
        bias = (cp["b"] - cp["mean"]) * scale + cp["beta"]            # (1, 2H)
        w_i, w_j, w_e = w[:hidden], w[hidden:2 * hidden], w[2 * hidden:]
        wig.append(w_i[:, :hidden]); wic.append(w_i[:, hidden:])
        wjg.append(w_j[:, :hidden]); wjc.append(w_j[:, hidden:])
        weg.append(w_e[:, :hidden]); wec.append(w_e[:, hidden:])
        bg.append(bias[:, :hidden]); bc.append(bias[:, hidden:])
    s = lambda xs: jnp.stack(xs, axis=0)
    return (s(wig), s(wjg), s(weg), s(bg), s(wic), s(wjc), s(wec), s(bc))


@functools.partial(jax.jit, static_argnames=("batch_size", "n_tasks"))
def cgnet_forward(params, node_x, edge_src, edge_dst, edge_attr,
                  batch_idx, node_weights, *, batch_size, n_tasks):
    hidden = params["emb_w"].shape[1]

    wig, wjg, weg, bg, wic, wjc, wec, bc = _fold_and_split_conv_params(
        params["convs"], hidden)

    args = (node_x, edge_src, edge_dst, edge_attr, batch_idx, node_weights,
            params["emb_w"], params["emb_b"],
            wig, wjg, weg, bg, wic, wjc, wec, bc,
            params["fc1_w"], params["fc1_b"],
            params["fc2_w"], params["fc2_b"],
            params["out_w"], params["out_b"])

    vmem = pl.BlockSpec(memory_space=pltpu.MemorySpace.VMEM)
    out = pl.pallas_call(
        _fused_cgnet_kernel,
        out_shape=jax.ShapeDtypeStruct((batch_size, n_tasks), F32),
        in_specs=[vmem] * len(args),
        out_specs=vmem,
    )(*args)

    # regression, n_tasks == 1  ->  squeeze last dim (shape (batch_size,))
    if n_tasks == 1:
        out = out[:, 0]
    return out


# ---------------------------------------------------------------------------
# Demo
# ---------------------------------------------------------------------------
if __name__ == "__main__":
    # Small graph with the module's default feature dims.
    N_NODES = 64          # total nodes across the batch of graphs
    N_EDGES = 128
    IN_NODE_DIM = 92      # default
    HIDDEN = 64           # default
    EDGE_DIM = 41         # default
    PRED_HIDDEN = 128     # default
    N_CONV = 3
    N_TASKS = 1
    BATCH_SIZE = 2        # two graphs, 32 nodes each

    key = jax.random.PRNGKey(0)
    k_param, k_x, k_ea, k_src, k_dst = jax.random.split(key, 5)

    params = init_params(k_param, IN_NODE_DIM, HIDDEN, EDGE_DIM,
                         PRED_HIDDEN, N_CONV, N_TASKS)

    node_x = jax.random.normal(k_x, (N_NODES, IN_NODE_DIM), F32)
    edge_attr = jax.random.normal(k_ea, (N_EDGES, EDGE_DIM), F32)

    # Two graphs; edges stay within their own graph.
    nodes_per_graph = N_NODES // BATCH_SIZE
    edges_per_graph = N_EDGES // BATCH_SIZE
    graph_of_edge = jnp.repeat(jnp.arange(BATCH_SIZE, dtype=jnp.int32), edges_per_graph)
    src_local = jax.random.randint(k_src, (N_EDGES,), 0, nodes_per_graph, jnp.int32)
    dst_local = jax.random.randint(k_dst, (N_EDGES,), 0, nodes_per_graph, jnp.int32)
    edge_src = (src_local + graph_of_edge * nodes_per_graph).reshape(N_EDGES, 1)
    edge_dst = (dst_local + graph_of_edge * nodes_per_graph).reshape(N_EDGES, 1)

    batch_idx = jnp.repeat(
        jnp.arange(BATCH_SIZE, dtype=jnp.int32), nodes_per_graph
    ).reshape(N_NODES, 1)
    node_weights = jnp.ones((N_NODES, 1), F32)   # default when data.node_weights is None

    out = cgnet_forward(params, node_x, edge_src, edge_dst, edge_attr,
                        batch_idx, node_weights,
                        batch_size=BATCH_SIZE, n_tasks=N_TASKS)
    out = jax.block_until_ready(out)
    assert out.shape == (BATCH_SIZE,)
    assert bool(jnp.all(jnp.isfinite(out)))
    print("KERNEL_OK")
</pallas_src>

<mosaic_0001>
module attributes {stable_mosaic.version = 11 : i64} {
  func.func @_fused_cgnet_kernel(%arg0: memref<64x92xf32, #tpu.memory_space<vmem>>, %arg1: memref<128x1xi32, #tpu.memory_space<vmem>>, %arg2: memref<128x1xi32, #tpu.memory_space<vmem>>, %arg3: memref<128x41xf32, #tpu.memory_space<vmem>>, %arg4: memref<64x1xi32, #tpu.memory_space<vmem>>, %arg5: memref<64x1xf32, #tpu.memory_space<vmem>>, %arg6: memref<92x64xf32, #tpu.memory_space<vmem>>, %arg7: memref<1x64xf32, #tpu.memory_space<vmem>>, %arg8: memref<3x64x64xf32, #tpu.memory_space<vmem>>, %arg9: memref<3x64x64xf32, #tpu.memory_space<vmem>>, %arg10: memref<3x41x64xf32, #tpu.memory_space<vmem>>, %arg11: memref<3x1x64xf32, #tpu.memory_space<vmem>>, %arg12: memref<3x64x64xf32, #tpu.memory_space<vmem>>, %arg13: memref<3x64x64xf32, #tpu.memory_space<vmem>>, %arg14: memref<3x41x64xf32, #tpu.memory_space<vmem>>, %arg15: memref<3x1x64xf32, #tpu.memory_space<vmem>>, %arg16: memref<64x128xf32, #tpu.memory_space<vmem>>, %arg17: memref<1x128xf32, #tpu.memory_space<vmem>>, %arg18: memref<128x128xf32, #tpu.memory_space<vmem>>, %arg19: memref<1x128xf32, #tpu.memory_space<vmem>>, %arg20: memref<128x1xf32, #tpu.memory_space<vmem>>, %arg21: memref<1x1xf32, #tpu.memory_space<vmem>>, %arg22: memref<2x1xf32, #tpu.memory_space<vmem>>) attributes {dimension_semantics = [], scalar_prefetch = 0 : i64, scratch_operands = 0 : i64, tpu.core_type = #tpu.core_type<tc>} {
    %c0 = arith.constant 0 : index
    %c0_0 = arith.constant 0 : index
    %0 = vector.load %arg0[%c0, %c0_0] : memref<64x92xf32, #tpu.memory_space<vmem>>, vector<64x92xf32>
    %c0_1 = arith.constant 0 : index
    %c0_2 = arith.constant 0 : index
    %1 = vector.load %arg6[%c0_1, %c0_2] : memref<92x64xf32, #tpu.memory_space<vmem>>, vector<92x64xf32>
    %cst = arith.constant dense<0.000000e+00> : vector<64x64xf32>
    %2 = tpu.matmul %0, %1, %cst {dimension_numbers = #tpu.dot_dimension_numbers<[1], [0], [0], [1], [0, 0, 1, 1], [], []>} : vector<64x92xf32>, vector<92x64xf32>, vector<64x64xf32> -> vector<64x64xf32>
    %c0_3 = arith.constant 0 : index
    %c0_4 = arith.constant 0 : index
    %3 = vector.load %arg7[%c0_3, %c0_4] : memref<1x64xf32, #tpu.memory_space<vmem>>, vector<1x64xf32>
    %4 = vector.broadcast %3 : vector<1x64xf32> to vector<64x64xf32>
    %5 = arith.addf %2, %4 : vector<64x64xf32>
    %c0_5 = arith.constant 0 : index
    %c0_6 = arith.constant 0 : index
    %6 = vector.load %arg1[%c0_5, %c0_6] : memref<128x1xi32, #tpu.memory_space<vmem>>, vector<128x1xi32>
    %c0_7 = arith.constant 0 : index
    %c0_8 = arith.constant 0 : index
    %7 = vector.load %arg2[%c0_7, %c0_8] : memref<128x1xi32, #tpu.memory_space<vmem>>, vector<128x1xi32>
    %8 = tpu.iota {dimensions = array<i32: 1>} : vector<128x64xi32>
    %9 = vector.broadcast %6 : vector<128x1xi32> to vector<128x64xi32>
    %10 = arith.cmpi eq, %8, %9 : vector<128x64xi32>
    %11 = arith.extui %10 : vector<128x64xi1> to vector<128x64xi32>
    %12 = arith.sitofp %11 : vector<128x64xi32> to vector<128x64xf32>
    %13 = vector.broadcast %7 : vector<128x1xi32> to vector<128x64xi32>
    %14 = arith.cmpi eq, %8, %13 : vector<128x64xi32>
    %15 = arith.extui %14 : vector<128x64xi1> to vector<128x64xi32>
    %16 = arith.sitofp %15 : vector<128x64xi32> to vector<128x64xf32>
    %c0_9 = arith.constant 0 : index
    %c0_10 = arith.constant 0 : index
    %17 = vector.load %arg3[%c0_9, %c0_10] : memref<128x41xf32, #tpu.memory_space<vmem>>, vector<128x41xf32>
    %cst_11 = arith.constant dense<0.000000e+00> : vector<128x64xf32>
    %18 = tpu.matmul %12, %5, %cst_11 {dimension_numbers = #tpu.dot_dimension_numbers<[1], [0], [0], [1], [0, 0, 1, 1], [], []>} : vector<128x64xf32>, vector<64x64xf32>, vector<128x64xf32> -> vector<128x64xf32>
    %cst_12 = arith.constant dense<0.000000e+00> : vector<128x64xf32>
    %19 = tpu.matmul %16, %5, %cst_12 {dimension_numbers = #tpu.dot_dimension_numbers<[1], [0], [0], [1], [0, 0, 1, 1], [], []>} : vector<128x64xf32>, vector<64x64xf32>, vector<128x64xf32> -> vector<128x64xf32>
    %c0_13 = arith.constant 0 : index
    %c0_14 = arith.constant 0 : index
    %c0_15 = arith.constant 0 : index
    %20 = vector.load %arg8[%c0_13, %c0_14, %c0_15] : memref<3x64x64xf32, #tpu.memory_space<vmem>>, vector<1x64x64xf32>
    %21 = vector.shape_cast %20 : vector<1x64x64xf32> to vector<64x64xf32>
    %cst_16 = arith.constant dense<0.000000e+00> : vector<128x64xf32>
    %22 = tpu.matmul %19, %21, %cst_16 {dimension_numbers = #tpu.dot_dimension_numbers<[1], [0], [0], [1], [0, 0, 1, 1], [], []>} : vector<128x64xf32>, vector<64x64xf32>, vector<128x64xf32> -> vector<128x64xf32>
    %c0_17 = arith.constant 0 : index
    %c0_18 = arith.constant 0 : index
    %c0_19 = arith.constant 0 : index
    %23 = vector.load %arg9[%c0_17, %c0_18, %c0_19] : memref<3x64x64xf32, #tpu.memory_space<vmem>>, vector<1x64x64xf32>
    %24 = vector.shape_cast %23 : vector<1x64x64xf32> to vector<64x64xf32>
    %cst_20 = arith.constant dense<0.000000e+00> : vector<128x64xf32>
    %25 = tpu.matmul %18, %24, %cst_20 {dimension_numbers = #tpu.dot_dimension_numbers<[1], [0], [0], [1], [0, 0, 1, 1], [], []>} : vector<128x64xf32>, vector<64x64xf32>, vector<128x64xf32> -> vector<128x64xf32>
    %26 = arith.addf %22, %25 : vector<128x64xf32>
    %c0_21 = arith.constant 0 : index
    %c0_22 = arith.constant 0 : index
    %c0_23 = arith.constant 0 : index
    %27 = vector.load %arg10[%c0_21, %c0_22, %c0_23] : memref<3x41x64xf32, #tpu.memory_space<vmem>>, vector<1x41x64xf32>
    %28 = vector.shape_cast %27 : vector<1x41x64xf32> to vector<41x64xf32>
    %cst_24 = arith.constant dense<0.000000e+00> : vector<128x64xf32>
    %29 = tpu.matmul %17, %28, %cst_24 {dimension_numbers = #tpu.dot_dimension_numbers<[1], [0], [0], [1], [0, 0, 1, 1], [], []>} : vector<128x41xf32>, vector<41x64xf32>, vector<128x64xf32> -> vector<128x64xf32>
    %30 = arith.addf %26, %29 : vector<128x64xf32>
    %c0_25 = arith.constant 0 : index
    %c0_26 = arith.constant 0 : index
    %c0_27 = arith.constant 0 : index
    %31 = vector.load %arg11[%c0_25, %c0_26, %c0_27] : memref<3x1x64xf32, #tpu.memory_space<vmem>>, vector<1x1x64xf32>
    %32 = vector.shape_cast %31 : vector<1x1x64xf32> to vector<1x64xf32>
    %33 = vector.broadcast %32 : vector<1x64xf32> to vector<128x64xf32>
    %34 = arith.addf %30, %33 : vector<128x64xf32>
    %c0_28 = arith.constant 0 : index
    %c0_29 = arith.constant 0 : index
    %c0_30 = arith.constant 0 : index
    %35 = vector.load %arg12[%c0_28, %c0_29, %c0_30] : memref<3x64x64xf32, #tpu.memory_space<vmem>>, vector<1x64x64xf32>
    %36 = vector.shape_cast %35 : vector<1x64x64xf32> to vector<64x64xf32>
    %cst_31 = arith.constant dense<0.000000e+00> : vector<128x64xf32>
    %37 = tpu.matmul %19, %36, %cst_31 {dimension_numbers = #tpu.dot_dimension_numbers<[1], [0], [0], [1], [0, 0, 1, 1], [], []>} : vector<128x64xf32>, vector<64x64xf32>, vector<128x64xf32> -> vector<128x64xf32>
    %c0_32 = arith.constant 0 : index
    %c0_33 = arith.constant 0 : index
    %c0_34 = arith.constant 0 : index
    %38 = vector.load %arg13[%c0_32, %c0_33, %c0_34] : memref<3x64x64xf32, #tpu.memory_space<vmem>>, vector<1x64x64xf32>
    %39 = vector.shape_cast %38 : vector<1x64x64xf32> to vector<64x64xf32>
    %cst_35 = arith.constant dense<0.000000e+00> : vector<128x64xf32>
    %40 = tpu.matmul %18, %39, %cst_35 {dimension_numbers = #tpu.dot_dimension_numbers<[1], [0], [0], [1], [0, 0, 1, 1], [], []>} : vector<128x64xf32>, vector<64x64xf32>, vector<128x64xf32> -> vector<128x64xf32>
    %41 = arith.addf %37, %40 : vector<128x64xf32>
    %c0_36 = arith.constant 0 : index
    %c0_37 = arith.constant 0 : index
    %c0_38 = arith.constant 0 : index
    %42 = vector.load %arg14[%c0_36, %c0_37, %c0_38] : memref<3x41x64xf32, #tpu.memory_space<vmem>>, vector<1x41x64xf32>
    %43 = vector.shape_cast %42 : vector<1x41x64xf32> to vector<41x64xf32>
    %cst_39 = arith.constant dense<0.000000e+00> : vector<128x64xf32>
    %44 = tpu.matmul %17, %43, %cst_39 {dimension_numbers = #tpu.dot_dimension_numbers<[1], [0], [0], [1], [0, 0, 1, 1], [], []>} : vector<128x41xf32>, vector<41x64xf32>, vector<128x64xf32> -> vector<128x64xf32>
    %45 = arith.addf %41, %44 : vector<128x64xf32>
    %c0_40 = arith.constant 0 : index
    %c0_41 = arith.constant 0 : index
    %c0_42 = arith.constant 0 : index
    %46 = vector.load %arg15[%c0_40, %c0_41, %c0_42] : memref<3x1x64xf32, #tpu.memory_space<vmem>>, vector<1x1x64xf32>
    %47 = vector.shape_cast %46 : vector<1x1x64xf32> to vector<1x64xf32>
    %48 = vector.broadcast %47 : vector<1x64xf32> to vector<128x64xf32>
    %49 = arith.addf %45, %48 : vector<128x64xf32>
    %50 = arith.negf %34 : vector<128x64xf32>
    %51 = math.exp %50 : vector<128x64xf32>
    %cst_43 = arith.constant 1.000000e+00 : f32
    %52 = vector.broadcast %cst_43 : f32 to vector<128x64xf32>
    %53 = arith.addf %52, %51 : vector<128x64xf32>
    %54 = arith.divf %52, %53 : vector<128x64xf32>
    %cst_44 = arith.constant 2.000000e+01 : f32
    %55 = vector.broadcast %cst_44 : f32 to vector<128x64xf32>
    %56 = arith.cmpf ogt, %49, %55 : vector<128x64xf32>
    %cst_45 = arith.constant 2.000000e+01 : f32
    %57 = vector.broadcast %cst_45 : f32 to vector<128x64xf32>
    %58 = arith.minimumf %49, %57 : vector<128x64xf32>
    %59 = math.exp %58 : vector<128x64xf32>
    %60 = math.log1p %59 : vector<128x64xf32>
    %61 = arith.select %56, %49, %60 : vector<128x64xi1>, vector<128x64xf32>
    %62 = arith.mulf %54, %61 : vector<128x64xf32>
    %cst_46 = arith.constant dense<0.000000e+00> : vector<64x64xf32>
    %63 = tpu.matmul %16, %62, %cst_46 {dimension_numbers = #tpu.dot_dimension_numbers<[0], [0], [1], [1], [0, 1, 1, 1], [], []>} : vector<128x64xf32>, vector<128x64xf32>, vector<64x64xf32> -> vector<64x64xf32>
    %64 = arith.addf %5, %63 : vector<64x64xf32>
    %cst_47 = arith.constant dense<0.000000e+00> : vector<128x64xf32>
    %65 = tpu.matmul %12, %64, %cst_47 {dimension_numbers = #tpu.dot_dimension_numbers<[1], [0], [0], [1], [0, 0, 1, 1], [], []>} : vector<128x64xf32>, vector<64x64xf32>, vector<128x64xf32> -> vector<128x64xf32>
    %cst_48 = arith.constant dense<0.000000e+00> : vector<128x64xf32>
    %66 = tpu.matmul %16, %64, %cst_48 {dimension_numbers = #tpu.dot_dimension_numbers<[1], [0], [0], [1], [0, 0, 1, 1], [], []>} : vector<128x64xf32>, vector<64x64xf32>, vector<128x64xf32> -> vector<128x64xf32>
    %c1 = arith.constant 1 : index
    %c0_49 = arith.constant 0 : index
    %c0_50 = arith.constant 0 : index
    %67 = vector.load %arg8[%c1, %c0_49, %c0_50] : memref<3x64x64xf32, #tpu.memory_space<vmem>>, vector<1x64x64xf32>
    %68 = vector.shape_cast %67 : vector<1x64x64xf32> to vector<64x64xf32>
    %cst_51 = arith.constant dense<0.000000e+00> : vector<128x64xf32>
    %69 = tpu.matmul %66, %68, %cst_51 {dimension_numbers = #tpu.dot_dimension_numbers<[1], [0], [0], [1], [0, 0, 1, 1], [], []>} : vector<128x64xf32>, vector<64x64xf32>, vector<128x64xf32> -> vector<128x64xf32>
    %c1_52 = arith.constant 1 : index
    %c0_53 = arith.constant 0 : index
    %c0_54 = arith.constant 0 : index
    %70 = vector.load %arg9[%c1_52, %c0_53, %c0_54] : memref<3x64x64xf32, #tpu.memory_space<vmem>>, vector<1x64x64xf32>
    %71 = vector.shape_cast %70 : vector<1x64x64xf32> to vector<64x64xf32>
    %cst_55 = arith.constant dense<0.000000e+00> : vector<128x64xf32>
    %72 = tpu.matmul %65, %71, %cst_55 {dimension_numbers = #tpu.dot_dimension_numbers<[1], [0], [0], [1], [0, 0, 1, 1], [], []>} : vector<128x64xf32>, vector<64x64xf32>, vector<128x64xf32> -> vector<128x64xf32>
    %73 = arith.addf %69, %72 : vector<128x64xf32>
    %c1_56 = arith.constant 1 : index
    %c0_57 = arith.constant 0 : index
    %c0_58 = arith.constant 0 : index
    %74 = vector.load %arg10[%c1_56, %c0_57, %c0_58] : memref<3x41x64xf32, #tpu.memory_space<vmem>>, vector<1x41x64xf32>
    %75 = vector.shape_cast %74 : vector<1x41x64xf32> to vector<41x64xf32>
    %cst_59 = arith.constant dense<0.000000e+00> : vector<128x64xf32>
    %76 = tpu.matmul %17, %75, %cst_59 {dimension_numbers = #tpu.dot_dimension_numbers<[1], [0], [0], [1], [0, 0, 1, 1], [], []>} : vector<128x41xf32>, vector<41x64xf32>, vector<128x64xf32> -> vector<128x64xf32>
    %77 = arith.addf %73, %76 : vector<128x64xf32>
    %c1_60 = arith.constant 1 : index
    %c0_61 = arith.constant 0 : index
    %c0_62 = arith.constant 0 : index
    %78 = vector.load %arg11[%c1_60, %c0_61, %c0_62] : memref<3x1x64xf32, #tpu.memory_space<vmem>>, vector<1x1x64xf32>
    %79 = vector.shape_cast %78 : vector<1x1x64xf32> to vector<1x64xf32>
    %80 = vector.broadcast %79 : vector<1x64xf32> to vector<128x64xf32>
    %81 = arith.addf %77, %80 : vector<128x64xf32>
    %c1_63 = arith.constant 1 : index
    %c0_64 = arith.constant 0 : index
    %c0_65 = arith.constant 0 : index
    %82 = vector.load %arg12[%c1_63, %c0_64, %c0_65] : memref<3x64x64xf32, #tpu.memory_space<vmem>>, vector<1x64x64xf32>
    %83 = vector.shape_cast %82 : vector<1x64x64xf32> to vector<64x64xf32>
    %cst_66 = arith.constant dense<0.000000e+00> : vector<128x64xf32>
    %84 = tpu.matmul %66, %83, %cst_66 {dimension_numbers = #tpu.dot_dimension_numbers<[1], [0], [0], [1], [0, 0, 1, 1], [], []>} : vector<128x64xf32>, vector<64x64xf32>, vector<128x64xf32> -> vector<128x64xf32>
    %c1_67 = arith.constant 1 : index
    %c0_68 = arith.constant 0 : index
    %c0_69 = arith.constant 0 : index
    %85 = vector.load %arg13[%c1_67, %c0_68, %c0_69] : memref<3x64x64xf32, #tpu.memory_space<vmem>>, vector<1x64x64xf32>
    %86 = vector.shape_cast %85 : vector<1x64x64xf32> to vector<64x64xf32>
    %cst_70 = arith.constant dense<0.000000e+00> : vector<128x64xf32>
    %87 = tpu.matmul %65, %86, %cst_70 {dimension_numbers = #tpu.dot_dimension_numbers<[1], [0], [0], [1], [0, 0, 1, 1], [], []>} : vector<128x64xf32>, vector<64x64xf32>, vector<128x64xf32> -> vector<128x64xf32>
    %88 = arith.addf %84, %87 : vector<128x64xf32>
    %c1_71 = arith.constant 1 : index
    %c0_72 = arith.constant 0 : index
    %c0_73 = arith.constant 0 : index
    %89 = vector.load %arg14[%c1_71, %c0_72, %c0_73] : memref<3x41x64xf32, #tpu.memory_space<vmem>>, vector<1x41x64xf32>
    %90 = vector.shape_cast %89 : vector<1x41x64xf32> to vector<41x64xf32>
    %cst_74 = arith.constant dense<0.000000e+00> : vector<128x64xf32>
    %91 = tpu.matmul %17, %90, %cst_74 {dimension_numbers = #tpu.dot_dimension_numbers<[1], [0], [0], [1], [0, 0, 1, 1], [], []>} : vector<128x41xf32>, vector<41x64xf32>, vector<128x64xf32> -> vector<128x64xf32>
    %92 = arith.addf %88, %91 : vector<128x64xf32>
    %c1_75 = arith.constant 1 : index
    %c0_76 = arith.constant 0 : index
    %c0_77 = arith.constant 0 : index
    %93 = vector.load %arg15[%c1_75, %c0_76, %c0_77] : memref<3x1x64xf32, #tpu.memory_space<vmem>>, vector<1x1x64xf32>
    %94 = vector.shape_cast %93 : vector<1x1x64xf32> to vector<1x64xf32>
    %95 = vector.broadcast %94 : vector<1x64xf32> to vector<128x64xf32>
    %96 = arith.addf %92, %95 : vector<128x64xf32>
    %97 = arith.negf %81 : vector<128x64xf32>
    %98 = math.exp %97 : vector<128x64xf32>
    %cst_78 = arith.constant 1.000000e+00 : f32
    %99 = vector.broadcast %cst_78 : f32 to vector<128x64xf32>
    %100 = arith.addf %99, %98 : vector<128x64xf32>
    %101 = arith.divf %99, %100 : vector<128x64xf32>
    %cst_79 = arith.constant 2.000000e+01 : f32
    %102 = vector.broadcast %cst_79 : f32 to vector<128x64xf32>
    %103 = arith.cmpf ogt, %96, %102 : vector<128x64xf32>
    %cst_80 = arith.constant 2.000000e+01 : f32
    %104 = vector.broadcast %cst_80 : f32 to vector<128x64xf32>
    %105 = arith.minimumf %96, %104 : vector<128x64xf32>
    %106 = math.exp %105 : vector<128x64xf32>
    %107 = math.log1p %106 : vector<128x64xf32>
    %108 = arith.select %103, %96, %107 : vector<128x64xi1>, vector<128x64xf32>
    %109 = arith.mulf %101, %108 : vector<128x64xf32>
    %cst_81 = arith.constant dense<0.000000e+00> : vector<64x64xf32>
    %110 = tpu.matmul %16, %109, %cst_81 {dimension_numbers = #tpu.dot_dimension_numbers<[0], [0], [1], [1], [0, 1, 1, 1], [], []>} : vector<128x64xf32>, vector<128x64xf32>, vector<64x64xf32> -> vector<64x64xf32>
    %111 = arith.addf %64, %110 : vector<64x64xf32>
    %cst_82 = arith.constant dense<0.000000e+00> : vector<128x64xf32>
    %112 = tpu.matmul %12, %111, %cst_82 {dimension_numbers = #tpu.dot_dimension_numbers<[1], [0], [0], [1], [0, 0, 1, 1], [], []>} : vector<128x64xf32>, vector<64x64xf32>, vector<128x64xf32> -> vector<128x64xf32>
    %cst_83 = arith.constant dense<0.000000e+00> : vector<128x64xf32>
    %113 = tpu.matmul %16, %111, %cst_83 {dimension_numbers = #tpu.dot_dimension_numbers<[1], [0], [0], [1], [0, 0, 1, 1], [], []>} : vector<128x64xf32>, vector<64x64xf32>, vector<128x64xf32> -> vector<128x64xf32>
    %c2 = arith.constant 2 : index
    %c0_84 = arith.constant 0 : index
    %c0_85 = arith.constant 0 : index
    %114 = vector.load %arg8[%c2, %c0_84, %c0_85] : memref<3x64x64xf32, #tpu.memory_space<vmem>>, vector<1x64x64xf32>
    %115 = vector.shape_cast %114 : vector<1x64x64xf32> to vector<64x64xf32>
    %cst_86 = arith.constant dense<0.000000e+00> : vector<128x64xf32>
    %116 = tpu.matmul %113, %115, %cst_86 {dimension_numbers = #tpu.dot_dimension_numbers<[1], [0], [0], [1], [0, 0, 1, 1], [], []>} : vector<128x64xf32>, vector<64x64xf32>, vector<128x64xf32> -> vector<128x64xf32>
    %c2_87 = arith.constant 2 : index
    %c0_88 = arith.constant 0 : index
    %c0_89 = arith.constant 0 : index
    %117 = vector.load %arg9[%c2_87, %c0_88, %c0_89] : memref<3x64x64xf32, #tpu.memory_space<vmem>>, vector<1x64x64xf32>
    %118 = vector.shape_cast %117 : vector<1x64x64xf32> to vector<64x64xf32>
    %cst_90 = arith.constant dense<0.000000e+00> : vector<128x64xf32>
    %119 = tpu.matmul %112, %118, %cst_90 {dimension_numbers = #tpu.dot_dimension_numbers<[1], [0], [0], [1], [0, 0, 1, 1], [], []>} : vector<128x64xf32>, vector<64x64xf32>, vector<128x64xf32> -> vector<128x64xf32>
    %120 = arith.addf %116, %119 : vector<128x64xf32>
    %c2_91 = arith.constant 2 : index
    %c0_92 = arith.constant 0 : index
    %c0_93 = arith.constant 0 : index
    %121 = vector.load %arg10[%c2_91, %c0_92, %c0_93] : memref<3x41x64xf32, #tpu.memory_space<vmem>>, vector<1x41x64xf32>
    %122 = vector.shape_cast %121 : vector<1x41x64xf32> to vector<41x64xf32>
    %cst_94 = arith.constant dense<0.000000e+00> : vector<128x64xf32>
    %123 = tpu.matmul %17, %122, %cst_94 {dimension_numbers = #tpu.dot_dimension_numbers<[1], [0], [0], [1], [0, 0, 1, 1], [], []>} : vector<128x41xf32>, vector<41x64xf32>, vector<128x64xf32> -> vector<128x64xf32>
    %124 = arith.addf %120, %123 : vector<128x64xf32>
    %c2_95 = arith.constant 2 : index
    %c0_96 = arith.constant 0 : index
    %c0_97 = arith.constant 0 : index
    %125 = vector.load %arg11[%c2_95, %c0_96, %c0_97] : memref<3x1x64xf32, #tpu.memory_space<vmem>>, vector<1x1x64xf32>
    %126 = vector.shape_cast %125 : vector<1x1x64xf32> to vector<1x64xf32>
    %127 = vector.broadcast %126 : vector<1x64xf32> to vector<128x64xf32>
    %128 = arith.addf %124, %127 : vector<128x64xf32>
    %c2_98 = arith.constant 2 : index
    %c0_99 = arith.constant 0 : index
    %c0_100 = arith.constant 0 : index
    %129 = vector.load %arg12[%c2_98, %c0_99, %c0_100] : memref<3x64x64xf32, #tpu.memory_space<vmem>>, vector<1x64x64xf32>
    %130 = vector.shape_cast %129 : vector<1x64x64xf32> to vector<64x64xf32>
    %cst_101 = arith.constant dense<0.000000e+00> : vector<128x64xf32>
    %131 = tpu.matmul %113, %130, %cst_101 {dimension_numbers = #tpu.dot_dimension_numbers<[1], [0], [0], [1], [0, 0, 1, 1], [], []>} : vector<128x64xf32>, vector<64x64xf32>, vector<128x64xf32> -> vector<128x64xf32>
    %c2_102 = arith.constant 2 : index
    %c0_103 = arith.constant 0 : index
    %c0_104 = arith.constant 0 : index
    %132 = vector.load %arg13[%c2_102, %c0_103, %c0_104] : memref<3x64x64xf32, #tpu.memory_space<vmem>>, vector<1x64x64xf32>
    %133 = vector.shape_cast %132 : vector<1x64x64xf32> to vector<64x64xf32>
    %cst_105 = arith.constant dense<0.000000e+00> : vector<128x64xf32>
    %134 = tpu.matmul %112, %133, %cst_105 {dimension_numbers = #tpu.dot_dimension_numbers<[1], [0], [0], [1], [0, 0, 1, 1], [], []>} : vector<128x64xf32>, vector<64x64xf32>, vector<128x64xf32> -> vector<128x64xf32>
    %135 = arith.addf %131, %134 : vector<128x64xf32>
    %c2_106 = arith.constant 2 : index
    %c0_107 = arith.constant 0 : index
    %c0_108 = arith.constant 0 : index
    %136 = vector.load %arg14[%c2_106, %c0_107, %c0_108] : memref<3x41x64xf32, #tpu.memory_space<vmem>>, vector<1x41x64xf32>
    %137 = vector.shape_cast %136 : vector<1x41x64xf32> to vector<41x64xf32>
    %cst_109 = arith.constant dense<0.000000e+00> : vector<128x64xf32>
    %138 = tpu.matmul %17, %137, %cst_109 {dimension_numbers = #tpu.dot_dimension_numbers<[1], [0], [0], [1], [0, 0, 1, 1], [], []>} : vector<128x41xf32>, vector<41x64xf32>, vector<128x64xf32> -> vector<128x64xf32>
    %139 = arith.addf %135, %138 : vector<128x64xf32>
    %c2_110 = arith.constant 2 : index
    %c0_111 = arith.constant 0 : index
    %c0_112 = arith.constant 0 : index
    %140 = vector.load %arg15[%c2_110, %c0_111, %c0_112] : memref<3x1x64xf32, #tpu.memory_space<vmem>>, vector<1x1x64xf32>
    %141 = vector.shape_cast %140 : vector<1x1x64xf32> to vector<1x64xf32>
    %142 = vector.broadcast %141 : vector<1x64xf32> to vector<128x64xf32>
    %143 = arith.addf %139, %142 : vector<128x64xf32>
    %144 = arith.negf %128 : vector<128x64xf32>
    %145 = math.exp %144 : vector<128x64xf32>
    %cst_113 = arith.constant 1.000000e+00 : f32
    %146 = vector.broadcast %cst_113 : f32 to vector<128x64xf32>
    %147 = arith.addf %146, %145 : vector<128x64xf32>
    %148 = arith.divf %146, %147 : vector<128x64xf32>
    %cst_114 = arith.constant 2.000000e+01 : f32
    %149 = vector.broadcast %cst_114 : f32 to vector<128x64xf32>
    %150 = arith.cmpf ogt, %143, %149 : vector<128x64xf32>
    %cst_115 = arith.constant 2.000000e+01 : f32
    %151 = vector.broadcast %cst_115 : f32 to vector<128x64xf32>
    %152 = arith.minimumf %143, %151 : vector<128x64xf32>
    %153 = math.exp %152 : vector<128x64xf32>
    %154 = math.log1p %153 : vector<128x64xf32>
    %155 = arith.select %150, %143, %154 : vector<128x64xi1>, vector<128x64xf32>
    %156 = arith.mulf %148, %155 : vector<128x64xf32>
    %cst_116 = arith.constant dense<0.000000e+00> : vector<64x64xf32>
    %157 = tpu.matmul %16, %156, %cst_116 {dimension_numbers = #tpu.dot_dimension_numbers<[0], [0], [1], [1], [0, 1, 1, 1], [], []>} : vector<128x64xf32>, vector<128x64xf32>, vector<64x64xf32> -> vector<64x64xf32>
    %158 = arith.addf %111, %157 : vector<64x64xf32>
    %c0_117 = arith.constant 0 : index
    %c0_118 = arith.constant 0 : index
    %159 = vector.load %arg4[%c0_117, %c0_118] : memref<64x1xi32, #tpu.memory_space<vmem>>, vector<64x1xi32>
    %c0_119 = arith.constant 0 : index
    %c0_120 = arith.constant 0 : index
    %160 = vector.load %arg5[%c0_119, %c0_120] : memref<64x1xf32, #tpu.memory_space<vmem>>, vector<64x1xf32>
    %161 = tpu.iota {dimensions = array<i32: 1>} : vector<64x2xi32>
    %162 = vector.broadcast %159 : vector<64x1xi32> to vector<64x2xi32>
    %163 = arith.cmpi eq, %161, %162 : vector<64x2xi32>
    %164 = arith.extui %163 : vector<64x2xi1> to vector<64x2xi32>
    %165 = arith.sitofp %164 : vector<64x2xi32> to vector<64x2xf32>
    %cst_121 = arith.constant dense<0.000000e+00> : vector<2x1xf32>
    %166 = tpu.matmul %165, %160, %cst_121 {dimension_numbers = #tpu.dot_dimension_numbers<[0], [0], [1], [1], [0, 1, 1, 1], [], []>} : vector<64x2xf32>, vector<64x1xf32>, vector<2x1xf32> -> vector<2x1xf32>
    %167 = tpu.reciprocal %166 {approx = true} : vector<2x1xf32> -> vector<2x1xf32>
    %cst_122 = arith.constant dense<0.000000e+00> : vector<64x1xf32>
    %168 = tpu.matmul %165, %167, %cst_122 {dimension_numbers = #tpu.dot_dimension_numbers<[1], [0], [0], [1], [0, 0, 1, 1], [], []>} : vector<64x2xf32>, vector<2x1xf32>, vector<64x1xf32> -> vector<64x1xf32>
    %169 = arith.mulf %160, %168 : vector<64x1xf32>
    %170 = vector.broadcast %169 : vector<64x1xf32> to vector<64x64xf32>
    %171 = arith.mulf %158, %170 : vector<64x64xf32>
    %cst_123 = arith.constant dense<0.000000e+00> : vector<2x64xf32>
    %172 = tpu.matmul %165, %171, %cst_123 {dimension_numbers = #tpu.dot_dimension_numbers<[0], [0], [1], [1], [0, 1, 1, 1], [], []>} : vector<64x2xf32>, vector<64x64xf32>, vector<2x64xf32> -> vector<2x64xf32>
    %cst_124 = arith.constant 2.000000e+01 : f32
    %173 = vector.broadcast %cst_124 : f32 to vector<2x64xf32>
    %174 = arith.cmpf ogt, %172, %173 : vector<2x64xf32>
    %cst_125 = arith.constant 2.000000e+01 : f32
    %175 = vector.broadcast %cst_125 : f32 to vector<2x64xf32>
    %176 = arith.minimumf %172, %175 : vector<2x64xf32>
    %177 = math.exp %176 : vector<2x64xf32>
    %178 = math.log1p %177 : vector<2x64xf32>
    %179 = arith.select %174, %172, %178 : vector<2x64xi1>, vector<2x64xf32>
    %c0_126 = arith.constant 0 : index
    %c0_127 = arith.constant 0 : index
    %180 = vector.load %arg16[%c0_126, %c0_127] : memref<64x128xf32, #tpu.memory_space<vmem>>, vector<64x128xf32>
    %cst_128 = arith.constant dense<0.000000e+00> : vector<2x128xf32>
    %181 = tpu.matmul %179, %180, %cst_128 {dimension_numbers = #tpu.dot_dimension_numbers<[1], [0], [0], [1], [0, 0, 1, 1], [], []>} : vector<2x64xf32>, vector<64x128xf32>, vector<2x128xf32> -> vector<2x128xf32>
    %c0_129 = arith.constant 0 : index
    %c0_130 = arith.constant 0 : index
    %182 = vector.load %arg17[%c0_129, %c0_130] : memref<1x128xf32, #tpu.memory_space<vmem>>, vector<1x128xf32>
    %183 = vector.broadcast %182 : vector<1x128xf32> to vector<2x128xf32>
    %184 = arith.addf %181, %183 : vector<2x128xf32>
    %cst_131 = arith.constant 2.000000e+01 : f32
    %185 = vector.broadcast %cst_131 : f32 to vector<2x128xf32>
    %186 = arith.cmpf ogt, %184, %185 : vector<2x128xf32>
    %cst_132 = arith.constant 2.000000e+01 : f32
    %187 = vector.broadcast %cst_132 : f32 to vector<2x128xf32>
    %188 = arith.minimumf %184, %187 : vector<2x128xf32>
    %189 = math.exp %188 : vector<2x128xf32>
    %190 = math.log1p %189 : vector<2x128xf32>
    %191 = arith.select %186, %184, %190 : vector<2x128xi1>, vector<2x128xf32>
    %c0_133 = arith.constant 0 : index
    %c0_134 = arith.constant 0 : index
    %192 = vector.load %arg18[%c0_133, %c0_134] : memref<128x128xf32, #tpu.memory_space<vmem>>, vector<128x128xf32>
    %cst_135 = arith.constant dense<0.000000e+00> : vector<2x128xf32>
    %193 = tpu.matmul %191, %192, %cst_135 {dimension_numbers = #tpu.dot_dimension_numbers<[1], [0], [0], [1], [0, 0, 1, 1], [], []>} : vector<2x128xf32>, vector<128x128xf32>, vector<2x128xf32> -> vector<2x128xf32>
    %c0_136 = arith.constant 0 : index
    %c0_137 = arith.constant 0 : index
    %194 = vector.load %arg19[%c0_136, %c0_137] : memref<1x128xf32, #tpu.memory_space<vmem>>, vector<1x128xf32>
    %195 = vector.broadcast %194 : vector<1x128xf32> to vector<2x128xf32>
    %196 = arith.addf %193, %195 : vector<2x128xf32>
    %cst_138 = arith.constant 2.000000e+01 : f32
    %197 = vector.broadcast %cst_138 : f32 to vector<2x128xf32>
    %198 = arith.cmpf ogt, %196, %197 : vector<2x128xf32>
    %cst_139 = arith.constant 2.000000e+01 : f32
    %199 = vector.broadcast %cst_139 : f32 to vector<2x128xf32>
    %200 = arith.minimumf %196, %199 : vector<2x128xf32>
    %201 = math.exp %200 : vector<2x128xf32>
    %202 = math.log1p %201 : vector<2x128xf32>
    %203 = arith.select %198, %196, %202 : vector<2x128xi1>, vector<2x128xf32>
    %c0_140 = arith.constant 0 : index
    %c0_141 = arith.constant 0 : index
    %204 = vector.load %arg20[%c0_140, %c0_141] : memref<128x1xf32, #tpu.memory_space<vmem>>, vector<128x1xf32>
    %cst_142 = arith.constant dense<0.000000e+00> : vector<2x1xf32>
    %205 = tpu.matmul %203, %204, %cst_142 {dimension_numbers = #tpu.dot_dimension_numbers<[1], [0], [0], [1], [0, 0, 1, 1], [], []>} : vector<2x128xf32>, vector<128x1xf32>, vector<2x1xf32> -> vector<2x1xf32>
    %c0_143 = arith.constant 0 : index
    %c0_144 = arith.constant 0 : index
    %206 = vector.load %arg21[%c0_143, %c0_144] : memref<1x1xf32, #tpu.memory_space<vmem>>, vector<1x1xf32>
    %207 = vector.broadcast %206 : vector<1x1xf32> to vector<2x1xf32>
    %208 = arith.addf %205, %207 : vector<2x1xf32>
    %c0_145 = arith.constant 0 : index
    %c0_146 = arith.constant 0 : index
    %209 = vector.load %arg22[%c0_145, %c0_146] : memref<2x1xf32, #tpu.memory_space<vmem>>, vector<2x1xf32>
    tpu.vector_store %arg22[%c0_145, %c0_146], %208 {strides = array<i32>} : memref<2x1xf32, #tpu.memory_space<vmem>>, vector<2x1xf32>,
    return
  }
}

</mosaic_0001>

<bundles_post_ra>
// kernel: cgnet_forward.1
= control target key start
LH: loop header
LB: loop body
LE: loop exit
PB: predicated region body
PF: predicated region fallthrough
CT: control target
= control target key end

     0   :  { %vm122_vm0 = vcmask 1043456   ;;  %v6212_v0 = vmov 0   ;;  %vm97_vm1 = vcmask 752640   ;;  %s11935_s6 = inlined_call_operand.vmem [shape: f32[92,64], index: 6, kind: input, shape index: {}]   ;;  %s11936_s2 = inlined_call_operand.vmem [shape: s32[128,1], index: 2, kind: input, shape index: {}]   ;;  %s11937_s1 = inlined_call_operand.vmem [shape: s32[128,1], index: 1, kind: input, shape index: {}]   ;;  %s11938_s0 = inlined_call_operand.vmem [shape: f32[64,92], index: 0, kind: input, shape index: {}]   ;;  %s11939_s7 = inlined_call_operand.vmem [shape: f32[1,64], index: 7, kind: input, shape index: {}]   ;;  %s11940_s4 = inlined_call_operand.vmem [shape: s32[64,1], index: 4, kind: input, shape index: {}]   ;;  %s11941_s9 = inlined_call_operand.vmem [shape: f32[3,64,64], index: 9, kind: input, shape index: {}]   ;;  %s11942_s8 = inlined_call_operand.vmem [shape: f32[3,64,64], index: 8, kind: input, shape index: {}]   ;;  %s11943_s13 = inlined_call_operand.vmem [shape: f32[3,64,64], index: 13, kind: input, shape index: {}]   ;;  %s11944_s10 = inlined_call_operand.vmem [shape: f32[3,41,64], index: 10, kind: input, shape index: {}]   ;;  %s11945_s3 = inlined_call_operand.vmem [shape: f32[128,41], index: 3, kind: input, shape index: {}]   ;;  %s11946_s11 = inlined_call_operand.vmem [shape: f32[3,1,64], index: 11, kind: input, shape index: {}]   ;;  %s11947_s12 = inlined_call_operand.vmem [shape: f32[3,64,64], index: 12, kind: input, shape index: {}]   ;;  %s11948_s14 = inlined_call_operand.vmem [shape: f32[3,41,64], index: 14, kind: input, shape index: {}]   ;;  %s11949_s15 = inlined_call_operand.vmem [shape: f32[3,1,64], index: 15, kind: input, shape index: {}]   ;;  %s11950_s5 = inlined_call_operand.vmem [shape: f32[64,1], index: 5, kind: input, shape index: {}]   ;;  %s11951_s17 = inlined_call_operand.vmem [shape: f32[1,128], index: 17, kind: input, shape index: {}]   ;;  %s11952_s16 = inlined_call_operand.vmem [shape: f32[64,128], index: 16, kind: input, shape index: {}]   ;;  %s11953_s18 = inlined_call_operand.vmem [shape: f32[128,128], index: 18, kind: input, shape index: {}]   ;;  %s11954_s19 = inlined_call_operand.vmem [shape: f32[1,128], index: 19, kind: input, shape index: {}]   ;;  %s11955_s20 = inlined_call_operand.vmem [shape: f32[128,1], index: 20, kind: input, shape index: {}]   ;;  %s11956_s21 = inlined_call_operand.<no memory space> [shape: f32[1,1], index: 21, kind: input, shape index: {}]   ;;  %s11957_s22 = inlined_call_operand.vmem [shape: f32[2,1], index: 22, kind: output, shape index: {}]  }
   0x1   :  { %12150 = sst [smem:[#allocation94_spill]] %s11935_s6  ;;  %5761 = vset.pattern.permute.xlu1 %v6212_v0  ;;  %5760 = vset.pattern.permute.xlu0 %v6212_v0 }
   0x2   :  { %12151 = sst [smem:[#allocation95_spill]] %s11936_s2  ;;  %5762 = vset.pattern.permute.xlu2 %v6212_v0 }
   0x3   :  { %12152 = sst [smem:[#allocation96_spill]] %s11937_s1 }
   0x4   :  { %12153 = sst [smem:[#allocation97_spill]] %s11938_s0 }
   0x5   :  { %12154 = sst [smem:[#allocation98_spill]] %s11939_s7 }
   0x6   :  { %12155 = sst [smem:[#allocation99_spill]] %s11940_s4 }
   0x7   :  { %12156 = sst [smem:[#allocation100_spill]] %s11941_s9 }
   0x8   :  { %s12157_s29 = sld [smem:[#allocation94_spill]] }
   0x9   :  { %s12158_s6 = sld [smem:[#allocation95_spill]] }
   0xa   :  { %s12159_s4 = sld [smem:[#allocation96_spill]] }
   0xb   :  { %s12160_s25 = sld [smem:[#allocation97_spill]] }
   0xc   :  { %s12161_s27 = sld [smem:[#allocation99_spill]] }
   0xe   :  { %v92_v1 = vld [vmem:[%s12157_s29 + $0x58] sm:$0xf]  ;;  %v91_v4 = vld [vmem:[%s12157_s29 + $0x50] sm:$0xff]  ;;  %v90_v5 = vld [vmem:[%s12157_s29 + $0x48] sm:$0xff] }
   0xf   :  { %v183_v2 = vld [vmem:[%s12158_s6] sm:$0xff]  ;;  %5026 = vmatpush.msk.msra.mxu0 %vm122_vm0, %v92_v1  ;;  %v88_v7 = vld [vmem:[%s12157_s29 + $0x38] sm:$0xff]  ;;  %v184_v9 = vld [vmem:[%s12158_s6 + $0x8] sm:$0xff] }
  0x10   :  { %v167_v3 = vld [vmem:[%s12159_s4] sm:$0xff]  ;;  %298 = vperm.xlu1 %5761, %v183_v2   ;;  %v169_v8 = vld [vmem:[%s12159_s4 + $0x10] sm:$0xff]  ;;  %v168_v10 = vld [vmem:[%s12159_s4 + $0x8] sm:$0xff]  ;;  %301 = vperm.xlu2 %5762, %v184_v9  }
  0x11   :  { %202 = vperm.xlu0 %5760, %v167_v3   ;;  %131 = vmatpush.msra.mxu0 %v91_v4  ;;  %v89_v6 = vld [vmem:[%s12157_s29 + $0x40] sm:$0xff]  ;;  %v87_v11 = vld [vmem:[%s12157_s29 + $0x30] sm:$0xff]  ;;  %v86_v12 = vld [vmem:[%s12157_s29 + $0x28] sm:$0xff] }
  0x12   :  { %v85_v13 = vld [vmem:[%s12157_s29 + $0x20] sm:$0xff]  ;;  %v170_v14 = vld [vmem:[%s12159_s4 + $0x18] sm:$0xff]  ;;  %v185_v17 = vld [vmem:[%s12158_s6 + $0x10] sm:$0xff] }
  0x13   :  { %132 = vmatpush.msra.mxu0 %v90_v5  ;;  %v84_v15 = vld [vmem:[%s12157_s29 + $0x18] sm:$0xff]  ;;  %v83_v18 = vld [vmem:[%s12157_s29 + $0x10] sm:$0xff]  ;;  %v82_v19 = vld [vmem:[%s12157_s29 + $0x8] sm:$0xff] }
  0x14   :  { %v186_v16 = vld [vmem:[%s12158_s6 + $0x18] sm:$0xff]  ;;  %v81_v20 = vld [vmem:[%s12157_s29] sm:$0xff]  ;;  %v172_v23 = vld [vmem:[%s12159_s4 + $0x28] sm:$0xff]  ;;  %s12163_s29 = sld [smem:[#allocation98_spill]] }
  0x15   :  { %133 = vmatpush.msra.mxu0 %v89_v6  ;;  %v171_v21 = vld [vmem:[%s12159_s4 + $0x20] sm:$0xff]  ;;  %v188_v25 = vld [vmem:[%s12158_s6 + $0x28] sm:$0xff]  ;;  %v189_v27 = vld [vmem:[%s12158_s6 + $0x30] sm:$0xff] }
  0x16   :  { %v73_v22 = vld [vmem:[%s12160_s25] sm:$0xff]  ;;  %v74_v26 = vld [vmem:[%s12160_s25 + $0x8] sm:$0xff]  ;;  %v173_v28 = vld [vmem:[%s12159_s4 + $0x30] sm:$0xff] }
  0x17   :  { %134 = vmatpush.msra.mxu0 %v88_v7  ;;  %v187_v24 = vld [vmem:[%s12158_s6 + $0x20] sm:$0xff]  ;;  %v174_v29 = vld [vmem:[%s12159_s4 + $0x38] sm:$0xff]  ;;  %v75_v30 = vld [vmem:[%s12160_s25 + $0x10] sm:$0xff] }
  0x18   :  { %208 = vperm.xlu1 %5761, %v169_v8   ;;  %211 = vperm.xlu2 %5762, %v170_v14   ;;  %v175_v31 = vld [vmem:[%s12159_s4 + $0x40] sm:$0xff]  ;;  %v190_v32 = vld [vmem:[%s12158_s6 + $0x38] sm:$0xff]  ;;  %v192_v35 = vld [vmem:[%s12158_s6 + $0x48] sm:$0xff] }
  0x19   :  { %205 = vperm.xlu0 %5760, %v168_v10   ;;  %135 = vmatpush.msra.mxu0 %v87_v11  ;;  %v191_v33 = vld [vmem:[%s12158_s6 + $0x40] sm:$0xff]  ;;  %v76_v34 = vld [vmem:[%s12160_s25 + $0x18] sm:$0xff]  ;;  %v176_v36 = vld [vmem:[%s12159_s4 + $0x48] sm:$0xff] }
  0x1a   :  { %v177_v37 = vld [vmem:[%s12159_s4 + $0x50] sm:$0xff]  ;;  %v77_v38 = vld [vmem:[%s12160_s25 + $0x20] sm:$0xff]  ;;  %v178_v39 = vld [vmem:[%s12159_s4 + $0x58] sm:$0xff] }
  0x1b   :  { %136 = vmatpush.msra.mxu0 %v86_v12  ;;  %v193_v40 = vld [vmem:[%s12158_s6 + $0x50] sm:$0xff]  ;;  %v194_v41 = vld [vmem:[%s12158_s6 + $0x58] sm:$0xff]  ;;  %v78_v42 = vld [vmem:[%s12160_s25 + $0x28] sm:$0xff] }
  0x1c   :  { %v195_v43 = vld [vmem:[%s12158_s6 + $0x60] sm:$0xff]  ;;  %v180_v45 = vld [vmem:[%s12159_s4 + $0x68] sm:$0xff]  ;;  %v79_v46 = vld [vmem:[%s12160_s25 + $0x30] sm:$0xff] }
  0x1d   :  { %137 = vmatpush.msra.mxu0 %v85_v13  ;;  %v179_v44 = vld [vmem:[%s12159_s4 + $0x60] sm:$0xff]  ;;  %v181_v47 = vld [vmem:[%s12159_s4 + $0x70] sm:$0xff]  ;;  %v196_v48 = vld [vmem:[%s12158_s6 + $0x68] sm:$0xff] }
  0x1e   :  { %v197_v49 = vld [vmem:[%s12158_s6 + $0x70] sm:$0xff]  ;;  %v80_v50 = vld [vmem:[%s12160_s25 + $0x38] sm:$0xff]  ;;  %v4597_v53 = vld [vmem:[%s12161_s27] sm:$0xff] }
  0x1f   :  { %138 = vmatpush.msra.mxu0 %v84_v15  ;;  %v198_v51 = vld [vmem:[%s12158_s6 + $0x78] sm:$0xff]  ;;  %v4599_v54 = vld [vmem:[%s12161_s27 + $0x10] sm:$0xff]  ;;  %v4598_v55 = vld [vmem:[%s12161_s27 + $0x8] sm:$0xff]  ;;  %s12202_s6 = sld [smem:[#allocation100_spill]] }
  0x20   :  { %307 = vperm.xlu1 %5761, %v186_v16   ;;  %214 = vperm.xlu2 %5762, %v171_v21   ;;  %v182_v52 = vld [vmem:[%s12159_s4 + $0x78] sm:$0xff]  ;;  %v4602_v56 = vld [vmem:[%s12161_s27 + $0x28] sm:$0xff]  ;;  %v4601_v58 = vld [vmem:[%s12161_s27 + $0x20] sm:$0xff] }
  0x21   :  { %304 = vperm.xlu0 %5760, %v185_v17   ;;  %139 = vmatpush.msra.mxu0 %v83_v18  ;;  %v4600_v57 = vld [vmem:[%s12161_s27 + $0x18] sm:$0xff]  ;;  %v4603_v62 = vld [vmem:[%s12161_s27 + $0x30] sm:$0xff] }
  0x22   :  { %v4604_v60 = vld [vmem:[%s12161_s27 + $0x38] sm:$0xff] }
  0x23   :  { %140 = vmatpush.msra.mxu0 %v82_v19 }
  0x25   :  { %141 = vmatpush.msra.mxu0 %v81_v20 }
  0x26   :  { %5027 = vmatmul.msk.f32.vlgmr.msra.gmra.mxu0 %vm97_vm1, %v73_v22 }
  0x28   :  { %217 = vperm.xlu1 %5761, %v172_v23   ;;  %313 = vperm.xlu2 %5762, %v188_v25  }
  0x29   :  { %310 = vperm.xlu0 %5760, %v187_v24   ;;  %v199_v24 = vlaneseq }
  0x2e   :  { %5028 = vmatmul.msk.f32.gmra.mxu0 %vm97_vm1, %v74_v26 }
  0x30   :  { %316 = vperm.xlu1 %5761, %v189_v27   ;;  %223 = vperm.xlu2 %5762, %v174_v29  }
  0x31   :  { %220 = vperm.xlu0 %5760, %v173_v28   ;;  %v6581_v28 = vand.u32 127, %v199_v24 }
  0x36   :  { %5029 = vmatmul.msk.f32.gmra.mxu0 %vm97_vm1, %v75_v30 }
  0x38   :  { %226 = vperm.xlu1 %5761, %v175_v31   ;;  %322 = vperm.xlu2 %5762, %v191_v33   ;;  %v6213_v31 = vmov 0.0  }
  0x39   :  { %319 = vperm.xlu0 %5760, %v190_v32  }
  0x3e   :  { %5030 = vmatmul.msk.f32.gmra.mxu0 %vm97_vm1, %v76_v34 }
  0x40   :  { %325 = vperm.xlu1 %5761, %v192_v35   ;;  %232 = vperm.xlu2 %5762, %v177_v37  }
  0x41   :  { %229 = vperm.xlu0 %5760, %v176_v36  }
  0x46   :  { %5031 = vmatmul.msk.f32.gmra.mxu0 %vm97_vm1, %v77_v38 }
  0x48   :  { %235 = vperm.xlu1 %5761, %v178_v39   ;;  %331 = vperm.xlu2 %5762, %v194_v41   ;;  %v6214_v41 = vmov 1.0  }
  0x49   :  { %328 = vperm.xlu0 %5760, %v193_v40  }
  0x4e   :  { %5032 = vmatmul.msk.f32.gmra.mxu0 %vm97_vm1, %v78_v42  ;;  %v6657_v42 = vld [vmem:[%s12163_s29] ss:$0 sm:$0xff] }
  0x50   :  { %334 = vperm.xlu1 %5761, %v195_v43   ;;  %241 = vperm.xlu2 %5762, %v180_v45  }
  0x51   :  { %238 = vperm.xlu0 %5760, %v179_v44  }
  0x56   :  { %5033 = vmatmul.msk.f32.gmra.mxu0 %vm97_vm1, %v79_v46 }
  0x58   :  { %244 = vperm.xlu1 %5761, %v181_v47   ;;  %340 = vperm.xlu2 %5762, %v197_v49  }
  0x59   :  { %337 = vperm.xlu0 %5760, %v196_v48  }
  0x5e   :  { %5034 = vmatmul.msk.f32.gmra.mxu0 %vm97_vm1, %v80_v50 }
  0x60   :  { %343 = vperm.xlu1 %5761, %v198_v51   ;;  %4614 = vperm.xlu2 %5762, %v4597_v53  }
  0x61   :  { %247 = vperm.xlu0 %5760, %v182_v52  }
  0x68   :  { %4620 = vperm.xlu1 %5761, %v4599_v54   ;;  %4623 = vperm.xlu2 %5762, %v4600_v57  }
  0x69   :  { %4617 = vperm.xlu0 %5760, %v4598_v55  }
  0x6a   :  { %v6515_v59 = vpop.permute.xlu2 %301 }
  0x70   :  { %4629 = vperm.xlu1 %5761, %v4602_v56   ;;  %4632 = vperm.xlu2 %5762, %v4603_v62  }
  0x71   :  { %4626 = vperm.xlu0 %5760, %v4601_v58  }
  0x72   :  { %v6520_v61 = vpop.permute.xlu2 %211 }
  0x79   :  { %4635 = vperm.xlu0 %5760, %v4604_v60  }
  0x7a   :  { %v6525_v63 = vpop.permute.xlu2 %214 }
  0x82   :  { %v6527_v0 = vpop.permute.xlu1 %298  ;;  %v6531_v2 = vpop.permute.xlu2 %313 }
  0x83   :  { %v6529_v1 = vpop.permute.xlu0 %202  ;;  %vm350_vm15 = vcmp.eq.s32.totalorder %v6581_v28, %v6531_v2 }
  0x8a   :  { %v6533_v3 = vpop.permute.xlu1 %208  ;;  %v6537_v5 = vpop.permute.xlu2 %223 }
  0x8b   :  { %v6535_v4 = vpop.permute.xlu0 %205 }
  0x92   :  { %v6539_v6 = vpop.permute.xlu1 %307  ;;  %v6543_v8 = vpop.permute.xlu2 %322 }
  0x93   :  { %v6541_v7 = vpop.permute.xlu0 %304  ;;  %vm353_vm11 = vcmp.eq.s32.totalorder %v6581_v28, %v6543_v8 }
  0x9a   :  { %v6545_v9 = vpop.permute.xlu1 %217  ;;  %v6549_v11 = vpop.permute.xlu2 %232 }
  0x9b   :  { %v6547_v10 = vpop.permute.xlu0 %310 }
  0x9c   :  { %vm349_vm0 = vcmp.eq.s32.totalorder %v6581_v28, %v6547_v10  ;;  %v6945_v10 = vsel %vm350_vm15, 1.0, %v6213_v31 }
  0x9d   :  { %12183 = vst [vmem:[#allocation23_spill] sm:$0xff] %v6945_v10 }
  0xa2   :  { %v6551_v12 = vpop.permute.xlu1 %316  ;;  %v6557_v15 = vpop.permute.xlu2 %331 }
  0xa3   :  { %v6553_v13 = vpop.permute.xlu0 %220  ;;  %v6555_v14 = vpop.f32.mrf.mxu0  ;;  %vm356_vm7 = vcmp.eq.s32.totalorder %v6581_v28, %v6557_v15  ;;  %vm351_vm14 = vcmp.eq.s32.totalorder %v6581_v28, %v6551_v12  ;;  %v651_v15 = vld [vmem:[%s12202_s6 + $0x38] sm:$0xff] }
  0xa4   :  { %v6843_v58 = vadd.f32 %v6657_v42, %v6555_v14 }
  0xa6   :  { %12175 = vst [vmem:[#allocation15_spill] sm:$0xff] %v6843_v58 }
  0xaa   :  { %v6559_v16 = vpop.permute.xlu1 %226  ;;  %v6565_v19 = vpop.permute.xlu2 %241 }
  0xab   :  { %v6561_v17 = vpop.permute.xlu0 %319  ;;  %v6563_v18 = vpop.f32.mrf.mxu0 }
  0xac   :  { %vm352_vm13 = vcmp.eq.s32.totalorder %v6581_v28, %v6561_v17  ;;  %v6810_v55 = vadd.f32 %v6657_v42, %v6563_v18  ;;  %v6929_v18 = vsel %vm349_vm0, 1.0, %v6213_v31 }
  0xad   :  { %12181 = vst [vmem:[#allocation21_spill] sm:$0xff] %v6929_v18  ;;  %v6999_v12 = vsel %vm352_vm13, 1.0, %v6213_v31 }
  0xae   :  { %12172 = vst [vmem:[#allocation12_spill] sm:$0xff] %v6810_v55 }
  0xaf   :  { %12191 = vst [vmem:[#allocation31_spill] sm:$0xff] %v6999_v12 }
  0xb2   :  { %v6567_v20 = vpop.permute.xlu1 %325  ;;  %v6573_v23 = vpop.permute.xlu2 %340 }
  0xb3   :  { %v6569_v21 = vpop.permute.xlu0 %229  ;;  %v6571_v22 = vpop.f32.mrf.mxu0  ;;  %vm11965_vm3 = vcmp.eq.s32.totalorder %v6581_v28, %v6573_v23  ;;  %vm354_vm10 = vcmp.eq.s32.totalorder %v6581_v28, %v6567_v20  ;;  %v7059_v20 = vsel %vm356_vm7, 1.0, %v6213_v31 }
  0xb4   :  { %v6788_v54 = vadd.f32 %v6657_v42, %v6571_v22  ;;  %v7029_v17 = vsel %vm354_vm10, 1.0, %v6213_v31  ;;  %12199 = vst [vmem:[#allocation39_spill] sm:$0xff] %v7059_v20 }
  0xb5   :  { %12195 = vst [vmem:[#allocation35_spill] sm:$0xff] %v7029_v17 }
  0xb6   :  { %12171 = vst [vmem:[#allocation11_spill] sm:$0xff] %v6788_v54 }
  0xba   :  { %v6575_v25 = vpop.permute.xlu1 %235  ;;  %v4615_v29 = vpop.permute.xlu2 %4614 }
  0xbb   :  { %v6577_v26 = vpop.permute.xlu0 %328  ;;  %v6579_v27 = vpop.f32.mrf.mxu0  ;;  %vm4637_vm2 = vcmp.eq.s32.totalorder %v6581_v28, %v4615_v29  ;;  %v6979_v29 = vsel %vm351_vm14, 1.0, %v6213_v31 }
  0xbc   :  { %v6587_v32 = vsel %vm4637_vm2, 1.0, %v6213_v31  ;;  %vm355_vm8 = vcmp.eq.s32.totalorder %v6581_v28, %v6577_v26  ;;  %v6767_v52 = vadd.f32 %v6657_v42, %v6579_v27  ;;  %vm249_vm2 = vcmp.eq.s32.totalorder %v6581_v28, %v6529_v1  ;;  %12188 = vst [vmem:[#allocation28_spill] sm:$0xff] %v6979_v29 }
  0xbd   :  { %12162 = vst [vmem:[#allocation3_spill] sm:$0xff] %v6587_v32  ;;  %4661 = vxpose.xlu1.b32.start [1/8] (short) (narrow) %v6587_v32, 8  ;;  %v6839_v57 = vsel %vm249_vm2, 1.0, %v6213_v31  ;;  %vm347_vm2 = vcmp.eq.s32.totalorder %v6581_v28, %v6541_v7  ;;  %v7370_v32 = vld [vmem:[%s11945_s3 + $0x50] sm:$0xff] }
  0xbe   :  { %12170 = vst [vmem:[#allocation10_spill] sm:$0xff] %v6767_v52 }
  0xbf   :  { %12174 = vst [vmem:[#allocation14_spill] sm:$0xff] %v6839_v57 }
  0xc2   :  { %v6584_v30 = vpop.permute.xlu1 %334  ;;  %v4624_v53 = vpop.permute.xlu2 %4623 }
  0xc3   :  { %v6589_v33 = vpop.permute.xlu0 %238  ;;  %v155_v34 = vpop.f32.mrf.mxu0  ;;  %vm357_vm6 = vcmp.eq.s32.totalorder %v6581_v28, %v6584_v30  ;;  %vm4640_vm1 = vcmp.eq.s32.totalorder %v6581_v28, %v4624_v53  ;;  %v648_v53 = vld [vmem:[%s12202_s6 + $0x20] sm:$0xff] }
  0xc4   :  { %v6746_v51 = vadd.f32 %v6657_v42, %v155_v34  ;;  %v6829_v56 = vsel %vm4640_vm1, 1.0, %v6213_v31  ;;  %vm12149_vm1 = vcmask 523264   ;;  %v7074_v26 = vsel %vm357_vm6, 1.0, %v6213_v31 }
  0xc5   :  { %12173 = vst [vmem:[#allocation13_spill] sm:$0xff] %v6829_v56 }
  0xc6   :  { %12169 = vst [vmem:[#allocation9_spill] sm:$0xff] %v6746_v51 }
  0xc7   :  { %12201 = vst [vmem:[#allocation41_spill] sm:$0xff] %v7074_v26 }
  0xca   :  { %v6592_v35 = vpop.permute.xlu1 %244  ;;  %v4633_v24 = vpop.permute.xlu2 %4632 }
  0xcb   :  { %v6594_v36 = vpop.permute.xlu0 %337  ;;  %v158_v37 = vpop.f32.mrf.mxu0 }
  0xcc   :  { %vm358_vm5 = vcmp.eq.s32.totalorder %v6581_v28, %v6594_v36  ;;  %v6725_v49 = vadd.f32 %v6657_v42, %v158_v37  ;;  %v7014_v37 = vsel %vm353_vm11, 1.0, %v6213_v31  ;;  %v649_v36 = vld [vmem:[%s12202_s6 + $0x28] sm:$0xff] }
  0xcd   :  { %12193 = vst [vmem:[#allocation33_spill] sm:$0xff] %v7014_v37 }
  0xce   :  { %12167 = vst [vmem:[#allocation7_spill] sm:$0xff] %v6725_v49 }
  0xd2   :  { %v6596_v38 = vpop.permute.xlu1 %343 }
  0xd3   :  { %vm11964_vm4 = vcmp.eq.s32.totalorder %v6581_v28, %v6596_v38  ;;  %v6602_v39 = vpop.permute.xlu0 %247  ;;  %v161_v40 = vpop.f32.mrf.mxu0 }
  0xd4   :  { %5709 = vmatpush.lsf.msk.msk.msrb.mxu1 %vm11964_vm4, %v6214_v41  ;;  %5725 = vmatpush.lsf.msk.msk.msrb.mxu2 %vm11964_vm4, %v6214_v41  ;;  %v6704_v48 = vadd.f32 %v6657_v42, %v161_v40  ;;  %v1053_v40 = vld [vmem:[%s11943_s13 + $0x38] sm:$0xff] }
  0xd5   :  { %5741 = vmatpush.lsf.msk.msk.msrb.mxu3 %vm11964_vm4, %v6214_v41  ;;  %vm346_vm4 = vcmp.eq.s32.totalorder %v6581_v28, %v6515_v59 }
  0xd6   :  { %5710 = vmatpush.lsf.msk.msk.msrb.mxu1 %vm11965_vm3, %v6214_v41  ;;  %5726 = vmatpush.lsf.msk.msk.msrb.mxu2 %vm11965_vm3, %v6214_v41  ;;  %12166 = vst [vmem:[#allocation6_spill] sm:$0xff] %v6704_v48 }
  0xd7   :  { %5742 = vmatpush.lsf.msk.msk.msrb.mxu3 %vm11965_vm3, %v6214_v41  ;;  %vm250_vm3 = vcmp.eq.s32.totalorder %v6581_v28, %v6535_v4  ;;  %v6913_v4 = vsel %vm346_vm4, 1.0, %v6213_v31 }
  0xd8   :  { %5711 = vmatpush.lsf.msk.msk.msrb.mxu1 %vm358_vm5, %v6214_v41  ;;  %5727 = vmatpush.lsf.msk.msk.msrb.mxu2 %vm358_vm5, %v6214_v41  ;;  %12179 = vst [vmem:[#allocation19_spill] sm:$0xff] %v6913_v4 }
  0xd9   :  { %5743 = vmatpush.lsf.msk.msk.msrb.mxu3 %vm358_vm5, %v6214_v41 }
  0xda   :  { %5712 = vmatpush.lsf.msk.msk.msrb.mxu1 %vm357_vm6, %v6214_v41  ;;  %5728 = vmatpush.lsf.msk.msk.msrb.mxu2 %vm357_vm6, %v6214_v41  ;;  %v4621_v47 = vpop.permute.xlu1 %4620 }
  0xdb   :  { %5744 = vmatpush.lsf.msk.msk.msrb.mxu3 %vm357_vm6, %v6214_v41  ;;  %v4618_v43 = vpop.permute.xlu0 %4617  ;;  %v164_v44 = vpop.f32.mrf.mxu0  ;;  %vm4639_vm12 = vcmp.eq.s32.totalorder %v6581_v28, %v4621_v47  ;;  %vm259_vm6 = vcmp.eq.s32.totalorder %v6581_v28, %v6549_v11  ;;  %v642_v11 = vld [vmem:[%s11942_s8 + $0x30] sm:$0xff]  ;;  %v1051_v47 = vld [vmem:[%s11943_s13 + $0x28] sm:$0xff] }
  0xdc   :  { %vm4638_vm9 = vcmp.eq.s32.totalorder %v6581_v28, %v4618_v43  ;;  %5713 = vmatpush.lsf.msk.msk.msrb.mxu1 %vm356_vm7, %v6214_v41  ;;  %5729 = vmatpush.lsf.msk.msk.msrb.mxu2 %vm356_vm7, %v6214_v41  ;;  %v6678_v46 = vadd.f32 %v6657_v42, %v164_v44  ;;  %v6741_v50 = vsel %vm4639_vm12, 1.0, %v6213_v31  ;;  %vm345_vm12 = vcmp.eq.s32.totalorder %v6581_v28, %v6527_v0  ;;  %v650_v42 = vld [vmem:[%s12202_s6 + $0x30] sm:$0xff]  ;;  %v641_v44 = vld [vmem:[%s11942_s8 + $0x28] sm:$0xff] }
  0xdd   :  { %v6675_v45 = vsel %vm4638_vm9, 1.0, %v6213_v31  ;;  %5745 = vmatpush.lsf.msk.msk.msrb.mxu3 %vm356_vm7, %v6214_v41  ;;  %12168 = vst [vmem:[#allocation8_spill] sm:$0xff] %v6741_v50  ;;  %vm348_vm9 = vcmp.eq.s32.totalorder %v6581_v28, %v6539_v6  ;;  %v6862_v60 = vsel %vm345_vm12, 1.0, %v6213_v31  ;;  %v6916_v6 = vsel %vm250_vm3, 1.0, %v6213_v31  ;;  %v1052_v43 = vld [vmem:[%s11943_s13 + $0x30] sm:$0xff] }
  0xde   :  { %12164 = vst [vmem:[#allocation4_spill] sm:$0xff] %v6675_v45  ;;  %4662 = vxpose.xlu1.b32.cont [2/8] (short) (narrow) %v6675_v45, 8  ;;  %5714 = vmatpush.lsf.msk.msk.msrb.mxu1 %vm355_vm8, %v6214_v41  ;;  %v6868_v62 = vsel %vm348_vm9, 1.0, %v6213_v31  ;;  %v7090_v30 = vsel %vm259_vm6, 1.0, %v6213_v31  ;;  %vm12206_vm7 = vcmp.eq.s32.totalorder %v6581_v28, %v6573_v23  ;;  %v645_v23 = vld [vmem:[%s12202_s6 + $0x8] sm:$0xff] }
  0xdf   :  { %12165 = vst [vmem:[#allocation5_spill] sm:$0xff] %v6678_v46  ;;  %5730 = vmatpush.lsf.msk.msk.msrb.mxu2 %vm355_vm8, %v6214_v41  ;;  %5746 = vmatpush.lsf.msk.msk.msrb.mxu3 %vm355_vm8, %v6214_v41  ;;  %v7359_v45 = vld [vmem:[%s11945_s3 + $0x48] sm:$0xff] }
  0xe0   :  { %466 = vmatpush.msra.mxu1 %v6678_v46  ;;  %579 = vmatpush.msrb.mxu0 %v6678_v46  ;;  %12176 = vst [vmem:[#allocation16_spill] sm:$0xff] %v6862_v60 }
  0xe1   :  { %5617 = vmatpush.msra.mxu2 %v6678_v46  ;;  %5747 = vmatpush.lsf.msk.msk.msrb.mxu3 %vm354_vm10, %v6214_v41  ;;  %12177 = vst [vmem:[#allocation17_spill] sm:$0xff] %v6868_v62 }
  0xe2   :  { %5715 = vmatpush.lsf.msk.msk.msrb.mxu1 %vm354_vm10, %v6214_v41  ;;  %580 = vmatpush.msrb.mxu0 %v6704_v48  ;;  %12180 = vst [vmem:[#allocation20_spill] sm:$0xff] %v6916_v6  ;;  %v4630_v14 = vpop.permute.xlu1 %4629 }
  0xe3   :  { %5731 = vmatpush.lsf.msk.msk.msrb.mxu2 %vm354_vm10, %v6214_v41  ;;  %5748 = vmatpush.lsf.msk.msk.msrb.mxu3 %vm353_vm11, %v6214_v41  ;;  %v4627_v1 = vpop.permute.xlu0 %4626  ;;  %vm4642_vm3 = vcmp.eq.s32.totalorder %v6581_v28, %v4630_v14  ;;  %vm257_vm10 = vcmp.eq.s32.totalorder %v6581_v28, %v6559_v16  ;;  %12203 = vst [vmem:[#allocation42_spill] sm:$0xff] %v7090_v30  ;;  %v1050_v14 = vld [vmem:[%s11943_s13 + $0x20] sm:$0xff] }
  0xe4   :  { %467 = vmatpush.msra.mxu1 %v6704_v48  ;;  %581 = vmatpush.msrb.mxu0 %v6725_v49  ;;  %v6939_v0 = vsel %vm4642_vm3, 1.0, %v6213_v31  ;;  %vm261_vm3 = vcmp.eq.s32.totalorder %v6581_v28, %v6589_v33  ;;  %v1046_v33 = vld [vmem:[%s11943_s13] sm:$0xff] }
  0xe5   :  { %5618 = vmatpush.msra.mxu2 %v6704_v48  ;;  %5749 = vmatpush.lsf.msk.msk.msrb.mxu3 %vm352_vm13, %v6214_v41  ;;  %12182 = vst [vmem:[#allocation22_spill] sm:$0xff] %v6939_v0 }
  0xe6   :  { %5716 = vmatpush.lsf.msk.msk.msrb.mxu1 %vm353_vm11, %v6214_v41  ;;  %4663 = vxpose.xlu1.b32.cont [3/8] (short) (narrow) %v6741_v50, 8 }
  0xe7   :  { %5732 = vmatpush.lsf.msk.msk.msrb.mxu2 %vm353_vm11, %v6214_v41  ;;  %582 = vmatpush.msrb.mxu0 %v6746_v51  ;;  %vm256_vm11 = vcmp.eq.s32.totalorder %v6581_v28, %v6537_v5  ;;  %v7051_v5 = vsel %vm257_vm10, 1.0, %v6213_v31 }
  0xe8   :  { %468 = vmatpush.msra.mxu1 %v6725_v49  ;;  %5750 = vmatpush.lsf.msk.msk.msrb.mxu3 %vm351_vm14, %v6214_v41  ;;  %v7036_v8 = vsel %vm256_vm11, 1.0, %v6213_v31  ;;  %12198 = vst [vmem:[#allocation38_spill] sm:$0xff] %v7051_v5 }
  0xe9   :  { %5619 = vmatpush.msra.mxu2 %v6725_v49  ;;  %583 = vmatpush.msrb.mxu0 %v6767_v52  ;;  %12196 = vst [vmem:[#allocation36_spill] sm:$0xff] %v7036_v8 }
  0xea   :  { %5717 = vmatpush.lsf.msk.msk.msrb.mxu1 %vm352_vm13, %v6214_v41  ;;  %5751 = vmatpush.lsf.msk.msk.msrb.mxu3 %vm350_vm15, %v6214_v41 }
  0xeb   :  { %5733 = vmatpush.lsf.msk.msk.msrb.mxu2 %vm352_vm13, %v6214_v41  ;;  %584 = vmatpush.msrb.mxu0 %v6788_v54  ;;  %v4636_v7 = vpop.permute.xlu0 %4635  ;;  %vm255_vm13 = vcmp.eq.s32.totalorder %v6581_v28, %v6553_v13  ;;  %v7044_v13 = vsel %vm355_vm8, 1.0, %v6213_v31  ;;  %vm258_vm8 = vcmp.eq.s32.totalorder %v6581_v28, %v6569_v21  ;;  %v643_v21 = vld [vmem:[%s11942_s8 + $0x38] sm:$0xff] }
  0xec   :  { %469 = vmatpush.msra.mxu1 %v6746_v51  ;;  %5752 = vmatpush.lsf.msk.msk.msrb.mxu3 %vm349_vm0, %v6214_v41  ;;  %12197 = vst [vmem:[#allocation37_spill] sm:$0xff] %v7044_v13  ;;  %v7066_v16 = vsel %vm258_vm8, 1.0, %v6213_v31 }
  0xed   :  { %5620 = vmatpush.msra.mxu2 %v6746_v51  ;;  %585 = vmatpush.msrb.mxu0 %v6810_v55  ;;  %12200 = vst [vmem:[#allocation40_spill] sm:$0xff] %v7066_v16 }
  0xee   :  { %5718 = vmatpush.lsf.msk.msk.msrb.mxu1 %vm351_vm14, %v6214_v41  ;;  %5753 = vmatpush.lsf.msk.msk.msrb.mxu3 %vm348_vm9, %v6214_v41 }
  0xef   :  { %5734 = vmatpush.lsf.msk.msk.msrb.mxu2 %vm351_vm14, %v6214_v41  ;;  %4664 = vxpose.xlu1.b32.cont [4/8] (short) (narrow) %v6829_v56, 8  ;;  %vm254_vm14 = vcmp.eq.s32.totalorder %v6581_v28, %v6545_v9  ;;  %v7021_v9 = vsel %vm255_vm13, 1.0, %v6213_v31  ;;  %v7346_v56 = vld [vmem:[%s11945_s3 + $0x40] sm:$0xff] }
  0xf0   :  { %470 = vmatpush.msra.mxu1 %v6767_v52  ;;  %586 = vmatpush.msrb.mxu0 %v6843_v58  ;;  %12194 = vst [vmem:[#allocation34_spill] sm:$0xff] %v7021_v9 }
  0xf1   :  { %5621 = vmatpush.msra.mxu2 %v6767_v52  ;;  %5083 = vmatmul.msk.f32.vlgmr.msrb.gmra.mxu0 %vm12149_vm1, %v6862_v60 }
  0xf2   :  { %5719 = vmatpush.lsf.msk.msk.msrb.mxu1 %vm350_vm15, %v6214_v41  ;;  %5754 = vmatpush.lsf.msk.msk.msrb.mxu3 %vm347_vm2, %v6214_v41 }
  0xf3   :  { %5735 = vmatpush.lsf.msk.msk.msrb.mxu2 %vm350_vm15, %v6214_v41  ;;  %vm4643_vm15 = vcmp.eq.s32.totalorder %v6581_v28, %v4633_v24  ;;  %821 = vmatpush.msra.mxu0 %v643_v21  ;;  %v647_v24 = vld [vmem:[%s12202_s6 + $0x18] sm:$0xff]  ;;  %v7149_v21 = vsel %vm12206_vm7, 1.0, %v6213_v31 }
  0xf4   :  { %471 = vmatpush.msra.mxu1 %v6788_v54  ;;  %5755 = vmatpush.lsf.msk.msk.msrb.mxu3 %vm346_vm4, %v6214_v41  ;;  %v6967_v2 = vsel %vm4643_vm15, 1.0, %v6213_v31  ;;  %12207 = vst [vmem:[#allocation45_spill] sm:$0xff] %v7149_v21  ;;  %vm262_vm15 = vcmp.eq.s32.totalorder %v6581_v28, %v6565_v19 }
  0xf5   :  { %5622 = vmatpush.msra.mxu2 %v6788_v54  ;;  %12186 = vst [vmem:[#allocation26_spill] sm:$0xff] %v6967_v2  ;;  %822 = vmatpush.msra.mxu0 %v642_v11  ;;  %v1048_v11 = vld [vmem:[%s11943_s13 + $0x10] sm:$0xff] }
  0xf6   :  { %5720 = vmatpush.lsf.msk.msk.msrb.mxu1 %vm349_vm0, %v6214_v41  ;;  %5756 = vmatpush.lsf.msk.msk.msrb.mxu3 %vm345_vm12, %v6214_v41 }
  0xf7   :  { %5736 = vmatpush.lsf.msk.msk.msrb.mxu2 %vm349_vm0, %v6214_v41  ;;  %5700 = vllmr.8.mxu3  ;;  %vm252_vm0 = vcmp.eq.s32.totalorder %v6581_v28, %v6520_v61 }
  0xf8   :  { %472 = vmatpush.msra.mxu1 %v6810_v55  ;;  %v6970_v27 = vsel %vm252_vm0, 1.0, %v6213_v31  ;;  %708 = vmatpush.msra.mxu3 %v651_v15  ;;  %vm263_vm0 = vcmp.eq.s32.totalorder %v6581_v28, %v6592_v35  ;;  %v7238_v35 = vld [vmem:[%s11945_s3] sm:$0xff] }
  0xf9   :  { %5623 = vmatpush.msra.mxu2 %v6810_v55  ;;  %5084 = vmatmul.msk.f32.gmra.mxu0 %vm12149_vm1, %v6913_v4  ;;  %12187 = vst [vmem:[#allocation27_spill] sm:$0xff] %v6970_v27  ;;  %v7224_v19 = vsel %vm263_vm0, 1.0, %v6213_v31 }
  0xfa   :  { %5721 = vmatpush.lsf.msk.msk.msrb.mxu1 %vm348_vm9, %v6214_v41  ;;  %709 = vmatpush.msra.mxu3 %v650_v42  ;;  %v638_v42 = vld [vmem:[%s11942_s8 + $0x10] sm:$0xff]  ;;  %12212 = vst [vmem:[#allocation49_spill] sm:$0xff] %v7224_v19 }
  0xfb   :  { %5737 = vmatpush.lsf.msk.msk.msrb.mxu2 %vm348_vm9, %v6214_v41  ;;  %vm4641_vm9 = vcmp.eq.s32.totalorder %v6581_v28, %v4627_v1  ;;  %v640_v1 = vld [vmem:[%s11942_s8 + $0x20] sm:$0xff]  ;;  %823 = vmatpush.msra.mxu0 %v641_v44  ;;  %v1047_v44 = vld [vmem:[%s11943_s13 + $0x8] sm:$0xff] }
  0xfc   :  { %473 = vmatpush.msra.mxu1 %v6843_v58  ;;  %v6902_v59 = vsel %vm4641_vm9, 1.0, %v6213_v31  ;;  %710 = vmatpush.msra.mxu3 %v649_v36  ;;  %vm12089_vm9 = vcmask 1040384   ;;  %v883_v36 = vld [vmem:[%s11944_s10 + $0x28] sm:$0x1] }
  0xfd   :  { %5624 = vmatpush.msra.mxu2 %v6843_v58  ;;  %5067 = vmatmul.msk.f32.vlgmr.msra.gmra.mxu1 %vm12149_vm1, %v6839_v57  ;;  %12178 = vst [vmem:[#allocation18_spill] sm:$0xff] %v6902_v59 }
  0xfe   :  { %5086 = vmatmul.msk.f32.vlgmr.msra.gmra.mxu2 %vm12149_vm1, %v6868_v62  ;;  %5722 = vmatpush.lsf.msk.msk.msrb.mxu1 %vm347_vm2, %v6214_v41 }
  0xff   :  { %5738 = vmatpush.lsf.msk.msk.msrb.mxu2 %vm347_vm2, %v6214_v41  ;;  %4665 = vxpose.xlu1.b32.cont [5/8] (short) (narrow) %v6902_v59, 8 }
 0x100   :  { %5723 = vmatpush.lsf.msk.msk.msrb.mxu1 %vm346_vm4, %v6214_v41  ;;  %711 = vmatpush.msra.mxu3 %v648_v53  ;;  %v636_v53 = vld [vmem:[%s11942_s8] sm:$0xff] }
 0x101   :  { %5739 = vmatpush.lsf.msk.msk.msrb.mxu2 %vm346_vm4, %v6214_v41  ;;  %vm251_vm4 = vcmp.eq.s32.totalorder %v6581_v28, %v6533_v3  ;;  %v6957_v3 = vsel %vm347_vm2, 1.0, %v6213_v31  ;;  %vm253_vm2 = vcmp.eq.s32.totalorder %v6581_v28, %v6525_v63  ;;  %v7006_v63 = vsel %vm254_vm14, 1.0, %v6213_v31  ;;  %824 = vmatpush.msra.mxu0 %v640_v1  ;;  %v882_v1 = vld [vmem:[%s11944_s10 + $0x20] sm:$0xff] }
 0x102   :  { %5724 = vmatpush.lsf.msk.msk.msrb.mxu1 %vm345_vm12, %v6214_v41  ;;  %v6948_v22 = vsel %vm251_vm4, 1.0, %v6213_v31  ;;  %12185 = vst [vmem:[#allocation25_spill] sm:$0xff] %v6957_v3  ;;  %5085 = vmatmul.msk.f32.gmra.mxu0 %vm12149_vm1, %v6957_v3  ;;  %v6990_v34 = vsel %vm253_vm2, 1.0, %v6213_v31  ;;  %vm12209_vm4 = vcmp.eq.s32.totalorder %v6581_v28, %v6596_v38  ;;  %v879_v38 = vld [vmem:[%s11944_s10 + $0x8] sm:$0xff]  ;;  %vm12088_vm2 = vcmask 334848  }
 0x103   :  { %5740 = vmatpush.lsf.msk.msk.msrb.mxu2 %vm345_vm12, %v6214_v41  ;;  %12184 = vst [vmem:[#allocation24_spill] sm:$0xff] %v6948_v22  ;;  %vm4644_vm12 = vcmp.eq.s32.totalorder %v6581_v28, %v4636_v7  ;;  %v7098_v41 = vsel %vm358_vm5, 1.0, %v6213_v31  ;;  %vm260_vm5 = vcmp.eq.s32.totalorder %v6581_v28, %v6575_v25  ;;  %v639_v7 = vld [vmem:[%s11942_s8 + $0x18] sm:$0xff]  ;;  %712 = vmatpush.msra.mxu3 %v647_v24  ;;  %v7198_v24 = vsel %vm12209_vm4, 1.0, %v6213_v31 }
 0x104   :  { %v6987_v61 = vsel %vm4644_vm12, 1.0, %v6213_v31  ;;  %12190 = vst [vmem:[#allocation30_spill] sm:$0xff] %v6990_v34  ;;  %v7138_v15 = vsel %vm260_vm5, 1.0, %v6213_v31  ;;  %v1049_v25 = vld [vmem:[%s11943_s13 + $0x18] sm:$0xff]  ;;  %825 = vmatpush.msra.mxu0 %v639_v7  ;;  %5131 = vmatpush.msk.msra.mxu1 %vm12089_vm9, %v883_v36  ;;  %vm264_vm12 = vcmp.eq.s32.totalorder %v6581_v28, %v6602_v39 }
 0x105   :  { %5068 = vmatmul.msk.f32.gmra.mxu1 %vm12149_vm1, %v6916_v6  ;;  %5672 = vllmr.8.mxu2  ;;  %12189 = vst [vmem:[#allocation29_spill] sm:$0xff] %v6987_v61  ;;  %v881_v7 = vld [vmem:[%s11944_s10 + $0x18] sm:$0xff] }
 0x106   :  { %5087 = vmatmul.msk.f32.gmra.mxu2 %vm12149_vm1, %v6929_v18  ;;  %12192 = vst [vmem:[#allocation32_spill] sm:$0xff] %v7006_v63  ;;  %826 = vmatpush.msra.mxu0 %v638_v42  ;;  %v7217_v42 = vsel %vm262_vm15, 1.0, %v6213_v31 }
 0x107   :  { %4666 = vxpose.xlu1.b32.cont [6/8] (short) (narrow) %v6939_v0, 8  ;;  %1062 = vmatpush.msra.mxu2 %v1053_v40  ;;  %12204 = vst [vmem:[#allocation43_spill] sm:$0xff] %v7098_v41  ;;  %v646_v40 = vld [vmem:[%s12202_s6 + $0x10] sm:$0xff]  ;;  %v7333_v0 = vld [vmem:[%s11945_s3 + $0x38] sm:$0xff] }
 0x108   :  { %12205 = vst [vmem:[#allocation44_spill] sm:$0xff] %v7138_v15  ;;  %713 = vmatpush.msra.mxu3 %v646_v40  ;;  %948 = vmatpush.msra.mxu1 %v882_v1  ;;  %v878_v40 = vld [vmem:[%s11944_s10] sm:$0xff] }
 0x109   :  { %1063 = vmatpush.msra.mxu2 %v1052_v43  ;;  %v637_v43 = vld [vmem:[%s11942_s8 + $0x8] sm:$0xff]  ;;  %12210 = vst [vmem:[#allocation47_spill] sm:$0xff] %v7198_v24 }
 0x10a   :  { %714 = vmatpush.msra.mxu3 %v645_v23  ;;  %827 = vmatpush.msra.mxu0 %v637_v43  ;;  %12211 = vst [vmem:[#allocation48_spill] sm:$0xff] %v7217_v42 }
 0x10b   :  { %1064 = vmatpush.msra.mxu2 %v1051_v47  ;;  %v644_v47 = vld [vmem:[%s12202_s6] sm:$0xff]  ;;  %949 = vmatpush.msra.mxu1 %v881_v7 }
 0x10c   :  { %5644 = vllmr.8.mxu1  ;;  %715 = vmatpush.msra.mxu3 %v644_v47 }
 0x10d   :  { %5069 = vmatmul.msk.f32.gmra.mxu1 %vm12149_vm1, %v6948_v22  ;;  %1065 = vmatpush.msra.mxu2 %v1050_v14  ;;  %v7187_v14 = vsel %vm261_vm3, 1.0, %v6213_v31 }
 0x10e   :  { %5088 = vmatmul.msk.f32.gmra.mxu2 %vm12149_vm1, %v6945_v10  ;;  %12208 = vst [vmem:[#allocation46_spill] sm:$0xff] %v7187_v14  ;;  %828 = vmatpush.msra.mxu0 %v636_v53  ;;  %v7268_v53 = vld [vmem:[%s11945_s3 + $0x10] sm:$0xff] }
 0x10f   :  { %4667 = vxpose.xlu1.b32.cont [7/8] (short) (narrow) %v6967_v2, 8  ;;  %1066 = vmatpush.msra.mxu2 %v1049_v25  ;;  %v880_v25 = vld [vmem:[%s11944_s10 + $0x10] sm:$0xff] }
 0x110   :  { %950 = vmatpush.msra.mxu1 %v880_v25  ;;  %v7283_v25 = vld [vmem:[%s11945_s3 + $0x18] sm:$0xff] }
 0x111   :  { %1067 = vmatpush.msra.mxu2 %v1048_v11  ;;  %v7231_v11 = vsel %vm264_vm12, 1.0, %v6213_v31  ;;  %v7253_v31 = vld [vmem:[%s11945_s3 + $0x8] sm:$0xff] }
 0x112   :  { %951 = vmatpush.msra.mxu1 %v879_v38  ;;  %12213 = vst [vmem:[#allocation50_spill] sm:$0xff] %v7231_v11 }
 0x113   :  { %1068 = vmatpush.msra.mxu2 %v1047_v44 }
 0x114   :  { %952 = vmatpush.msra.mxu1 %v878_v40 }
 0x115   :  { %5070 = vmatmul.msk.f32.gmra.mxu1 %vm12149_vm1, %v6970_v27  ;;  %1069 = vmatpush.msra.mxu2 %v1046_v33 }
 0x116   :  { %5089 = vmatmul.msk.f32.gmra.mxu2 %vm12149_vm1, %v6979_v29 }
 0x117   :  { %4668 = vxpose.xlu1.b32.end [8/8] (short) (narrow) %v6987_v61, 8  ;;  %v7320_v61 = vld [vmem:[%s11945_s3 + $0x30] sm:$0xff] }
 0x11d   :  { %5071 = vmatmul.msk.f32.gmra.mxu1 %vm12149_vm1, %v6990_v34 }
 0x11e   :  { %5090 = vmatmul.msk.f32.gmra.mxu2 %vm12149_vm1, %v6999_v12 }
 0x125   :  { %5072 = vmatmul.msk.f32.gmra.mxu1 %vm12149_vm1, %v7006_v63  ;;  %v7622_v63 = vld [vmem:[%s11946_s11] ss:$0 sm:$0xff] }
 0x126   :  { %5091 = vmatmul.msk.f32.gmra.mxu2 %vm12149_vm1, %v7014_v37 }
 0x12d   :  { %5073 = vmatmul.msk.f32.gmra.mxu1 %vm12149_vm1, %v7021_v9 }
 0x12e   :  { %5092 = vmatmul.msk.f32.gmra.mxu2 %vm12149_vm1, %v7029_v17 }
 0x135   :  { %5074 = vmatmul.msk.f32.gmra.mxu1 %vm12149_vm1, %v7036_v8 }
 0x136   :  { %5093 = vmatmul.msk.f32.gmra.mxu2 %vm12149_vm1, %v7044_v13 }
 0x13d   :  { %5075 = vmatmul.msk.f32.gmra.mxu1 %vm12149_vm1, %v7051_v5 }
 0x13e   :  { %5094 = vmatmul.msk.f32.gmra.mxu2 %vm12149_vm1, %v7059_v20 }
 0x145   :  { %5076 = vmatmul.msk.f32.gmra.mxu1 %vm12149_vm1, %v7066_v16 }
 0x146   :  { %5095 = vmatmul.msk.f32.gmra.mxu2 %vm12149_vm1, %v7074_v26  ;;  %v1188_v26 = vld [vmem:[%s11948_s14 + $0x20] sm:$0xff] }
 0x14d   :  { %5077 = vmatmul.msk.f32.gmra.mxu1 %vm12149_vm1, %v7090_v30 }
 0x14e   :  { %5096 = vmatmul.msk.f32.gmra.mxu2 %vm12149_vm1, %v7098_v41  ;;  %v1042_v41 = vld [vmem:[%s11947_s12 + $0x20] sm:$0xff] }
 0x155   :  { %5078 = vmatmul.msk.f32.gmra.mxu1 %vm12149_vm1, %v7138_v15  ;;  %v7465_v15 = vld [vmem:[%s11945_s3 + $0x70] sm:$0xff] }
 0x156   :  { %5097 = vmatmul.msk.f32.gmra.mxu2 %vm12149_vm1, %v7149_v21  ;;  %v1043_v21 = vld [vmem:[%s11947_s12 + $0x28] sm:$0xff] }
 0x15d   :  { %5079 = vmatmul.msk.f32.gmra.mxu1 %vm12149_vm1, %v7187_v14 }
 0x15e   :  { %5098 = vmatmul.msk.f32.gmra.mxu2 %vm12149_vm1, %v7198_v24 }
 0x165   :  { %5080 = vmatmul.msk.f32.gmra.mxu1 %vm12149_vm1, %v7217_v42  ;;  %v1038_v42 = vld [vmem:[%s11947_s12] sm:$0xff] }
 0x16d   :  { %5081 = vmatmul.msk.f32.gmra.mxu1 %vm12149_vm1, %v7224_v19  ;;  %v7392_v19 = vld [vmem:[%s11945_s3 + $0x58] sm:$0xff] }
 0x16e   :  { %v7240_v43 = vpop.f32.mrf.mxu0 }
 0x16f   :  { %5115 = vmatmul.msk.f32.vlgmr.msra.gmra.mxu0 %vm12149_vm1, %v7240_v43 }
 0x175   :  { %5082 = vmatmul.msk.f32.gmra.mxu1 %vm12149_vm1, %v7231_v11  ;;  %v1044_v11 = vld [vmem:[%s11947_s12 + $0x30] sm:$0xff] }
 0x176   :  { %v7255_v36 = vpop.f32.mrf.mxu0 }
 0x177   :  { %5116 = vmatmul.msk.f32.gmra.mxu0 %vm12149_vm1, %v7255_v36 }
 0x17a   :  { %v475_v23 = vpop.f32.mrf.mxu1 }
 0x17b   :  { %5099 = vmatmul.msk.f32.vlgmr.msra.gmra.mxu3 %vm12149_vm1, %v475_v23  ;;  %5148 = vmatmul.msk.f32.vlgmr.msra.gmra.mxu2 %vm12149_vm1, %v475_v23  ;;  %v7296_v23 = vld [vmem:[%s11945_s3 + $0x20] sm:$0xff] }
 0x17d   :  { %5132 = vmatmul.msk.f32.vlgmr.msra.gmra.mxu1 %vm12088_vm2, %v7238_v35 }
 0x17f   :  { %v7270_v1 = vpop.f32.mrf.mxu0 }
 0x180   :  { %5117 = vmatmul.msk.f32.gmra.mxu0 %vm12149_vm1, %v7270_v1 }
 0x181   :  { %v7248_v28 = vpop.f32.mrf.mxu2 }
 0x182   :  { %v478_v39 = vpop.f32.mrf.mxu1 }
 0x183   :  { %5100 = vmatmul.msk.f32.gmra.mxu3 %vm12149_vm1, %v478_v39  ;;  %5149 = vmatmul.msk.f32.gmra.mxu2 %vm12149_vm1, %v478_v39 }
 0x185   :  { %5133 = vmatmul.msk.f32.gmra.mxu1 %vm12088_vm2, %v7253_v31 }
 0x188   :  { %5118 = vmatmul.msk.f32.gmra.mxu0 %vm12149_vm1, %v7248_v28 }
 0x189   :  { %v7263_v44 = vpop.f32.mrf.mxu2 }
 0x18a   :  { %v481_v47 = vpop.f32.mrf.mxu1 }
 0x18b   :  { %5101 = vmatmul.msk.f32.gmra.mxu3 %vm12149_vm1, %v481_v47  ;;  %5150 = vmatmul.msk.f32.gmra.mxu2 %vm12149_vm1, %v481_v47  ;;  %v7307_v47 = vld [vmem:[%s11945_s3 + $0x28] sm:$0xff] }
 0x18d   :  { %5134 = vmatmul.msk.f32.gmra.mxu1 %vm12088_vm2, %v7268_v53 }
 0x190   :  { %5119 = vmatmul.msk.f32.gmra.mxu0 %vm12149_vm1, %v7263_v44 }
 0x191   :  { %v7278_v33 = vpop.f32.mrf.mxu2 }
 0x192   :  { %v484_v7 = vpop.f32.mrf.mxu1 }
 0x193   :  { %5102 = vmatmul.msk.f32.gmra.mxu3 %vm12149_vm1, %v484_v7  ;;  %5151 = vmatmul.msk.f32.gmra.mxu2 %vm12149_vm1, %v484_v7 }
 0x195   :  { %5135 = vmatmul.msk.f32.gmra.mxu1 %vm12088_vm2, %v7283_v25 }
 0x198   :  { %5120 = vmatmul.msk.f32.gmra.mxu0 %vm12149_vm1, %v7278_v33 }
 0x199   :  { %v7291_v38 = vpop.f32.mrf.mxu2 }
 0x19a   :  { %v487_v40 = vpop.f32.mrf.mxu1 }
 0x19b   :  { %5103 = vmatmul.msk.f32.gmra.mxu3 %vm12149_vm1, %v487_v40  ;;  %5152 = vmatmul.msk.f32.gmra.mxu2 %vm12149_vm1, %v487_v40 }
 0x19d   :  { %5136 = vmatmul.msk.f32.gmra.mxu1 %vm12088_vm2, %v7296_v23 }
 0x1a0   :  { %5121 = vmatmul.msk.f32.gmra.mxu0 %vm12149_vm1, %v7291_v38 }
 0x1a1   :  { %v7309_v7 = vpop.f32.mrf.mxu2 }
 0x1a2   :  { %v490_v39 = vpop.f32.mrf.mxu1 }
 0x1a3   :  { %5104 = vmatmul.msk.f32.gmra.mxu3 %vm12149_vm1, %v490_v39  ;;  %5153 = vmatmul.msk.f32.gmra.mxu2 %vm12149_vm1, %v490_v39 }
 0x1a5   :  { %5137 = vmatmul.msk.f32.gmra.mxu1 %vm12088_vm2, %v7307_v47 }
 0x1a8   :  { %5122 = vmatmul.msk.f32.gmra.mxu0 %vm12149_vm1, %v7309_v7 }
 0x1a9   :  { %v7326_v39 = vpop.f32.mrf.mxu2 }
 0x1aa   :  { %v493_v40 = vpop.f32.mrf.mxu1 }
 0x1ab   :  { %5105 = vmatmul.msk.f32.gmra.mxu3 %vm12149_vm1, %v493_v40  ;;  %5154 = vmatmul.msk.f32.gmra.mxu2 %vm12149_vm1, %v493_v40 }
 0x1ad   :  { %5138 = vmatmul.msk.f32.gmra.mxu1 %vm12088_vm2, %v7320_v61 }
 0x1b0   :  { %5123 = vmatmul.msk.f32.gmra.mxu0 %vm12149_vm1, %v7326_v39 }
 0x1b1   :  { %v7341_v40 = vpop.f32.mrf.mxu2 }
 0x1b2   :  { %v496_v2 = vpop.f32.mrf.mxu1 }
 0x1b3   :  { %5106 = vmatmul.msk.f32.gmra.mxu3 %vm12149_vm1, %v496_v2  ;;  %5155 = vmatmul.msk.f32.gmra.mxu2 %vm12149_vm1, %v496_v2 }
 0x1b5   :  { %5139 = vmatmul.msk.f32.gmra.mxu1 %vm12088_vm2, %v7333_v0 }
 0x1b8   :  { %5124 = vmatmul.msk.f32.gmra.mxu0 %vm12149_vm1, %v7341_v40 }
 0x1b9   :  { %v7354_v2 = vpop.f32.mrf.mxu2 }
 0x1ba   :  { %v499_v59 = vpop.f32.mrf.mxu1 }
 0x1bb   :  { %5107 = vmatmul.msk.f32.gmra.mxu3 %vm12149_vm1, %v499_v59  ;;  %5156 = vmatmul.msk.f32.gmra.mxu2 %vm12149_vm1, %v499_v59 }
 0x1bd   :  { %5140 = vmatmul.msk.f32.gmra.mxu1 %vm12088_vm2, %v7346_v56 }
 0x1c0   :  { %5125 = vmatmul.msk.f32.gmra.mxu0 %vm12149_vm1, %v7354_v2 }
 0x1c1   :  { %v7372_v24 = vpop.f32.mrf.mxu2 }
 0x1c2   :  { %v502_v50 = vpop.f32.mrf.mxu1 }
 0x1c3   :  { %5108 = vmatmul.msk.f32.gmra.mxu3 %vm12149_vm1, %v502_v50  ;;  %5157 = vmatmul.msk.f32.gmra.mxu2 %vm12149_vm1, %v502_v50  ;;  %v1045_v50 = vld [vmem:[%s11947_s12 + $0x38] sm:$0xff] }
 0x1c4   :  { %1127 = vmatpush.msra.mxu3 %v1045_v50 }
 0x1c5   :  { %5141 = vmatmul.msk.f32.gmra.mxu1 %vm12088_vm2, %v7359_v45 }
 0x1c6   :  { %1128 = vmatpush.msra.mxu3 %v1044_v11  ;;  %v1189_v11 = vld [vmem:[%s11948_s14 + $0x28] sm:$0x1] }
 0x1c7   :  { %5180 = vmatpush.msk.msrb.mxu0 %vm12089_vm9, %v1189_v11  ;;  %v7427_v11 = vld [vmem:[%s11945_s3 + $0x60] sm:$0xff] }
 0x1c8   :  { %1129 = vmatpush.msra.mxu3 %v1043_v21  ;;  %5126 = vmatmul.msk.f32.gmra.mxu0 %vm12149_vm1, %v7372_v24  ;;  %v1041_v21 = vld [vmem:[%s11947_s12 + $0x18] sm:$0xff] }
 0x1c9   :  { %v7407_v50 = vpop.f32.mrf.mxu2  ;;  %1204 = vmatpush.msrb.mxu0 %v1188_v26  ;;  %v1186_v26 = vld [vmem:[%s11948_s14 + $0x10] sm:$0xff] }
 0x1ca   :  { %v505_v59 = vpop.f32.mrf.mxu1  ;;  %1130 = vmatpush.msra.mxu3 %v1042_v41  ;;  %v1039_v41 = vld [vmem:[%s11947_s12 + $0x8] sm:$0xff] }
 0x1cb   :  { %5109 = vmatmul.msk.f32.gmra.mxu3 %vm12149_vm1, %v505_v59  ;;  %5158 = vmatmul.msk.f32.gmra.mxu2 %vm12149_vm1, %v505_v59 }
 0x1cc   :  { %1131 = vmatpush.msra.mxu3 %v1041_v21  ;;  %v1187_v21 = vld [vmem:[%s11948_s14 + $0x18] sm:$0xff] }
 0x1cd   :  { %5142 = vmatmul.msk.f32.gmra.mxu1 %vm12088_vm2, %v7370_v32  ;;  %1205 = vmatpush.msrb.mxu0 %v1187_v21  ;;  %v1184_v21 = vld [vmem:[%s11948_s14] sm:$0xff] }
 0x1cf   :  { %1206 = vmatpush.msrb.mxu0 %v1186_v26 }
 0x1d0   :  { %5127 = vmatmul.msk.f32.gmra.mxu0 %vm12149_vm1, %v7407_v50 }
 0x1d2   :  { %v508_v59 = vpop.f32.mrf.mxu1 }
 0x1d3   :  { %5110 = vmatmul.msk.f32.gmra.mxu3 %vm12149_vm1, %v508_v59  ;;  %5159 = vmatmul.msk.f32.gmra.mxu2 %vm12149_vm1, %v508_v59  ;;  %v1040_v59 = vld [vmem:[%s11947_s12 + $0x10] sm:$0xff] }
 0x1d4   :  { %1132 = vmatpush.msra.mxu3 %v1040_v59  ;;  %v7438_v59 = vpop.f32.mrf.mxu2 }
 0x1d5   :  { %5143 = vmatmul.msk.f32.gmra.mxu1 %vm12088_vm2, %v7392_v19 }
 0x1d6   :  { %1133 = vmatpush.msra.mxu3 %v1039_v41  ;;  %v7446_v41 = vld [vmem:[%s11945_s3 + $0x68] sm:$0xff] }
 0x1d8   :  { %1134 = vmatpush.msra.mxu3 %v1038_v42  ;;  %v1185_v42 = vld [vmem:[%s11948_s14 + $0x8] sm:$0xff]  ;;  %5128 = vmatmul.msk.f32.gmra.mxu0 %vm12149_vm1, %v7438_v59 }
 0x1d9   :  { %1207 = vmatpush.msrb.mxu0 %v1185_v42  ;;  %v7476_v42 = vld [vmem:[%s11945_s3 + $0x78] sm:$0xff] }
 0x1da   :  { %v511_v14 = vpop.f32.mrf.mxu1 }
 0x1db   :  { %5111 = vmatmul.msk.f32.gmra.mxu3 %vm12149_vm1, %v511_v14  ;;  %5160 = vmatmul.msk.f32.gmra.mxu2 %vm12149_vm1, %v511_v14 }
 0x1dc   :  { %1208 = vmatpush.msrb.mxu0 %v1184_v21  ;;  %v7460_v26 = vpop.f32.mrf.mxu2 }
 0x1dd   :  { %5144 = vmatmul.msk.f32.gmra.mxu1 %vm12088_vm2, %v7427_v11 }
 0x1e0   :  { %5129 = vmatmul.msk.f32.gmra.mxu0 %vm12149_vm1, %v7460_v26 }
 0x1e2   :  { %v514_v14 = vpop.f32.mrf.mxu1 }
 0x1e3   :  { %5112 = vmatmul.msk.f32.gmra.mxu3 %vm12149_vm1, %v514_v14  ;;  %5161 = vmatmul.msk.f32.gmra.mxu2 %vm12149_vm1, %v514_v14 }
 0x1e4   :  { %v7478_v21 = vpop.f32.mrf.mxu2 }
 0x1e5   :  { %5145 = vmatmul.msk.f32.gmra.mxu1 %vm12088_vm2, %v7446_v41 }
 0x1e8   :  { %5130 = vmatmul.msk.f32.gmra.mxu0 %vm12149_vm1, %v7478_v21 }
 0x1ea   :  { %v517_v20 = vpop.f32.mrf.mxu1 }
 0x1eb   :  { %5113 = vmatmul.msk.f32.gmra.mxu3 %vm12149_vm1, %v517_v20  ;;  %5162 = vmatmul.msk.f32.gmra.mxu2 %vm12149_vm1, %v517_v20 }
 0x1ec   :  { %v830_v20 = vpop.f32.mrf.mxu0 }
 0x1ed   :  { %5146 = vmatmul.msk.f32.gmra.mxu1 %vm12088_vm2, %v7465_v15 }
 0x1f0   :  { %5181 = vmatmul.msk.f32.vlgmr.msrb.gmra.mxu0 %vm12088_vm2, %v7238_v35 }
 0x1f2   :  { %v520_v14 = vpop.f32.mrf.mxu1 }
 0x1f3   :  { %5114 = vmatmul.msk.f32.gmra.mxu3 %vm12149_vm1, %v520_v14  ;;  %5163 = vmatmul.msk.f32.gmra.mxu2 %vm12149_vm1, %v520_v14 }
 0x1f4   :  { %v833_v17 = vpop.f32.mrf.mxu0 }
 0x1f5   :  { %5147 = vmatmul.msk.f32.gmra.mxu1 %vm12088_vm2, %v7476_v42 }
 0x1f8   :  { %5182 = vmatmul.msk.f32.gmra.mxu0 %vm12088_vm2, %v7253_v31 }
 0x1fb   :  { %5164 = vmatmul.msk.f32.vlgmr.msra.gmra.mxu3 %vm12149_vm1, %v7240_v43 }
 0x1fd   :  { %v836_v37 = vpop.f32.mrf.mxu0 }
 0x1fe   :  { %v717_v13 = vpop.f32.mrf.mxu3 }
 0x1ff   :  { %v7490_v30 = vadd.f32 %v830_v20, %v717_v13 }
 0x200   :  { %5183 = vmatmul.msk.f32.gmra.mxu0 %vm12088_vm2, %v7268_v53 }
 0x203   :  { %5165 = vmatmul.msk.f32.gmra.mxu3 %vm12149_vm1, %v7255_v36 }
 0x205   :  { %v839_v43 = vpop.f32.mrf.mxu0 }
 0x206   :  { %v720_v14 = vpop.f32.mrf.mxu3 }
 0x207   :  { %v7496_v16 = vadd.f32 %v833_v17, %v720_v14 }
 0x208   :  { %5184 = vmatmul.msk.f32.gmra.mxu0 %vm12088_vm2, %v7283_v25 }
 0x20b   :  { %5166 = vmatmul.msk.f32.gmra.mxu3 %vm12149_vm1, %v7270_v1 }
 0x20d   :  { %v842_v36 = vpop.f32.mrf.mxu0 }
 0x20e   :  { %v723_v35 = vpop.f32.mrf.mxu3 }
 0x20f   :  { %v7502_v13 = vadd.f32 %v836_v37, %v723_v35 }
 0x210   :  { %5185 = vmatmul.msk.f32.gmra.mxu0 %vm12088_vm2, %v7296_v23 }
 0x213   :  { %5167 = vmatmul.msk.f32.gmra.mxu3 %vm12149_vm1, %v7248_v28 }
 0x215   :  { %v845_v1 = vpop.f32.mrf.mxu0 }
 0x216   :  { %v726_v31 = vpop.f32.mrf.mxu3 }
 0x217   :  { %v7508_v17 = vadd.f32 %v839_v43, %v726_v31 }
 0x218   :  { %5186 = vmatmul.msk.f32.gmra.mxu0 %vm12088_vm2, %v7307_v47 }
 0x21b   :  { %5168 = vmatmul.msk.f32.gmra.mxu3 %vm12149_vm1, %v7263_v44  ;;  %v954_v44 = vpop.f32.mrf.mxu1 }
 0x21d   :  { %v848_v20 = vpop.f32.mrf.mxu0 }
 0x21e   :  { %v729_v53 = vpop.f32.mrf.mxu3 }
 0x21f   :  { %v7514_v37 = vadd.f32 %v842_v36, %v729_v53 }
 0x220   :  { %5187 = vmatmul.msk.f32.gmra.mxu0 %vm12088_vm2, %v7320_v61 }
 0x223   :  { %5169 = vmatmul.msk.f32.gmra.mxu3 %vm12149_vm1, %v7278_v33  ;;  %v957_v43 = vpop.f32.mrf.mxu1 }
 0x224   :  { %v1003_v18 = vadd.f32 %v957_v43, %v7496_v16 }
 0x225   :  { %v851_v35 = vpop.f32.mrf.mxu0 }
 0x226   :  { %v732_v28 = vpop.f32.mrf.mxu3  ;;  %v1023_v3 = vadd.f32 %v7622_v63, %v1003_v18 }
 0x227   :  { %v7520_v25 = vadd.f32 %v845_v1, %v732_v28 }
 0x228   :  { %5188 = vmatmul.msk.f32.gmra.mxu0 %vm12088_vm2, %v7333_v0  ;;  %v5198_v16 = vmul.f32 -1.442695, %v1023_v3 }
 0x22b   :  { %5170 = vmatmul.msk.f32.gmra.mxu3 %vm12149_vm1, %v7291_v38 }
 0x22d   :  { %v7534_v31 = vpop.f32.mrf.mxu0 }
 0x22e   :  { %v735_v23 = vpop.f32.mrf.mxu3 }
 0x22f   :  { %v7526_v14 = vadd.f32 %v848_v20, %v735_v23 }
 0x230   :  { %5189 = vmatmul.msk.f32.gmra.mxu0 %vm12088_vm2, %v7346_v56 }
 0x233   :  { %5171 = vmatmul.msk.f32.gmra.mxu3 %vm12149_vm1, %v7309_v7  ;;  %v960_v7 = vpop.f32.mrf.mxu1 }
 0x234   :  { %v1004_v27 = vadd.f32 %v960_v7, %v7502_v13 }
 0x235   :  { %v7542_v38 = vpop.f32.mrf.mxu0 }
 0x236   :  { %v738_v33 = vpop.f32.mrf.mxu3  ;;  %v1024_v60 = vadd.f32 %v7622_v63, %v1004_v27 }
 0x237   :  { %v7532_v47 = vadd.f32 %v851_v35, %v738_v33 }
 0x238   :  { %5190 = vmatmul.msk.f32.gmra.mxu0 %vm12088_vm2, %v7359_v45  ;;  %v5199_v18 = vmul.f32 -1.442695, %v1024_v60 }
 0x23b   :  { %5172 = vmatmul.msk.f32.gmra.mxu3 %vm12149_vm1, %v7326_v39  ;;  %v963_v39 = vpop.f32.mrf.mxu1 }
 0x23c   :  { %v1005_v22 = vadd.f32 %v963_v39, %v7508_v17 }
 0x23d   :  { %v7550_v36 = vpop.f32.mrf.mxu0 }
 0x23e   :  { %v7540_v61 = vpop.f32.mrf.mxu3  ;;  %v1025_v43 = vadd.f32 %v7622_v63, %v1005_v22 }
 0x240   :  { %5191 = vmatmul.msk.f32.gmra.mxu0 %vm12088_vm2, %v7370_v32  ;;  %v5200_v13 = vmul.f32 -1.442695, %v1025_v43 }
 0x243   :  { %5173 = vmatmul.msk.f32.gmra.mxu3 %vm12149_vm1, %v7341_v40  ;;  %v966_v45 = vpop.f32.mrf.mxu1 }
 0x245   :  { %v7558_v53 = vpop.f32.mrf.mxu0 }
 0x246   :  { %v7548_v0 = vpop.f32.mrf.mxu3 }
 0x248   :  { %5192 = vmatmul.msk.f32.gmra.mxu0 %vm12088_vm2, %v7392_v19 }
 0x24b   :  { %5174 = vmatmul.msk.f32.gmra.mxu3 %vm12149_vm1, %v7354_v2  ;;  %v7574_v2 = vpop.f32.mrf.mxu2  ;;  %v969_v28 = vpop.f32.mrf.mxu1 }
 0x24c   :  { %v1007_v17 = vadd.f32 %v969_v28, %v7520_v25 }
 0x24d   :  { %v7566_v1 = vpop.f32.mrf.mxu0 }
 0x24e   :  { %v7556_v56 = vpop.f32.mrf.mxu3 }
 0x250   :  { %5193 = vmatmul.msk.f32.gmra.mxu0 %vm12088_vm2, %v7427_v11 }
 0x253   :  { %5175 = vmatmul.msk.f32.gmra.mxu3 %vm12149_vm1, %v7372_v24  ;;  %v7584_v20 = vpop.f32.mrf.mxu2  ;;  %v972_v11 = vpop.f32.mrf.mxu1 }
 0x254   :  { %v1008_v3 = vadd.f32 %v972_v11, %v7526_v14 }
 0x255   :  { %v7576_v24 = vpop.f32.mrf.mxu0 }
 0x256   :  { %v7564_v40 = vpop.f32.mrf.mxu3  ;;  %v1028_v25 = vadd.f32 %v7622_v63, %v1008_v3 }
 0x258   :  { %5194 = vmatmul.msk.f32.gmra.mxu0 %vm12088_vm2, %v7446_v41 }
 0x25b   :  { %5176 = vmatmul.msk.f32.gmra.mxu3 %vm12149_vm1, %v7407_v50  ;;  %v975_v41 = vpop.f32.mrf.mxu1 }
 0x25c   :  { %v1009_v14 = vadd.f32 %v975_v41, %v7532_v47 }
 0x25d   :  { %v7586_v50 = vpop.f32.mrf.mxu0 }
 0x25e   :  { %v7572_v32 = vpop.f32.mrf.mxu3  ;;  %v1029_v47 = vadd.f32 %v7622_v63, %v1009_v14 }
 0x260   :  { %5195 = vmatmul.msk.f32.gmra.mxu0 %vm12088_vm2, %v7465_v15 }
 0x263   :  { %5177 = vmatmul.msk.f32.gmra.mxu3 %vm12149_vm1, %v7438_v59  ;;  %v7596_v59 = vpop.f32.mrf.mxu2  ;;  %v978_v15 = vpop.f32.mrf.mxu1 }
 0x265   :  { %v7594_v35 = vpop.f32.mrf.mxu0 }
 0x266   :  { %v7582_v19 = vpop.f32.mrf.mxu3 }
 0x268   :  { %5196 = vmatmul.msk.f32.gmra.mxu0 %vm12088_vm2, %v7476_v42  ;;  %v1002_v42 = vadd.f32 %v954_v44, %v7490_v30 }
 0x26a   :  { %v1022_v62 = vadd.f32 %v7622_v63, %v1002_v42  ;;  %v1006_v42 = vadd.f32 %v966_v45, %v7514_v37  ;;  %v1027_v37 = vadd.f32 %v7622_v63, %v1007_v17  ;;  %v5203_v17 = vmul.f32 -1.442695, %v1028_v25 }
 0x26b   :  { %5178 = vmatmul.msk.f32.gmra.mxu3 %vm12149_vm1, %v7460_v26  ;;  %v7606_v26 = vpop.f32.mrf.mxu2 }
 0x26c   :  { %v5197_v6 = vmul.f32 -1.442695, %v1022_v62  ;;  %v1026_v39 = vadd.f32 %v7622_v63, %v1006_v42  ;;  %v5202_v43 = vmul.f32 -1.442695, %v1027_v37 }
 0x26d   :  { %v7604_v5 = vpop.f32.mrf.mxu0 }
 0x26e   :  { %v7592_v23 = vpop.f32.mrf.mxu3  ;;  %5773 = vpow2.f32 %v5197_v6  ;;  %v5201_v6 = vmul.f32 -1.442695, %v1026_v39  ;;  %v858_v39 = vadd.f32 %v7542_v38, %v7548_v0 }
 0x26f   :  { %5775 = vpow2.f32 %v5198_v16  ;;  %v855_v16 = vadd.f32 %v7534_v31, %v7540_v61 }
 0x270   :  { %5777 = vpow2.f32 %v5199_v18 }
 0x271   :  { %5779 = vpow2.f32 %v5200_v13  ;;  %v1010_v3 = vadd.f32 %v978_v15, %v855_v16  ;;  %v5204_v15 = vmul.f32 -1.442695, %v1029_v47 }
 0x272   :  { %5781 = vpow2.f32 %v5201_v6 }
 0x273   :  { %5179 = vmatmul.msk.f32.gmra.mxu3 %vm12149_vm1, %v7478_v21  ;;  %v7614_v9 = vpop.f32.mrf.mxu2  ;;  %v981_v21 = vpop.f32.mrf.mxu1  ;;  %v1030_v0 = vadd.f32 %v7622_v63, %v1010_v3 }
 0x274   :  { %v5774_v27 = vpop.eup %5773  ;;  %v1011_v6 = vadd.f32 %v981_v21, %v858_v39 }
 0x275   :  { %v7610_v8 = vpop.f32.mrf.mxu0  ;;  %v5776_v45 = vpop.eup %5775  ;;  %v7653_v28 = vadd.f32 1.0, %v5774_v27 }
 0x276   :  { %v7602_v33 = vpop.f32.mrf.mxu3  ;;  %v5778_v42 = vpop.eup %5777  ;;  %v7660_v18 = vadd.f32 1.0, %v5776_v45  ;;  %v861_v45 = vadd.f32 %v7550_v36, %v7556_v56  ;;  %v1031_v21 = vadd.f32 %v7622_v63, %v1011_v6 }
 0x277   :  { %12214 = vst [vmem:[#allocation51_spill] sm:$0xff] %v7653_v28  ;;  %v5780_v13 = vpop.eup %5779  ;;  %5783 = vrcp.f32 %v7653_v28  ;;  %v7665_v27 = vadd.f32 1.0, %v5778_v42  ;;  %v864_v42 = vadd.f32 %v7558_v53, %v7564_v40 }
 0x278   :  { %12215 = vst [vmem:[#allocation52_spill] sm:$0xff] %v7660_v18  ;;  %5785 = vpow2.f32 %v5202_v43  ;;  %v7671_v61 = vadd.f32 1.0, %v5780_v13  ;;  %v5782_v38 = vpop.eup %5781  ;;  %v5206_v53 = vmul.f32 -1.442695, %v1031_v21 }
 0x279   :  { %12216 = vst [vmem:[#allocation53_spill] sm:$0xff] %v7665_v27  ;;  %5787 = vrcp.f32 %v7660_v18  ;;  %v7684_v14 = vadd.f32 1.0, %v5782_v38 }
 0x27a   :  { %12217 = vst [vmem:[#allocation54_spill] sm:$0xff] %v7671_v61  ;;  %5789 = vpow2.f32 %v5203_v17  ;;  %v5205_v17 = vmul.f32 -1.442695, %v1030_v0  ;;  %v867_v0 = vadd.f32 %v7566_v1, %v7572_v32  ;;  %vm1408_vm14 = vweird.f32 %v7671_v61 }
 0x27b   :  { %v7631_v4 = vpop.f32.mrf.mxu2  ;;  %v7635_v44 = vpop.f32.mrf.mxu1  ;;  %5791 = vrcp.f32 %v7665_v27  ;;  %12219 = vst [vmem:[#allocation56_spill] sm:$0xff] %v7684_v14  ;;  %vm1423_vm11 = vweird.f32 %v7684_v14 }
 0x27c   :  { %5793 = vrcp.f32 %v7671_v61  ;;  %v1012_v36 = vadd.f32 %v7635_v44, %v861_v45 }
 0x27d   :  { %v7616_v10 = vpop.f32.mrf.mxu0  ;;  %v7681_v16 = vpop.eup %5783  ;;  %5795 = vpow2.f32 %v5204_v15 }
 0x27e   :  { %v7608_v12 = vpop.f32.mrf.mxu3  ;;  %12218 = vst [vmem:[#allocation55_spill] sm:$0xff] %v7681_v16  ;;  %v5786_v43 = vpop.eup %5785  ;;  %v1359_v56 = vmul.f32 %v7681_v16, %v7653_v28  ;;  %5797 = vrcp.f32 %v7684_v14  ;;  %v1032_v58 = vadd.f32 %v7622_v63, %v1012_v36 }
 0x27f   :  { %v7689_v13 = vpop.eup %5787  ;;  %v7694_v3 = vadd.f32 1.0, %v5786_v43  ;;  %5799 = vpow2.f32 %v5205_v17 }
 0x280   :  { %12220 = vst [vmem:[#allocation57_spill] sm:$0xff] %v7689_v13  ;;  %v5790_v39 = vpop.eup %5789  ;;  %v1374_v43 = vmul.f32 %v7689_v13, %v7660_v18  ;;  %v1360_v54 = vsub.f32 1.0, %v1359_v56  ;;  %v5207_v36 = vmul.f32 -1.442695, %v1032_v58 }
 0x281   :  { %v7698_v38 = vpop.eup %5791  ;;  %v7707_v44 = vadd.f32 1.0, %v5790_v39  ;;  %5801 = vrcp.f32 %v7694_v3  ;;  %vm1438_vm6 = vweird.f32 %v7694_v3 }
 0x282   :  { %12221 = vst [vmem:[#allocation58_spill] sm:$0xff] %v7698_v38  ;;  %v7705_v15 = vpop.eup %5793  ;;  %5803 = vpow2.f32 %v5206_v53  ;;  %v1375_v17 = vsub.f32 1.0, %v1374_v43  ;;  %v1361_v56 = vmul.f32 %v7681_v16, %v1360_v54 }
 0x283   :  { %v7646_v62 = vpop.f32.mrf.mxu2  ;;  %v987_v22 = vpop.f32.mrf.mxu1  ;;  %12222 = vst [vmem:[#allocation59_spill] sm:$0xff] %v7705_v15  ;;  %5805 = vrcp.f32 %v7707_v44  ;;  %vm1409_vm13 = vweird.f32 %v7705_v15  ;;  %vm1453_vm3 = vweird.f32 %v7707_v44 }
 0x284   :  { %v1013_v40 = vadd.f32 %v987_v22, %v864_v42  ;;  %v1389_v22 = vmul.f32 %v7698_v38, %v7665_v27  ;;  %v5796_v1 = vpop.eup %5795  ;;  %v1404_v42 = vmul.f32 %v7705_v15, %v7671_v61  ;;  %v1376_v54 = vmul.f32 %v7689_v13, %v1375_v17  ;;  %vm7803_vm8 = vmor %vm1408_vm14, %vm1409_vm13 }
 0x285   :  { %v7633_v30 = vpop.f32.mrf.mxu0  ;;  %v7721_v39 = vpop.eup %5797  ;;  %v7724_v51 = vadd.f32 1.0, %v5796_v1  ;;  %5807 = vpow2.f32 %v5207_v36  ;;  %v1414_v1 = vand.u32 2147483648, %v7671_v61 }
 0x286   :  { %v7612_v29 = vpop.f32.mrf.mxu3  ;;  %v1033_v32 = vadd.f32 %v7622_v63, %v1013_v40  ;;  %12224 = vst [vmem:[#allocation61_spill] sm:$0xff] %v7721_v39  ;;  %v5800_v52 = vpop.eup %5799  ;;  %v1390_v53 = vsub.f32 1.0, %v1389_v22  ;;  %v1405_v48 = vsub.f32 1.0, %v1404_v42  ;;  %v1419_v58 = vmul.f32 %v7721_v39, %v7684_v14 }
 0x287   :  { %v7731_v43 = vpop.eup %5801  ;;  %v7747_v40 = vadd.f32 %v7681_v16, %v1361_v56  ;;  %5809 = vrcp.f32 %v7724_v51  ;;  %v7762_v16 = vadd.f32 %v7689_v13, %v1376_v54  ;;  %vm1424_vm10 = vweird.f32 %v7721_v39 }
 0x288   :  { %v5804_v22 = vpop.eup %5803  ;;  %vm1439_vm5 = vweird.f32 %v7731_v43  ;;  %vm7858_vm15 = vmor %vm1423_vm11, %vm1424_vm10  ;;  %vm1468_vm14 = vweird.f32 %v7724_v51 }
 0x289   :  { %12227 = vst [vmem:[#allocation64_spill] sm:$0xff] %v7747_v40  ;;  %v7749_v46 = vpop.eup %5805  ;;  %v7758_v56 = vadd.f32 1.0, %v5804_v22  ;;  %v1420_v40 = vsub.f32 1.0, %v1419_v58  ;;  %v7772_v58 = vor.u32 1.1754944e-38, %v1414_v1  ;;  %vm7871_vm12 = vmor %vm1438_vm6, %vm1439_vm5 }
 0x28a   :  { %12228 = vst [vmem:[#allocation65_spill] sm:$0xff] %v7762_v16  ;;  %v1444_v16 = vand.u32 2147483648, %v7694_v3  ;;  %vm1454_vm4 = vweird.f32 %v7749_v46 }
 0x28b   :  { %v7667_v31 = vpop.f32.mrf.mxu2  ;;  %v990_v41 = vpop.f32.mrf.mxu1  ;;  %12229 = vst [vmem:[#allocation66_spill] sm:$0xff] %v7772_v58  ;;  %v1421_v1 = vmul.f32 %v7721_v39, %v1420_v40  ;;  %v1442_v58 = vand.u32 2147483647, %v7694_v3  ;;  %vm7894_vm13 = vmor %vm1453_vm3, %vm1454_vm4 }
 0x28c   :  { %v1014_v21 = vadd.f32 %v990_v41, %v867_v0  ;;  %v5208_v41 = vmul.f32 -1.442695, %v1033_v32  ;;  %v5808_v54 = vpop.eup %5807  ;;  %v1445_v13 = vor.u32 1.1754944e-38, %v1444_v16 }
 0x28d   :  { %v7643_v7 = vpop.f32.mrf.mxu0  ;;  %v7824_v27 = vadd.f32 %v7721_v39, %v1421_v1  ;;  %vm7828_vm7 = vcmp.eq.f32.partialorder %v1442_v58, 8.507059e+37  ;;  %v1459_v58 = vand.u32 2147483648, %v7707_v44 }
 0x28e   :  { %v7625_v34 = vpop.f32.mrf.mxu3  ;;  %v1034_v0 = vadd.f32 %v7622_v63, %v1014_v21  ;;  %v870_v21 = vadd.f32 %v7576_v24, %v7582_v19  ;;  %5811 = vpow2.f32 %v5208_v41  ;;  %v1434_v24 = vmul.f32 %v7731_v43, %v7694_v3 }
 0x28f   :  { %v1406_v19 = vmul.f32 %v7705_v15, %v1405_v48  ;;  %v1449_v41 = vmul.f32 %v7749_v46, %v7707_v44  ;;  %v1429_v48 = vand.u32 2147483648, %v7684_v14  ;;  %12237 = vst [vmem:[#allocation72_spill] sm:$0xff] %v7824_v27  ;;  %v1460_v14 = vor.u32 1.1754944e-38, %v1459_v58 }
 0x290   :  { %v5209_v36 = vmul.f32 -1.442695, %v1034_v0 }
 0x291   :  { %v7797_v40 = vor.u32 1.1754944e-38, %v1429_v48 }
 0x293   :  { %v7701_v6 = vpop.f32.mrf.mxu2  ;;  %v993_v45 = vpop.f32.mrf.mxu1  ;;  %12233 = vst [vmem:[#allocation70_spill] sm:$0xff] %v7797_v40 }
 0x295   :  { %v7658_v11 = vpop.f32.mrf.mxu0 }
 0x296   :  { %v7640_v57 = vpop.f32.mrf.mxu3 }
 0x29b   :  { %v7740_v32 = vpop.f32.mrf.mxu2  ;;  %v996_v17 = vpop.f32.mrf.mxu1 }
 0x29c   :  { %12226 = vst [vmem:[#allocation63_spill] sm:$0xff] %v7740_v32 }
 0x29d   :  { %v7679_v25 = vpop.f32.mrf.mxu0 }
 0x29e   :  { %v7650_v60 = vpop.f32.mrf.mxu3 }
 0x2a3   :  { %v999_v40 = vpop.f32.mrf.mxu1 }
 0x2a5   :  { %v7712_v55 = vpop.f32.mrf.mxu0 }
 0x2a6   :  { %v7673_v37 = vpop.f32.mrf.mxu3  ;;  %12223 = vst [vmem:[#allocation60_spill] sm:$0xff] %v7712_v55  ;;  %v1435_v55 = vsub.f32 1.0, %v1434_v24 }
 0x2ad   :  { %v7744_v42 = vpop.f32.mrf.mxu0 }
 0x2ae   :  { %v7696_v47 = vpop.f32.mrf.mxu3 }
 0x2b5   :  { %v7790_v24 = vpop.f32.mrf.mxu0 }
 0x2b6   :  { %v7726_v49 = vpop.f32.mrf.mxu3  ;;  %12232 = vst [vmem:[#allocation69_spill] sm:$0xff] %v7790_v24 }
 0x2b7   :  { %12225 = vst [vmem:[#allocation62_spill] sm:$0xff] %v7726_v49  ;;  %v7738_v49 = vadd.f32 1.0, %v5800_v52  ;;  %v1391_v52 = vmul.f32 %v7698_v38, %v1390_v53  ;;  %v1015_v53 = vadd.f32 %v993_v45, %v870_v21  ;;  %v7778_v45 = vadd.f32 %v7705_v15, %v1406_v19  ;;  %v7781_v21 = vpop.eup %5809 }
 0x2b8   :  { %v1450_v19 = vsub.f32 1.0, %v1449_v41  ;;  %v876_v41 = vadd.f32 %v7594_v35, %v7602_v33  ;;  %v1464_v61 = vmul.f32 %v7781_v21, %v7724_v51  ;;  %vm1469_vm10 = vweird.f32 %v7781_v21 }
 0x2b9   :  { %5813 = vrcp.f32 %v7738_v49  ;;  %v7775_v28 = vadd.f32 %v7698_v38, %v1391_v52  ;;  %12231 = vst [vmem:[#allocation68_spill] sm:$0xff] %v7778_v45  ;;  %v5812_v52 = vpop.eup %5811  ;;  %v1035_v22 = vadd.f32 %v7622_v63, %v1015_v53  ;;  %v12234_v53 = vmov 0  ;;  %vm7959_vm4 = vmor %vm1468_vm14, %vm1469_vm10 }
 0x2ba   :  { %5815 = vpow2.f32 %v5209_v36  ;;  %v873_v36 = vadd.f32 %v7586_v50, %v7592_v23  ;;  %v12235_v53 = vsel %vm7803_vm8, 4294967295, %v12234_v53  ;;  %v7809_v23 = vpop.f32.mrf.mxu2  ;;  %v7819_v18 = vadd.f32 1.0, %v5812_v52 }
 0x2bb   :  { %12230 = vst [vmem:[#allocation67_spill] sm:$0xff] %v7775_v28  ;;  %5817 = vrcp.f32 %v7758_v56  ;;  %v7793_v28 = vadd.f32 1.0, %v5808_v54  ;;  %v1436_v54 = vmul.f32 %v7731_v43, %v1435_v55  ;;  %v5210_v33 = vmul.f32 -1.442695, %v1035_v22 }
 0x2bc   :  { %12236 = vst [vmem:[#allocation71_spill] sm:$0xff] %v12235_v53  ;;  %v1016_v55 = vadd.f32 %v996_v17, %v873_v36  ;;  %v1451_v38 = vmul.f32 %v7749_v46, %v1450_v19  ;;  %v1457_v17 = vand.u32 2147483647, %v7707_v44  ;;  %v1017_v22 = vadd.f32 %v999_v40, %v876_v41 }
 0x2bd   :  { %5819 = vrcp.f32 %v7793_v28  ;;  %v1437_v1 = vadd.f32 %v7731_v43, %v1436_v54  ;;  %v1465_v19 = vsub.f32 1.0, %v1464_v61  ;;  %v1474_v45 = vand.u32 2147483648, %v7724_v51  ;;  %v7849_v24 = vpop.f32.mrf.mxu0 }
 0x2be   :  { %v7768_v0 = vpop.f32.mrf.mxu3  ;;  %5821 = vrcp.f32 %v7819_v18  ;;  %v1036_v15 = vadd.f32 %v7622_v63, %v1016_v55  ;;  %12241 = vst [vmem:[#allocation74_spill] sm:$0xff] %v7849_v24  ;;  %v1452_v41 = vadd.f32 %v7749_v46, %v1451_v38  ;;  %v12242_v54 = vmov 0 }
 0x2bf   :  { %v7807_v50 = vpop.eup %5813  ;;  %5823 = vpow2.f32 %v5210_v33  ;;  %v12243_v54 = vsel %vm7858_vm15, 4294967295, %v12242_v54  ;;  %vm7863_vm0 = vcmp.eq.f32.partialorder %v1457_v17, 8.507059e+37  ;;  %v1489_v17 = vand.u32 2147483648, %v7738_v49 }
 0x2c0   :  { %v5816_v35 = vpop.eup %5815  ;;  %v1479_v16 = vmul.f32 %v7807_v50, %v7738_v49  ;;  %12244 = vst [vmem:[#allocation75_spill] sm:$0xff] %v12243_v54  ;;  %v1441_v24 = vsel %vm7871_vm12, %v7731_v43, %v1437_v1  ;;  %v1487_v3 = vand.u32 2147483647, %v7738_v49  ;;  %v1466_v32 = vmul.f32 %v7781_v21, %v1465_v19 }
 0x2c1   :  { %v7832_v52 = vpop.eup %5817  ;;  %v7845_v36 = vadd.f32 1.0, %v5816_v35  ;;  %v1472_v35 = vand.u32 2147483647, %v7724_v51  ;;  %v5211_v43 = vmul.f32 -1.442695, %v1036_v15  ;;  %v1475_v1 = vor.u32 1.1754944e-38, %v1474_v45 }
 0x2c2   :  { %v1494_v40 = vmul.f32 %v7832_v52, %v7758_v56  ;;  %v1480_v61 = vsub.f32 1.0, %v1479_v16  ;;  %v1037_v16 = vadd.f32 %v7622_v63, %v1017_v22  ;;  %v7898_v22 = vpop.f32.mrf.mxu2  ;;  %v1456_v38 = vsel %vm7894_vm13, %v7749_v46, %v1452_v41 }
 0x2c3   :  { %5825 = vrcp.f32 %v7845_v36  ;;  %vm1483_vm11 = vweird.f32 %v7738_v49  ;;  %vm7910_vm6 = vcmp.eq.f32.partialorder %v1472_v35, 8.507059e+37  ;;  %v7916_v15 = vsel %vm7828_vm7, %v1445_v13, %v1441_v24 }
 0x2c4   :  { %v1495_v58 = vsub.f32 1.0, %v1494_v40  ;;  %v1481_v27 = vmul.f32 %v7807_v50, %v1480_v61  ;;  %12253 = vst [vmem:[#allocation76_spill] sm:$0xff] %v7916_v15  ;;  %v5212_v46 = vmul.f32 -1.442695, %v1037_v16  ;;  %v1137_v40 = vadd.f32 %v7608_v12, %v7574_v2  ;;  %v7952_v16 = vld [vmem:[%s11949_s15] ss:$0 sm:$0xff] }
 0x2c5   :  { %v1490_v61 = vor.u32 1.1754944e-38, %v1489_v17  ;;  %v1140_v63 = vadd.f32 %v7612_v29, %v7584_v20  ;;  %v1502_v35 = vand.u32 2147483647, %v7758_v56  ;;  %vm7925_vm5 = vcmp.eq.f32.partialorder %v1487_v3, 8.507059e+37  ;;  %v7934_v12 = vpop.f32.mrf.mxu0 }
 0x2c6   :  { %v7835_v48 = vpop.f32.mrf.mxu3  ;;  %v1467_v13 = vadd.f32 %v7781_v21, %v1466_v32  ;;  %v7932_v24 = vsel %vm7863_vm0, %v1460_v14, %v1456_v38  ;;  %5827 = vpow2.f32 %v5211_v43  ;;  %v1496_v2 = vmul.f32 %v7832_v52, %v1495_v58 }
 0x2c7   :  { %12240 = vst [vmem:[#allocation73_spill] sm:$0xff] %v7835_v48  ;;  %v7884_v48 = vpop.eup %5819  ;;  %vm1498_vm7 = vweird.f32 %v7758_v56  ;;  %vm1484_vm3 = vweird.f32 %v7807_v50  ;;  %v1143_v32 = vadd.f32 %v7625_v34, %v7596_v59  ;;  %v1482_v53 = vadd.f32 %v7807_v50, %v1481_v27 }
 0x2c8   :  { %v7903_v19 = vpop.eup %5821  ;;  %v1509_v41 = vmul.f32 %v7884_v48, %v7793_v28  ;;  %12256 = vst [vmem:[#allocation77_spill] sm:$0xff] %v7932_v24  ;;  %5829 = vpow2.f32 %v5212_v46  ;;  %v1258_v33 = vadd.f32 %v7604_v5, %v1137_v40  ;;  %v1504_v3 = vand.u32 2147483648, %v7758_v56  ;;  %vm7981_vm14 = vmor %vm1483_vm11, %vm1484_vm3 }
 0x2c9   :  { %v5824_v45 = vpop.eup %5823  ;;  %v1524_v14 = vmul.f32 %v7903_v19, %v7819_v18  ;;  %v1259_v59 = vadd.f32 %v7610_v8, %v1140_v63  ;;  %vm1499_vm0 = vweird.f32 %v7832_v52  ;;  %vm7965_vm12 = vcmp.eq.f32.partialorder %v1502_v35, 8.507059e+37 }
 0x2ca   :  { %v7939_v29 = vpop.eup %5825  ;;  %v7941_v20 = vadd.f32 1.0, %v5824_v45  ;;  %v1510_v17 = vsub.f32 1.0, %v1509_v41  ;;  %v1471_v27 = vsel %vm7959_vm4, %v7781_v21, %v1467_v13  ;;  %v1517_v51 = vand.u32 2147483647, %v7793_v28  ;;  %v7992_v63 = vpop.f32.mrf.mxu2  ;;  %vm8012_vm11 = vmor %vm1498_vm7, %vm1499_vm0 }
 0x2cb   :  { %v1539_v43 = vmul.f32 %v7939_v29, %v7845_v36  ;;  %v1519_v58 = vand.u32 2147483648, %v7793_v28  ;;  %v1497_v38 = vadd.f32 %v7832_v52, %v1496_v2  ;;  %v1260_v21 = vadd.f32 %v7616_v10, %v1143_v32 }
 0x2cc   :  { %5831 = vrcp.f32 %v7941_v20  ;;  %v1525_v46 = vsub.f32 1.0, %v1524_v14  ;;  %v1486_v40 = vsel %vm7981_vm14, %v7807_v50, %v1482_v53  ;;  %v5828_v41 = vpop.eup %5827  ;;  %v7995_v49 = vadd.f32 %v7952_v16, %v1258_v33 }
 0x2cd   :  { %v1511_v35 = vmul.f32 %v7884_v48, %v1510_v17  ;;  %v1505_v13 = vor.u32 1.1754944e-38, %v1504_v3  ;;  %v8000_v2 = vsel %vm7910_vm6, %v1475_v1, %v1471_v27  ;;  %v8003_v10 = vadd.f32 %v7952_v16, %v1259_v59  ;;  %v8016_v1 = vpop.f32.mrf.mxu0 }
 0x2ce   :  { %v7905_v55 = vpop.f32.mrf.mxu3  ;;  %12263 = vst [vmem:[#allocation78_spill] sm:$0xff] %v7995_v49  ;;  %v1532_v32 = vand.u32 2147483647, %v7819_v18  ;;  %v1534_v50 = vand.u32 2147483648, %v7819_v18  ;;  %vm1513_vm13 = vweird.f32 %v7793_v28  ;;  %v5830_v44 = vpop.eup %5829  ;;  %v1540_v53 = vsub.f32 1.0, %v1539_v43 }
 0x2cf   :  { %12264 = vst [vmem:[#allocation79_spill] sm:$0xff] %v8000_v2  ;;  %v1520_v33 = vor.u32 1.1754944e-38, %v1519_v58  ;;  %v1501_v17 = vsel %vm8012_vm11, %v7832_v52, %v1497_v38  ;;  %v8023_v3 = vsel %vm7925_vm5, %v1490_v61, %v1486_v40  ;;  %v8025_v34 = vadd.f32 1.0, %v5828_v41 }
 0x2d0   :  { %12265 = vst [vmem:[#allocation80_spill] sm:$0xff] %v8003_v10  ;;  %v8028_v56 = vadd.f32 %v7952_v16, %v1260_v21  ;;  %v1526_v59 = vmul.f32 %v7903_v19, %v1525_v46  ;;  %vm1514_vm10 = vweird.f32 %v7884_v48  ;;  %vm8032_vm6 = vcmp.eq.f32.partialorder %v1517_v51, 8.507059e+37 }
 0x2d1   :  { %12268 = vst [vmem:[#allocation81_spill] sm:$0xff] %v8023_v3  ;;  %v1614_v43 = vmin.f32 %v7995_v49, 20.0  ;;  %v1547_v52 = vand.u32 2147483647, %v7845_v36  ;;  %vm1528_vm5 = vweird.f32 %v7819_v18  ;;  %v1512_v39 = vadd.f32 %v7884_v48, %v1511_v35  ;;  %vm8066_vm0 = vmor %vm1513_vm13, %vm1514_vm10 }
 0x2d2   :  { %12269 = vst [vmem:[#allocation82_spill] sm:$0xff] %v8028_v56  ;;  %v8040_v61 = vpop.eup %5831  ;;  %v8042_v58 = vadd.f32 1.0, %v5830_v44  ;;  %v1615_v38 = vmin.f32 %v8003_v10, 20.0  ;;  %vm8045_vm7 = vcmp.eq.f32.partialorder %v1532_v32, 8.507059e+37  ;;  %v1535_v51 = vor.u32 1.1754944e-38, %v1534_v50 }
 0x2d3   :  { %v8051_v21 = vsel %vm7965_vm12, %v1505_v13, %v1501_v17  ;;  %v1541_v46 = vmul.f32 %v7939_v29, %v1540_v53  ;;  %vm1543_vm3 = vweird.f32 %v7845_v36  ;;  %v1549_v40 = vand.u32 2147483648, %v7845_v36  ;;  %v1110_v17 = vpop.f32.mrf.mxu2 }
 0x2d4   :  { %vm1529_vm4 = vweird.f32 %v7903_v19  ;;  %5833 = vrcp.f32 %v8025_v34  ;;  %v1616_v41 = vmin.f32 %v8028_v56, 20.0  ;;  %v1146_v35 = vadd.f32 %v7640_v57, %v7606_v26 }
 0x2d5   :  { %v1527_v5 = vadd.f32 %v7903_v19, %v1526_v59  ;;  %v1630_v50 = vmul.f32 1.442695, %v1614_v43  ;;  %v1554_v14 = vmul.f32 %v8040_v61, %v7941_v20  ;;  %vm8072_vm12 = vcmp.eq.f32.partialorder %v1547_v52, 8.507059e+37  ;;  %vm8091_vm13 = vmor %vm1528_vm5, %vm1529_vm4 }
 0x2d6   :  { %v7987_v45 = vpop.f32.mrf.mxu3  ;;  %v1516_v57 = vsel %vm8066_vm0, %v7884_v48, %v1512_v39  ;;  %5835 = vrcp.f32 %v8042_v58  ;;  %v1632_v26 = vmul.f32 1.442695, %v1615_v38  ;;  %v1149_v28 = vadd.f32 %v7650_v60, %v7614_v9  ;;  %v12290_v48 = vld [vmem:[#allocation73_spill] sm:$0xff] }
 0x2d7   :  { %v1564_v53 = vand.u32 2147483648, %v7941_v20  ;;  %v1152_v59 = vadd.f32 %v7673_v37, %v7631_v4  ;;  %v1542_v43 = vadd.f32 %v7939_v29, %v1541_v46  ;;  %vm1544_vm14 = vweird.f32 %v7939_v29  ;;  %v1249_v4 = vpop.f32.mrf.mxu0 }
 0x2d8   :  { %v1550_v52 = vor.u32 1.1754944e-38, %v1549_v40  ;;  %v1634_v9 = vmul.f32 1.442695, %v1616_v41  ;;  %v1261_v60 = vadd.f32 %v7633_v30, %v1146_v35  ;;  %v1155_v39 = vadd.f32 %v7696_v47, %v7646_v62  ;;  %vm8116_vm11 = vmor %vm1543_vm3, %vm1544_vm14 }
 0x2d9   :  { %v1531_v37 = vsel %vm8091_vm13, %v7903_v19, %v1527_v5  ;;  %5837 = vpow2.f32 %v1630_v50  ;;  %v1555_v38 = vsub.f32 1.0, %v1554_v14  ;;  %v1562_v46 = vand.u32 2147483647, %v7941_v20 }
 0x2da   :  { %v8104_v18 = vsel %vm8032_vm6, %v1520_v33, %v1516_v57  ;;  %v8106_v40 = vpop.eup %5833  ;;  %5839 = vpow2.f32 %v1632_v26  ;;  %v1262_v30 = vadd.f32 %v7643_v7, %v1149_v28  ;;  %v1579_v62 = vand.u32 2147483648, %v8025_v34 }
 0x2db   :  { %v8110_v47 = vor.u32 1.1754944e-38, %v1564_v53  ;;  %v1263_v33 = vadd.f32 %v7658_v11, %v1152_v59  ;;  %v1577_v27 = vand.u32 2147483647, %v8025_v34  ;;  %v1546_v7 = vsel %vm8116_vm11, %v7939_v29, %v1542_v43  ;;  %v1113_v43 = vpop.f32.mrf.mxu2 }
 0x2dc   :  { %v8127_v41 = vsel %vm8045_vm7, %v1535_v51, %v1531_v37  ;;  %v8129_v35 = vpop.eup %5835  ;;  %5841 = vpow2.f32 %v1634_v9  ;;  %v8132_v36 = vadd.f32 %v7952_v16, %v1261_v60  ;;  %v1264_v5 = vadd.f32 %v7679_v25, %v1155_v39 }
 0x2dd   :  { %v1161_v50 = vadd.f32 %v7768_v0, %v7701_v6  ;;  %v8140_v29 = vmul.f32 %v8106_v40, %v8025_v34  ;;  %v1556_v8 = vmul.f32 %v8040_v61, %v1555_v38  ;;  %v8144_v51 = vadd.f32 %v7952_v16, %v1262_v30  ;;  %v12292_v30 = vld [vmem:[#allocation60_spill] sm:$0xff] }
 0x2de   :  { %v1172_v32 = vpop.f32.mrf.mxu3  ;;  %12282 = vst [vmem:[#allocation83_spill] sm:$0xff] %v8132_v36  ;;  %v1170_v57 = vadd.f32 %v7987_v45, %v7898_v22  ;;  %v8148_v25 = vor.u32 1.1754944e-38, %v1579_v62  ;;  %v8157_v0 = vadd.f32 %v7952_v16, %v1263_v33  ;;  %v8163_v53 = vmul.f32 %v8129_v35, %v8042_v58 }
 0x2df   :  { %v1173_v11 = vadd.f32 %v1172_v32, %v7992_v63  ;;  %12283 = vst [vmem:[#allocation84_spill] sm:$0xff] %v8144_v51  ;;  %v8152_v63 = vsel %vm8072_vm12, %v1550_v52, %v1546_v7  ;;  %v8154_v6 = vpop.eup %5837  ;;  %v12286_v32 = vld [vmem:[#allocation62_spill] sm:$0xff]  ;;  %v1617_v45 = vmin.f32 %v8132_v36, 20.0  ;;  %v8169_v44 = vadd.f32 %v7952_v16, %v1264_v5  ;;  %v12289_v52 = vld [vmem:[#allocation63_spill] sm:$0xff] }
 0x2e0   :  { %12284 = vst [vmem:[#allocation85_spill] sm:$0xff] %v8154_v6  ;;  %v1158_v26 = vadd.f32 %v12286_v32, %v7667_v31  ;;  %v8165_v22 = vpop.eup %5839  ;;  %v1266_v31 = vadd.f32 %v7744_v42, %v1161_v50  ;;  %v1164_v9 = vadd.f32 %v12290_v48, %v12289_v52  ;;  %v1570_v60 = vsub.f32 1.0, %v8140_v29  ;;  %v12294_v29 = vld [vmem:[#allocation69_spill] sm:$0xff] }
 0x2e1   :  { %12285 = vst [vmem:[#allocation86_spill] sm:$0xff] %v8157_v0  ;;  %v1270_v59 = vadd.f32 %v8016_v1, %v1173_v11  ;;  %v8179_v39 = vadd.f32 %v8040_v61, %v1556_v8  ;;  %v1618_v37 = vmin.f32 %v8144_v51, 20.0  ;;  %v1269_v38 = vadd.f32 %v7934_v12, %v1170_v57  ;;  %v12293_v12 = vld [vmem:[#allocation74_spill] sm:$0xff] }
 0x2e2   :  { %12287 = vst [vmem:[#allocation62_spill] sm:$0xff] %v8165_v22  ;;  %v1662_v42 = vadd.f32 1.0, %v8154_v6  ;;  %v1619_v1 = vmin.f32 %v8157_v0, 20.0  ;;  %v1265_v62 = vadd.f32 %v12292_v30, %v1158_v26  ;;  %v1585_v19 = vsub.f32 1.0, %v8163_v53 }
 0x2e3   :  { %12288 = vst [vmem:[#allocation87_spill] sm:$0xff] %v8169_v44  ;;  %vm1559_vm10 = vweird.f32 %v8040_v61  ;;  %v1671_v33 = vadd.f32 1.0, %v8165_v22  ;;  %v1636_v7 = vmul.f32 1.442695, %v1617_v45  ;;  %v1620_v5 = vmin.f32 %v8169_v44, 20.0 }
 0x2e4   :  { %v1267_v8 = vadd.f32 %v12294_v29, %v1164_v9  ;;  %vm1558_vm6 = vweird.f32 %v7941_v20  ;;  %v1638_v26 = vmul.f32 1.442695, %v1618_v37  ;;  %5843 = vlog2.f32 %v1662_v42 }
 0x2e5   :  { %v1640_v45 = vmul.f32 1.442695, %v1619_v1  ;;  %5845 = vlog2.f32 %v1671_v33  ;;  %vm1573_vm5 = vweird.f32 %v8025_v34  ;;  %vm1574_vm7 = vweird.f32 %v8106_v40  ;;  %v1116_v1 = vpop.f32.mrf.mxu2  ;;  %vm8256_vm0 = vmor %vm1558_vm6, %vm1559_vm10 }
 0x2e6   :  { %v1175_v13 = vpop.f32.mrf.mxu3  ;;  %5847 = vpow2.f32 %v1636_v7  ;;  %v8218_v9 = vadd.f32 %v7952_v16, %v1267_v8  ;;  %vm8228_vm3 = vcmp.eq.f32.partialorder %v1562_v46, 8.507059e+37  ;;  %v1571_v33 = vmul.f32 %v8106_v40, %v1570_v60  ;;  %vm8289_vm11 = vmor %vm1573_vm5, %vm1574_vm7 }
 0x2e7   :  { %v1176_v14 = vadd.f32 %v1175_v13, %v1110_v17  ;;  %v1167_v17 = vadd.f32 %v7905_v55, %v7809_v23  ;;  %v1252_v55 = vpop.f32.mrf.mxu0  ;;  %v8197_v13 = vadd.f32 %v7952_v16, %v1270_v59  ;;  %v1586_v46 = vmul.f32 %v8129_v35, %v1585_v19 }
 0x2e8   :  { %vm8248_vm4 = vcmp.eq.f32.partialorder %v1577_v27, 8.507059e+37  ;;  %v1561_v27 = vsel %vm8256_vm0, %v8040_v61, %v8179_v39  ;;  %vm1589_vm12 = vweird.f32 %v8129_v35  ;;  %v1572_v20 = vadd.f32 %v8106_v40, %v1571_v33 }
 0x2e9   :  { %v1271_v28 = vadd.f32 %v1249_v4, %v1176_v14  ;;  %v8181_v4 = vpop.eup %5841  ;;  %v1268_v11 = vadd.f32 %v12293_v12, %v1167_v17  ;;  %v8200_v14 = vadd.f32 %v7952_v16, %v1266_v31  ;;  %v8210_v17 = vadd.f32 %v7952_v16, %v1265_v62 }
 0x2ea   :  { %12291 = vst [vmem:[#allocation63_spill] sm:$0xff] %v8181_v4  ;;  %v1680_v32 = vadd.f32 1.0, %v8181_v4  ;;  %v1642_v31 = vmul.f32 1.442695, %v1620_v5  ;;  %v1626_v52 = vmin.f32 %v8197_v13, 20.0  ;;  %v8235_v7 = vpop.eup %5843  ;;  %vm1588_vm14 = vweird.f32 %v8042_v58 }
 0x2eb   :  { %v8186_v23 = vadd.f32 %v7952_v16, %v1271_v28  ;;  %v8206_v28 = vadd.f32 %v7952_v16, %v1269_v38  ;;  %v1622_v48 = vmin.f32 %v8200_v14, 20.0  ;;  %v1621_v30 = vmin.f32 %v8210_v17, 20.0  ;;  %12297 = vst [vmem:[#allocation73_spill] sm:$0xff] %v8235_v7  ;;  %v8239_v29 = vpop.eup %5845  ;;  %vm8302_vm10 = vmor %vm1588_vm14, %vm1589_vm12 }
 0x2ec   :  { %5849 = vlog2.f32 %v1680_v32  ;;  %v1654_v12 = vmul.f32 1.442695, %v1626_v52  ;;  %12298 = vst [vmem:[#allocation60_spill] sm:$0xff] %v8239_v29  ;;  %v1576_v34 = vsel %vm8289_vm11, %v8106_v40, %v1572_v20  ;;  %v1683_v40 = vmul.f32 -0.5, %v8181_v4 }
 0x2ed   :  { %v1627_v53 = vmin.f32 %v8186_v23, 20.0  ;;  %5851 = vpow2.f32 %v1638_v26  ;;  %v1625_v38 = vmin.f32 %v8206_v28, 20.0  ;;  %v1646_v8 = vmul.f32 1.442695, %v1622_v48 }
 0x2ee   :  { %v1178_v50 = vpop.f32.mrf.mxu3  ;;  %5853 = vpow2.f32 %v1640_v45  ;;  %v1592_v45 = vand.u32 2147483647, %v8042_v58  ;;  %v1644_v48 = vmul.f32 1.442695, %v1621_v30  ;;  %v1674_v19 = vmul.f32 -0.5, %v8165_v22 }
 0x2ef   :  { %v1179_v57 = vadd.f32 %v1178_v50, %v1113_v43  ;;  %v8213_v43 = vadd.f32 %v7952_v16, %v1268_v11  ;;  %5855 = vpow2.f32 %v1642_v31  ;;  %v1255_v50 = vpop.f32.mrf.mxu0  ;;  %v1652_v60 = vmul.f32 1.442695, %v1625_v38 }
 0x2f0   :  { %vm8279_vm13 = vcmp.eq.f32.partialorder %v1592_v45, 8.507059e+37  ;;  %vm1611_vm12 = vcmp.gt.f32.partialorder %v8186_v23, 20.0 }
 0x2f1   :  { %v1272_v59 = vadd.f32 %v1252_v55, %v1179_v57  ;;  %v1656_v55 = vmul.f32 1.442695, %v1627_v53  ;;  %v1624_v5 = vmin.f32 %v8213_v43, 20.0  ;;  %v1623_v57 = vmin.f32 %v8218_v9, 20.0  ;;  %v8242_v53 = vpop.eup %5847 }
 0x2f2   :  { %12299 = vst [vmem:[#allocation74_spill] sm:$0xff] %v8242_v53  ;;  %v8260_v52 = vpop.eup %5849  ;;  %v1689_v39 = vadd.f32 1.0, %v8242_v53 }
 0x2f3   :  { %v8221_v37 = vadd.f32 %v7952_v16, %v1272_v59  ;;  %5857 = vpow2.f32 %v1656_v55  ;;  %v1594_v59 = vand.u32 2147483648, %v8042_v58  ;;  %12304 = vst [vmem:[#allocation69_spill] sm:$0xff] %v8260_v52  ;;  %v8266_v55 = vpop.eup %5851  ;;  %v8296_v58 = vsel %vm8228_vm3, %v8110_v47, %v1561_v27 }
 0x2f4   :  { %v1692_v27 = vmul.f32 -0.5, %v8242_v53 }
 0x2f5   :  { %v1628_v62 = vmin.f32 %v8221_v37, 20.0 }
 0x2f6   :  { %v1181_v11 = vpop.f32.mrf.mxu3 }
 0x2f7   :  { %v1658_v32 = vmul.f32 1.442695, %v1628_v62  ;;  %v1182_v26 = vadd.f32 %v1181_v11, %v1116_v1  ;;  %v1650_v1 = vmul.f32 1.442695, %v1624_v5  ;;  %v8270_v62 = vpop.eup %5853  ;;  %v1648_v11 = vmul.f32 1.442695, %v1623_v57 }
 0x2f8   :  { %v1595_v5 = vor.u32 1.1754944e-38, %v1594_v59  ;;  %v1665_v57 = vmul.f32 -0.5, %v8154_v6 }
 0x2f9   :  { %5859 = vpow2.f32 %v1658_v32  ;;  %v1273_v38 = vadd.f32 %v1255_v50, %v1182_v26  ;;  %v1587_v50 = vadd.f32 %v8129_v35, %v1586_v46  ;;  %v8276_v32 = vpop.eup %5855 }
 0x2fa   :  { %5861 = vpow2.f32 %v1654_v12  ;;  %v8298_v12 = vpop.eup %5857 }
 0x2fb   :  { %5863 = vpow2.f32 %v1646_v8  ;;  %v8273_v30 = vadd.f32 %v7952_v16, %v1273_v38  ;;  %v1698_v8 = vadd.f32 1.0, %v8266_v55  ;;  %v1591_v26 = vsel %vm8302_vm10, %v8129_v35, %v1587_v50 }
 0x2fc   :  { %5865 = vpow2.f32 %v1652_v60  ;;  %v1707_v60 = vadd.f32 1.0, %v8270_v62  ;;  %v8327_v38 = vsel %vm8248_vm4, %v8148_v25, %v1576_v34  ;;  %v1716_v35 = vadd.f32 1.0, %v8276_v32 }
 0x2fd   :  { %5867 = vpow2.f32 %v1644_v48  ;;  %v1629_v33 = vmin.f32 %v8273_v30, 20.0  ;;  %v1779_v20 = vadd.f32 1.0, %v8298_v12  ;;  %v1701_v50 = vmul.f32 -0.5, %v8266_v55 }
 0x2fe   :  { %5869 = vpow2.f32 %v1650_v1  ;;  %v8340_v31 = vsel %vm8279_vm13, %v1595_v5, %v1591_v26  ;;  %v8348_v34 = vadd.f32 1.0, %v1683_v40  ;;  %v1719_v5 = vmul.f32 -0.5, %v8276_v32 }
 0x2ff   :  { %v8311_v42 = vpop.eup %5859  ;;  %5871 = vpow2.f32 %v1648_v11  ;;  %v1660_v47 = vmul.f32 1.442695, %v1629_v33  ;;  %v1710_v11 = vmul.f32 -0.5, %v8270_v62  ;;  %v8343_v33 = vadd.f32 1.0, %v1665_v57 }
 0x300   :  { %v8317_v45 = vpop.eup %5861  ;;  %v1788_v59 = vadd.f32 1.0, %v8311_v42  ;;  %5873 = vlog2.f32 %v1689_v39  ;;  %12312 = vst [vmem:[#allocation89_spill] sm:$0xff] %v8348_v34  ;;  %v8356_v26 = vadd.f32 1.0, %v1692_v27  ;;  %v8363_v40 = vadd.f32 1.0, %v1701_v50 }
 0x301   :  { %v8322_v48 = vpop.eup %5863  ;;  %5875 = vpow2.f32 %v1660_v47  ;;  %v1770_v25 = vadd.f32 1.0, %v8317_v45  ;;  %12311 = vst [vmem:[#allocation88_spill] sm:$0xff] %v8343_v33  ;;  %v1791_v49 = vmul.f32 -0.5, %v8311_v42  ;;  %v1782_v54 = vmul.f32 -0.5, %v8298_v12 }
 0x302   :  { %v8331_v1 = vpop.eup %5865  ;;  %5877 = vlog2.f32 %v1698_v8  ;;  %v1734_v46 = vadd.f32 1.0, %v8322_v48  ;;  %v8350_v8 = vadd.f32 1.0, %v1674_v19  ;;  %12314 = vst [vmem:[#allocation91_spill] sm:$0xff] %v8356_v26  ;;  %v1773_v36 = vmul.f32 -0.5, %v8317_v45 }
 0x303   :  { %v8336_v39 = vpop.eup %5867  ;;  %5879 = vlog2.f32 %v1707_v60  ;;  %v1761_v61 = vadd.f32 1.0, %v8331_v1  ;;  %12316 = vst [vmem:[#allocation93_spill] sm:$0xff] %v8363_v40  ;;  %v1792_v34 = vadd.f32 1.0, %v1791_v49  ;;  %v1783_v0 = vadd.f32 1.0, %v1782_v54 }
 0x304   :  { %v8345_v16 = vpop.eup %5869  ;;  %5881 = vlog2.f32 %v1788_v59  ;;  %12313 = vst [vmem:[#allocation90_spill] sm:$0xff] %v8350_v8  ;;  %v1728_v60 = vmul.f32 -0.5, %v8336_v39  ;;  %v8361_v59 = vadd.f32 1.0, %v1710_v11  ;;  %v8375_v8 = vadd.f32 1.0, %v1719_v5 }
 0x305   :  { %v8352_v47 = vpop.eup %5871  ;;  %5883 = vlog2.f32 %v1716_v35  ;;  %v1752_v10 = vadd.f32 1.0, %v8345_v16  ;;  %v1737_v35 = vmul.f32 -0.5, %v8322_v48  ;;  %v1755_v15 = vmul.f32 -0.5, %v8345_v16 }
 0x306   :  { %v8358_v57 = vpop.eup %5873  ;;  %5885 = vlog2.f32 %v1779_v20  ;;  %v1743_v56 = vadd.f32 1.0, %v8352_v47  ;;  %v1746_v20 = vmul.f32 -0.5, %v8352_v47  ;;  %v1725_v6 = vadd.f32 1.0, %v8336_v39 }
 0x307   :  { %12315 = vst [vmem:[#allocation92_spill] sm:$0xff] %v8358_v57  ;;  %v5876_v19 = vpop.eup %5875  ;;  %5887 = vlog2.f32 %v1770_v25  ;;  %v8383_v51 = vadd.f32 1.0, %v1728_v60  ;;  %v1758_v2 = vand.u32 2147483647, %v8345_v16  ;;  %v1774_v60 = vadd.f32 1.0, %v1773_v36 }
 0x308   :  { %v8368_v33 = vpop.eup %5877  ;;  %v1797_v27 = vadd.f32 1.0, %v5876_v19  ;;  %5889 = vlog2.f32 %v1734_v46  ;;  %v1800_v50 = vmul.f32 -0.5, %v5876_v19  ;;  %v1764_v46 = vmul.f32 -0.5, %v8331_v1 }
 0x309   :  { %v8372_v11 = vpop.eup %5879  ;;  %5891 = vlog2.f32 %v1761_v61  ;;  %v1794_v61 = vand.u32 2147483647, %v8311_v42  ;;  %v8386_v5 = vadd.f32 1.0, %v1746_v20  ;;  %v1803_v4 = vand.u32 2147483647, %v5876_v19 }
 0x30a   :  { %v5882_v25 = vpop.eup %5881  ;;  %5893 = vlog2.f32 %v1797_v27  ;;  %v8388_v27 = vadd.f32 1.0, %v1737_v35  ;;  %v1801_v29 = vadd.f32 1.0, %v1800_v50  ;;  %v1756_v52 = vadd.f32 1.0, %v1755_v15 }
 0x30b   :  { %v8380_v7 = vpop.eup %5883  ;;  %5895 = vlog2.f32 %v1752_v10  ;;  %v1790_v26 = vmul.f32 0.6931472, %v5882_v25  ;;  %v1785_v10 = vand.u32 2147483647, %v8298_v12  ;;  %v1793_v44 = vmul.f32 %v8311_v42, %v1792_v34 }
 0x30c   :  { %v5886_v24 = vpop.eup %5885  ;;  %5897 = vlog2.f32 %v1743_v56  ;;  %v1765_v20 = vadd.f32 1.0, %v1764_v46  ;;  %v1767_v35 = vand.u32 2147483647, %v8331_v1  ;;  %vm8394_vm6 = vcmp.lt.f32.partialorder %v1794_v61, 0.0004427343 }
 0x30d   :  { %v5888_v22 = vpop.eup %5887  ;;  %v1781_v56 = vmul.f32 0.6931472, %v5886_v24  ;;  %v1776_v25 = vand.u32 2147483647, %v8317_v45  ;;  %5899 = vlog2.f32 %v1725_v6  ;;  %v1802_v36 = vmul.f32 %v5876_v19, %v1801_v29 }
 0x30e   :  { %v5890_v49 = vpop.eup %5889  ;;  %v1772_v54 = vmul.f32 0.6931472, %v5888_v22  ;;  %v1796_v15 = vsel %vm8394_vm6, %v1793_v44, %v1790_v26  ;;  %v1784_v24 = vmul.f32 %v8298_v12, %v1783_v0  ;;  %vm1804_vm5 = vcmp.lt.f32.partialorder %v1803_v4, 0.0004427343  ;;  %v12347_v4 = vld [vmem:[#allocation87_spill] sm:$0xff] }
 0x30f   :  { %v5892_v40 = vpop.eup %5891  ;;  %vm8402_vm7 = vcmp.lt.f32.partialorder %v1785_v10, 0.0004427343  ;;  %v1775_v46 = vmul.f32 %v8317_v45, %v1774_v60  ;;  %vm1613_vm3 = vcmp.gt.f32.partialorder %v8273_v30, 20.0  ;;  %vm1612_vm4 = vcmp.gt.f32.partialorder %v8221_v37, 20.0 }
 0x310   :  { %v5894_v3 = vpop.eup %5893  ;;  %v1763_v22 = vmul.f32 0.6931472, %v5892_v40  ;;  %v1820_v0 = vsel %vm1612_vm4, %v8221_v37, %v1796_v15  ;;  %vm8413_vm0 = vcmp.lt.f32.partialorder %v1776_v25, 0.0004427343  ;;  %v1766_v26 = vmul.f32 %v8331_v1, %v1765_v20  ;;  %v12378_v15 = vld [vmem:[#allocation83_spill] sm:$0xff] }
 0x311   :  { %v5896_v53 = vpop.eup %5895  ;;  %v1799_v57 = vmul.f32 0.6931472, %v5894_v3  ;;  %v1787_v3 = vsel %vm8402_vm7, %v1784_v24, %v1781_v56  ;;  %v1778_v45 = vsel %vm8413_vm0, %v1775_v46, %v1772_v54  ;;  %vm8423_vm14 = vcmp.lt.f32.partialorder %v1767_v35, 0.0004427343  ;;  %v12391_v46 = vld [vmem:[#allocation88_spill] sm:$0xff] }
 0x312   :  { %v5898_v42 = vpop.eup %5897  ;;  %v1754_v29 = vmul.f32 0.6931472, %v5896_v53  ;;  %v1819_v40 = vsel %vm1611_vm12, %v8186_v23, %v1787_v3  ;;  %v1749_v19 = vand.u32 2147483647, %v8352_v47  ;;  %v1836_v53 = vmul.f32 %v1820_v0, %v8327_v38 }
 0x313   :  { %v1805_v6 = vsel %vm1804_vm5, %v1802_v36, %v1799_v57  ;;  %v5900_v57 = vpop.eup %5899  ;;  %v1745_v37 = vmul.f32 0.6931472, %v5898_v42  ;;  %vm1610_vm13 = vcmp.gt.f32.partialorder %v8197_v13, 20.0  ;;  %v1757_v1 = vmul.f32 %v8345_v16, %v1756_v52  ;;  %v12333_v36 = vld [vmem:[#allocation58_spill] sm:$0xff]  ;;  %v12336_v42 = vld [vmem:[#allocation53_spill] sm:$0xff] }
 0x314   :  { %v1821_v44 = vsel %vm1613_vm3, %v8273_v30, %v1805_v6  ;;  %v1818_v61 = vsel %vm1610_vm13, %v8197_v13, %v1778_v45  ;;  %vm8434_vm11 = vcmp.lt.f32.partialorder %v1758_v2, 0.0004427343  ;;  %v1736_v10 = vmul.f32 0.6931472, %v5890_v49  ;;  %v12344_v6 = vld [vmem:[#allocation92_spill] sm:$0xff]  ;;  %v12354_v30 = vld [vmem:[#allocation55_spill] sm:$0xff] }
 0x315   :  { %v1837_v12 = vmul.f32 %v1821_v44, %v8340_v31  ;;  %v1769_v31 = vsel %vm8423_vm14, %v1766_v26, %v1763_v22  ;;  %v1740_v60 = vand.u32 2147483647, %v8322_v48  ;;  %v1835_v56 = vmul.f32 %v1819_v40, %v8296_v58  ;;  %v12345_v44 = vld [vmem:[#allocation74_spill] sm:$0xff]  ;;  %v12353_v40 = vld [vmem:[#allocation52_spill] sm:$0xff]  ;;  %v12365_v2 = vld [vmem:[#allocation51_spill] sm:$0xff] }
 0x316   :  { %vm1609_vm10 = vcmp.gt.f32.partialorder %v8206_v28, 20.0  ;;  %v1760_v38 = vsel %vm8434_vm11, %v1757_v1, %v1754_v29  ;;  %v1748_v52 = vmul.f32 %v8352_v47, %v8386_v5  ;;  %vm8446_vm6 = vcmp.lt.f32.partialorder %v1749_v19, 0.0004427343  ;;  %v12358_v1 = vld [vmem:[#allocation63_spill] sm:$0xff]  ;;  %v12370_v5 = vld [vmem:[#allocation77_spill] sm:$0xff] }
 0x317   :  { %1870 = vmatpush.msra.mxu1 %v1837_v12  ;;  %v1817_v13 = vsel %vm1609_vm10, %v8206_v28, %v1769_v31  ;;  %v1727_v16 = vmul.f32 0.6931472, %v5900_v57  ;;  %v1731_v49 = vand.u32 2147483647, %v8336_v39  ;;  %v1834_v58 = vmul.f32 %v1818_v61, %v8152_v63  ;;  %v12348_v12 = vld [vmem:[#allocation93_spill] sm:$0xff]  ;;  %v12359_v61 = vld [vmem:[#allocation79_spill] sm:$0xff] }
 0x318   :  { %vm1608_vm5 = vcmp.gt.f32.partialorder %v8213_v43, 20.0  ;;  %v1751_v20 = vsel %vm8446_vm6, %v1748_v52, %v1745_v37  ;;  %v1739_v47 = vmul.f32 %v8322_v48, %v8388_v27  ;;  %vm8458_vm7 = vcmp.lt.f32.partialorder %v1740_v60, 0.0004427343 }
 0x319   :  { %1871 = vmatpush.msra.mxu1 %v1836_v53  ;;  %v1816_v28 = vsel %vm1608_vm5, %v8213_v43, %v1760_v38  ;;  %v1718_v35 = vmul.f32 0.6931472, %v8380_v7  ;;  %v1722_v50 = vand.u32 2147483647, %v8276_v32  ;;  %v1833_v63 = vmul.f32 %v1817_v13, %v8127_v41  ;;  %v12357_v53 = vld [vmem:[#allocation69_spill] sm:$0xff]  ;;  %v12407_v13 = vld [vmem:[#allocation78_spill] sm:$0xff] }
 0x31a   :  { %vm1607_vm3 = vcmp.gt.f32.partialorder %v8218_v9, 20.0  ;;  %v1742_v54 = vsel %vm8458_vm7, %v1739_v47, %v1736_v10  ;;  %v1730_v48 = vmul.f32 %v8336_v39, %v8383_v51  ;;  %vm8471_vm4 = vcmp.lt.f32.partialorder %v1731_v49, 0.0004427343  ;;  %v12360_v10 = vld [vmem:[#allocation86_spill] sm:$0xff] }
 0x31b   :  { %1872 = vmatpush.msra.mxu1 %v1835_v56  ;;  %v1815_v43 = vsel %vm1607_vm3, %v8218_v9, %v1751_v20  ;;  %v1709_v7 = vmul.f32 0.6931472, %v8372_v11  ;;  %v1713_v25 = vand.u32 2147483647, %v8270_v62  ;;  %vm1394_vm0 = vweird.f32 %v12333_v36  ;;  %v12361_v56 = vld [vmem:[#allocation91_spill] sm:$0xff]  ;;  %v12369_v47 = vld [vmem:[#allocation62_spill] sm:$0xff] }
 0x31c   :  { %v1832_v41 = vmul.f32 %v1816_v28, %v8104_v18  ;;  %vm1606_vm12 = vcmp.gt.f32.partialorder %v8200_v14, 20.0  ;;  %v1733_v51 = vsel %vm8471_vm4, %v1730_v48, %v1727_v16  ;;  %v1721_v9 = vmul.f32 %v8276_v32, %v8375_v8  ;;  %v12337_v8 = vld [vmem:[#allocation56_spill] sm:$0xff] }
 0x31d   :  { %1873 = vmatpush.msra.mxu1 %v1834_v58  ;;  %v1814_v39 = vsel %vm1606_vm12, %v8200_v14, %v1742_v54  ;;  %vm8485_vm14 = vcmp.lt.f32.partialorder %v1722_v50, 0.0004427343  ;;  %v1700_v11 = vmul.f32 0.6931472, %v8368_v33  ;;  %v1704_v24 = vand.u32 2147483647, %v8266_v55 }
 0x31e   :  { %vm1393_vm13 = vweird.f32 %v12336_v42  ;;  %v1831_v18 = vmul.f32 %v1815_v43, %v8051_v21  ;;  %vm1605_vm11 = vcmp.gt.f32.partialorder %v8210_v17, 20.0  ;;  %v1724_v32 = vsel %vm8485_vm14, %v1721_v9, %v1718_v35  ;;  %v12341_v33 = vld [vmem:[#allocation57_spill] sm:$0xff]  ;;  %v12368_v58 = vld [vmem:[#allocation60_spill] sm:$0xff]  ;;  %v12386_v21 = vld [vmem:[#allocation70_spill] sm:$0xff] }
 0x31f   :  { %1874 = vmatpush.msra.mxu1 %v1833_v63  ;;  %v1712_v14 = vmul.f32 %v8270_v62, %v8361_v59  ;;  %v12338_v34 = vand.u32 2147483647, %v12337_v8  ;;  %vm1379_vm6 = vweird.f32 %v12341_v33  ;;  %v1813_v22 = vsel %vm1605_vm11, %v8210_v17, %v1733_v51  ;;  %v12346_v62 = vld [vmem:[#allocation81_spill] sm:$0xff]  ;;  %v12349_v17 = vld [vmem:[#allocation54_spill] sm:$0xff]  ;;  %v12371_v50 = vld [vmem:[#allocation84_spill] sm:$0xff] }
 0x320   :  { %vm8506_vm5 = vcmp.lt.f32.partialorder %v1713_v25, 0.0004427343  ;;  %v1691_v3 = vmul.f32 0.6931472, %v12344_v6  ;;  %v1695_v0 = vand.u32 2147483647, %v12345_v44  ;;  %v1830_v59 = vmul.f32 %v1814_v39, %v12346_v62 }
 0x321   :  { %1875 = vmatpush.msra.mxu1 %v1832_v41  ;;  %vm8500_vm10 = vcmp.eq.f32.partialorder %v12338_v34, 8.507059e+37  ;;  %vm1604_vm7 = vcmp.gt.f32.partialorder %v12347_v4, 20.0  ;;  %v1715_v29 = vsel %vm8506_vm5, %v1712_v14, %v1709_v7  ;;  %v1703_v45 = vmul.f32 %v8266_v55, %v12348_v12  ;;  %v12372_v54 = vld [vmem:[#allocation89_spill] sm:$0xff]  ;;  %v12377_v9 = vld [vmem:[#allocation76_spill] sm:$0xff]  ;;  %v12418_v14 = vld [vmem:[#allocation10_spill] sm:$0xff] }
 0x322   :  { %v12350_v26 = vand.u32 2147483647, %v12349_v17  ;;  %vm1378_vm4 = vweird.f32 %v12353_v40  ;;  %vm1364_vm12 = vweird.f32 %v12354_v30  ;;  %v1812_v37 = vsel %vm1604_vm7, %v12347_v4, %v1724_v32  ;;  %v12375_v7 = vld [vmem:[#allocation73_spill] sm:$0xff]  ;;  %v12384_v34 = vld [vmem:[#allocation72_spill] sm:$0xff]  ;;  %v12390_v4 = vld [vmem:[#allocation82_spill] sm:$0xff] }
 0x323   :  { %1876 = vmatpush.msra.mxu1 %v1831_v18  ;;  %vm8527_vm14 = vcmp.lt.f32.partialorder %v1704_v24, 0.0004427343  ;;  %v1682_v31 = vmul.f32 0.6931472, %v12357_v53  ;;  %v1686_v55 = vand.u32 2147483647, %v12358_v1  ;;  %v1829_v23 = vmul.f32 %v1813_v22, %v12359_v61 }
 0x324   :  { %vm8520_vm3 = vcmp.eq.f32.partialorder %v12350_v26, 8.507059e+37  ;;  %vm1603_vm11 = vcmp.gt.f32.partialorder %v12360_v10, 20.0  ;;  %v1706_v60 = vsel %vm8527_vm14, %v1703_v45, %v1700_v11  ;;  %v1694_v38 = vmul.f32 %v12345_v44, %v12361_v56  ;;  %v12376_v41 = vld [vmem:[#allocation85_spill] sm:$0xff]  ;;  %v12381_v18 = vld [vmem:[#allocation90_spill] sm:$0xff]  ;;  %v12387_v44 = vld [vmem:[#allocation67_spill] sm:$0xff] }
 0x325   :  { %1877 = vmatpush.msra.mxu1 %v1830_v59  ;;  %v12362_v52 = vand.u32 2147483647, %v12336_v42  ;;  %vm1363_vm7 = vweird.f32 %v12365_v2  ;;  %v1811_v16 = vsel %vm1603_vm11, %v12360_v10, %v1715_v29  ;;  %vm8547_vm2 = vcmp.lt.f32.partialorder %v1695_v0, 0.0004427343  ;;  %v12383_v8 = vld [vmem:[#allocation61_spill] sm:$0xff]  ;;  %v12393_v17 = vld [vmem:[#allocation59_spill] sm:$0xff] }
 0x326   :  { %v1673_v20 = vmul.f32 0.6931472, %v12368_v58  ;;  %v1677_v28 = vand.u32 2147483647, %v12369_v47  ;;  %v1828_v35 = vmul.f32 %v1812_v37, %v12370_v5  ;;  %vm1602_vm14 = vcmp.gt.f32.partialorder %v12371_v50, 20.0  ;;  %v12394_v26 = vld [vmem:[#allocation68_spill] sm:$0xff] }
 0x327   :  { %vm8541_vm5 = vcmp.eq.f32.partialorder %v12362_v52, 8.507059e+37  ;;  %1878 = vmatpush.msra.mxu1 %v1829_v23  ;;  %v1697_v63 = vsel %vm8547_vm2, %v1694_v38, %v1691_v3  ;;  %v1685_v48 = vmul.f32 %v12358_v1, %v12372_v54  ;;  %v1810_v43 = vsel %vm1602_vm14, %v12371_v50, %v1706_v60  ;;  %vm8572_vm2 = vmor %vm1393_vm13, %vm1394_vm0  ;;  %v12402_v23 = vld [vmem:[#allocation65_spill] sm:$0xff]  ;;  %v12403_v10 = vld [vmem:[#allocation80_spill] sm:$0xff] }
 0x328   :  { %vm8560_vm11 = vcmp.lt.f32.partialorder %v1686_v55, 0.0004427343  ;;  %v1664_v25 = vmul.f32 0.6931472, %v12375_v7  ;;  %v1668_v51 = vand.u32 2147483647, %v12376_v41  ;;  %v1827_v39 = vmul.f32 %v1811_v16, %v12377_v9 }
 0x329   :  { %1879 = vmatpush.msra.mxu1 %v1828_v35  ;;  %vm1601_vm9 = vcmp.gt.f32.partialorder %v12378_v15, 20.0  ;;  %v1688_v24 = vsel %vm8560_vm11, %v1685_v48, %v1682_v31  ;;  %v1676_v32 = vmul.f32 %v12369_v47, %v12381_v18  ;;  %v12385_v22 = vsel %vm7858_vm15, %v12383_v8, %v12384_v34  ;;  %v12406_v58 = vld [vmem:[#allocation64_spill] sm:$0xff]  ;;  %v12414_v11 = vld [vmem:[#allocation7_spill] sm:$0xff]  ;;  %v12416_v18 = vld [vmem:[#allocation9_spill] sm:$0xff] }
 0x32a   :  { %v1431_v6 = vsel %vm8500_vm10, %v12386_v21, %v12385_v22  ;;  %v1809_v3 = vsel %vm1601_vm9, %v12378_v15, %v1697_v63  ;;  %v1396_v0 = vsel %vm8572_vm2, %v12333_v36, %v12387_v44  ;;  %vm8593_vm0 = vcmp.lt.f32.partialorder %v1677_v28, 0.0004427343  ;;  %v12396_v36 = vld [vmem:[#allocation66_spill] sm:$0xff]  ;;  %vm8617_vm9 = vmor %vm1378_vm4, %vm1379_vm6  ;;  %v12420_v34 = vld [vmem:[#allocation11_spill] sm:$0xff] }
 0x32b   :  { %1880 = vmatpush.msra.mxu1 %v1827_v39  ;;  %v1826_v59 = vmul.f32 %v1810_v43, %v1431_v6  ;;  %vm1600_vm13 = vcmp.gt.f32.partialorder %v12390_v4, 20.0  ;;  %v1679_v29 = vsel %vm8593_vm0, %v1676_v32, %v1673_v20  ;;  %v1667_v12 = vmul.f32 %v12376_v41, %v12391_v46  ;;  %vm1365_vm10 = vmor %vm1363_vm7, %vm1364_vm12  ;;  %v12412_v39 = vld [vmem:[#allocation6_spill] sm:$0xff]  ;;  %v12422_v21 = vld [vmem:[#allocation12_spill] sm:$0xff] }
 0x32c   :  { %v12395_v37 = vsel %vm7803_vm8, %v12393_v17, %v12394_v26  ;;  %v12397_v53 = vand.u32 2147483648, %v12336_v42  ;;  %v1808_v1 = vsel %vm1600_vm13, %v12390_v4, %v1688_v24  ;;  %vm8621_vm15 = vcmp.lt.f32.partialorder %v1668_v51, 0.0004427343  ;;  %v12410_v51 = vld [vmem:[#allocation5_spill] sm:$0xff]  ;;  %v12427_v62 = vld [vmem:[#allocation16_spill] sm:$0xff]  ;;  %v12429_v4 = vld [vmem:[#allocation19_spill] sm:$0xff] }
 0x32d   :  { %v1416_v19 = vsel %vm8520_vm3, %v12396_v36, %v12395_v37  ;;  %1881 = vmatpush.msra.mxu1 %v1826_v59  ;;  %v1381_v42 = vsel %vm8617_vm9, %v12341_v33, %v12402_v23  ;;  %vm1599_vm8 = vcmp.gt.f32.partialorder %v12403_v10, 20.0  ;;  %v1670_v60 = vsel %vm8621_vm15, %v1667_v12, %v1664_v25  ;;  %v12428_v59 = vld [vmem:[#allocation20_spill] sm:$0xff]  ;;  %v12431_v46 = vld [vmem:[#allocation25_spill] sm:$0xff]  ;;  %v12432_v12 = vld [vmem:[#allocation27_spill] sm:$0xff] }
 0x32e   :  { %v1400_v31 = vor.u32 1.1754944e-38, %v12397_v53  ;;  %v1825_v57 = vmul.f32 %v1809_v3, %v1416_v19  ;;  %v12404_v38 = vand.u32 2147483648, %v12353_v40  ;;  %v1807_v16 = vsel %vm1599_vm8, %v12403_v10, %v1679_v29  ;;  %v12424_v3 = vld [vmem:[#allocation15_spill] sm:$0xff]  ;;  %v12430_v29 = vld [vmem:[#allocation24_spill] sm:$0xff]  ;;  %v12433_v45 = vld [vmem:[#allocation17_spill] sm:$0xff] }
 0x32f   :  { %v12405_v49 = vand.u32 2147483647, %v12353_v40  ;;  %v1366_v20 = vsel %vm1365_vm10, %v12354_v30, %v12406_v58  ;;  %vm1598_vm3 = vcmp.gt.f32.partialorder %v12407_v13, 20.0  ;;  %v12408_v28 = vand.u32 2147483648, %v12365_v2  ;;  %v12434_v17 = vld [vmem:[#allocation30_spill] sm:$0xff]  ;;  %v12435_v26 = vld [vmem:[#allocation21_spill] sm:$0xff] }
 0x330   :  { %v1401_v56 = vsel %vm8541_vm5, %v1400_v31, %v1396_v0  ;;  %v1385_v52 = vor.u32 1.1754944e-38, %v12404_v38  ;;  %1882 = vmatpush.msra.mxu1 %v1825_v57  ;;  %v1806_v35 = vsel %vm1598_vm3, %v12407_v13, %v1670_v60  ;;  %v12409_v63 = vand.u32 2147483647, %v12365_v2  ;;  %v12426_v0 = vld [vmem:[#allocation14_spill] sm:$0xff]  ;;  %v12436_v37 = vld [vmem:[#allocation32_spill] sm:$0xff]  ;;  %v12437_v36 = vld [vmem:[#allocation23_spill] sm:$0xff] }
 0x331   :  { %v1824_v33 = vmul.f32 %v1808_v1, %v1401_v56  ;;  %vm1383_vm6 = vcmp.eq.f32.partialorder %v12405_v49, 8.507059e+37  ;;  %v1370_v5 = vor.u32 1.1754944e-38, %v12408_v28  ;;  %v12438_v19 = vld [vmem:[#allocation34_spill] sm:$0xff]  ;;  %v12439_v53 = vld [vmem:[#allocation28_spill] sm:$0xff]  ;;  %v12441_v1 = vld [vmem:[#allocation31_spill] sm:$0xff]  ;;  %vm12448_vm12 = vcmask 1040384  }
 0x332   :  { %v1386_v47 = vsel %vm1383_vm6, %v1385_v52, %v1381_v42  ;;  %vm1368_vm4 = vcmp.eq.f32.partialorder %v12409_v63, 8.507059e+37  ;;  %v12440_v31 = vld [vmem:[#allocation36_spill] sm:$0xff]  ;;  %v12442_v55 = vld [vmem:[#allocation38_spill] sm:$0xff]  ;;  %v12443_v61 = vld [vmem:[#allocation33_spill] sm:$0xff]  ;;  %vm12459_vm5 = vcmask 334848  }
 0x333   :  { %1883 = vmatpush.msra.mxu1 %v1824_v33  ;;  %v1823_v50 = vmul.f32 %v1807_v16, %v1386_v47  ;;  %v1371_v54 = vsel %vm1368_vm4, %v1370_v5, %v1366_v20  ;;  %v12444_v57 = vld [vmem:[#allocation40_spill] sm:$0xff]  ;;  %v12445_v23 = vld [vmem:[#allocation35_spill] sm:$0xff]  ;;  %v12446_v42 = vld [vmem:[#allocation42_spill] sm:$0xff] }
 0x334   :  { %v1822_v40 = vmul.f32 %v1806_v35, %v1371_v54  ;;  %v12447_v10 = vld [vmem:[#allocation37_spill] sm:$0xff]  ;;  %v12449_v20 = vld [vmem:[#allocation44_spill] sm:$0xff]  ;;  %v12450_v13 = vld [vmem:[#allocation39_spill] sm:$0xff] }
 0x335   :  { %1884 = vmatpush.msra.mxu1 %v1823_v50  ;;  %v5260_v60 = vld [vmem:[%s12202_s6 + $0x78] sm:$0xff]  ;;  %v5259_v16 = vld [vmem:[%s12202_s6 + $0x70] sm:$0xff]  ;;  %v5258_v47 = vld [vmem:[%s12202_s6 + $0x68] sm:$0xff] }
 0x336   :  { %v5252_v56 = vld [vmem:[%s11942_s8 + $0x78] sm:$0xff]  ;;  %v5251_v33 = vld [vmem:[%s11942_s8 + $0x70] sm:$0xff]  ;;  %v5250_v28 = vld [vmem:[%s11942_s8 + $0x68] sm:$0xff] }
 0x337   :  { %1885 = vmatpush.msra.mxu1 %v1822_v40  ;;  %v5298_v38 = vld [vmem:[%s11944_s10 + $0x58] sm:$0x1]  ;;  %2236 = vmatpush.msra.mxu0 %v5252_v56  ;;  %v5297_v49 = vld [vmem:[%s11944_s10 + $0x50] sm:$0xff]  ;;  %v5296_v5 = vld [vmem:[%s11944_s10 + $0x48] sm:$0xff] }
 0x338   :  { %5645 = vmatmul.lmr.bf16.vlgmr.msra.gmra.8.mxu1  ;;  %v5332_v52 = vld [vmem:[%s11943_s13 + $0x78] sm:$0xff]  ;;  %v5331_v58 = vld [vmem:[%s11943_s13 + $0x70] sm:$0xff]  ;;  %v5330_v35 = vld [vmem:[%s11943_s13 + $0x68] sm:$0xff] }
 0x339   :  { %2123 = vmatpush.msra.mxu1 %v5260_v60  ;;  %2237 = vmatpush.msra.mxu0 %v5251_v33  ;;  %v5257_v50 = vld [vmem:[%s12202_s6 + $0x60] sm:$0xff]  ;;  %v12453_v60 = vld [vmem:[#allocation48_spill] sm:$0xff]  ;;  %vm12460_vm7 = vmmov %vm12459_vm5 }
 0x33a   :  { %v5249_v63 = vld [vmem:[%s11942_s8 + $0x60] sm:$0xff]  ;;  %vm12461_vm14 = vmmov %vm12459_vm5 }
 0x33b   :  { %2124 = vmatpush.msra.mxu1 %v5259_v16  ;;  %2238 = vmatpush.msra.mxu0 %v5250_v28  ;;  %v5295_v54 = vld [vmem:[%s11944_s10 + $0x40] sm:$0xff]  ;;  %v8862_v28 = vld [vmem:[%s11945_s3 + $0x8] sm:$0xff]  ;;  %vm12462_vm11 = vmmov %vm12459_vm5 }
 0x33c   :  { %v5329_v40 = vld [vmem:[%s11943_s13 + $0x60] sm:$0xff]  ;;  %vm12463_vm2 = vmmov %vm12459_vm5 }
 0x33d   :  { %2125 = vmatpush.msra.mxu1 %v5258_v47  ;;  %2239 = vmatpush.msra.mxu0 %v5249_v63  ;;  %v12454_v56 = vld [vmem:[#allocation43_spill] sm:$0xff]  ;;  %v12457_v16 = vld [vmem:[#allocation50_spill] sm:$0xff]  ;;  %vm12464_vm0 = vmmov %vm12463_vm2 }
 0x33e   :  { %v12458_v33 = vld [vmem:[#allocation47_spill] sm:$0xff]  ;;  %vm12465_vm13 = vmmov %vm12464_vm0 }
 0x33f   :  { %2126 = vmatpush.msra.mxu1 %v5257_v50  ;;  %v8875_v50 = vld [vmem:[%s11945_s3 + $0x10] sm:$0xff]  ;;  %vm12466_vm9 = vmmov %vm12464_vm0 }
 0x340   :  { %5646 = vmatmul.lmr.bf16.gmra.8.mxu1  ;;  %vm12467_vm15 = vmmov %vm12464_vm0 }
 0x341   :  { %vm12468_vm8 = vmmov %vm12464_vm0 }
 0x342   :  { %vm12469_vm10 = vmmov %vm12464_vm0 }
 0x343   :  { %vm12470_vm6 = vmmov %vm12448_vm12 }
 0x344   :  { %vm12471_vm3 = vmmov %vm12464_vm0 }
 0x345   :  { %vm12472_vm4 = vmmov %vm12464_vm0 }
 0x348   :  { %5647 = vmatmul.lmr.bf16.gmra.8.mxu1 }
 0x350   :  { %5648 = vmatmul.lmr.bf16.gmra.8.mxu1 }
 0x358   :  { %5649 = vmatmul.lmr.bf16.gmra.8.mxu1 }
 0x360   :  { %5650 = vmatmul.lmr.bf16.gmra.8.mxu1 }
 0x368   :  { %5651 = vmatmul.lmr.bf16.gmra.8.mxu1 }
 0x370   :  { %5652 = vmatmul.lmr.bf16.gmra.8.mxu1 }
 0x3b5   :  { %v1887_v30 = vpop.f32.mrf.mxu1 }
 0x3b6   :  { %v8685_v44 = vadd.f32 %v1887_v30, %v12424_v3  ;;  %v5256_v30 = vld [vmem:[%s12202_s6 + $0x58] sm:$0xff]  ;;  %v5325_v3 = vld [vmem:[%s11943_s13 + $0x40] sm:$0xff] }
 0x3b7   :  { %2127 = vmatpush.msra.mxu1 %v5256_v30 }
 0x3b8   :  { %12425 = vst [vmem:[#allocation87_spill] sm:$0xff] %v8685_v44 }
 0x3bd   :  { %v1890_v48 = vpop.f32.mrf.mxu1 }
 0x3be   :  { %v8680_v6 = vadd.f32 %v1890_v48, %v12422_v21  ;;  %v5248_v48 = vld [vmem:[%s11942_s8 + $0x58] sm:$0xff]  ;;  %v5245_v21 = vld [vmem:[%s11942_s8 + $0x40] sm:$0xff] }
 0x3bf   :  { %2240 = vmatpush.msra.mxu0 %v5248_v48 }
 0x3c0   :  { %12423 = vst [vmem:[#allocation81_spill] sm:$0xff] %v8680_v6 }
 0x3c5   :  { %v1893_v43 = vpop.f32.mrf.mxu1 }
 0x3c6   :  { %v8675_v22 = vadd.f32 %v1893_v43, %v12420_v34  ;;  %v5294_v43 = vld [vmem:[%s11944_s10 + $0x38] sm:$0xff]  ;;  %v5253_v34 = vld [vmem:[%s12202_s6 + $0x40] sm:$0xff] }
 0x3c8   :  { %12421 = vst [vmem:[#allocation74_spill] sm:$0xff] %v8675_v22 }
 0x3cd   :  { %v1896_v27 = vpop.f32.mrf.mxu1 }
 0x3ce   :  { %v8670_v8 = vadd.f32 %v1896_v27, %v12418_v14  ;;  %v5328_v27 = vld [vmem:[%s11943_s13 + $0x58] sm:$0xff]  ;;  %v5326_v14 = vld [vmem:[%s11943_s13 + $0x48] sm:$0xff] }
 0x3d0   :  { %12419 = vst [vmem:[#allocation92_spill] sm:$0xff] %v8670_v8 }
 0x3d5   :  { %v1899_v7 = vpop.f32.mrf.mxu1 }
 0x3d6   :  { %v8665_v32 = vadd.f32 %v1899_v7, %v12416_v18  ;;  %v5255_v7 = vld [vmem:[%s12202_s6 + $0x50] sm:$0xff]  ;;  %v5246_v18 = vld [vmem:[%s11942_s8 + $0x48] sm:$0xff] }
 0x3d7   :  { %2128 = vmatpush.msra.mxu1 %v5255_v7 }
 0x3d8   :  { %12417 = vst [vmem:[#allocation57_spill] sm:$0xff] %v8665_v32 }
 0x3dd   :  { %v1902_v25 = vpop.f32.mrf.mxu1 }
 0x3de   :  { %v8660_v24 = vadd.f32 %v1902_v25, %v12414_v11  ;;  %v5247_v25 = vld [vmem:[%s11942_s8 + $0x50] sm:$0xff]  ;;  %v5254_v11 = vld [vmem:[%s12202_s6 + $0x48] sm:$0xff] }
 0x3df   :  { %2241 = vmatpush.msra.mxu0 %v5247_v25  ;;  %2129 = vmatpush.msra.mxu1 %v5254_v11  ;;  %v8914_v25 = vld [vmem:[%s11945_s3 + $0x28] sm:$0xff]  ;;  %v8927_v11 = vld [vmem:[%s11945_s3 + $0x30] sm:$0xff] }
 0x3e0   :  { %12415 = vst [vmem:[#allocation56_spill] sm:$0xff] %v8660_v24 }
 0x3e1   :  { %2242 = vmatpush.msra.mxu0 %v5246_v18  ;;  %2130 = vmatpush.msra.mxu1 %v5253_v34  ;;  %v8940_v34 = vld [vmem:[%s11945_s3 + $0x38] sm:$0xff] }
 0x3e3   :  { %2243 = vmatpush.msra.mxu0 %v5245_v21 }
 0x3e5   :  { %v1905_v2 = vpop.f32.mrf.mxu1 }
 0x3e6   :  { %v8655_v15 = vadd.f32 %v1905_v2, %v12412_v39  ;;  %v5293_v2 = vld [vmem:[%s11944_s10 + $0x30] sm:$0xff] }
 0x3e7   :  { %v12452_v39 = vld [vmem:[#allocation41_spill] sm:$0xff] }
 0x3e8   :  { %12413 = vst [vmem:[#allocation53_spill] sm:$0xff] %v8655_v15 }
 0x3ed   :  { %v1908_v41 = vpop.f32.mrf.mxu1 }
 0x3ee   :  { %v8652_v9 = vadd.f32 %v1908_v41, %v12410_v51  ;;  %v5327_v41 = vld [vmem:[%s11943_s13 + $0x50] sm:$0xff]  ;;  %v12451_v51 = vld [vmem:[#allocation46_spill] sm:$0xff] }
 0x3f0   :  { %12411 = vst [vmem:[#allocation58_spill] sm:$0xff] %v8652_v9  ;;  %1927 = vmatpush.msra.mxu2 %v8652_v9  ;;  %1992 = vmatpush.msra.mxu3 %v8652_v9 }
 0x3f2   :  { %1928 = vmatpush.msra.mxu2 %v8655_v15  ;;  %1993 = vmatpush.msra.mxu3 %v8655_v15 }
 0x3f4   :  { %1929 = vmatpush.msra.mxu2 %v8660_v24  ;;  %1994 = vmatpush.msra.mxu3 %v8660_v24 }
 0x3f6   :  { %1930 = vmatpush.msra.mxu2 %v8665_v32  ;;  %1995 = vmatpush.msra.mxu3 %v8665_v32 }
 0x3f8   :  { %1931 = vmatpush.msra.mxu2 %v8670_v8  ;;  %1996 = vmatpush.msra.mxu3 %v8670_v8 }
 0x3fa   :  { %1932 = vmatpush.msra.mxu2 %v8675_v22  ;;  %1997 = vmatpush.msra.mxu3 %v8675_v22 }
 0x3fc   :  { %1933 = vmatpush.msra.mxu2 %v8680_v6  ;;  %1998 = vmatpush.msra.mxu3 %v8680_v6 }
 0x3fe   :  { %1934 = vmatpush.msra.mxu2 %v8685_v44  ;;  %1999 = vmatpush.msra.mxu3 %v8685_v44 }
 0x3ff   :  { %5213 = vmatmul.msk.f32.vlgmr.msra.gmra.mxu2 %vm12149_vm1, %v12426_v0  ;;  %5229 = vmatmul.msk.f32.vlgmr.msra.gmra.mxu3 %vm12149_vm1, %v12427_v62  ;;  %v9252_v62 = vld [vmem:[%s11946_s11 + $0x1] ss:$0 sm:$0xff] }
 0x400   :  { %5299 = vmatpush.msk.msra.mxu2 %vm12448_vm12, %v5298_v38  ;;  %2431 = vmatpush.msra.mxu3 %v5332_v52  ;;  %v12455_v38 = vld [vmem:[#allocation49_spill] sm:$0xff]  ;;  %vm12473_vm12 = vmmov %vm12464_vm0 }
 0x401   :  { %v12456_v52 = vld [vmem:[#allocation45_spill] sm:$0xff] }
 0x402   :  { %2314 = vmatpush.msra.mxu2 %v5297_v49  ;;  %2432 = vmatpush.msra.mxu3 %v5331_v58  ;;  %v8849_v49 = vld [vmem:[%s11945_s3] sm:$0xff] }
 0x404   :  { %2315 = vmatpush.msra.mxu2 %v5296_v5  ;;  %2433 = vmatpush.msra.mxu3 %v5330_v35 }
 0x406   :  { %2316 = vmatpush.msra.mxu2 %v5295_v54  ;;  %2434 = vmatpush.msra.mxu3 %v5329_v40  ;;  %v8888_v40 = vld [vmem:[%s11945_s3 + $0x18] sm:$0xff] }
 0x407   :  { %5214 = vmatmul.msk.f32.gmra.mxu2 %vm12149_vm1, %v12428_v59  ;;  %5230 = vmatmul.msk.f32.gmra.mxu3 %vm12149_vm1, %v12429_v4 }
 0x408   :  { %2317 = vmatpush.msra.mxu2 %v5294_v43  ;;  %2435 = vmatpush.msra.mxu3 %v5328_v27  ;;  %v8901_v43 = vld [vmem:[%s11945_s3 + $0x20] sm:$0xff] }
 0x40a   :  { %2318 = vmatpush.msra.mxu2 %v5293_v2  ;;  %2436 = vmatpush.msra.mxu3 %v5327_v41 }
 0x40c   :  { %2437 = vmatpush.msra.mxu3 %v5326_v14 }
 0x40e   :  { %2438 = vmatpush.msra.mxu3 %v5325_v3 }
 0x40f   :  { %5215 = vmatmul.msk.f32.gmra.mxu2 %vm12149_vm1, %v12430_v29  ;;  %5231 = vmatmul.msk.f32.gmra.mxu3 %vm12149_vm1, %v12431_v46 }
 0x417   :  { %5216 = vmatmul.msk.f32.gmra.mxu2 %vm12149_vm1, %v12432_v12  ;;  %5232 = vmatmul.msk.f32.gmra.mxu3 %vm12149_vm1, %v12433_v45 }
 0x41f   :  { %5217 = vmatmul.msk.f32.gmra.mxu2 %vm12149_vm1, %v12434_v17  ;;  %5233 = vmatmul.msk.f32.gmra.mxu3 %vm12149_vm1, %v12435_v26 }
 0x427   :  { %5218 = vmatmul.msk.f32.gmra.mxu2 %vm12149_vm1, %v12436_v37  ;;  %5234 = vmatmul.msk.f32.gmra.mxu3 %vm12149_vm1, %v12437_v36 }
 0x42f   :  { %5219 = vmatmul.msk.f32.gmra.mxu2 %vm12149_vm1, %v12438_v19  ;;  %5235 = vmatmul.msk.f32.gmra.mxu3 %vm12149_vm1, %v12439_v53 }
 0x437   :  { %5220 = vmatmul.msk.f32.gmra.mxu2 %vm12149_vm1, %v12440_v31  ;;  %5236 = vmatmul.msk.f32.gmra.mxu3 %vm12149_vm1, %v12441_v1 }
 0x43f   :  { %5221 = vmatmul.msk.f32.gmra.mxu2 %vm12149_vm1, %v12442_v55  ;;  %5237 = vmatmul.msk.f32.gmra.mxu3 %vm12149_vm1, %v12443_v61 }
 0x447   :  { %5222 = vmatmul.msk.f32.gmra.mxu2 %vm12149_vm1, %v12444_v57  ;;  %5238 = vmatmul.msk.f32.gmra.mxu3 %vm12149_vm1, %v12445_v23 }
 0x44f   :  { %5223 = vmatmul.msk.f32.gmra.mxu2 %vm12149_vm1, %v12446_v42  ;;  %5239 = vmatmul.msk.f32.gmra.mxu3 %vm12149_vm1, %v12447_v10 }
 0x457   :  { %5224 = vmatmul.msk.f32.gmra.mxu2 %vm12149_vm1, %v12449_v20  ;;  %5240 = vmatmul.msk.f32.gmra.mxu3 %vm12149_vm1, %v12450_v13 }
 0x45f   :  { %5225 = vmatmul.msk.f32.gmra.mxu2 %vm12149_vm1, %v12451_v51  ;;  %5241 = vmatmul.msk.f32.gmra.mxu3 %vm12149_vm1, %v12452_v39 }
 0x467   :  { %5226 = vmatmul.msk.f32.gmra.mxu2 %vm12149_vm1, %v12453_v60  ;;  %5242 = vmatmul.msk.f32.gmra.mxu3 %vm12149_vm1, %v12454_v56  ;;  %v5368_v60 = vld [vmem:[%s11948_s14 + $0x48] sm:$0xff] }
 0x46f   :  { %5227 = vmatmul.msk.f32.gmra.mxu2 %vm12149_vm1, %v12455_v38  ;;  %5243 = vmatmul.msk.f32.gmra.mxu3 %vm12149_vm1, %v12456_v52  ;;  %v9002_v52 = vld [vmem:[%s11945_s3 + $0x58] sm:$0xff] }
 0x477   :  { %5228 = vmatmul.msk.f32.gmra.mxu2 %vm12149_vm1, %v12457_v16  ;;  %5244 = vmatmul.msk.f32.gmra.mxu3 %vm12149_vm1, %v12458_v33  ;;  %v5323_v33 = vld [vmem:[%s11947_s12 + $0x70] sm:$0xff]  ;;  %v5370_v16 = vld [vmem:[%s11948_s14 + $0x58] sm:$0x1] }
 0x478   :  { %5371 = vmatpush.msk.msrb.mxu0 %vm12470_vm6, %v5370_v16  ;;  %v5321_v16 = vld [vmem:[%s11947_s12 + $0x60] sm:$0xff]  ;;  %vm12484_vm6 = vmmov %vm12464_vm0 }
 0x47f   :  { %5300 = vmatmul.msk.f32.vlgmr.msra.gmra.mxu2 %vm12459_vm5, %v8849_v49  ;;  %vm12474_vm5 = vmmov %vm12464_vm0 }
 0x482   :  { %v1936_v58 = vpop.f32.mrf.mxu2  ;;  %v8853_v47 = vpop.f32.mrf.mxu3 }
 0x483   :  { %5261 = vmatmul.msk.f32.vlgmr.msra.gmra.mxu1 %vm12149_vm1, %v1936_v58  ;;  %5277 = vmatmul.msk.f32.vlgmr.msra.gmra.mxu0 %vm12149_vm1, %v8853_v47 }
 0x484   :  { %5333 = vmatmul.msk.f32.vlgmr.msra.gmra.mxu3 %vm12149_vm1, %v1936_v58  ;;  %v8953_v58 = vld [vmem:[%s11945_s3 + $0x40] sm:$0xff] }
 0x487   :  { %5301 = vmatmul.msk.f32.gmra.mxu2 %vm12460_vm7, %v8862_v28  ;;  %vm12475_vm7 = vmmov %vm12464_vm0 }
 0x48a   :  { %v1939_v5 = vpop.f32.mrf.mxu2  ;;  %v8866_v35 = vpop.f32.mrf.mxu3 }
 0x48b   :  { %5262 = vmatmul.msk.f32.gmra.mxu1 %vm12149_vm1, %v1939_v5  ;;  %5278 = vmatmul.msk.f32.gmra.mxu0 %vm12149_vm1, %v8866_v35 }
 0x48c   :  { %5334 = vmatmul.msk.f32.gmra.mxu3 %vm12149_vm1, %v1939_v5 }
 0x48f   :  { %5302 = vmatmul.msk.f32.gmra.mxu2 %vm12461_vm14, %v8875_v50  ;;  %vm12476_vm14 = vmmov %vm12464_vm0 }
 0x492   :  { %v1942_v63 = vpop.f32.mrf.mxu2  ;;  %v8879_v54 = vpop.f32.mrf.mxu3 }
 0x493   :  { %5263 = vmatmul.msk.f32.gmra.mxu1 %vm12149_vm1, %v1942_v63  ;;  %5279 = vmatmul.msk.f32.gmra.mxu0 %vm12149_vm1, %v8879_v54 }
 0x494   :  { %5335 = vmatmul.msk.f32.gmra.mxu3 %vm12149_vm1, %v1942_v63 }
 0x497   :  { %5303 = vmatmul.msk.f32.gmra.mxu2 %vm12462_vm11, %v8888_v40  ;;  %vm12477_vm11 = vmmov %vm12464_vm0 }
 0x49a   :  { %v1945_v30 = vpop.f32.mrf.mxu2  ;;  %v8892_v48 = vpop.f32.mrf.mxu3 }
 0x49b   :  { %5264 = vmatmul.msk.f32.gmra.mxu1 %vm12149_vm1, %v1945_v30  ;;  %5280 = vmatmul.msk.f32.gmra.mxu0 %vm12149_vm1, %v8892_v48 }
 0x49c   :  { %5336 = vmatmul.msk.f32.gmra.mxu3 %vm12149_vm1, %v1945_v30  ;;  %v8966_v30 = vld [vmem:[%s11945_s3 + $0x48] sm:$0xff] }
 0x49f   :  { %5304 = vmatmul.msk.f32.gmra.mxu2 %vm12463_vm2, %v8901_v43  ;;  %vm12478_vm2 = vmmov %vm12464_vm0 }
 0x4a2   :  { %v1948_v27 = vpop.f32.mrf.mxu2  ;;  %v8905_v7 = vpop.f32.mrf.mxu3 }
 0x4a3   :  { %5265 = vmatmul.msk.f32.gmra.mxu1 %vm12149_vm1, %v1948_v27  ;;  %5281 = vmatmul.msk.f32.gmra.mxu0 %vm12149_vm1, %v8905_v7 }
 0x4a4   :  { %5337 = vmatmul.msk.f32.gmra.mxu3 %vm12149_vm1, %v1948_v27 }
 0x4a7   :  { %5305 = vmatmul.msk.f32.gmra.mxu2 %vm12464_vm0, %v8914_v25 }
 0x4aa   :  { %v1951_v2 = vpop.f32.mrf.mxu2  ;;  %v8918_v41 = vpop.f32.mrf.mxu3 }
 0x4ab   :  { %5266 = vmatmul.msk.f32.gmra.mxu1 %vm12149_vm1, %v1951_v2  ;;  %5282 = vmatmul.msk.f32.gmra.mxu0 %vm12149_vm1, %v8918_v41 }
 0x4ac   :  { %5338 = vmatmul.msk.f32.gmra.mxu3 %vm12149_vm1, %v1951_v2 }
 0x4af   :  { %5306 = vmatmul.msk.f32.gmra.mxu2 %vm12465_vm13, %v8927_v11  ;;  %vm12479_vm13 = vmmov %vm12464_vm0 }
 0x4b2   :  { %v1954_v18 = vpop.f32.mrf.mxu2  ;;  %v8931_v14 = vpop.f32.mrf.mxu3 }
 0x4b3   :  { %5267 = vmatmul.msk.f32.gmra.mxu1 %vm12149_vm1, %v1954_v18  ;;  %5283 = vmatmul.msk.f32.gmra.mxu0 %vm12149_vm1, %v8931_v14 }
 0x4b4   :  { %5339 = vmatmul.msk.f32.gmra.mxu3 %vm12149_vm1, %v1954_v18  ;;  %v8979_v18 = vld [vmem:[%s11945_s3 + $0x50] sm:$0xff] }
 0x4b7   :  { %5307 = vmatmul.msk.f32.gmra.mxu2 %vm12466_vm9, %v8940_v34  ;;  %vm12480_vm9 = vmmov %vm12464_vm0 }
 0x4ba   :  { %v1957_v21 = vpop.f32.mrf.mxu2  ;;  %v8944_v3 = vpop.f32.mrf.mxu3 }
 0x4bb   :  { %5268 = vmatmul.msk.f32.gmra.mxu1 %vm12149_vm1, %v1957_v21  ;;  %5284 = vmatmul.msk.f32.gmra.mxu0 %vm12149_vm1, %v8944_v3 }
 0x4bc   :  { %5340 = vmatmul.msk.f32.gmra.mxu3 %vm12149_vm1, %v1957_v21 }
 0x4bf   :  { %5308 = vmatmul.msk.f32.gmra.mxu2 %vm12467_vm15, %v8953_v58  ;;  %vm12481_vm15 = vmmov %vm12464_vm0 }
 0x4c2   :  { %v1960_v5 = vpop.f32.mrf.mxu2  ;;  %v8957_v63 = vpop.f32.mrf.mxu3 }
 0x4c3   :  { %5269 = vmatmul.msk.f32.gmra.mxu1 %vm12149_vm1, %v1960_v5  ;;  %5285 = vmatmul.msk.f32.gmra.mxu0 %vm12149_vm1, %v8957_v63 }
 0x4c4   :  { %5341 = vmatmul.msk.f32.gmra.mxu3 %vm12149_vm1, %v1960_v5 }
 0x4c7   :  { %5309 = vmatmul.msk.f32.gmra.mxu2 %vm12468_vm8, %v8966_v30  ;;  %vm12482_vm8 = vmmov %vm12464_vm0 }
 0x4ca   :  { %v1963_v27 = vpop.f32.mrf.mxu2  ;;  %v8970_v2 = vpop.f32.mrf.mxu3 }
 0x4cb   :  { %5270 = vmatmul.msk.f32.gmra.mxu1 %vm12149_vm1, %v1963_v27  ;;  %5286 = vmatmul.msk.f32.gmra.mxu0 %vm12149_vm1, %v8970_v2 }
 0x4cc   :  { %5342 = vmatmul.msk.f32.gmra.mxu3 %vm12149_vm1, %v1963_v27  ;;  %v5324_v27 = vld [vmem:[%s11947_s12 + $0x78] sm:$0xff] }
 0x4cd   :  { %2496 = vmatpush.msra.mxu1 %v5324_v27  ;;  %v5369_v27 = vld [vmem:[%s11948_s14 + $0x50] sm:$0xff] }
 0x4ce   :  { %2574 = vmatpush.msrb.mxu0 %v5369_v27  ;;  %v5367_v27 = vld [vmem:[%s11948_s14 + $0x40] sm:$0xff] }
 0x4cf   :  { %5310 = vmatmul.msk.f32.gmra.mxu2 %vm12469_vm10, %v8979_v18  ;;  %2497 = vmatpush.msra.mxu1 %v5323_v33  ;;  %v5320_v33 = vld [vmem:[%s11947_s12 + $0x58] sm:$0xff]  ;;  %vm12483_vm10 = vmmov %vm12464_vm0 }
 0x4d0   :  { %2575 = vmatpush.msrb.mxu0 %v5368_v60  ;;  %v5317_v60 = vld [vmem:[%s11947_s12 + $0x40] sm:$0xff] }
 0x4d2   :  { %v1966_v21 = vpop.f32.mrf.mxu2  ;;  %v8983_v5 = vpop.f32.mrf.mxu3  ;;  %2576 = vmatpush.msrb.mxu0 %v5367_v27  ;;  %v9061_v27 = vld [vmem:[%s11945_s3 + $0x68] sm:$0xff] }
 0x4d3   :  { %5271 = vmatmul.msk.f32.gmra.mxu1 %vm12149_vm1, %v1966_v21  ;;  %5287 = vmatmul.msk.f32.gmra.mxu0 %vm12149_vm1, %v8983_v5 }
 0x4d4   :  { %5343 = vmatmul.msk.f32.gmra.mxu3 %vm12149_vm1, %v1966_v21  ;;  %v5322_v21 = vld [vmem:[%s11947_s12 + $0x68] sm:$0xff] }
 0x4d5   :  { %2498 = vmatpush.msra.mxu1 %v5322_v21  ;;  %v5319_v21 = vld [vmem:[%s11947_s12 + $0x50] sm:$0xff] }
 0x4d7   :  { %5311 = vmatmul.msk.f32.gmra.mxu2 %vm12471_vm3, %v9002_v52  ;;  %2499 = vmatpush.msra.mxu1 %v5321_v16  ;;  %v5318_v16 = vld [vmem:[%s11947_s12 + $0x48] sm:$0xff]  ;;  %vm12485_vm3 = vmmov %vm12464_vm0 }
 0x4d9   :  { %2500 = vmatpush.msra.mxu1 %v5320_v33 }
 0x4da   :  { %v1969_v38 = vpop.f32.mrf.mxu2  ;;  %v9009_v56 = vpop.f32.mrf.mxu3 }
 0x4db   :  { %5272 = vmatmul.msk.f32.gmra.mxu1 %vm12149_vm1, %v1969_v38  ;;  %5288 = vmatmul.msk.f32.gmra.mxu0 %vm12149_vm1, %v9009_v56 }
 0x4dc   :  { %5344 = vmatmul.msk.f32.gmra.mxu3 %vm12149_vm1, %v1969_v38  ;;  %v9033_v38 = vld [vmem:[%s11945_s3 + $0x60] sm:$0xff]  ;;  %2501 = vmatpush.msra.mxu1 %v5319_v21  ;;  %v5366_v21 = vld [vmem:[%s11948_s14 + $0x38] sm:$0xff] }
 0x4dd   :  { %2577 = vmatpush.msrb.mxu0 %v5366_v21 }
 0x4de   :  { %2502 = vmatpush.msra.mxu1 %v5318_v16  ;;  %v5365_v16 = vld [vmem:[%s11948_s14 + $0x30] sm:$0xff] }
 0x4df   :  { %5312 = vmatmul.msk.f32.gmra.mxu2 %vm12472_vm4, %v9033_v38  ;;  %2578 = vmatpush.msrb.mxu0 %v5365_v16  ;;  %vm12486_vm4 = vmmov %vm12464_vm0 }
 0x4e0   :  { %2503 = vmatpush.msra.mxu1 %v5317_v60  ;;  %v9074_v60 = vld [vmem:[%s11945_s3 + $0x70] sm:$0xff] }
 0x4e2   :  { %v1972_v39 = vpop.f32.mrf.mxu2  ;;  %v9043_v33 = vpop.f32.mrf.mxu3 }
 0x4e3   :  { %5273 = vmatmul.msk.f32.gmra.mxu1 %vm12149_vm1, %v1972_v39  ;;  %5289 = vmatmul.msk.f32.gmra.mxu0 %vm12149_vm1, %v9043_v33 }
 0x4e4   :  { %5345 = vmatmul.msk.f32.gmra.mxu3 %vm12149_vm1, %v1972_v39 }
 0x4e7   :  { %5313 = vmatmul.msk.f32.gmra.mxu2 %vm12473_vm12, %v9061_v27  ;;  %vm12487_vm12 = vmmov %vm12464_vm0 }
 0x4ea   :  { %v1975_v39 = vpop.f32.mrf.mxu2  ;;  %v9065_v51 = vpop.f32.mrf.mxu3 }
 0x4eb   :  { %5274 = vmatmul.msk.f32.gmra.mxu1 %vm12149_vm1, %v1975_v39  ;;  %5290 = vmatmul.msk.f32.gmra.mxu0 %vm12149_vm1, %v9065_v51 }
 0x4ec   :  { %5346 = vmatmul.msk.f32.gmra.mxu3 %vm12149_vm1, %v1975_v39  ;;  %v9087_v39 = vld [vmem:[%s11945_s3 + $0x78] sm:$0xff] }
 0x4ef   :  { %5314 = vmatmul.msk.f32.gmra.mxu2 %vm12474_vm5, %v9074_v60  ;;  %vm12488_vm5 = vmmov %vm12464_vm0 }
 0x4f2   :  { %v1978_v21 = vpop.f32.mrf.mxu2  ;;  %v9078_v16 = vpop.f32.mrf.mxu3 }
 0x4f3   :  { %5275 = vmatmul.msk.f32.gmra.mxu1 %vm12149_vm1, %v1978_v21  ;;  %5291 = vmatmul.msk.f32.gmra.mxu0 %vm12149_vm1, %v9078_v16 }
 0x4f4   :  { %5347 = vmatmul.msk.f32.gmra.mxu3 %vm12149_vm1, %v1978_v21 }
 0x4f7   :  { %5315 = vmatmul.msk.f32.gmra.mxu2 %vm12475_vm7, %v9087_v39  ;;  %vm12489_vm7 = vmmov %vm12464_vm0 }
 0x4fa   :  { %v1981_v13 = vpop.f32.mrf.mxu2  ;;  %v9091_v20 = vpop.f32.mrf.mxu3 }
 0x4fb   :  { %5276 = vmatmul.msk.f32.gmra.mxu1 %vm12149_vm1, %v1981_v13  ;;  %5292 = vmatmul.msk.f32.gmra.mxu0 %vm12149_vm1, %v9091_v20 }
 0x4fc   :  { %5348 = vmatmul.msk.f32.gmra.mxu3 %vm12149_vm1, %v1981_v13 }
 0x500   :  { %v9097_v10 = vpop.f32.mrf.mxu1  ;;  %v9099_v21 = vpop.f32.mrf.mxu0 }
 0x501   :  { %v2246_v29 = vadd.f32 %v9099_v21, %v9097_v10 }
 0x503   :  { %5349 = vmatmul.msk.f32.vlgmr.msra.gmra.mxu1 %vm12149_vm1, %v8853_v47  ;;  %5372 = vmatmul.msk.f32.vlgmr.msrb.gmra.mxu0 %vm12476_vm14, %v8849_v49  ;;  %vm12490_vm14 = vmmov %vm12464_vm0 }
 0x507   :  { %v9197_v19 = vpop.f32.mrf.mxu3 }
 0x508   :  { %v9105_v42 = vpop.f32.mrf.mxu1  ;;  %v9107_v23 = vpop.f32.mrf.mxu0 }
 0x50b   :  { %5350 = vmatmul.msk.f32.gmra.mxu1 %vm12149_vm1, %v8866_v35  ;;  %5373 = vmatmul.msk.f32.gmra.mxu0 %vm12477_vm11, %v8862_v28 }
 0x510   :  { %v9113_v13 = vpop.f32.mrf.mxu1  ;;  %v9115_v57 = vpop.f32.mrf.mxu0 }
 0x511   :  { %v2252_v0 = vadd.f32 %v9115_v57, %v9113_v13 }
 0x513   :  { %5351 = vmatmul.msk.f32.gmra.mxu1 %vm12149_vm1, %v8879_v54  ;;  %5374 = vmatmul.msk.f32.gmra.mxu0 %vm12478_vm2, %v8875_v50 }
 0x518   :  { %v9121_v49 = vpop.f32.mrf.mxu1  ;;  %v9123_v47 = vpop.f32.mrf.mxu0 }
 0x519   :  { %v2255_v10 = vadd.f32 %v9123_v47, %v9121_v49 }
 0x51b   :  { %5352 = vmatmul.msk.f32.gmra.mxu1 %vm12149_vm1, %v8892_v48  ;;  %5375 = vmatmul.msk.f32.gmra.mxu0 %vm12464_vm0, %v8888_v40  ;;  %v2320_v40 = vpop.f32.mrf.mxu2 }
 0x51c   :  { %v2368_v59 = vadd.f32 %v2320_v40, %v2246_v29 }
 0x51e   :  { %v2389_v22 = vadd.f32 %v9252_v62, %v2368_v59 }
 0x520   :  { %v9129_v28 = vpop.f32.mrf.mxu1  ;;  %v9131_v35 = vpop.f32.mrf.mxu0  ;;  %v5389_v57 = vmul.f32 -1.442695, %v2389_v22 }
 0x522   :  { %5901 = vpow2.f32 %v5389_v57 }
 0x523   :  { %5353 = vmatmul.msk.f32.gmra.mxu1 %vm12149_vm1, %v8905_v7  ;;  %5376 = vmatmul.msk.f32.gmra.mxu0 %vm12479_vm13, %v8901_v43  ;;  %v2323_v55 = vpop.f32.mrf.mxu2 }
 0x528   :  { %v9137_v50 = vpop.f32.mrf.mxu1  ;;  %v9139_v54 = vpop.f32.mrf.mxu0 }
 0x529   :  { %v2261_v59 = vadd.f32 %v9139_v54, %v9137_v50  ;;  %v5902_v50 = vpop.eup %5901 }
 0x52b   :  { %5354 = vmatmul.msk.f32.gmra.mxu1 %vm12149_vm1, %v8918_v41  ;;  %5377 = vmatmul.msk.f32.gmra.mxu0 %vm12480_vm9, %v8914_v25  ;;  %v2326_v1 = vpop.f32.mrf.mxu2 }
 0x530   :  { %v9145_v48 = vpop.f32.mrf.mxu1  ;;  %v9147_v61 = vpop.f32.mrf.mxu0 }
 0x533   :  { %5355 = vmatmul.msk.f32.gmra.mxu1 %vm12149_vm1, %v8931_v14  ;;  %5378 = vmatmul.msk.f32.gmra.mxu0 %vm12481_vm15, %v8927_v11 }
 0x538   :  { %v9153_v43 = vpop.f32.mrf.mxu1  ;;  %v9155_v7 = vpop.f32.mrf.mxu0 }
 0x53b   :  { %5356 = vmatmul.msk.f32.gmra.mxu1 %vm12149_vm1, %v8944_v3  ;;  %5379 = vmatmul.msk.f32.gmra.mxu0 %vm12482_vm8, %v8940_v34  ;;  %v2329_v34 = vpop.f32.mrf.mxu2 }
 0x540   :  { %v9161_v25 = vpop.f32.mrf.mxu1  ;;  %v9163_v41 = vpop.f32.mrf.mxu0 }
 0x541   :  { %v2270_v57 = vadd.f32 %v9163_v41, %v9161_v25 }
 0x543   :  { %5357 = vmatmul.msk.f32.gmra.mxu1 %vm12149_vm1, %v8957_v63  ;;  %5380 = vmatmul.msk.f32.gmra.mxu0 %vm12483_vm10, %v8953_v58  ;;  %v2332_v58 = vpop.f32.mrf.mxu2 }
 0x548   :  { %v9169_v11 = vpop.f32.mrf.mxu1  ;;  %v9171_v14 = vpop.f32.mrf.mxu0 }
 0x54b   :  { %5358 = vmatmul.msk.f32.gmra.mxu1 %vm12149_vm1, %v8970_v2  ;;  %5381 = vmatmul.msk.f32.gmra.mxu0 %vm12484_vm6, %v8966_v30 }
 0x550   :  { %v9177_v3 = vpop.f32.mrf.mxu1  ;;  %v9179_v31 = vpop.f32.mrf.mxu0 }
 0x553   :  { %5359 = vmatmul.msk.f32.gmra.mxu1 %vm12149_vm1, %v8983_v5  ;;  %5382 = vmatmul.msk.f32.gmra.mxu0 %vm12485_vm3, %v8979_v18  ;;  %v2335_v5 = vpop.f32.mrf.mxu2 }
 0x558   :  { %v9185_v63 = vpop.f32.mrf.mxu1  ;;  %v9187_v53 = vpop.f32.mrf.mxu0 }
 0x55b   :  { %5360 = vmatmul.msk.f32.gmra.mxu1 %vm12149_vm1, %v9009_v56  ;;  %5383 = vmatmul.msk.f32.gmra.mxu0 %vm12486_vm4, %v9002_v52  ;;  %v9207_v56 = vpop.f32.mrf.mxu3  ;;  %v2338_v52 = vpop.f32.mrf.mxu2 }
 0x560   :  { %v9193_v30 = vpop.f32.mrf.mxu1  ;;  %v9195_v2 = vpop.f32.mrf.mxu0 }
 0x563   :  { %5361 = vmatmul.msk.f32.gmra.mxu1 %vm12149_vm1, %v9043_v33  ;;  %5384 = vmatmul.msk.f32.gmra.mxu0 %vm12487_vm12, %v9033_v38  ;;  %v9221_v38 = vpop.f32.mrf.mxu3  ;;  %v2341_v33 = vpop.f32.mrf.mxu2 }
 0x568   :  { %v9203_v18 = vpop.f32.mrf.mxu1  ;;  %v9205_v36 = vpop.f32.mrf.mxu0 }
 0x56b   :  { %5362 = vmatmul.msk.f32.gmra.mxu1 %vm12149_vm1, %v9065_v51  ;;  %5385 = vmatmul.msk.f32.gmra.mxu0 %vm12488_vm5, %v9061_v27  ;;  %v9231_v51 = vpop.f32.mrf.mxu3  ;;  %v2344_v27 = vpop.f32.mrf.mxu2 }
 0x570   :  { %v9213_v37 = vpop.f32.mrf.mxu1  ;;  %v9215_v26 = vpop.f32.mrf.mxu0 }
 0x573   :  { %5363 = vmatmul.msk.f32.gmra.mxu1 %vm12149_vm1, %v9078_v16  ;;  %5386 = vmatmul.msk.f32.gmra.mxu0 %vm12489_vm7, %v9074_v60  ;;  %v9243_v4 = vpop.f32.mrf.mxu3 }
 0x578   :  { %v9223_v17 = vpop.f32.mrf.mxu1  ;;  %v9225_v45 = vpop.f32.mrf.mxu0 }
 0x57b   :  { %5364 = vmatmul.msk.f32.gmra.mxu1 %vm12149_vm1, %v9091_v20  ;;  %5387 = vmatmul.msk.f32.gmra.mxu0 %vm12490_vm14, %v9087_v39  ;;  %v9245_v20 = vpop.f32.mrf.mxu2  ;;  %v2249_v39 = vadd.f32 %v9107_v23, %v9105_v42  ;;  %v2370_v23 = vadd.f32 %v2326_v1, %v2252_v0  ;;  %v2371_v42 = vadd.f32 %v2329_v34, %v2255_v10  ;;  %v9264_v40 = vpop.f32.mrf.mxu3 }
 0x57c   :  { %v2264_v34 = vadd.f32 %v9147_v61, %v9145_v48 }
 0x57d   :  { %v2369_v44 = vadd.f32 %v2323_v55, %v2249_v39  ;;  %v2258_v55 = vadd.f32 %v9131_v35, %v9129_v28  ;;  %v2391_v13 = vadd.f32 %v9252_v62, %v2370_v23  ;;  %v2392_v47 = vadd.f32 %v9252_v62, %v2371_v42 }
 0x57e   :  { %v2373_v28 = vadd.f32 %v2335_v5, %v2261_v59  ;;  %v2374_v10 = vadd.f32 %v2338_v52, %v2264_v34  ;;  %v9291_v52 = vadd.f32 1.0, %v5902_v50  ;;  %v2376_v34 = vadd.f32 %v2344_v27, %v2270_v57 }
 0x57f   :  { %v2390_v29 = vadd.f32 %v9252_v62, %v2369_v44  ;;  %v2372_v0 = vadd.f32 %v2332_v58, %v2258_v55  ;;  %v5391_v39 = vmul.f32 -1.442695, %v2391_v13  ;;  %v5392_v22 = vmul.f32 -1.442695, %v2392_v47 }
 0x580   :  { %v9233_v16 = vpop.f32.mrf.mxu1  ;;  %v9235_v12 = vpop.f32.mrf.mxu0  ;;  %v2394_v54 = vadd.f32 %v9252_v62, %v2373_v28  ;;  %v2267_v58 = vadd.f32 %v9155_v7, %v9153_v43  ;;  %v2395_v55 = vadd.f32 %v9252_v62, %v2374_v10  ;;  %12491 = vst [vmem:[#allocation93_spill] sm:$0xff] %v9291_v52  ;;  %v2397_v27 = vadd.f32 %v9252_v62, %v2376_v34 }
 0x581   :  { %v5390_v49 = vmul.f32 -1.442695, %v2390_v29  ;;  %v2393_v35 = vadd.f32 %v9252_v62, %v2372_v0  ;;  %v2273_v0 = vadd.f32 %v9171_v14, %v9169_v11  ;;  %v2276_v50 = vadd.f32 %v9179_v31, %v9177_v3 }
 0x582   :  { %v5394_v13 = vmul.f32 -1.442695, %v2394_v54  ;;  %v5395_v7 = vmul.f32 -1.442695, %v2395_v55  ;;  %v5397_v57 = vmul.f32 -1.442695, %v2397_v27 }
 0x583   :  { %v9266_v8 = vpop.f32.mrf.mxu2  ;;  %5903 = vpow2.f32 %v5390_v49  ;;  %v9281_v23 = vpop.f32.mrf.mxu3  ;;  %v5393_v42 = vmul.f32 -1.442695, %v2393_v35  ;;  %v2375_v49 = vadd.f32 %v2341_v33, %v2267_v58  ;;  %v2377_v11 = vadd.f32 %v9245_v20, %v2273_v0 }
 0x584   :  { %5905 = vpow2.f32 %v5391_v39  ;;  %v2279_v20 = vadd.f32 %v9187_v53, %v9185_v63 }
 0x585   :  { %5907 = vpow2.f32 %v5392_v22  ;;  %v2396_v22 = vadd.f32 %v9252_v62, %v2375_v49  ;;  %v2378_v49 = vadd.f32 %v9266_v8, %v2276_v50  ;;  %v2282_v8 = vadd.f32 %v9195_v2, %v9193_v30 }
 0x586   :  { %5909 = vpow2.f32 %v5393_v42 }
 0x587   :  { %5911 = vrcp.f32 %v9291_v52  ;;  %v5396_v10 = vmul.f32 -1.442695, %v2396_v22  ;;  %v2399_v27 = vadd.f32 %v9252_v62, %v2378_v49 }
 0x588   :  { %v9237_v60 = vpop.f32.mrf.mxu1  ;;  %v9239_v46 = vpop.f32.mrf.mxu0  ;;  %5913 = vpow2.f32 %v5394_v13 }
 0x589   :  { %v5904_v5 = vpop.eup %5903 }
 0x58a   :  { %v5906_v47 = vpop.eup %5905  ;;  %v9295_v59 = vadd.f32 1.0, %v5904_v5  ;;  %v2398_v5 = vadd.f32 %v9252_v62, %v2377_v11 }
 0x58b   :  { %v2353_v29 = vpop.f32.mrf.mxu2  ;;  %v5908_v43 = vpop.eup %5907  ;;  %v9300_v39 = vadd.f32 1.0, %v5906_v47 }
 0x58c   :  { %12492 = vst [vmem:[#allocation54_spill] sm:$0xff] %v9295_v59  ;;  %v9303_v25 = vpop.f32.mrf.mxu3  ;;  %5915 = vrcp.f32 %v9295_v59  ;;  %v9306_v33 = vadd.f32 1.0, %v5908_v43  ;;  %v5910_v14 = vpop.eup %5909  ;;  %v5398_v63 = vmul.f32 -1.442695, %v2398_v5  ;;  %v2379_v0 = vadd.f32 %v2353_v29, %v2279_v20 }
 0x58d   :  { %12493 = vst [vmem:[#allocation52_spill] sm:$0xff] %v9300_v39  ;;  %5917 = vpow2.f32 %v5395_v7  ;;  %v9317_v54 = vpop.eup %5911  ;;  %v9320_v42 = vadd.f32 1.0, %v5910_v14 }
 0x58e   :  { %12494 = vst [vmem:[#allocation55_spill] sm:$0xff] %v9306_v33  ;;  %5919 = vrcp.f32 %v9300_v39  ;;  %v5914_v58 = vpop.eup %5913  ;;  %v2730_v31 = vmul.f32 %v9317_v54, %v9291_v52  ;;  %v2400_v30 = vadd.f32 %v9252_v62, %v2379_v0  ;;  %vm2779_vm11 = vweird.f32 %v9306_v33 }
 0x58f   :  { %12495 = vst [vmem:[#allocation69_spill] sm:$0xff] %v9317_v54  ;;  %5921 = vrcp.f32 %v9306_v33  ;;  %v9330_v3 = vadd.f32 1.0, %v5914_v58  ;;  %vm2794_vm0 = vweird.f32 %v9320_v42 }
 0x590   :  { %v9258_v21 = vpop.f32.mrf.mxu1  ;;  %v9260_v6 = vpop.f32.mrf.mxu0  ;;  %12496 = vst [vmem:[#allocation63_spill] sm:$0xff] %v9320_v42  ;;  %5923 = vpow2.f32 %v5396_v10  ;;  %v2731_v10 = vsub.f32 1.0, %v2730_v31 }
 0x591   :  { %5925 = vrcp.f32 %v9320_v42  ;;  %vm2809_vm15 = vweird.f32 %v9330_v3 }
 0x592   :  { %v9325_v55 = vpop.eup %5915  ;;  %5927 = vpow2.f32 %v5397_v57  ;;  %v5399_v57 = vmul.f32 -1.442695, %v2399_v27 }
 0x593   :  { %v2356_v41 = vpop.f32.mrf.mxu2  ;;  %12497 = vst [vmem:[#allocation79_spill] sm:$0xff] %v9325_v55  ;;  %v5918_v13 = vpop.eup %5917  ;;  %v2745_v14 = vmul.f32 %v9325_v55, %v9295_v59  ;;  %5929 = vrcp.f32 %v9330_v3 }
 0x594   :  { %v9336_v7 = vpop.eup %5919  ;;  %v9339_v53 = vpop.f32.mrf.mxu3  ;;  %v9345_v22 = vadd.f32 1.0, %v5918_v13  ;;  %5931 = vpow2.f32 %v5398_v63  ;;  %v2380_v2 = vadd.f32 %v2356_v41, %v2282_v8  ;;  %v2732_v13 = vmul.f32 %v9317_v54, %v2731_v10 }
 0x595   :  { %12498 = vst [vmem:[#allocation86_spill] sm:$0xff] %v9336_v7  ;;  %v9343_v34 = vpop.eup %5921  ;;  %v2760_v29 = vmul.f32 %v9336_v7, %v9300_v39  ;;  %v2746_v5 = vsub.f32 1.0, %v2745_v14  ;;  %v5400_v8 = vmul.f32 -1.442695, %v2400_v30  ;;  %v2785_v14 = vand.u32 2147483648, %v9306_v33 }
 0x596   :  { %12499 = vst [vmem:[#allocation91_spill] sm:$0xff] %v9343_v34  ;;  %v5924_v50 = vpop.eup %5923  ;;  %v2775_v58 = vmul.f32 %v9343_v34, %v9306_v33  ;;  %5933 = vrcp.f32 %v9345_v22  ;;  %v2401_v24 = vadd.f32 %v9252_v62, %v2380_v2  ;;  %v2285_v2 = vadd.f32 %v9205_v36, %v9203_v18 }
 0x597   :  { %v9357_v20 = vpop.eup %5925  ;;  %v9360_v31 = vadd.f32 1.0, %v5924_v50  ;;  %v2761_v0 = vsub.f32 1.0, %v2760_v29  ;;  %v2747_v10 = vmul.f32 %v9325_v55, %v2746_v5  ;;  %5935 = vpow2.f32 %v5399_v57 }
 0x598   :  { %v9274_v1 = vpop.f32.mrf.mxu1  ;;  %v9276_v44 = vpop.f32.mrf.mxu0  ;;  %12500 = vst [vmem:[#allocation51_spill] sm:$0xff] %v9357_v20  ;;  %v2776_v15 = vsub.f32 1.0, %v2775_v58  ;;  %v2790_v27 = vmul.f32 %v9357_v20, %v9320_v42  ;;  %v9383_v58 = vadd.f32 %v9317_v54, %v2732_v13  ;;  %vm2780_vm2 = vweird.f32 %v9343_v34 }
 0x599   :  { %v5928_v49 = vpop.eup %5927  ;;  %5937 = vrcp.f32 %v9360_v31  ;;  %v2762_v50 = vmul.f32 %v9336_v7, %v2761_v0  ;;  %v9398_v52 = vadd.f32 %v9325_v55, %v2747_v10  ;;  %v2815_v54 = vand.u32 2147483648, %v9330_v3  ;;  %vm9439_vm9 = vmor %vm2779_vm11, %vm2780_vm2 }
 0x59a   :  { %v9369_v9 = vpop.eup %5929  ;;  %12504 = vst [vmem:[#allocation84_spill] sm:$0xff] %v9383_v58  ;;  %5939 = vpow2.f32 %v5400_v8  ;;  %v2777_v36 = vmul.f32 %v9343_v34, %v2776_v15  ;;  %v2791_v13 = vsub.f32 1.0, %v2790_v27  ;;  %v2800_v15 = vand.u32 2147483648, %v9320_v42 }
 0x59b   :  { %v2359_v11 = vpop.f32.mrf.mxu2  ;;  %v5932_v29 = vpop.eup %5931  ;;  %v2805_v57 = vmul.f32 %v9369_v9, %v9330_v3  ;;  %12505 = vst [vmem:[#allocation89_spill] sm:$0xff] %v9398_v52  ;;  %v9413_v10 = vadd.f32 %v9336_v7, %v2762_v50  ;;  %vm2795_vm13 = vweird.f32 %v9357_v20  ;;  %v2816_v33 = vor.u32 1.1754944e-38, %v2815_v54 }
 0x59c   :  { %v9378_v30 = vpop.f32.mrf.mxu3  ;;  %v9385_v41 = vpop.eup %5933  ;;  %v9394_v18 = vadd.f32 1.0, %v5932_v29  ;;  %v2381_v0 = vadd.f32 %v2359_v11, %v2285_v2  ;;  %v9410_v29 = vor.u32 1.1754944e-38, %v2785_v14  ;;  %v9416_v2 = vadd.f32 %v9343_v34, %v2777_v36  ;;  %vm9494_vm4 = vmor %vm2794_vm0, %vm2795_vm13 }
 0x59d   :  { %12503 = vst [vmem:[#allocation77_spill] sm:$0xff] %v9378_v30  ;;  %v2820_v8 = vmul.f32 %v9385_v41, %v9345_v22  ;;  %v5936_v58 = vpop.eup %5935  ;;  %v2806_v11 = vsub.f32 1.0, %v2805_v57  ;;  %v2792_v14 = vmul.f32 %v9357_v20, %v2791_v13  ;;  %v2813_v36 = vand.u32 2147483647, %v9330_v3 }
 0x59e   :  { %12506 = vst [vmem:[#allocation73_spill] sm:$0xff] %v9410_v29  ;;  %v2402_v27 = vadd.f32 %v9252_v62, %v2381_v0  ;;  %v9429_v29 = vadd.f32 1.0, %v5936_v58  ;;  %v9433_v59 = vor.u32 1.1754944e-38, %v2800_v15  ;;  %v12510_v13 = vmov 0 }
 0x59f   :  { %12507 = vst [vmem:[#allocation85_spill] sm:$0xff] %v9413_v10  ;;  %v9419_v52 = vpop.eup %5937  ;;  %v2821_v57 = vsub.f32 1.0, %v2820_v8  ;;  %v12511_v13 = vsel %vm9439_vm9, 4294967295, %v12510_v13  ;;  %v2291_v58 = vadd.f32 %v9225_v45, %v9223_v17  ;;  %v2807_v0 = vmul.f32 %v9369_v9, %v2806_v11 }
 0x5a0   :  { %v9286_v61 = vpop.f32.mrf.mxu1  ;;  %v9288_v48 = vpop.f32.mrf.mxu0  ;;  %12508 = vst [vmem:[#allocation76_spill] sm:$0xff] %v9416_v2  ;;  %v9460_v55 = vadd.f32 %v9357_v20, %v2792_v14  ;;  %v5402_v17 = vmul.f32 -1.442695, %v2402_v27  ;;  %vm2810_vm8 = vweird.f32 %v9369_v9  ;;  %vm9464_vm10 = vcmp.eq.f32.partialorder %v2813_v36, 8.507059e+37 }
 0x5a1   :  { %v5940_v50 = vpop.eup %5939  ;;  %12509 = vst [vmem:[#allocation83_spill] sm:$0xff] %v9433_v59  ;;  %v2835_v59 = vmul.f32 %v9419_v52, %v9360_v31  ;;  %v2822_v39 = vmul.f32 %v9385_v41, %v2821_v57  ;;  %vm2824_vm6 = vweird.f32 %v9345_v22  ;;  %vm2825_vm3 = vweird.f32 %v9385_v41  ;;  %vm9507_vm5 = vmor %vm2809_vm15, %vm2810_vm8 }
 0x5a2   :  { %12512 = vst [vmem:[#allocation90_spill] sm:$0xff] %v12511_v13  ;;  %v9455_v15 = vadd.f32 1.0, %v5940_v50  ;;  %v2808_v57 = vadd.f32 %v9369_v9, %v2807_v0  ;;  %v2845_v34 = vand.u32 2147483648, %v9360_v31  ;;  %vm2839_vm7 = vweird.f32 %v9360_v31  ;;  %vm9530_vm14 = vmor %vm2824_vm6, %vm2825_vm3 }
 0x5a3   :  { %v2362_v5 = vpop.f32.mrf.mxu2  ;;  %12513 = vst [vmem:[#allocation75_spill] sm:$0xff] %v9460_v55  ;;  %v2836_v2 = vsub.f32 1.0, %v2835_v59  ;;  %v2843_v59 = vand.u32 2147483647, %v9360_v31  ;;  %vm2840_vm2 = vweird.f32 %v9419_v52  ;;  %v2509_v20 = vadd.f32 %v9237_v60, %v9207_v56 }
 0x5a4   :  { %v2812_v42 = vsel %vm9507_vm5, %v9369_v9, %v2808_v57  ;;  %v2846_v57 = vor.u32 1.1754944e-38, %v2845_v34  ;;  %vm2869_vm15 = vweird.f32 %v9394_v18  ;;  %v2512_v60 = vadd.f32 %v9258_v21, %v9221_v38 }
 0x5a5   :  { %v2837_v30 = vmul.f32 %v9419_v52, %v2836_v2  ;;  %vm9548_vm0 = vcmp.eq.f32.partialorder %v2843_v59, 8.507059e+37  ;;  %v9554_v34 = vsel %vm9464_vm10, %v2816_v33, %v2812_v42  ;;  %v2873_v59 = vand.u32 2147483647, %v9394_v18  ;;  %vm9595_vm10 = vmor %vm2839_vm7, %vm2840_vm2 }
 0x5a6   :  { %12529 = vst [vmem:[#allocation67_spill] sm:$0xff] %v9554_v34  ;;  %v2629_v21 = vadd.f32 %v9239_v46, %v2509_v20  ;;  %v2888_v31 = vand.u32 2147483647, %v9429_v29  ;;  %vm2884_vm5 = vweird.f32 %v9429_v29  ;;  %vm2899_vm2 = vweird.f32 %v9455_v15 }
 0x5a7   :  { %v2838_v33 = vadd.f32 %v9419_v52, %v2837_v30  ;;  %vm9601_vm3 = vcmp.eq.f32.partialorder %v2873_v59, 8.507059e+37 }
 0x5a8   :  { %v9308_v28 = vpop.f32.mrf.mxu1  ;;  %v9310_v35 = vpop.f32.mrf.mxu0 }
 0x5ab   :  { %v2365_v10 = vpop.f32.mrf.mxu2 }
 0x5ac   :  { %v2383_v14 = vadd.f32 %v2365_v10, %v2291_v58  ;;  %v2823_v10 = vadd.f32 %v9385_v41, %v2822_v39  ;;  %v12518_v58 = vmov 0 }
 0x5ad   :  { %v12519_v58 = vsel %vm9494_vm4, 4294967295, %v12518_v58 }
 0x5ae   :  { %12520 = vst [vmem:[#allocation70_spill] sm:$0xff] %v12519_v58  ;;  %v2827_v39 = vsel %vm9530_vm14, %v9385_v41, %v2823_v10  ;;  %v2506_v10 = vadd.f32 %v9233_v16, %v9197_v19 }
 0x5b0   :  { %v9332_v47 = vpop.f32.mrf.mxu1  ;;  %v9334_v43 = vpop.f32.mrf.mxu0 }
 0x5b8   :  { %v9362_v32 = vpop.f32.mrf.mxu1  ;;  %v9364_v63 = vpop.f32.mrf.mxu0 }
 0x5b9   :  { %12501 = vst [vmem:[#allocation60_spill] sm:$0xff] %v9362_v32  ;;  %v9376_v32 = vadd.f32 1.0, %v5928_v49 }
 0x5ba   :  { %12502 = vst [vmem:[#allocation62_spill] sm:$0xff] %v9364_v63  ;;  %v5401_v63 = vmul.f32 -1.442695, %v2401_v24 }
 0x5bb   :  { %5941 = vrcp.f32 %v9376_v32  ;;  %v2858_v3 = vand.u32 2147483647, %v9376_v32  ;;  %vm2854_vm11 = vweird.f32 %v9376_v32 }
 0x5bc   :  { %5943 = vpow2.f32 %v5401_v63  ;;  %v2288_v63 = vadd.f32 %v9215_v26, %v9213_v37  ;;  %v9445_v37 = vpop.f32.mrf.mxu3 }
 0x5bd   :  { %5945 = vrcp.f32 %v9394_v18  ;;  %vm9563_vm13 = vcmp.eq.f32.partialorder %v2858_v3, 8.507059e+37  ;;  %v2842_v3 = vsel %vm9595_vm10, %v9419_v52, %v2838_v33  ;;  %v2630_v52 = vadd.f32 %v9260_v6, %v2512_v60 }
 0x5be   :  { %v2382_v11 = vadd.f32 %v2362_v5, %v2288_v63  ;;  %5947 = vrcp.f32 %v9429_v29  ;;  %v2828_v5 = vand.u32 2147483647, %v9345_v22  ;;  %v2830_v63 = vand.u32 2147483648, %v9345_v22 }
 0x5bf   :  { %5949 = vrcp.f32 %v9455_v15  ;;  %v9638_v6 = vsel %vm9548_vm0, %v2846_v57, %v2842_v3  ;;  %v2903_v60 = vand.u32 2147483647, %v9455_v15 }
 0x5c0   :  { %v9404_v24 = vpop.f32.mrf.mxu1  ;;  %v9406_v49 = vpop.f32.mrf.mxu0  ;;  %5951 = vpow2.f32 %v5402_v17  ;;  %v2403_v7 = vadd.f32 %v9252_v62, %v2382_v11  ;;  %vm9499_vm12 = vcmp.eq.f32.partialorder %v2828_v5, 8.507059e+37  ;;  %v2404_v11 = vadd.f32 %v9252_v62, %v2383_v14  ;;  %12540 = vst [vmem:[#allocation71_spill] sm:$0xff] %v9638_v6 }
 0x5c1   :  { %v9443_v26 = vpop.eup %5941  ;;  %v2831_v5 = vor.u32 1.1754944e-38, %v2830_v63  ;;  %vm9681_vm0 = vcmp.eq.f32.partialorder %v2903_v60, 8.507059e+37 }
 0x5c2   :  { %v5944_v45 = vpop.eup %5943  ;;  %v2850_v27 = vmul.f32 %v9443_v26, %v9376_v32  ;;  %v5403_v9 = vmul.f32 -1.442695, %v2403_v7  ;;  %vm2855_vm8 = vweird.f32 %v9443_v26 }
 0x5c3   :  { %v9468_v50 = vpop.eup %5945  ;;  %v9483_v36 = vadd.f32 1.0, %v5944_v45  ;;  %v9570_v42 = vsel %vm9499_vm12, %v2831_v5, %v2827_v39  ;;  %v2628_v45 = vadd.f32 %v9235_v12, %v2506_v10  ;;  %v2875_v5 = vand.u32 2147483648, %v9394_v18  ;;  %vm9617_vm12 = vmor %vm2854_vm11, %vm2855_vm8 }
 0x5c4   :  { %v2851_v0 = vsub.f32 1.0, %v2850_v27  ;;  %v2860_v27 = vand.u32 2147483648, %v9376_v32  ;;  %v9534_v14 = vpop.f32.mrf.mxu3  ;;  %12532 = vst [vmem:[#allocation82_spill] sm:$0xff] %v9570_v42  ;;  %vm2870_vm6 = vweird.f32 %v9468_v50  ;;  %vm9668_vm11 = vcmp.eq.f32.partialorder %v2888_v31, 8.507059e+37 }
 0x5c5   :  { %5953 = vrcp.f32 %v9483_v36  ;;  %v2876_v33 = vor.u32 1.1754944e-38, %v2875_v5  ;;  %vm9650_vm7 = vmor %vm2869_vm15, %vm2870_vm6 }
 0x5c6   :  { %v2852_v22 = vmul.f32 %v9443_v26, %v2851_v0  ;;  %v2861_v62 = vor.u32 1.1754944e-38, %v2860_v27  ;;  %5955 = vpow2.f32 %v5403_v9 }
 0x5c8   :  { %v9471_v8 = vpop.f32.mrf.mxu1  ;;  %v9473_v54 = vpop.f32.mrf.mxu0  ;;  %v2853_v13 = vadd.f32 %v9443_v26, %v2852_v22 }
 0x5c9   :  { %12516 = vst [vmem:[#allocation61_spill] sm:$0xff] %v9471_v8  ;;  %v9520_v8 = vpop.eup %5947 }
 0x5ca   :  { %12517 = vst [vmem:[#allocation72_spill] sm:$0xff] %v9473_v54  ;;  %v2865_v54 = vmul.f32 %v9468_v50, %v9394_v18  ;;  %v9539_v2 = vpop.eup %5949  ;;  %v2880_v0 = vmul.f32 %v9520_v8, %v9429_v29  ;;  %vm2885_vm14 = vweird.f32 %v9520_v8 }
 0x5cb   :  { %v5952_v41 = vpop.eup %5951  ;;  %v2895_v30 = vmul.f32 %v9539_v2, %v9455_v15  ;;  %vm2900_vm15 = vweird.f32 %v9539_v2  ;;  %vm9702_vm8 = vmor %vm2884_vm5, %vm2885_vm14 }
 0x5cc   :  { %v2866_v63 = vsub.f32 1.0, %v2865_v54  ;;  %v5404_v54 = vmul.f32 -1.442695, %v2404_v11  ;;  %v9575_v56 = vpop.eup %5953  ;;  %v9577_v16 = vadd.f32 1.0, %v5952_v41  ;;  %v9588_v11 = vld [vmem:[%s11949_s15 + $0x1] ss:$0 sm:$0xff] }
 0x5cd   :  { %v2881_v27 = vsub.f32 1.0, %v2880_v0  ;;  %v2910_v9 = vmul.f32 %v9575_v56, %v9483_v36  ;;  %v2896_v41 = vsub.f32 1.0, %v2895_v30  ;;  %v5956_v10 = vpop.eup %5955  ;;  %v9630_v0 = vpop.f32.mrf.mxu3  ;;  %v9633_v32 = vadd.f32 %v9588_v11, %v2628_v45 }
 0x5ce   :  { %v2867_v19 = vmul.f32 %v9468_v50, %v2866_v63  ;;  %5957 = vpow2.f32 %v5404_v54  ;;  %v2890_v63 = vand.u32 2147483648, %v9429_v29  ;;  %v2857_v54 = vsel %vm9617_vm12, %v9443_v26, %v2853_v13 }
 0x5cf   :  { %5959 = vrcp.f32 %v9577_v16  ;;  %12539 = vst [vmem:[#allocation88_spill] sm:$0xff] %v9633_v32  ;;  %v2882_v59 = vmul.f32 %v9520_v8, %v2881_v27  ;;  %v2905_v26 = vand.u32 2147483648, %v9455_v15  ;;  %v2911_v57 = vsub.f32 1.0, %v2910_v9 }
 0x5d0   :  { %v9541_v17 = vpop.f32.mrf.mxu1  ;;  %v9543_v55 = vpop.f32.mrf.mxu0  ;;  %v2868_v39 = vadd.f32 %v9468_v50, %v2867_v19  ;;  %v9641_v19 = vadd.f32 %v9588_v11, %v2629_v21  ;;  %v2891_v13 = vor.u32 1.1754944e-38, %v2890_v63  ;;  %v9659_v27 = vsel %vm9563_vm13, %v2861_v62, %v2857_v54 }
 0x5d1   :  { %12544 = vst [vmem:[#allocation68_spill] sm:$0xff] %v9659_v27  ;;  %v9661_v5 = vadd.f32 1.0, %v5956_v10  ;;  %v9664_v38 = vadd.f32 %v9588_v11, %v2630_v52  ;;  %v2897_v18 = vmul.f32 %v9539_v2, %v2896_v41  ;;  %v2985_v3 = vmin.f32 %v9633_v32, 20.0 }
 0x5d2   :  { %12541 = vst [vmem:[#allocation59_spill] sm:$0xff] %v9641_v19  ;;  %v2872_v45 = vsel %vm9650_vm7, %v9468_v50, %v2868_v39  ;;  %v2918_v50 = vand.u32 2147483647, %v9483_v36  ;;  %v2883_v58 = vadd.f32 %v9520_v8, %v2882_v59  ;;  %v2986_v63 = vmin.f32 %v9641_v19, 20.0 }
 0x5d3   :  { %12545 = vst [vmem:[#allocation66_spill] sm:$0xff] %v9664_v38  ;;  %v2906_v31 = vor.u32 1.1754944e-38, %v2905_v26  ;;  %v9687_v46 = vsel %vm9601_vm3, %v2876_v33, %v2872_v45  ;;  %v2912_v52 = vmul.f32 %v9575_v56, %v2911_v57  ;;  %vm2914_vm13 = vweird.f32 %v9483_v36  ;;  %vm9727_vm3 = vmor %vm2899_vm2, %vm2900_vm15 }
 0x5d4   :  { %v5958_v7 = vpop.eup %5957  ;;  %v2920_v41 = vand.u32 2147483648, %v9483_v36  ;;  %5961 = vrcp.f32 %v9661_v5  ;;  %v2987_v54 = vmin.f32 %v9664_v38, 20.0  ;;  %v2515_v10 = vadd.f32 %v9274_v1, %v9231_v51 }
 0x5d5   :  { %v9676_v62 = vpop.eup %5959  ;;  %v9678_v9 = vadd.f32 1.0, %v5958_v7  ;;  %v2898_v12 = vadd.f32 %v9539_v2, %v2897_v18  ;;  %v3001_v26 = vmul.f32 1.442695, %v2985_v3  ;;  %vm9708_vm10 = vcmp.eq.f32.partialorder %v2918_v50, 8.507059e+37  ;;  %v2479_v45 = vpop.f32.mrf.mxu3 }
 0x5d6   :  { %v2925_v30 = vmul.f32 %v9676_v62, %v9577_v16  ;;  %v2887_v51 = vsel %vm9702_vm8, %v9520_v8, %v2883_v58  ;;  %v3003_v1 = vmul.f32 1.442695, %v2986_v63  ;;  %v2518_v29 = vadd.f32 %v9286_v61, %v9243_v4  ;;  %v12566_v8 = vld [vmem:[#allocation61_spill] sm:$0xff] }
 0x5d7   :  { %5963 = vrcp.f32 %v9678_v9  ;;  %v2935_v57 = vand.u32 2147483648, %v9577_v16  ;;  %v2521_v18 = vadd.f32 %v9308_v28, %v9264_v40  ;;  %v2913_v3 = vadd.f32 %v9575_v56, %v2912_v52 }
 0x5d8   :  { %v9623_v20 = vpop.f32.mrf.mxu1  ;;  %v9625_v22 = vpop.f32.mrf.mxu0  ;;  %vm2915_vm6 = vweird.f32 %v9575_v56  ;;  %v2921_v50 = vor.u32 1.1754944e-38, %v2920_v41  ;;  %v3005_v4 = vmul.f32 1.442695, %v2987_v54  ;;  %v2631_v61 = vadd.f32 %v9276_v44, %v2515_v10 }
 0x5d9   :  { %v2524_v58 = vadd.f32 %v9332_v47, %v9281_v23  ;;  %v2902_v40 = vsel %vm9727_vm3, %v9539_v2, %v2898_v12  ;;  %5965 = vpow2.f32 %v3001_v26  ;;  %v2926_v28 = vsub.f32 1.0, %v2925_v30  ;;  %vm9752_vm12 = vmor %vm2914_vm13, %vm2915_vm6 }
 0x5da   :  { %v2933_v63 = vand.u32 2147483647, %v9577_v16  ;;  %v9740_v15 = vsel %vm9668_vm11, %v2891_v13, %v2887_v51  ;;  %v9742_v52 = vpop.eup %5961  ;;  %5967 = vpow2.f32 %v3003_v1  ;;  %v2632_v44 = vadd.f32 %v9288_v48, %v2518_v29 }
 0x5db   :  { %v2950_v41 = vand.u32 2147483648, %v9661_v5  ;;  %v9746_v23 = vor.u32 1.1754944e-38, %v2935_v57  ;;  %v2633_v2 = vadd.f32 %v9310_v35, %v2521_v18  ;;  %v2948_v13 = vand.u32 2147483647, %v9661_v5 }
 0x5dc   :  { %v2917_v48 = vsel %vm9752_vm12, %v9575_v56, %v2913_v3  ;;  %v9763_v21 = vsel %vm9681_vm0, %v2906_v31, %v2902_v40  ;;  %5969 = vpow2.f32 %v3005_v4  ;;  %v9768_v36 = vadd.f32 %v9588_v11, %v2631_v61 }
 0x5dd   :  { %v9765_v54 = vpop.eup %5963  ;;  %v2634_v10 = vadd.f32 %v9334_v43, %v2524_v58  ;;  %v2530_v26 = vadd.f32 %v9404_v24, %v9339_v53  ;;  %v9776_v39 = vmul.f32 %v9742_v52, %v9661_v5  ;;  %v2927_v31 = vmul.f32 %v9676_v62, %v2926_v28  ;;  %v2482_v3 = vpop.f32.mrf.mxu3 }
 0x5de   :  { %12558 = vst [vmem:[#allocation65_spill] sm:$0xff] %v9768_v36  ;;  %v9780_v30 = vadd.f32 %v9588_v11, %v2632_v44  ;;  %v2539_v43 = vadd.f32 %v9623_v20, %v9534_v14  ;;  %v9784_v51 = vor.u32 1.1754944e-38, %v2950_v41  ;;  %v9793_v24 = vadd.f32 %v9588_v11, %v2633_v2 }
 0x5df   :  { %v9790_v53 = vpop.eup %5965  ;;  %v9799_v57 = vmul.f32 %v9765_v54, %v9678_v9  ;;  %v2988_v20 = vmin.f32 %v9768_v36, 20.0  ;;  %v9805_v7 = vadd.f32 %v9588_v11, %v2634_v10  ;;  %v2941_v61 = vsub.f32 1.0, %v9776_v39 }
 0x5e0   :  { %v2541_v59 = vpop.f32.mrf.mxu1  ;;  %v2616_v60 = vpop.f32.mrf.mxu0  ;;  %12559 = vst [vmem:[#allocation80_spill] sm:$0xff] %v9780_v30  ;;  %v9814_v58 = vadd.f32 %v9676_v62, %v2927_v31  ;;  %v2989_v28 = vmin.f32 %v9780_v30, 20.0  ;;  %v2639_v44 = vadd.f32 %v9625_v22, %v2539_v43  ;;  %vm2930_vm5 = vweird.f32 %v9676_v62 }
 0x5e1   :  { %v2542_v35 = vadd.f32 %v2541_v59, %v9630_v0  ;;  %v9788_v0 = vsel %vm9708_vm10, %v2921_v50, %v2917_v48  ;;  %12560 = vst [vmem:[#allocation64_spill] sm:$0xff] %v9790_v53  ;;  %v12562_v59 = vld [vmem:[#allocation60_spill] sm:$0xff]  ;;  %v9801_v14 = vpop.eup %5967  ;;  %v2636_v50 = vadd.f32 %v9406_v49, %v2530_v26  ;;  %v2990_v49 = vmin.f32 %v9793_v24, 20.0 }
 0x5e2   :  { %12561 = vst [vmem:[#allocation78_spill] sm:$0xff] %v9793_v24  ;;  %v2527_v1 = vadd.f32 %v12562_v59, %v9303_v25  ;;  %v12565_v25 = vld [vmem:[#allocation77_spill] sm:$0xff]  ;;  %v9816_v40 = vpop.eup %5969  ;;  %v2956_v47 = vsub.f32 1.0, %v9799_v57  ;;  %v3042_v2 = vadd.f32 1.0, %v9801_v14  ;;  %v3007_v48 = vmul.f32 1.442695, %v2988_v20 }
 0x5e3   :  { %12563 = vst [vmem:[#allocation5_spill] sm:$0xff] %v9801_v14  ;;  %v2640_v18 = vadd.f32 %v2616_v60, %v2542_v35  ;;  %v2533_v4 = vadd.f32 %v12566_v8, %v12565_v25  ;;  %v12568_v60 = vld [vmem:[#allocation62_spill] sm:$0xff]  ;;  %v2991_v10 = vmin.f32 %v9805_v7, 20.0  ;;  %v9835_v26 = vadd.f32 %v9588_v11, %v2636_v50 }
 0x5e4   :  { %12564 = vst [vmem:[#allocation6_spill] sm:$0xff] %v9805_v7  ;;  %v2635_v41 = vadd.f32 %v12568_v60, %v2527_v1  ;;  %vm2929_vm7 = vweird.f32 %v9577_v16  ;;  %v3051_v43 = vadd.f32 1.0, %v9816_v40  ;;  %v3009_v59 = vmul.f32 1.442695, %v2989_v28 }
 0x5e5   :  { %12567 = vst [vmem:[#allocation7_spill] sm:$0xff] %v9816_v40  ;;  %v9832_v35 = vadd.f32 %v9588_v11, %v2640_v18  ;;  %v9841_v1 = vadd.f32 %v9588_v11, %v2639_v44  ;;  %v2993_v50 = vmin.f32 %v9835_v26, 20.0  ;;  %vm2944_vm14 = vweird.f32 %v9661_v5  ;;  %vm9891_vm13 = vmor %vm2929_vm7, %vm2930_vm5 }
 0x5e6   :  { %v9845_v57 = vadd.f32 %v9588_v11, %v2635_v41  ;;  %vm2945_vm11 = vweird.f32 %v9742_v52  ;;  %vm9863_vm2 = vcmp.eq.f32.partialorder %v2933_v63, 8.507059e+37  ;;  %v2942_v41 = vmul.f32 %v9742_v52, %v2941_v61 }
 0x5e7   :  { %v2957_v63 = vmul.f32 %v9765_v54, %v2956_v47  ;;  %vm9883_vm0 = vcmp.eq.f32.partialorder %v2948_v13, 8.507059e+37  ;;  %v2932_v13 = vsel %vm9891_vm13, %v9676_v62, %v9814_v58  ;;  %vm2960_vm15 = vweird.f32 %v9765_v54  ;;  %vm9924_vm6 = vmor %vm2944_vm14, %vm2945_vm11 }
 0x5e8   :  { %v2544_v12 = vpop.f32.mrf.mxu1  ;;  %v2619_v33 = vpop.f32.mrf.mxu0  ;;  %v2943_v16 = vadd.f32 %v9742_v52, %v2942_v41  ;;  %vm2959_vm8 = vweird.f32 %v9678_v9 }
 0x5e9   :  { %v2545_v56 = vadd.f32 %v2544_v12, %v2479_v45  ;;  %v2536_v45 = vadd.f32 %v9541_v17, %v9445_v37  ;;  %v3033_v17 = vadd.f32 1.0, %v9790_v53  ;;  %vm9937_vm3 = vmor %vm2959_vm8, %vm2960_vm15  ;;  %vm2981_vm15 = vcmp.gt.f32.partialorder %v9832_v35, 20.0 }
 0x5ea   :  { %v2947_v5 = vsel %vm9924_vm6, %v9742_v52, %v2943_v16  ;;  %v3054_v52 = vmul.f32 -0.5, %v9816_v40 }
 0x5eb   :  { %v2641_v29 = vadd.f32 %v2619_v33, %v2545_v56  ;;  %v2638_v22 = vadd.f32 %v9543_v55, %v2536_v45  ;;  %v12569_v56 = vld [vmem:[#allocation72_spill] sm:$0xff]  ;;  %5971 = vlog2.f32 %v3033_v17  ;;  %v3013_v45 = vmul.f32 1.442695, %v2991_v10  ;;  %v2485_v17 = vpop.f32.mrf.mxu3 }
 0x5ec   :  { %v2637_v39 = vadd.f32 %v12569_v56, %v2533_v4  ;;  %5973 = vlog2.f32 %v3042_v2  ;;  %v2996_v4 = vmin.f32 %v9841_v1, 20.0  ;;  %v3017_v56 = vmul.f32 1.442695, %v2993_v50 }
 0x5ed   :  { %v9821_v37 = vadd.f32 %v9588_v11, %v2641_v29  ;;  %v3011_v29 = vmul.f32 1.442695, %v2990_v49  ;;  %5975 = vpow2.f32 %v3007_v48  ;;  %v9848_v18 = vadd.f32 %v9588_v11, %v2638_v22 }
 0x5ee   :  { %v9853_v25 = vadd.f32 %v9588_v11, %v2637_v39  ;;  %5977 = vlog2.f32 %v3051_v43  ;;  %v2992_v49 = vmin.f32 %v9845_v57, 20.0  ;;  %v3023_v61 = vmul.f32 1.442695, %v2996_v4 }
 0x5ef   :  { %v2998_v55 = vmin.f32 %v9821_v37, 20.0  ;;  %5979 = vpow2.f32 %v3009_v59  ;;  %v2995_v48 = vmin.f32 %v9848_v18, 20.0 }
 0x5f0   :  { %v2547_v12 = vpop.f32.mrf.mxu1  ;;  %v2622_v33 = vpop.f32.mrf.mxu0  ;;  %5981 = vpow2.f32 %v3011_v29  ;;  %v2994_v39 = vmin.f32 %v9853_v25, 20.0  ;;  %v2965_v29 = vand.u32 2147483648, %v9678_v9 }
 0x5f1   :  { %v2548_v31 = vadd.f32 %v2547_v12, %v2482_v3  ;;  %v2997_v3 = vmin.f32 %v9832_v35, 20.0  ;;  %v3027_v28 = vmul.f32 1.442695, %v2998_v55  ;;  %v9870_v2 = vpop.eup %5971  ;;  %5983 = vpow2.f32 %v3013_v45 }
 0x5f2   :  { %12572 = vst [vmem:[#allocation9_spill] sm:$0xff] %v9870_v2  ;;  %v2963_v55 = vand.u32 2147483647, %v9678_v9  ;;  %v9931_v9 = vsel %vm9863_vm2, %v9746_v23, %v2932_v13 }
 0x5f3   :  { %v2642_v20 = vadd.f32 %v2622_v33, %v2548_v31  ;;  %v3025_v10 = vmul.f32 1.442695, %v2997_v3  ;;  %v9874_v33 = vpop.eup %5973  ;;  %5985 = vpow2.f32 %v3027_v28  ;;  %v3015_v3 = vmul.f32 1.442695, %v2992_v49 }
 0x5f4   :  { %12573 = vst [vmem:[#allocation10_spill] sm:$0xff] %v9874_v33  ;;  %v9877_v59 = vpop.eup %5975  ;;  %v3021_v28 = vmul.f32 1.442695, %v2995_v48  ;;  %vm9914_vm10 = vcmp.eq.f32.partialorder %v2963_v55, 8.507059e+37  ;;  %v2966_v48 = vor.u32 1.1754944e-38, %v2965_v29  ;;  %v3045_v29 = vmul.f32 -0.5, %v9801_v14 }
 0x5f5   :  { %v9856_v8 = vadd.f32 %v9588_v11, %v2642_v20  ;;  %12574 = vst [vmem:[#allocation11_spill] sm:$0xff] %v9877_v59  ;;  %v9895_v45 = vpop.eup %5977  ;;  %v3060_v58 = vadd.f32 1.0, %v9877_v59 }
 0x5f6   :  { %12579 = vst [vmem:[#allocation12_spill] sm:$0xff] %v9895_v45  ;;  %v9901_v4 = vpop.eup %5979 }
 0x5f7   :  { %v2999_v60 = vmin.f32 %v9856_v8, 20.0  ;;  %vm2983_vm11 = vcmp.gt.f32.partialorder %v9856_v8, 20.0 }
 0x5f8   :  { %v2550_v22 = vpop.f32.mrf.mxu1  ;;  %v2625_v12 = vpop.f32.mrf.mxu0 }
 0x5f9   :  { %v3029_v31 = vmul.f32 1.442695, %v2999_v60  ;;  %v2551_v43 = vadd.f32 %v2550_v22, %v2485_v17  ;;  %v9905_v17 = vpop.eup %5981  ;;  %v3019_v60 = vmul.f32 1.442695, %v2994_v39  ;;  %v2958_v22 = vadd.f32 %v9765_v54, %v2957_v63 }
 0x5fa   :  { %v3036_v39 = vmul.f32 -0.5, %v9790_v53  ;;  %v3081_v16 = vmul.f32 -0.5, %v9905_v17  ;;  %v9983_v63 = vadd.f32 1.0, %v3054_v52 }
 0x5fb   :  { %5987 = vpow2.f32 %v3029_v31  ;;  %v2643_v50 = vadd.f32 %v2625_v12, %v2551_v43  ;;  %v9911_v12 = vpop.eup %5983  ;;  %v2962_v31 = vsel %vm9937_vm3, %v9765_v54, %v2958_v22  ;;  %v3078_v43 = vadd.f32 1.0, %v9905_v17 }
 0x5fc   :  { %5989 = vpow2.f32 %v3025_v10  ;;  %v9933_v10 = vpop.eup %5985  ;;  %v3087_v54 = vadd.f32 1.0, %v9911_v12  ;;  %v9975_v20 = vsel %vm9914_vm10, %v2966_v48, %v2962_v31  ;;  %12587 = vst [vmem:[#allocation60_spill] sm:$0xff] %v9983_v63  ;;  %v3090_v48 = vmul.f32 -0.5, %v9911_v12 }
 0x5fd   :  { %5991 = vpow2.f32 %v3017_v56  ;;  %v9908_v49 = vadd.f32 %v9588_v11, %v2643_v50  ;;  %v3069_v56 = vadd.f32 1.0, %v9901_v4  ;;  %v3063_v50 = vmul.f32 -0.5, %v9877_v59 }
 0x5fe   :  { %5993 = vpow2.f32 %v3023_v61  ;;  %v3153_v38 = vmul.f32 -0.5, %v9933_v10  ;;  %vm2980_vm10 = vcmp.gt.f32.partialorder %v9841_v1, 20.0  ;;  %vm2979_vm3 = vcmp.gt.f32.partialorder %v9848_v18, 20.0 }
 0x5ff   :  { %5995 = vpow2.f32 %v3015_v3  ;;  %v3000_v41 = vmin.f32 %v9908_v49, 20.0  ;;  %v9962_v3 = vsel %vm9883_vm0, %v9784_v51, %v2947_v5  ;;  %v9985_v5 = vadd.f32 1.0, %v3045_v29 }
 0x600   :  { %5997 = vpow2.f32 %v3021_v28  ;;  %v3150_v28 = vadd.f32 1.0, %v9933_v10  ;;  %v3154_v24 = vadd.f32 1.0, %v3153_v38  ;;  %vm2984_vm14 = vcmp.gt.f32.partialorder %v9908_v49, 20.0 }
 0x601   :  { %v9946_v44 = vpop.eup %5987  ;;  %5999 = vpow2.f32 %v3019_v60  ;;  %v3031_v23 = vmul.f32 1.442695, %v3000_v41  ;;  %v3072_v60 = vmul.f32 -0.5, %v9901_v4  ;;  %12588 = vst [vmem:[#allocation77_spill] sm:$0xff] %v9985_v5  ;;  %v10010_v5 = vadd.f32 1.0, %v3090_v48 }
 0x602   :  { %v9952_v61 = vpop.eup %5989  ;;  %v3159_v55 = vadd.f32 1.0, %v9946_v44  ;;  %6001 = vlog2.f32 %v3060_v58  ;;  %v9978_v58 = vadd.f32 1.0, %v3036_v39  ;;  %v3162_v29 = vmul.f32 -0.5, %v9946_v44 }
 0x603   :  { %v9957_v47 = vpop.eup %5991  ;;  %6003 = vpow2.f32 %v3031_v23  ;;  %v3141_v51 = vadd.f32 1.0, %v9952_v61  ;;  %v9991_v23 = vadd.f32 1.0, %v3063_v50  ;;  %v3144_v36 = vmul.f32 -0.5, %v9952_v61 }
 0x604   :  { %v9966_v13 = vpop.eup %5993  ;;  %6005 = vlog2.f32 %v3069_v56  ;;  %12586 = vst [vmem:[#allocation15_spill] sm:$0xff] %v9978_v58  ;;  %v3105_v11 = vadd.f32 1.0, %v9957_v47  ;;  %v3163_v63 = vadd.f32 1.0, %v3162_v29  ;;  %vm2982_vm0 = vcmp.gt.f32.partialorder %v9821_v37, 20.0 }
 0x605   :  { %v9971_v22 = vpop.eup %5995  ;;  %6007 = vlog2.f32 %v3078_v43  ;;  %v3132_v62 = vadd.f32 1.0, %v9966_v13  ;;  %12589 = vst [vmem:[#allocation61_spill] sm:$0xff] %v9991_v23  ;;  %v9996_v43 = vadd.f32 1.0, %v3081_v16 }
 0x606   :  { %v9980_v41 = vpop.eup %5997  ;;  %6009 = vlog2.f32 %v3159_v55  ;;  %v3099_v31 = vmul.f32 -0.5, %v9971_v22  ;;  %v9998_v55 = vadd.f32 1.0, %v3072_v60  ;;  %v3096_v53 = vadd.f32 1.0, %v9971_v22 }
 0x607   :  { %v9987_v56 = vpop.eup %5999  ;;  %6011 = vlog2.f32 %v3087_v54  ;;  %v3123_v32 = vadd.f32 1.0, %v9980_v41  ;;  %v3108_v54 = vmul.f32 -0.5, %v9957_v47  ;;  %v3126_v34 = vmul.f32 -0.5, %v9980_v41 }
 0x608   :  { %v9993_v39 = vpop.eup %6001  ;;  %6013 = vlog2.f32 %v3150_v28  ;;  %12591 = vst [vmem:[#allocation72_spill] sm:$0xff] %v9998_v55  ;;  %v3114_v58 = vadd.f32 1.0, %v9987_v56  ;;  %v3117_v28 = vmul.f32 -0.5, %v9987_v56  ;;  %v10018_v30 = vadd.f32 1.0, %v3099_v31 }
 0x609   :  { %12590 = vst [vmem:[#allocation62_spill] sm:$0xff] %v9993_v39  ;;  %v6004_v52 = vpop.eup %6003  ;;  %6015 = vlog2.f32 %v3141_v51  ;;  %v3129_v6 = vand.u32 2147483647, %v9980_v41  ;;  %v3145_v31 = vadd.f32 1.0, %v3144_v36  ;;  %v3127_v45 = vadd.f32 1.0, %v3126_v34 }
 0x60a   :  { %v10003_v19 = vpop.eup %6005  ;;  %v3168_v50 = vadd.f32 1.0, %v6004_v52  ;;  %6017 = vlog2.f32 %v3105_v11  ;;  %v3171_v60 = vmul.f32 -0.5, %v6004_v52  ;;  %v3135_v11 = vmul.f32 -0.5, %v9966_v13 }
 0x60b   :  { %v10007_v16 = vpop.eup %6007  ;;  %6019 = vlog2.f32 %v3132_v62  ;;  %v3165_v62 = vand.u32 2147483647, %v9946_v44  ;;  %v10021_v48 = vadd.f32 1.0, %v3117_v28  ;;  %v3174_v40 = vand.u32 2147483647, %v6004_v52 }
 0x60c   :  { %v6010_v51 = vpop.eup %6009  ;;  %6021 = vlog2.f32 %v3168_v50  ;;  %v10023_v50 = vadd.f32 1.0, %v3108_v54  ;;  %v3172_v33 = vadd.f32 1.0, %v3171_v60  ;;  %v3164_v7 = vmul.f32 %v9946_v44, %v3163_v63 }
 0x60d   :  { %v10015_v2 = vpop.eup %6011  ;;  %6023 = vlog2.f32 %v3123_v32  ;;  %v3161_v23 = vmul.f32 0.6931472, %v6010_v51  ;;  %v3156_v32 = vand.u32 2147483647, %v9933_v10  ;;  %v3136_v28 = vadd.f32 1.0, %v3135_v11 }
 0x60e   :  { %v6014_v42 = vpop.eup %6013  ;;  %6025 = vlog2.f32 %v3114_v58  ;;  %v3138_v54 = vand.u32 2147483647, %v9966_v13  ;;  %vm10029_vm12 = vcmp.lt.f32.partialorder %v3165_v62, 0.0004427343  ;;  %v3147_v51 = vand.u32 2147483647, %v9952_v61 }
 0x60f   :  { %v6016_v14 = vpop.eup %6015  ;;  %v3152_v58 = vmul.f32 0.6931472, %v6014_v42  ;;  %6027 = vlog2.f32 %v3096_v53  ;;  %v3173_v36 = vmul.f32 %v6004_v52, %v3172_v33  ;;  %v3167_v34 = vsel %vm10029_vm12, %v3164_v7, %v3161_v23 }
 0x610   :  { %v6018_v29 = vpop.eup %6017  ;;  %v3143_v38 = vmul.f32 0.6931472, %v6016_v14  ;;  %v3155_v42 = vmul.f32 %v9933_v10, %v3154_v24  ;;  %vm3175_vm5 = vcmp.lt.f32.partialorder %v3174_v40, 0.0004427343  ;;  %vm10037_vm7 = vcmp.lt.f32.partialorder %v3156_v32, 0.0004427343 }
 0x611   :  { %v6020_v55 = vpop.eup %6019  ;;  %v3146_v11 = vmul.f32 %v9952_v61, %v3145_v31  ;;  %v3191_v24 = vsel %vm2983_vm11, %v9856_v8, %v3167_v34  ;;  %vm10048_vm2 = vcmp.lt.f32.partialorder %v3147_v51, 0.0004427343  ;;  %v3137_v23 = vmul.f32 %v9966_v13, %v3136_v28  ;;  %v12622_v40 = vld [vmem:[#allocation6_spill] sm:$0xff]  ;;  %v12653_v34 = vld [vmem:[#allocation65_spill] sm:$0xff] }
 0x612   :  { %v6022_v27 = vpop.eup %6021  ;;  %v3134_v14 = vmul.f32 0.6931472, %v6020_v55  ;;  %vm10058_vm13 = vcmp.lt.f32.partialorder %v3138_v54, 0.0004427343  ;;  %v3120_v52 = vand.u32 2147483647, %v9987_v56  ;;  %v3128_v13 = vmul.f32 %v9980_v41, %v3127_v45 }
 0x613   :  { %v6024_v59 = vpop.eup %6023  ;;  %v3170_v39 = vmul.f32 0.6931472, %v6022_v27  ;;  %v3158_v27 = vsel %vm10037_vm7, %v3155_v42, %v3152_v58  ;;  %v3149_v61 = vsel %vm10048_vm2, %v3146_v11, %v3143_v38  ;;  %vm10069_vm8 = vcmp.lt.f32.partialorder %v3129_v6, 0.0004427343  ;;  %v12640_v6 = vld [vmem:[#allocation93_spill] sm:$0xff]  ;;  %v12666_v11 = vld [vmem:[#allocation15_spill] sm:$0xff] }
 0x614   :  { %v6026_v44 = vpop.eup %6025  ;;  %v3125_v33 = vmul.f32 0.6931472, %v6024_v59  ;;  %v3190_v55 = vsel %vm2982_vm0, %v9821_v37, %v3158_v27  ;;  %v3207_v59 = vmul.f32 %v3191_v24, %v9962_v3  ;;  %v3189_v62 = vsel %vm2981_vm15, %v9832_v35, %v3149_v61 }
 0x615   :  { %v3176_v53 = vsel %vm3175_vm5, %v3173_v36, %v3170_v39  ;;  %v6028_v39 = vpop.eup %6027  ;;  %v3116_v8 = vmul.f32 0.6931472, %v6026_v44  ;;  %v3107_v32 = vmul.f32 0.6931472, %v6018_v29  ;;  %v3111_v31 = vand.u32 2147483647, %v9957_v47 }
 0x616   :  { %v3192_v7 = vsel %vm2984_vm14, %v9908_v49, %v3176_v53  ;;  %v3206_v58 = vmul.f32 %v3190_v55, %v9931_v9  ;;  %v3131_v3 = vsel %vm10069_vm8, %v3128_v13, %v3125_v33  ;;  %v3119_v45 = vmul.f32 %v9987_v56, %v10021_v48  ;;  %v12608_v36 = vld [vmem:[#allocation86_spill] sm:$0xff]  ;;  %v12611_v44 = vld [vmem:[#allocation52_spill] sm:$0xff]  ;;  %v12629_v49 = vld [vmem:[#allocation69_spill] sm:$0xff] }
 0x617   :  { %v3208_v10 = vmul.f32 %v3192_v7, %v9975_v20  ;;  %v3140_v20 = vsel %vm10058_vm13, %v3137_v23, %v3134_v14  ;;  %vm10081_vm6 = vcmp.lt.f32.partialorder %v3120_v52, 0.0004427343  ;;  %v3098_v41 = vmul.f32 0.6931472, %v6028_v39  ;;  %v12619_v53 = vld [vmem:[#allocation62_spill] sm:$0xff]  ;;  %v12620_v7 = vld [vmem:[#allocation11_spill] sm:$0xff] }
 0x618   :  { %v3188_v35 = vsel %vm2980_vm10, %v9841_v1, %v3140_v20  ;;  %v3102_v29 = vand.u32 2147483647, %v9971_v22  ;;  %v3205_v9 = vmul.f32 %v3189_v62, %v9788_v0  ;;  %v3122_v28 = vsel %vm10081_vm6, %v3119_v45, %v3116_v8  ;;  %v12628_v55 = vld [vmem:[#allocation54_spill] sm:$0xff]  ;;  %v12633_v13 = vld [vmem:[#allocation7_spill] sm:$0xff] }
 0x619   :  { %3209 = vmatpush.msra.mxu2 %v3208_v10  ;;  %v3110_v56 = vmul.f32 %v9957_v47, %v10023_v50  ;;  %v3187_v1 = vsel %vm2979_vm3, %v9848_v18, %v3131_v3  ;;  %vm10093_vm12 = vcmp.lt.f32.partialorder %v3111_v31, 0.0004427343  ;;  %v3089_v54 = vmul.f32 0.6931472, %v10015_v2  ;;  %v12623_v10 = vld [vmem:[#allocation72_spill] sm:$0xff]  ;;  %v12634_v62 = vld [vmem:[#allocation71_spill] sm:$0xff] }
 0x61a   :  { %v3093_v60 = vand.u32 2147483647, %v9911_v12  ;;  %v3204_v0 = vmul.f32 %v3188_v35, %v9763_v21  ;;  %vm2978_vm5 = vcmp.gt.f32.partialorder %v9853_v25, 20.0  ;;  %v3101_v47 = vmul.f32 %v9971_v22, %v10018_v30  ;;  %v12645_v48 = vld [vmem:[#allocation82_spill] sm:$0xff]  ;;  %v12682_v35 = vld [vmem:[#allocation88_spill] sm:$0xff] }
 0x61b   :  { %3210 = vmatpush.msra.mxu2 %v3207_v59  ;;  %v3113_v38 = vsel %vm10093_vm12, %v3110_v56, %v3107_v32  ;;  %v3186_v18 = vsel %vm2978_vm5, %v9853_v25, %v3122_v28  ;;  %vm10106_vm7 = vcmp.lt.f32.partialorder %v3102_v29, 0.0004427343  ;;  %v3080_v2 = vmul.f32 0.6931472, %v10007_v16  ;;  %v12632_v59 = vld [vmem:[#allocation12_spill] sm:$0xff]  ;;  %v12635_v32 = vld [vmem:[#allocation78_spill] sm:$0xff] }
 0x61c   :  { %v3084_v51 = vand.u32 2147483647, %v9905_v17  ;;  %vm2765_vm14 = vweird.f32 %v12608_v36  ;;  %v3203_v21 = vmul.f32 %v3187_v1, %v9740_v15  ;;  %vm2977_vm11 = vcmp.gt.f32.partialorder %v9835_v26, 20.0  ;;  %v12644_v56 = vld [vmem:[#allocation5_spill] sm:$0xff] }
 0x61d   :  { %3211 = vmatpush.msra.mxu2 %v3206_v58  ;;  %v3104_v30 = vsel %vm10106_vm7, %v3101_v47, %v3098_v41  ;;  %v3092_v25 = vmul.f32 %v9911_v12, %v10010_v5  ;;  %v3185_v22 = vsel %vm2977_vm11, %v9835_v26, %v3113_v38  ;;  %vm10120_vm2 = vcmp.lt.f32.partialorder %v3093_v60, 0.0004427343  ;;  %v12612_v5 = vld [vmem:[#allocation63_spill] sm:$0xff]  ;;  %v12636_v58 = vld [vmem:[#allocation61_spill] sm:$0xff]  ;;  %v12646_v60 = vld [vmem:[#allocation80_spill] sm:$0xff] }
 0x61e   :  { %v3071_v16 = vmul.f32 0.6931472, %v10003_v19  ;;  %v3075_v42 = vand.u32 2147483647, %v9901_v4  ;;  %vm2764_vm0 = vweird.f32 %v12611_v44  ;;  %v3202_v15 = vmul.f32 %v3186_v18, %v9687_v46  ;;  %v12616_v19 = vld [vmem:[#allocation79_spill] sm:$0xff]  ;;  %v12647_v38 = vld [vmem:[#allocation60_spill] sm:$0xff] }
 0x61f   :  { %3212 = vmatpush.msra.mxu2 %v3205_v9  ;;  %vm2976_vm13 = vcmp.gt.f32.partialorder %v9845_v57, 20.0  ;;  %v3095_v12 = vsel %vm10120_vm2, %v3092_v25, %v3089_v54  ;;  %v3083_v26 = vmul.f32 %v9905_v17, %v9996_v43  ;;  %v12613_v63 = vand.u32 2147483647, %v12612_v5  ;;  %v12621_v17 = vld [vmem:[#allocation68_spill] sm:$0xff]  ;;  %v12643_v9 = vld [vmem:[#allocation10_spill] sm:$0xff]  ;;  %v12652_v25 = vld [vmem:[#allocation67_spill] sm:$0xff] }
 0x620   :  { %vm2750_vm8 = vweird.f32 %v12616_v19  ;;  %v3184_v14 = vsel %vm2976_vm13, %v9845_v57, %v3104_v30  ;;  %vm10141_vm10 = vcmp.lt.f32.partialorder %v3084_v51, 0.0004427343  ;;  %v3062_v27 = vmul.f32 0.6931472, %v12619_v53  ;;  %v12624_v57 = vld [vmem:[#allocation55_spill] sm:$0xff] }
 0x621   :  { %3213 = vmatpush.msra.mxu2 %v3204_v0  ;;  %vm10135_vm15 = vcmp.eq.f32.partialorder %v12613_v63, 8.507059e+37  ;;  %v3066_v24 = vand.u32 2147483647, %v12620_v7  ;;  %v3201_v43 = vmul.f32 %v3185_v22, %v12621_v17  ;;  %vm2975_vm6 = vcmp.gt.f32.partialorder %v12622_v40, 20.0  ;;  %v12658_v5 = vld [vmem:[#allocation51_spill] sm:$0xff]  ;;  %v12702_v17 = vld [vmem:[#allocation16_spill] sm:$0xff] }
 0x622   :  { %v3086_v33 = vsel %vm10141_vm10, %v3083_v26, %v3080_v2  ;;  %v3074_v61 = vmul.f32 %v9901_v4, %v12623_v10  ;;  %v12625_v23 = vand.u32 2147483647, %v12624_v57  ;;  %vm2749_vm12 = vweird.f32 %v12628_v55  ;;  %v12650_v2 = vld [vmem:[#allocation9_spill] sm:$0xff]  ;;  %v12659_v63 = vld [vmem:[#allocation75_spill] sm:$0xff]  ;;  %v12693_v26 = vld [vmem:[#allocation92_spill] sm:$0xff] }
 0x623   :  { %3214 = vmatpush.msra.mxu2 %v3203_v21  ;;  %vm2735_vm5 = vweird.f32 %v12629_v49  ;;  %v3183_v8 = vsel %vm2975_vm6, %v12622_v40, %v3095_v12  ;;  %vm10162_vm7 = vcmp.lt.f32.partialorder %v3075_v42, 0.0004427343  ;;  %v3053_v20 = vmul.f32 0.6931472, %v12632_v59  ;;  %v12651_v21 = vld [vmem:[#allocation64_spill] sm:$0xff]  ;;  %v12661_v46 = vld [vmem:[#allocation83_spill] sm:$0xff] }
 0x624   :  { %vm10155_vm3 = vcmp.eq.f32.partialorder %v12625_v23, 8.507059e+37  ;;  %v3057_v4 = vand.u32 2147483647, %v12633_v13  ;;  %v3200_v37 = vmul.f32 %v3184_v14, %v12634_v62  ;;  %vm2974_vm11 = vcmp.gt.f32.partialorder %v12635_v32, 20.0  ;;  %v12665_v40 = vld [vmem:[#allocation66_spill] sm:$0xff]  ;;  %v12668_v57 = vld [vmem:[#allocation91_spill] sm:$0xff] }
 0x625   :  { %3215 = vmatpush.msra.mxu2 %v3202_v15  ;;  %v3077_v31 = vsel %vm10162_vm7, %v3074_v61, %v3071_v16  ;;  %v3065_v3 = vmul.f32 %v12620_v7, %v12636_v58  ;;  %v12637_v45 = vand.u32 2147483647, %v12611_v44  ;;  %vm2734_vm13 = vweird.f32 %v12640_v6  ;;  %v12656_v15 = vld [vmem:[#allocation77_spill] sm:$0xff]  ;;  %v12669_v23 = vld [vmem:[#allocation76_spill] sm:$0xff] }
 0x626   :  { %v3182_v41 = vsel %vm2974_vm11, %v12635_v32, %v3086_v33  ;;  %vm10182_vm10 = vcmp.lt.f32.partialorder %v3066_v24, 0.0004427343  ;;  %v3044_v28 = vmul.f32 0.6931472, %v12643_v9  ;;  %v3048_v1 = vand.u32 2147483647, %v12644_v56 }
 0x627   :  { %3216 = vmatpush.msra.mxu2 %v3201_v43  ;;  %vm10176_vm2 = vcmp.eq.f32.partialorder %v12637_v45, 8.507059e+37  ;;  %v3199_v54 = vmul.f32 %v3183_v8, %v12645_v48  ;;  %vm2973_vm6 = vcmp.gt.f32.partialorder %v12646_v60, 20.0  ;;  %v3068_v0 = vsel %vm10182_vm10, %v3065_v3, %v3062_v27  ;;  %vm10207_vm10 = vmor %vm2764_vm0, %vm2765_vm14  ;;  %v12662_v7 = vld [vmem:[#allocation85_spill] sm:$0xff]  ;;  %v12678_v32 = vld [vmem:[#allocation59_spill] sm:$0xff] }
 0x628   :  { %v3056_v47 = vmul.f32 %v12633_v13, %v12647_v38  ;;  %v3181_v18 = vsel %vm2973_vm6, %v12646_v60, %v3077_v31  ;;  %vm10195_vm7 = vcmp.lt.f32.partialorder %v3057_v4, 0.0004427343  ;;  %v3035_v51 = vmul.f32 0.6931472, %v12650_v2  ;;  %v12681_v9 = vld [vmem:[#allocation84_spill] sm:$0xff]  ;;  %v12708_v61 = vld [vmem:[#allocation17_spill] sm:$0xff] }
 0x629   :  { %3217 = vmatpush.msra.mxu2 %v3200_v37  ;;  %v3039_v30 = vand.u32 2147483647, %v12651_v21  ;;  %v3198_v22 = vmul.f32 %v3182_v41, %v12652_v25  ;;  %vm2972_vm11 = vcmp.gt.f32.partialorder %v12653_v34, 20.0  ;;  %v3047_v12 = vmul.f32 %v12644_v56, %v12656_v15  ;;  %v12677_v37 = vld [vmem:[#allocation89_spill] sm:$0xff]  ;;  %v12689_v16 = vld [vmem:[#allocation56_spill] sm:$0xff]  ;;  %v12717_v4 = vld [vmem:[#allocation38_spill] sm:$0xff] }
 0x62a   :  { %v3059_v42 = vsel %vm10195_vm7, %v3056_v47, %v3053_v20  ;;  %v12660_v14 = vsel %vm9494_vm4, %v12658_v5, %v12659_v63  ;;  %v3180_v27 = vsel %vm2972_vm11, %v12653_v34, %v3068_v0  ;;  %v2767_v24 = vsel %vm10207_vm10, %v12608_v36, %v12662_v7  ;;  %v12671_v36 = vld [vmem:[#allocation73_spill] sm:$0xff]  ;;  %vm10252_vm4 = vmor %vm2749_vm12, %vm2750_vm8  ;;  %v12695_v63 = vld [vmem:[#allocation74_spill] sm:$0xff] }
 0x62b   :  { %3218 = vmatpush.msra.mxu2 %v3199_v54  ;;  %v2802_v53 = vsel %vm10135_vm15, %v12661_v46, %v12660_v14  ;;  %vm10228_vm14 = vcmp.lt.f32.partialorder %v3048_v1, 0.0004427343  ;;  %vm2971_vm0 = vcmp.gt.f32.partialorder %v12665_v40, 20.0  ;;  %v3038_v10 = vmul.f32 %v12651_v21, %v12666_v11  ;;  %vm2736_vm8 = vmor %vm2734_vm13, %vm2735_vm5  ;;  %v12691_v15 = vld [vmem:[#allocation57_spill] sm:$0xff] }
 0x62c   :  { %v3197_v43 = vmul.f32 %v3181_v18, %v2802_v53  ;;  %v3050_v33 = vsel %vm10228_vm14, %v3047_v12, %v3044_v28  ;;  %v12670_v8 = vsel %vm9439_vm9, %v12668_v57, %v12669_v23  ;;  %v12672_v59 = vand.u32 2147483648, %v12611_v44  ;;  %v12697_v46 = vld [vmem:[#allocation81_spill] sm:$0xff]  ;;  %v12709_v57 = vld [vmem:[#allocation30_spill] sm:$0xff] }
 0x62d   :  { %3219 = vmatpush.msra.mxu2 %v3198_v22  ;;  %v2787_v52 = vsel %vm10155_vm3, %v12671_v36, %v12670_v8  ;;  %v3179_v13 = vsel %vm2971_vm0, %v12665_v40, %v3059_v42  ;;  %vm10256_vm15 = vcmp.lt.f32.partialorder %v3039_v30, 0.0004427343  ;;  %v2752_v44 = vsel %vm10252_vm4, %v12616_v19, %v12677_v37  ;;  %v12685_v30 = vld [vmem:[#allocation58_spill] sm:$0xff]  ;;  %v12687_v22 = vld [vmem:[#allocation53_spill] sm:$0xff]  ;;  %v12704_v40 = vld [vmem:[#allocation19_spill] sm:$0xff] }
 0x62e   :  { %v2771_v20 = vor.u32 1.1754944e-38, %v12672_v59  ;;  %v3196_v39 = vmul.f32 %v3180_v27, %v2787_v52  ;;  %vm2970_vm9 = vcmp.gt.f32.partialorder %v12678_v32, 20.0  ;;  %v3041_v31 = vsel %vm10256_vm15, %v3038_v10, %v3035_v51  ;;  %v12699_v27 = vld [vmem:[#allocation87_spill] sm:$0xff]  ;;  %v12706_v11 = vld [vmem:[#allocation25_spill] sm:$0xff]  ;;  %v12711_v8 = vld [vmem:[#allocation32_spill] sm:$0xff] }
 0x62f   :  { %3220 = vmatpush.msra.mxu2 %v3197_v43  ;;  %v12679_v3 = vand.u32 2147483648, %v12628_v55  ;;  %v3178_v41 = vsel %vm2970_vm9, %v12678_v32, %v3050_v33  ;;  %v12680_v29 = vand.u32 2147483647, %v12628_v55  ;;  %v2737_v28 = vsel %vm2736_vm8, %v12629_v49, %v12681_v9  ;;  %v12703_v43 = vld [vmem:[#allocation20_spill] sm:$0xff]  ;;  %v12707_v10 = vld [vmem:[#allocation27_spill] sm:$0xff]  ;;  %v12710_v23 = vld [vmem:[#allocation21_spill] sm:$0xff] }
 0x630   :  { %v2772_v58 = vsel %vm10176_vm2, %v2771_v20, %v2767_v24  ;;  %vm2969_vm12 = vcmp.gt.f32.partialorder %v12682_v35, 20.0  ;;  %v12683_v1 = vand.u32 2147483648, %v12640_v6  ;;  %v12684_v0 = vand.u32 2147483647, %v12640_v6  ;;  %v12701_v24 = vld [vmem:[#allocation14_spill] sm:$0xff]  ;;  %v12705_v33 = vld [vmem:[#allocation24_spill] sm:$0xff] }
 0x631   :  { %v2756_v45 = vor.u32 1.1754944e-38, %v12679_v3  ;;  %3221 = vmatpush.msra.mxu2 %v3196_v39  ;;  %v3195_v19 = vmul.f32 %v3179_v13, %v2772_v58  ;;  %vm2754_vm3 = vcmp.eq.f32.partialorder %v12680_v29, 8.507059e+37  ;;  %v3177_v54 = vsel %vm2969_vm12, %v12682_v35, %v3041_v31  ;;  %v12712_v36 = vld [vmem:[#allocation23_spill] sm:$0xff]  ;;  %v12713_v52 = vld [vmem:[#allocation34_spill] sm:$0xff]  ;;  %v12714_v59 = vld [vmem:[#allocation28_spill] sm:$0xff] }
 0x632   :  { %v2741_v48 = vor.u32 1.1754944e-38, %v12683_v1  ;;  %vm2739_vm5 = vcmp.eq.f32.partialorder %v12684_v0, 8.507059e+37  ;;  %v12715_v20 = vld [vmem:[#allocation36_spill] sm:$0xff]  ;;  %v12716_v13 = vld [vmem:[#allocation31_spill] sm:$0xff]  ;;  %v12718_v62 = vld [vmem:[#allocation33_spill] sm:$0xff]  ;;  %vm12725_vm2 = vcmask 1040384  }
 0x633   :  { %v2757_v56 = vsel %vm2754_vm3, %v2756_v45, %v2752_v44  ;;  %3222 = vmatpush.msra.mxu2 %v3195_v19  ;;  %v12719_v39 = vld [vmem:[#allocation40_spill] sm:$0xff]  ;;  %v12720_v37 = vld [vmem:[#allocation35_spill] sm:$0xff]  ;;  %v5444_v44 = vld [vmem:[%s11942_s8 + $0xb8] sm:$0xff]  ;;  %vm12734_vm13 = vcmask 334848  }
 0x634   :  { %v3194_v60 = vmul.f32 %v3178_v41, %v2757_v56  ;;  %v2742_v38 = vsel %vm2739_vm5, %v2741_v48, %v2737_v28  ;;  %3575 = vmatpush.msra.mxu0 %v5444_v44  ;;  %v12721_v32 = vld [vmem:[#allocation42_spill] sm:$0xff]  ;;  %v12722_v31 = vld [vmem:[#allocation37_spill] sm:$0xff]  ;;  %v5442_v3 = vld [vmem:[%s11942_s8 + $0xa8] sm:$0xff] }
 0x635   :  { %v3193_v55 = vmul.f32 %v3177_v54, %v2742_v38  ;;  %v5443_v58 = vld [vmem:[%s11942_s8 + $0xb0] sm:$0xff]  ;;  %v5452_v45 = vld [vmem:[%s12202_s6 + $0xb8] sm:$0xff]  ;;  %v5441_v29 = vld [vmem:[%s11942_s8 + $0xa0] sm:$0xff] }
 0x636   :  { %3223 = vmatpush.msra.mxu2 %v3194_v60  ;;  %3576 = vmatpush.msra.mxu0 %v5443_v58  ;;  %v5524_v41 = vld [vmem:[%s11943_s13 + $0xb8] sm:$0xff]  ;;  %v5451_v19 = vld [vmem:[%s12202_s6 + $0xb0] sm:$0xff]  ;;  %v12724_v56 = vld [vmem:[#allocation39_spill] sm:$0xff] }
 0x637   :  { %v5523_v9 = vld [vmem:[%s11943_s13 + $0xb0] sm:$0xff]  ;;  %v5440_v28 = vld [vmem:[%s11942_s8 + $0x98] sm:$0xff]  ;;  %v5450_v1 = vld [vmem:[%s12202_s6 + $0xa8] sm:$0xff] }
 0x638   :  { %3224 = vmatpush.msra.mxu2 %v3193_v55  ;;  %3577 = vmatpush.msra.mxu0 %v5442_v3  ;;  %v12723_v35 = vld [vmem:[#allocation44_spill] sm:$0xff]  ;;  %v5449_v60 = vld [vmem:[%s12202_s6 + $0xa0] sm:$0xff]  ;;  %v5490_v38 = vld [vmem:[%s11944_s10 + $0x88] sm:$0x1] }
 0x639   :  { %5673 = vmatmul.lmr.bf16.vlgmr.msra.gmra.8.mxu2  ;;  %v5439_v48 = vld [vmem:[%s11942_s8 + $0x90] sm:$0xff]  ;;  %v5522_v54 = vld [vmem:[%s11943_s13 + $0xa8] sm:$0xff]  ;;  %v5521_v55 = vld [vmem:[%s11943_s13 + $0xa0] sm:$0xff] }
 0x63a   :  { %3462 = vmatpush.msra.mxu2 %v5452_v45  ;;  %3578 = vmatpush.msra.mxu0 %v5441_v29  ;;  %v5438_v0 = vld [vmem:[%s11942_s8 + $0x88] sm:$0xff]  ;;  %vm12735_vm6 = vmmov %vm12734_vm13  ;;  %v10566_v45 = vld [vmem:[%s11945_s3 + $0x30] sm:$0xff] }
 0x63b   :  { %vm12736_vm7 = vmmov %vm12735_vm6  ;;  %v10579_v29 = vld [vmem:[%s11945_s3 + $0x38] sm:$0xff] }
 0x63c   :  { %3463 = vmatpush.msra.mxu2 %v5451_v19  ;;  %3579 = vmatpush.msra.mxu0 %v5440_v28  ;;  %vm12737_vm11 = vmmov %vm12735_vm6 }
 0x63d   :  { %vm12738_vm10 = vmmov %vm12735_vm6 }
 0x63e   :  { %3464 = vmatpush.msra.mxu2 %v5450_v1  ;;  %3580 = vmatpush.msra.mxu0 %v5439_v48  ;;  %vm12739_vm14 = vmmov %vm12735_vm6  ;;  %v10605_v48 = vld [vmem:[%s11945_s3 + $0x48] sm:$0xff] }
 0x63f   :  { %vm12740_vm0 = vmmov %vm12735_vm6 }
 0x640   :  { %3465 = vmatpush.msra.mxu2 %v5449_v60  ;;  %3581 = vmatpush.msra.mxu0 %v5438_v0  ;;  %vm12741_vm4 = vmmov %vm12740_vm0  ;;  %v10618_v0 = vld [vmem:[%s11945_s3 + $0x50] sm:$0xff] }
 0x641   :  { %5674 = vmatmul.lmr.bf16.gmra.8.mxu2  ;;  %vm12742_vm15 = vmmov %vm12740_vm0 }
 0x642   :  { %vm12743_vm9 = vmmov %vm12740_vm0 }
 0x643   :  { %vm12744_vm8 = vmmov %vm12740_vm0 }
 0x644   :  { %vm12745_vm3 = vmmov %vm12740_vm0 }
 0x645   :  { %vm12746_vm12 = vmmov %vm12725_vm2 }
 0x646   :  { %vm12747_vm5 = vmmov %vm12740_vm0 }
 0x649   :  { %5675 = vmatmul.lmr.bf16.gmra.8.mxu2 }
 0x651   :  { %5676 = vmatmul.lmr.bf16.gmra.8.mxu2 }
 0x659   :  { %5677 = vmatmul.lmr.bf16.gmra.8.mxu2 }
 0x661   :  { %5678 = vmatmul.lmr.bf16.gmra.8.mxu2 }
 0x669   :  { %5679 = vmatmul.lmr.bf16.gmra.8.mxu2 }
 0x671   :  { %5680 = vmatmul.lmr.bf16.gmra.8.mxu2 }
 0x6bc   :  { %v3226_v49 = vpop.f32.mrf.mxu2 }
 0x6bd   :  { %v10320_v7 = vadd.f32 %v3226_v49, %v12699_v27  ;;  %v5448_v49 = vld [vmem:[%s12202_s6 + $0x98] sm:$0xff]  ;;  %v5485_v27 = vld [vmem:[%s11944_s10 + $0x60] sm:$0xff] }
 0x6be   :  { %3466 = vmatpush.msra.mxu2 %v5448_v49  ;;  %v5516_v49 = vld [vmem:[%s11947_s12 + $0xb8] sm:$0xff] }
 0x6bf   :  { %12700 = vst [vmem:[#allocation6_spill] sm:$0xff] %v10320_v7 }
 0x6c4   :  { %v3229_v47 = vpop.f32.mrf.mxu2 }
 0x6c5   :  { %v10315_v53 = vadd.f32 %v3229_v47, %v12697_v46  ;;  %v5437_v47 = vld [vmem:[%s11942_s8 + $0x80] sm:$0xff] }
 0x6c6   :  { %3582 = vmatpush.msra.mxu0 %v5437_v47  ;;  %v5517_v46 = vld [vmem:[%s11943_s13 + $0x80] sm:$0xff]  ;;  %v4612_v47 = vld [vmem:[%s11950_s5 + $0x38] sm:$0xff] }
 0x6c7   :  { %12698 = vst [vmem:[#allocation68_spill] sm:$0xff] %v10315_v53 }
 0x6cc   :  { %v3232_v18 = vpop.f32.mrf.mxu2 }
 0x6cd   :  { %v10310_v14 = vadd.f32 %v3232_v18, %v12695_v63  ;;  %v5489_v18 = vld [vmem:[%s11944_s10 + $0x80] sm:$0xff]  ;;  %v5486_v63 = vld [vmem:[%s11944_s10 + $0x68] sm:$0xff] }
 0x6cf   :  { %12696 = vst [vmem:[#allocation11_spill] sm:$0xff] %v10310_v14 }
 0x6d4   :  { %v3235_v50 = vpop.f32.mrf.mxu2 }
 0x6d5   :  { %v10305_v5 = vadd.f32 %v3235_v50, %v12693_v26  ;;  %v5520_v50 = vld [vmem:[%s11943_s13 + $0x98] sm:$0xff]  ;;  %v5445_v26 = vld [vmem:[%s12202_s6 + $0x80] sm:$0xff] }
 0x6d7   :  { %12694 = vst [vmem:[#allocation62_spill] sm:$0xff] %v10305_v5 }
 0x6dc   :  { %v3238_v2 = vpop.f32.mrf.mxu2 }
 0x6dd   :  { %v10300_v12 = vadd.f32 %v3238_v2, %v12691_v15  ;;  %v5447_v2 = vld [vmem:[%s12202_s6 + $0x90] sm:$0xff]  ;;  %v5518_v15 = vld [vmem:[%s11943_s13 + $0x88] sm:$0xff] }
 0x6de   :  { %3467 = vmatpush.msra.mxu2 %v5447_v2  ;;  %v5514_v2 = vld [vmem:[%s11947_s12 + $0xa8] sm:$0xff] }
 0x6df   :  { %12692 = vst [vmem:[#allocation79_spill] sm:$0xff] %v10300_v12 }
 0x6e4   :  { %v3241_v51 = vpop.f32.mrf.mxu2 }
 0x6e5   :  { %v10295_v42 = vadd.f32 %v3241_v51, %v12689_v16  ;;  %v5488_v51 = vld [vmem:[%s11944_s10 + $0x78] sm:$0xff]  ;;  %v5487_v16 = vld [vmem:[%s11944_s10 + $0x70] sm:$0xff] }
 0x6e7   :  { %12690 = vst [vmem:[#allocation63_spill] sm:$0xff] %v10295_v42 }
 0x6ec   :  { %v3244_v6 = vpop.f32.mrf.mxu2 }
 0x6ed   :  { %v10290_v34 = vadd.f32 %v3244_v6, %v12687_v22  ;;  %v5519_v6 = vld [vmem:[%s11943_s13 + $0x90] sm:$0xff]  ;;  %v5446_v22 = vld [vmem:[%s12202_s6 + $0x88] sm:$0xff] }
 0x6ee   :  { %3468 = vmatpush.msra.mxu2 %v5446_v22  ;;  %v4609_v22 = vld [vmem:[%s11950_s5 + $0x20] sm:$0xff] }
 0x6ef   :  { %12688 = vst [vmem:[#allocation52_spill] sm:$0xff] %v10290_v34 }
 0x6f0   :  { %3469 = vmatpush.msra.mxu2 %v5445_v26 }
 0x6f4   :  { %v3247_v21 = vpop.f32.mrf.mxu2 }
 0x6f5   :  { %v10287_v25 = vadd.f32 %v3247_v21, %v12685_v30  ;;  %v12726_v21 = vld [vmem:[#allocation46_spill] sm:$0xff]  ;;  %v12727_v30 = vld [vmem:[#allocation41_spill] sm:$0xff] }
 0x6f7   :  { %12686 = vst [vmem:[#allocation86_spill] sm:$0xff] %v10287_v25  ;;  %3266 = vmatpush.msra.mxu3 %v10287_v25  ;;  %3331 = vmatpush.msra.mxu1 %v10287_v25  ;;  %v12780_v25 = vld [vmem:[#allocation8_spill] sm:$0xff] }
 0x6f9   :  { %3267 = vmatpush.msra.mxu3 %v10290_v34  ;;  %3332 = vmatpush.msra.mxu1 %v10290_v34 }
 0x6fb   :  { %3268 = vmatpush.msra.mxu3 %v10295_v42  ;;  %3333 = vmatpush.msra.mxu1 %v10295_v42 }
 0x6fd   :  { %3269 = vmatpush.msra.mxu3 %v10300_v12  ;;  %3334 = vmatpush.msra.mxu1 %v10300_v12 }
 0x6ff   :  { %3270 = vmatpush.msra.mxu3 %v10305_v5  ;;  %3335 = vmatpush.msra.mxu1 %v10305_v5 }
 0x701   :  { %3271 = vmatpush.msra.mxu3 %v10310_v14  ;;  %3336 = vmatpush.msra.mxu1 %v10310_v14 }
 0x703   :  { %3272 = vmatpush.msra.mxu3 %v10315_v53  ;;  %3337 = vmatpush.msra.mxu1 %v10315_v53 }
 0x705   :  { %3273 = vmatpush.msra.mxu3 %v10320_v7  ;;  %3338 = vmatpush.msra.mxu1 %v10320_v7 }
 0x706   :  { %5405 = vmatmul.msk.f32.vlgmr.msra.gmra.mxu3 %vm12149_vm1, %v12701_v24  ;;  %5421 = vmatmul.msk.f32.vlgmr.msra.gmra.mxu1 %vm12149_vm1, %v12702_v17  ;;  %v12728_v24 = vld [vmem:[#allocation48_spill] sm:$0xff]  ;;  %v12729_v17 = vld [vmem:[#allocation43_spill] sm:$0xff] }
 0x707   :  { %3770 = vmatpush.msra.mxu1 %v5524_v41  ;;  %5491 = vmatpush.msk.msra.mxu3 %vm12725_vm2, %v5490_v38  ;;  %vm12748_vm2 = vmmov %vm12740_vm0 }
 0x709   :  { %3771 = vmatpush.msra.mxu1 %v5523_v9  ;;  %3653 = vmatpush.msra.mxu3 %v5489_v18  ;;  %v5515_v18 = vld [vmem:[%s11947_s12 + $0xb0] sm:$0xff] }
 0x70b   :  { %3772 = vmatpush.msra.mxu1 %v5522_v54  ;;  %3654 = vmatpush.msra.mxu3 %v5488_v51  ;;  %v10646_v51 = vld [vmem:[%s11945_s3 + $0x58] sm:$0xff] }
 0x70d   :  { %3773 = vmatpush.msra.mxu1 %v5521_v55  ;;  %3655 = vmatpush.msra.mxu3 %v5487_v16  ;;  %v5512_v16 = vld [vmem:[%s11947_s12 + $0x98] sm:$0xff] }
 0x70e   :  { %5406 = vmatmul.msk.f32.gmra.mxu3 %vm12149_vm1, %v12703_v43  ;;  %5422 = vmatmul.msk.f32.gmra.mxu1 %vm12149_vm1, %v12704_v40  ;;  %v12730_v43 = vld [vmem:[#allocation49_spill] sm:$0xff] }
 0x70f   :  { %3774 = vmatpush.msra.mxu1 %v5520_v50  ;;  %3656 = vmatpush.msra.mxu3 %v5486_v63  ;;  %v12731_v40 = vld [vmem:[#allocation45_spill] sm:$0xff] }
 0x710   :  { %v4611_v50 = vld [vmem:[%s11950_s5 + $0x30] sm:$0xff]  ;;  %v4608_v63 = vld [vmem:[%s11950_s5 + $0x18] sm:$0xff] }
 0x711   :  { %3775 = vmatpush.msra.mxu1 %v5519_v6  ;;  %3657 = vmatpush.msra.mxu3 %v5485_v27  ;;  %v4610_v6 = vld [vmem:[%s11950_s5 + $0x28] sm:$0xff]  ;;  %v4607_v27 = vld [vmem:[%s11950_s5 + $0x10] sm:$0xff] }
 0x713   :  { %3776 = vmatpush.msra.mxu1 %v5518_v15  ;;  %v5562_v15 = vld [vmem:[%s11948_s14 + $0x88] sm:$0x1] }
 0x714   :  { %5563 = vmatpush.msk.msrb.mxu0 %vm12746_vm12, %v5562_v15  ;;  %vm12762_vm12 = vmmov %vm12740_vm0 }
 0x715   :  { %3777 = vmatpush.msra.mxu1 %v5517_v46  ;;  %v5511_v46 = vld [vmem:[%s11947_s12 + $0x90] sm:$0xff] }
 0x716   :  { %5407 = vmatmul.msk.f32.gmra.mxu3 %vm12149_vm1, %v12705_v33  ;;  %5423 = vmatmul.msk.f32.gmra.mxu1 %vm12149_vm1, %v12706_v11  ;;  %v12732_v33 = vld [vmem:[#allocation50_spill] sm:$0xff]  ;;  %v12733_v11 = vld [vmem:[#allocation47_spill] sm:$0xff] }
 0x71e   :  { %5408 = vmatmul.msk.f32.gmra.mxu3 %vm12149_vm1, %v12707_v10  ;;  %5424 = vmatmul.msk.f32.gmra.mxu1 %vm12149_vm1, %v12708_v61  ;;  %v10488_v61 = vld [vmem:[%s11945_s3] sm:$0xff] }
 0x726   :  { %5409 = vmatmul.msk.f32.gmra.mxu3 %vm12149_vm1, %v12709_v57  ;;  %5425 = vmatmul.msk.f32.gmra.mxu1 %vm12149_vm1, %v12710_v23 }
 0x72e   :  { %5410 = vmatmul.msk.f32.gmra.mxu3 %vm12149_vm1, %v12711_v8  ;;  %5426 = vmatmul.msk.f32.gmra.mxu1 %vm12149_vm1, %v12712_v36  ;;  %v10501_v8 = vld [vmem:[%s11945_s3 + $0x8] sm:$0xff] }
 0x736   :  { %5411 = vmatmul.msk.f32.gmra.mxu3 %vm12149_vm1, %v12713_v52  ;;  %5427 = vmatmul.msk.f32.gmra.mxu1 %vm12149_vm1, %v12714_v59  ;;  %v10514_v59 = vld [vmem:[%s11945_s3 + $0x10] sm:$0xff] }
 0x73e   :  { %5412 = vmatmul.msk.f32.gmra.mxu3 %vm12149_vm1, %v12715_v20  ;;  %5428 = vmatmul.msk.f32.gmra.mxu1 %vm12149_vm1, %v12716_v13 }
 0x746   :  { %5413 = vmatmul.msk.f32.gmra.mxu3 %vm12149_vm1, %v12717_v4  ;;  %5429 = vmatmul.msk.f32.gmra.mxu1 %vm12149_vm1, %v12718_v62  ;;  %v10527_v4 = vld [vmem:[%s11945_s3 + $0x18] sm:$0xff] }
 0x74e   :  { %5414 = vmatmul.msk.f32.gmra.mxu3 %vm12149_vm1, %v12719_v39  ;;  %5430 = vmatmul.msk.f32.gmra.mxu1 %vm12149_vm1, %v12720_v37  ;;  %v10540_v37 = vld [vmem:[%s11945_s3 + $0x20] sm:$0xff] }
 0x756   :  { %5415 = vmatmul.msk.f32.gmra.mxu3 %vm12149_vm1, %v12721_v32  ;;  %5431 = vmatmul.msk.f32.gmra.mxu1 %vm12149_vm1, %v12722_v31  ;;  %v10553_v31 = vld [vmem:[%s11945_s3 + $0x28] sm:$0xff] }
 0x75e   :  { %5416 = vmatmul.msk.f32.gmra.mxu3 %vm12149_vm1, %v12723_v35  ;;  %5432 = vmatmul.msk.f32.gmra.mxu1 %vm12149_vm1, %v12724_v56  ;;  %v10592_v35 = vld [vmem:[%s11945_s3 + $0x40] sm:$0xff] }
 0x766   :  { %5417 = vmatmul.msk.f32.gmra.mxu3 %vm12149_vm1, %v12726_v21  ;;  %5433 = vmatmul.msk.f32.gmra.mxu1 %vm12149_vm1, %v12727_v30  ;;  %v5513_v30 = vld [vmem:[%s11947_s12 + $0xa0] sm:$0xff] }
 0x76e   :  { %5418 = vmatmul.msk.f32.gmra.mxu3 %vm12149_vm1, %v12728_v24  ;;  %5434 = vmatmul.msk.f32.gmra.mxu1 %vm12149_vm1, %v12729_v17  ;;  %v10684_v24 = vld [vmem:[%s11945_s3 + $0x60] sm:$0xff]  ;;  %v5510_v17 = vld [vmem:[%s11947_s12 + $0x88] sm:$0xff] }
 0x776   :  { %5419 = vmatmul.msk.f32.gmra.mxu3 %vm12149_vm1, %v12730_v43  ;;  %5435 = vmatmul.msk.f32.gmra.mxu1 %vm12149_vm1, %v12731_v40  ;;  %v4606_v43 = vld [vmem:[%s11950_s5 + $0x8] sm:$0xff] }
 0x77e   :  { %5420 = vmatmul.msk.f32.gmra.mxu3 %vm12149_vm1, %v12732_v33  ;;  %5436 = vmatmul.msk.f32.gmra.mxu1 %vm12149_vm1, %v12733_v11  ;;  %v5509_v33 = vld [vmem:[%s11947_s12 + $0x80] sm:$0xff] }
 0x77f   :  { %v5561_v11 = vld [vmem:[%s11948_s14 + $0x80] sm:$0xff] }
 0x780   :  { %3913 = vmatpush.msrb.mxu0 %v5561_v11 }
 0x783   :  { %v10481_v10 = vpop.f32.mrf.mxu1 }
 0x784   :  { %5469 = vmatmul.msk.f32.vlgmr.msra.gmra.mxu0 %vm12149_vm1, %v10481_v10 }
 0x786   :  { %5492 = vmatmul.msk.f32.vlgmr.msra.gmra.mxu3 %vm12734_vm13, %v10488_v61  ;;  %vm12749_vm13 = vmmov %vm12740_vm0 }
 0x789   :  { %v3275_v57 = vpop.f32.mrf.mxu3 }
 0x78a   :  { %5453 = vmatmul.msk.f32.vlgmr.msra.gmra.mxu2 %vm12149_vm1, %v3275_v57  ;;  %5525 = vmatmul.msk.f32.vlgmr.msra.gmra.mxu1 %vm12149_vm1, %v3275_v57  ;;  %v4605_v57 = vld [vmem:[%s11950_s5] sm:$0xff] }
 0x78b   :  { %v10494_v23 = vpop.f32.mrf.mxu1  ;;  %3835 = vmatpush.msra.mxu2 %v5516_v49  ;;  %4704 = vmatpush.msra.mxu1 %v4612_v47  ;;  %v10750_v47 = vld [vmem:[%s11945_s3 + $0x78] sm:$0xff] }
 0x78c   :  { %5470 = vmatmul.msk.f32.gmra.mxu0 %vm12149_vm1, %v10494_v23 }
 0x78d   :  { %3836 = vmatpush.msra.mxu2 %v5515_v18  ;;  %4705 = vmatpush.msra.mxu1 %v4611_v50 }
 0x78e   :  { %5493 = vmatmul.msk.f32.gmra.mxu3 %vm12735_vm6, %v10501_v8  ;;  %vm12750_vm6 = vmmov %vm12740_vm0 }
 0x78f   :  { %3837 = vmatpush.msra.mxu2 %v5514_v2  ;;  %4706 = vmatpush.msra.mxu1 %v4610_v6  ;;  %v10760_v6 = vpop.trf.xlu1 }
 0x790   :  { %12752 = vst [vmem:[#allocation72_spill] sm:$0xff] %v10760_v6 }
 0x791   :  { %v3278_v36 = vpop.f32.mrf.mxu3  ;;  %3838 = vmatpush.msra.mxu2 %v5513_v30  ;;  %4707 = vmatpush.msra.mxu1 %v4609_v22 }
 0x792   :  { %5454 = vmatmul.msk.f32.gmra.mxu2 %vm12149_vm1, %v3278_v36  ;;  %5526 = vmatmul.msk.f32.gmra.mxu1 %vm12149_vm1, %v3278_v36 }
 0x793   :  { %v10507_v52 = vpop.f32.mrf.mxu1  ;;  %3839 = vmatpush.msra.mxu2 %v5512_v16  ;;  %4708 = vmatpush.msra.mxu1 %v4608_v63 }
 0x794   :  { %5471 = vmatmul.msk.f32.gmra.mxu0 %vm12149_vm1, %v10507_v52 }
 0x795   :  { %3840 = vmatpush.msra.mxu2 %v5511_v46  ;;  %4709 = vmatpush.msra.mxu1 %v4607_v27 }
 0x796   :  { %5494 = vmatmul.msk.f32.gmra.mxu3 %vm12736_vm7, %v10514_v59  ;;  %vm12751_vm7 = vmmov %vm12740_vm0 }
 0x797   :  { %3841 = vmatpush.msra.mxu2 %v5510_v17  ;;  %4710 = vmatpush.msra.mxu1 %v4606_v43 }
 0x799   :  { %v3281_v20 = vpop.f32.mrf.mxu3  ;;  %3842 = vmatpush.msra.mxu2 %v5509_v33  ;;  %4711 = vmatpush.msra.mxu1 %v4605_v57 }
 0x79a   :  { %5455 = vmatmul.msk.f32.gmra.mxu2 %vm12149_vm1, %v3281_v20  ;;  %5527 = vmatmul.msk.f32.gmra.mxu1 %vm12149_vm1, %v3281_v20  ;;  %v5560_v20 = vld [vmem:[%s11948_s14 + $0x78] sm:$0xff] }
 0x79b   :  { %v10520_v13 = vpop.f32.mrf.mxu1  ;;  %3914 = vmatpush.msrb.mxu0 %v5560_v20 }
 0x79c   :  { %5472 = vmatmul.msk.f32.gmra.mxu0 %vm12149_vm1, %v10520_v13 }
 0x79e   :  { %5495 = vmatmul.msk.f32.gmra.mxu3 %vm12737_vm11, %v10527_v4  ;;  %vm12753_vm11 = vmmov %vm12740_vm0 }
 0x7a1   :  { %v3284_v62 = vpop.f32.mrf.mxu3 }
 0x7a2   :  { %5456 = vmatmul.msk.f32.gmra.mxu2 %vm12149_vm1, %v3284_v62  ;;  %5528 = vmatmul.msk.f32.gmra.mxu1 %vm12149_vm1, %v3284_v62  ;;  %v10715_v62 = vld [vmem:[%s11945_s3 + $0x68] sm:$0xff] }
 0x7a3   :  { %v10533_v39 = vpop.f32.mrf.mxu1 }
 0x7a4   :  { %5473 = vmatmul.msk.f32.gmra.mxu0 %vm12149_vm1, %v10533_v39 }
 0x7a6   :  { %5496 = vmatmul.msk.f32.gmra.mxu3 %vm12738_vm10, %v10540_v37  ;;  %vm12754_vm10 = vmmov %vm12740_vm0 }
 0x7a9   :  { %v3287_v44 = vpop.f32.mrf.mxu3 }
 0x7aa   :  { %5457 = vmatmul.msk.f32.gmra.mxu2 %vm12149_vm1, %v3287_v44  ;;  %5529 = vmatmul.msk.f32.gmra.mxu1 %vm12149_vm1, %v3287_v44  ;;  %v5559_v44 = vld [vmem:[%s11948_s14 + $0x70] sm:$0xff] }
 0x7ab   :  { %v10546_v32 = vpop.f32.mrf.mxu1  ;;  %3915 = vmatpush.msrb.mxu0 %v5559_v44 }
 0x7ac   :  { %5474 = vmatmul.msk.f32.gmra.mxu0 %vm12149_vm1, %v10546_v32 }
 0x7ae   :  { %5497 = vmatmul.msk.f32.gmra.mxu3 %vm12739_vm14, %v10553_v31  ;;  %vm12755_vm14 = vmmov %vm12740_vm0 }
 0x7b1   :  { %v3290_v58 = vpop.f32.mrf.mxu3 }
 0x7b2   :  { %5458 = vmatmul.msk.f32.gmra.mxu2 %vm12149_vm1, %v3290_v58  ;;  %5530 = vmatmul.msk.f32.gmra.mxu1 %vm12149_vm1, %v3290_v58 }
 0x7b3   :  { %v10559_v3 = vpop.f32.mrf.mxu1 }
 0x7b4   :  { %5475 = vmatmul.msk.f32.gmra.mxu0 %vm12149_vm1, %v10559_v3 }
 0x7b6   :  { %5498 = vmatmul.msk.f32.gmra.mxu3 %vm12740_vm0, %v10566_v45 }
 0x7b9   :  { %v3293_v41 = vpop.f32.mrf.mxu3 }
 0x7ba   :  { %5459 = vmatmul.msk.f32.gmra.mxu2 %vm12149_vm1, %v3293_v41  ;;  %5531 = vmatmul.msk.f32.gmra.mxu1 %vm12149_vm1, %v3293_v41  ;;  %v5558_v41 = vld [vmem:[%s11948_s14 + $0x68] sm:$0xff] }
 0x7bb   :  { %v10572_v19 = vpop.f32.mrf.mxu1  ;;  %3916 = vmatpush.msrb.mxu0 %v5558_v41 }
 0x7bc   :  { %5476 = vmatmul.msk.f32.gmra.mxu0 %vm12149_vm1, %v10572_v19 }
 0x7be   :  { %5499 = vmatmul.msk.f32.gmra.mxu3 %vm12741_vm4, %v10579_v29  ;;  %vm12756_vm4 = vmmov %vm12740_vm0 }
 0x7c1   :  { %v3296_v9 = vpop.f32.mrf.mxu3 }
 0x7c2   :  { %5460 = vmatmul.msk.f32.gmra.mxu2 %vm12149_vm1, %v3296_v9  ;;  %5532 = vmatmul.msk.f32.gmra.mxu1 %vm12149_vm1, %v3296_v9 }
 0x7c3   :  { %v10585_v28 = vpop.f32.mrf.mxu1 }
 0x7c4   :  { %5477 = vmatmul.msk.f32.gmra.mxu0 %vm12149_vm1, %v10585_v28 }
 0x7c6   :  { %5500 = vmatmul.msk.f32.gmra.mxu3 %vm12742_vm15, %v10592_v35  ;;  %vm12757_vm15 = vmmov %vm12740_vm0 }
 0x7c9   :  { %v3299_v56 = vpop.f32.mrf.mxu3 }
 0x7ca   :  { %5461 = vmatmul.msk.f32.gmra.mxu2 %vm12149_vm1, %v3299_v56  ;;  %5533 = vmatmul.msk.f32.gmra.mxu1 %vm12149_vm1, %v3299_v56  ;;  %v5557_v56 = vld [vmem:[%s11948_s14 + $0x60] sm:$0xff] }
 0x7cb   :  { %v10598_v1 = vpop.f32.mrf.mxu1  ;;  %3917 = vmatpush.msrb.mxu0 %v5557_v56 }
 0x7cc   :  { %5478 = vmatmul.msk.f32.gmra.mxu0 %vm12149_vm1, %v10598_v1 }
 0x7ce   :  { %5501 = vmatmul.msk.f32.gmra.mxu3 %vm12743_vm9, %v10605_v48  ;;  %vm12758_vm9 = vmmov %vm12740_vm0 }
 0x7d1   :  { %v3302_v54 = vpop.f32.mrf.mxu3 }
 0x7d2   :  { %5462 = vmatmul.msk.f32.gmra.mxu2 %vm12149_vm1, %v3302_v54  ;;  %5534 = vmatmul.msk.f32.gmra.mxu1 %vm12149_vm1, %v3302_v54  ;;  %v10737_v54 = vld [vmem:[%s11945_s3 + $0x70] sm:$0xff] }
 0x7d3   :  { %v10611_v60 = vpop.f32.mrf.mxu1 }
 0x7d4   :  { %5479 = vmatmul.msk.f32.gmra.mxu0 %vm12149_vm1, %v10611_v60 }
 0x7d6   :  { %5502 = vmatmul.msk.f32.gmra.mxu3 %vm12744_vm8, %v10618_v0  ;;  %vm12759_vm8 = vmmov %vm12740_vm0 }
 0x7d9   :  { %v3305_v38 = vpop.f32.mrf.mxu3 }
 0x7da   :  { %5463 = vmatmul.msk.f32.gmra.mxu2 %vm12149_vm1, %v3305_v38  ;;  %5535 = vmatmul.msk.f32.gmra.mxu1 %vm12149_vm1, %v3305_v38 }
 0x7db   :  { %v10624_v55 = vpop.f32.mrf.mxu1 }
 0x7dc   :  { %5480 = vmatmul.msk.f32.gmra.mxu0 %vm12149_vm1, %v10624_v55 }
 0x7de   :  { %5503 = vmatmul.msk.f32.gmra.mxu3 %vm12745_vm3, %v10646_v51  ;;  %vm12760_vm3 = vmmov %vm12740_vm0 }
 0x7e1   :  { %v3308_v21 = vpop.f32.mrf.mxu3 }
 0x7e2   :  { %5464 = vmatmul.msk.f32.gmra.mxu2 %vm12149_vm1, %v3308_v21  ;;  %5536 = vmatmul.msk.f32.gmra.mxu1 %vm12149_vm1, %v3308_v21 }
 0x7e3   :  { %v10667_v26 = vpop.f32.mrf.mxu1 }
 0x7e4   :  { %5481 = vmatmul.msk.f32.gmra.mxu0 %vm12149_vm1, %v10667_v26 }
 0x7e6   :  { %5504 = vmatmul.msk.f32.gmra.mxu3 %vm12747_vm5, %v10684_v24  ;;  %vm12764_vm5 = vmmov %vm12740_vm0 }
 0x7e9   :  { %v3311_v40 = vpop.f32.mrf.mxu3 }
 0x7ea   :  { %5465 = vmatmul.msk.f32.gmra.mxu2 %vm12149_vm1, %v3311_v40  ;;  %5537 = vmatmul.msk.f32.gmra.mxu1 %vm12149_vm1, %v3311_v40 }
 0x7eb   :  { %v10705_v36 = vpop.f32.mrf.mxu1 }
 0x7ec   :  { %5482 = vmatmul.msk.f32.gmra.mxu0 %vm12149_vm1, %v10705_v36 }
 0x7ee   :  { %5505 = vmatmul.msk.f32.gmra.mxu3 %vm12748_vm2, %v10715_v62  ;;  %vm12766_vm2 = vmmov %vm12740_vm0 }
 0x7f1   :  { %v3314_v58 = vpop.f32.mrf.mxu3 }
 0x7f2   :  { %5466 = vmatmul.msk.f32.gmra.mxu2 %vm12149_vm1, %v3314_v58  ;;  %5538 = vmatmul.msk.f32.gmra.mxu1 %vm12149_vm1, %v3314_v58 }
 0x7f3   :  { %v10727_v9 = vpop.f32.mrf.mxu1 }
 0x7f4   :  { %5483 = vmatmul.msk.f32.gmra.mxu0 %vm12149_vm1, %v10727_v9 }
 0x7f6   :  { %5506 = vmatmul.msk.f32.gmra.mxu3 %vm12749_vm13, %v10737_v54  ;;  %vm12768_vm13 = vmmov %vm12740_vm0 }
 0x7f9   :  { %v3317_v38 = vpop.f32.mrf.mxu3 }
 0x7fa   :  { %5467 = vmatmul.msk.f32.gmra.mxu2 %vm12149_vm1, %v3317_v38  ;;  %5539 = vmatmul.msk.f32.gmra.mxu1 %vm12149_vm1, %v3317_v38 }
 0x7fb   :  { %v10743_v49 = vpop.f32.mrf.mxu1 }
 0x7fc   :  { %5484 = vmatmul.msk.f32.gmra.mxu0 %vm12149_vm1, %v10743_v49 }
 0x7fe   :  { %5507 = vmatmul.msk.f32.gmra.mxu3 %vm12750_vm6, %v10750_v47  ;;  %vm12771_vm6 = vmmov %vm12740_vm0 }
 0x801   :  { %v3320_v18 = vpop.f32.mrf.mxu3  ;;  %v3584_v50 = vpop.f32.mrf.mxu0 }
 0x802   :  { %5468 = vmatmul.msk.f32.gmra.mxu2 %vm12149_vm1, %v3320_v18  ;;  %5540 = vmatmul.msk.f32.gmra.mxu1 %vm12149_vm1, %v3320_v18 }
 0x804   :  { %5564 = vmatmul.msk.f32.vlgmr.msrb.gmra.mxu0 %vm12751_vm7, %v10488_v61  ;;  %vm12774_vm7 = vmmov %vm12740_vm0 }
 0x807   :  { %v10758_v2 = vpop.f32.mrf.mxu1 }
 0x809   :  { %v3587_v21 = vpop.f32.mrf.mxu0  ;;  %v10762_v30 = vpop.f32.mrf.mxu3 }
 0x80a   :  { %5541 = vmatmul.msk.f32.vlgmr.msra.gmra.mxu2 %vm12149_vm1, %v10481_v10  ;;  %5605 = vmatmul.msk.f32.vlgmr.msra.gmra.mxu1 %vm12149_vm1, %v10760_v6 }
 0x80c   :  { %5565 = vmatmul.msk.f32.gmra.mxu0 %vm12753_vm11, %v10501_v8  ;;  %vm4742_vm11 = vcmask 1041408  }
 0x80d   :  { %v3471_v22 = vpop.f32.mrf.mxu2 }
 0x80e   :  { %v10770_v16 = vadd.f32 %v3584_v50, %v3471_v22 }
 0x80f   :  { %v10772_v61 = vpop.f32.mrf.mxu1 }
 0x811   :  { %v3590_v15 = vpop.f32.mrf.mxu0  ;;  %v10774_v63 = vpop.f32.mrf.mxu3 }
 0x812   :  { %5542 = vmatmul.msk.f32.gmra.mxu2 %vm12149_vm1, %v10494_v23 }
 0x814   :  { %5566 = vmatmul.msk.f32.gmra.mxu0 %vm12754_vm10, %v10514_v59  ;;  %vm4717_vm10 = vcmask 15360  }
 0x815   :  { %v3474_v10 = vpop.f32.mrf.mxu2 }
 0x816   :  { %v10780_v46 = vadd.f32 %v3587_v21, %v3474_v10 }
 0x817   :  { %v10782_v27 = vpop.f32.mrf.mxu1 }
 0x819   :  { %v3593_v8 = vpop.f32.mrf.mxu0  ;;  %v3665_v17 = vpop.f32.mrf.mxu3 }
 0x81a   :  { %5543 = vmatmul.msk.f32.gmra.mxu2 %vm12149_vm1, %v10507_v52 }
 0x81c   :  { %5567 = vmatmul.msk.f32.gmra.mxu0 %vm12755_vm14, %v10527_v4 }
 0x81d   :  { %v3477_v43 = vpop.f32.mrf.mxu2 }
 0x81e   :  { %v3591_v40 = vadd.f32 %v3590_v15, %v3477_v43 }
 0x81f   :  { %v10788_v33 = vpop.f32.mrf.mxu1 }
 0x820   :  { %v10790_v23 = vadd.f32 %v3665_v17, %v3591_v40 }
 0x821   :  { %v3596_v59 = vpop.f32.mrf.mxu0  ;;  %v3668_v11 = vpop.f32.mrf.mxu3 }
 0x822   :  { %5544 = vmatmul.msk.f32.gmra.mxu2 %vm12149_vm1, %v10520_v13 }
 0x824   :  { %5568 = vmatmul.msk.f32.gmra.mxu0 %vm12740_vm0, %v10540_v37 }
 0x825   :  { %v3480_v57 = vpop.f32.mrf.mxu2 }
 0x826   :  { %v3594_v20 = vadd.f32 %v3593_v8, %v3480_v57 }
 0x827   :  { %v10796_v52 = vpop.f32.mrf.mxu1 }
 0x828   :  { %v10798_v44 = vadd.f32 %v3668_v11, %v3594_v20 }
 0x829   :  { %v3599_v4 = vpop.f32.mrf.mxu0  ;;  %v3671_v58 = vpop.f32.mrf.mxu3 }
 0x82a   :  { %5545 = vmatmul.msk.f32.gmra.mxu2 %vm12149_vm1, %v10533_v39 }
 0x82c   :  { %5569 = vmatmul.msk.f32.gmra.mxu0 %vm12756_vm4, %v10553_v31 }
 0x82d   :  { %v3483_v41 = vpop.f32.mrf.mxu2 }
 0x82e   :  { %v3597_v56 = vadd.f32 %v3596_v59, %v3483_v41 }
 0x82f   :  { %v10804_v13 = vpop.f32.mrf.mxu1 }
 0x830   :  { %v10806_v38 = vadd.f32 %v3671_v58, %v3597_v56 }
 0x831   :  { %v3602_v37 = vpop.f32.mrf.mxu0  ;;  %v3674_v18 = vpop.f32.mrf.mxu3 }
 0x832   :  { %5546 = vmatmul.msk.f32.gmra.mxu2 %vm12149_vm1, %v10546_v32 }
 0x834   :  { %5570 = vmatmul.msk.f32.gmra.mxu0 %vm12757_vm15, %v10566_v45 }
 0x835   :  { %v3486_v50 = vpop.f32.mrf.mxu2 }
 0x836   :  { %v3600_v21 = vadd.f32 %v3599_v4, %v3486_v50 }
 0x837   :  { %v10812_v39 = vpop.f32.mrf.mxu1 }
 0x838   :  { %v10814_v22 = vadd.f32 %v3674_v18, %v3600_v21 }
 0x839   :  { %v3605_v31 = vpop.f32.mrf.mxu0  ;;  %v3677_v15 = vpop.f32.mrf.mxu3 }
 0x83a   :  { %5547 = vmatmul.msk.f32.gmra.mxu2 %vm12149_vm1, %v10559_v3 }
 0x83c   :  { %5571 = vmatmul.msk.f32.gmra.mxu0 %vm12758_vm9, %v10579_v29 }
 0x83d   :  { %v3489_v10 = vpop.f32.mrf.mxu2 }
 0x83e   :  { %v3603_v8 = vadd.f32 %v3602_v37, %v3489_v10 }
 0x83f   :  { %v10820_v32 = vpop.f32.mrf.mxu1 }
 0x840   :  { %v10822_v17 = vadd.f32 %v3677_v15, %v3603_v8 }
 0x841   :  { %v10824_v45 = vpop.f32.mrf.mxu0  ;;  %v3680_v3 = vpop.f32.mrf.mxu3 }
 0x842   :  { %5548 = vmatmul.msk.f32.gmra.mxu2 %vm12149_vm1, %v10572_v19 }
 0x844   :  { %5572 = vmatmul.msk.f32.gmra.mxu0 %vm12759_vm8, %v10592_v35 }
 0x845   :  { %v3492_v43 = vpop.f32.mrf.mxu2 }
 0x846   :  { %v3606_v40 = vadd.f32 %v3605_v31, %v3492_v43 }
 0x847   :  { %v10830_v59 = vpop.f32.mrf.mxu1 }
 0x848   :  { %v10832_v29 = vadd.f32 %v3680_v3, %v3606_v40 }
 0x849   :  { %v10834_v11 = vpop.f32.mrf.mxu0  ;;  %v10970_v42 = vpop.f32.mrf.mxu3 }
 0x84a   :  { %5549 = vmatmul.msk.f32.gmra.mxu2 %vm12149_vm1, %v10585_v28 }
 0x84c   :  { %5573 = vmatmul.msk.f32.gmra.mxu0 %vm12760_vm3, %v10605_v48 }
 0x84d   :  { %v10840_v57 = vpop.f32.mrf.mxu2 }
 0x84f   :  { %v10842_v19 = vpop.f32.mrf.mxu1 }
 0x850   :  { %12761 = vst [vmem:[#allocation55_spill] sm:$0xff] %v10842_v19 }
 0x851   :  { %v10844_v35 = vpop.f32.mrf.mxu0 }
 0x852   :  { %5550 = vmatmul.msk.f32.gmra.mxu2 %vm12149_vm1, %v10598_v1 }
 0x854   :  { %5574 = vmatmul.msk.f32.gmra.mxu0 %vm12762_vm12, %v10618_v0 }
 0x855   :  { %v10850_v20 = vpop.f32.mrf.mxu2 }
 0x857   :  { %v10852_v4 = vpop.f32.mrf.mxu1 }
 0x858   :  { %12763 = vst [vmem:[#allocation54_spill] sm:$0xff] %v10852_v4 }
 0x859   :  { %v10854_v28 = vpop.f32.mrf.mxu0 }
 0x85a   :  { %5551 = vmatmul.msk.f32.gmra.mxu2 %vm12149_vm1, %v10611_v60 }
 0x85c   :  { %5575 = vmatmul.msk.f32.gmra.mxu0 %vm12764_vm5, %v10646_v51 }
 0x85d   :  { %v10860_v48 = vpop.f32.mrf.mxu2 }
 0x85f   :  { %v10862_v58 = vpop.f32.mrf.mxu1 }
 0x860   :  { %12765 = vst [vmem:[#allocation69_spill] sm:$0xff] %v10862_v58 }
 0x861   :  { %v10864_v1 = vpop.f32.mrf.mxu0 }
 0x862   :  { %5552 = vmatmul.msk.f32.gmra.mxu2 %vm12149_vm1, %v10624_v55 }
 0x864   :  { %5576 = vmatmul.msk.f32.gmra.mxu0 %vm12766_vm2, %v10684_v24  ;;  %v3707_v24 = vadd.f32 %v10762_v30, %v10770_v16 }
 0x865   :  { %v10870_v0 = vpop.f32.mrf.mxu2 }
 0x867   :  { %v10872_v41 = vpop.f32.mrf.mxu1 }
 0x868   :  { %12767 = vst [vmem:[#allocation12_spill] sm:$0xff] %v10872_v41 }
 0x869   :  { %v10874_v60 = vpop.f32.mrf.mxu0 }
 0x86a   :  { %5553 = vmatmul.msk.f32.gmra.mxu2 %vm12149_vm1, %v10667_v26  ;;  %v10895_v26 = vld [vmem:[%s11946_s11 + $0x2] ss:$0 sm:$0xff] }
 0x86b   :  { %v3728_v18 = vadd.f32 %v10895_v26, %v3707_v24 }
 0x86c   :  { %5577 = vmatmul.msk.f32.gmra.mxu0 %vm12768_vm13, %v10715_v62 }
 0x86d   :  { %v10880_v51 = vpop.f32.mrf.mxu2 }
 0x86f   :  { %v10882_v56 = vpop.f32.mrf.mxu1 }
 0x870   :  { %12769 = vst [vmem:[#allocation7_spill] sm:$0xff] %v10882_v56 }
 0x871   :  { %v10884_v55 = vpop.f32.mrf.mxu0 }
 0x872   :  { %12770 = vst [vmem:[#allocation71_spill] sm:$0xff] %v10884_v55  ;;  %5554 = vmatmul.msk.f32.gmra.mxu2 %vm12149_vm1, %v10705_v36  ;;  %v3708_v36 = vadd.f32 %v10774_v63, %v10780_v46 }
 0x874   :  { %5578 = vmatmul.msk.f32.gmra.mxu0 %vm12771_vm6, %v10737_v54  ;;  %v5581_v54 = vmul.f32 -1.442695, %v3728_v18  ;;  %v3729_v30 = vadd.f32 %v10895_v26, %v3708_v36  ;;  %v3731_v36 = vadd.f32 %v10895_v26, %v10798_v44 }
 0x875   :  { %v10897_v62 = vpop.f32.mrf.mxu2 }
 0x876   :  { %6029 = vpow2.f32 %v5581_v54  ;;  %v5582_v31 = vmul.f32 -1.442695, %v3729_v30  ;;  %v12778_v30 = vld [vmem:[#allocation3_spill] sm:$0xff] }
 0x877   :  { %v10899_v37 = vpop.f32.mrf.mxu1 }
 0x878   :  { %12772 = vst [vmem:[#allocation78_spill] sm:$0xff] %v10899_v37  ;;  %6031 = vpow2.f32 %v5582_v31 }
 0x879   :  { %v10904_v50 = vpop.f32.mrf.mxu0 }
 0x87a   :  { %12773 = vst [vmem:[#allocation61_spill] sm:$0xff] %v10904_v50  ;;  %5555 = vmatmul.msk.f32.gmra.mxu2 %vm12149_vm1, %v10727_v9 }
 0x87c   :  { %5579 = vmatmul.msk.f32.gmra.mxu0 %vm12774_vm7, %v10750_v47  ;;  %v6030_v9 = vpop.eup %6029  ;;  %v3730_v47 = vadd.f32 %v10895_v26, %v10790_v23  ;;  %v10930_v23 = vld [vmem:[%s11949_s15 + $0x2] ss:$0 sm:$0xff] }
 0x87d   :  { %v10911_v16 = vpop.f32.mrf.mxu2  ;;  %v10921_v8 = vadd.f32 1.0, %v6030_v9 }
 0x87e   :  { %12775 = vst [vmem:[#allocation93_spill] sm:$0xff] %v10911_v16  ;;  %v6032_v43 = vpop.eup %6031  ;;  %v5583_v3 = vmul.f32 -1.442695, %v3730_v47  ;;  %v11029_v16 = vpop.f32.mrf.mxu3 }
 0x87f   :  { %v10913_v21 = vpop.f32.mrf.mxu1  ;;  %v4079_v53 = vand.u32 2147483648, %v10921_v8  ;;  %vm4073_vm14 = vweird.f32 %v10921_v8 }
 0x880   :  { %12776 = vst [vmem:[#allocation10_spill] sm:$0xff] %v10913_v21 }
 0x881   :  { %v3919_v15 = vpop.f32.mrf.mxu0 }
 0x882   :  { %5556 = vmatmul.msk.f32.gmra.mxu2 %vm12149_vm1, %v10743_v49  ;;  %v10924_v49 = vadd.f32 1.0, %v6032_v43 }
 0x884   :  { %vm4088_vm0 = vweird.f32 %v10924_v49 }
 0x885   :  { %v10917_v63 = vpop.f32.mrf.mxu2 }
 0x886   :  { %12777 = vst [vmem:[#allocation5_spill] sm:$0xff] %v10917_v63 }
 0x887   :  { %v4713_v46 = vpop.f32.mrf.mxu1 }
 0x888   :  { %6033 = vrcp.f32 %v4713_v46 }
 0x889   :  { %v3922_v10 = vpop.f32.mrf.mxu0  ;;  %6035 = vrcp.f32 %v10921_v8 }
 0x88a   :  { %6037 = vpow2.f32 %v5583_v3 }
 0x88b   :  { %6039 = vrcp.f32 %v10924_v49 }
 0x88d   :  { %v3844_v40 = vpop.f32.mrf.mxu2 }
 0x88e   :  { %v6034_v24 = vpop.eup %6033  ;;  %v3845_v18 = vadd.f32 %v3844_v40, %v10758_v2  ;;  %v5584_v2 = vmul.f32 -1.442695, %v3731_v36 }
 0x88f   :  { %5606 = vmatpush.msk.msra.mxu2 %vm4742_vm11, %v6034_v24  ;;  %v10940_v47 = vpop.eup %6035 }
 0x890   :  { %v3967_v54 = vadd.f32 %v3919_v15, %v3845_v18  ;;  %5607 = vmatmul.msk.f32.vlgmr.msra.gmra.mxu2 %vm4717_vm10, %v12778_v30  ;;  %v6038_v43 = vpop.eup %6037  ;;  %6041 = vpow2.f32 %v5584_v2  ;;  %v3732_v15 = vadd.f32 %v10895_v26, %v10806_v38  ;;  %v4069_v24 = vmul.f32 %v10940_v47, %v10921_v8  ;;  %v12779_v30 = vld [vmem:[#allocation4_spill] sm:$0xff] }
 0x891   :  { %v3925_v31 = vpop.f32.mrf.mxu0  ;;  %v10948_v18 = vpop.eup %6039  ;;  %vm4074_vm4 = vweird.f32 %v10940_v47 }
 0x892   :  { %v10938_v9 = vadd.f32 %v10930_v23, %v3967_v54  ;;  %v10950_v54 = vadd.f32 1.0, %v6038_v43  ;;  %v4084_v38 = vmul.f32 %v10948_v18, %v10924_v49  ;;  %v4070_v2 = vsub.f32 1.0, %v4069_v24  ;;  %vm11009_vm8 = vmor %vm4073_vm14, %vm4074_vm4 }
 0x893   :  { %vm4089_vm9 = vweird.f32 %v10948_v18 }
 0x894   :  { %v4324_v46 = vmin.f32 %v10938_v9, 20.0  ;;  %v4085_v24 = vsub.f32 1.0, %v4084_v38  ;;  %v4071_v14 = vmul.f32 %v10940_v47, %v4070_v2  ;;  %v4092_v2 = vand.u32 2147483647, %v10924_v49  ;;  %vm11045_vm2 = vmor %vm4088_vm0, %vm4089_vm9 }
 0x895   :  { %v3847_v3 = vpop.f32.mrf.mxu2  ;;  %v4109_v19 = vand.u32 2147483648, %v10950_v54  ;;  %vm4308_vm12 = vcmp.gt.f32.partialorder %v10938_v9, 20.0  ;;  %vm4103_vm13 = vweird.f32 %v10950_v54 }
 0x896   :  { %v4340_v40 = vmul.f32 1.442695, %v4324_v46  ;;  %v3848_v44 = vadd.f32 %v3847_v3, %v10772_v61  ;;  %v5585_v61 = vmul.f32 -1.442695, %v3732_v15  ;;  %v6042_v43 = vpop.eup %6041  ;;  %v4094_v15 = vand.u32 2147483648, %v10924_v49 }
 0x897   :  { %v10968_v12 = vadd.f32 1.0, %v6042_v43  ;;  %vm11035_vm5 = vcmp.eq.f32.partialorder %v4092_v2, 8.507059e+37 }
 0x898   :  { %6043 = vpow2.f32 %v4340_v40  ;;  %v3968_v36 = vadd.f32 %v3922_v10, %v3848_v44  ;;  %5608 = vmatmul.msk.f32.gmra.mxu2 %vm4717_vm10, %v12779_v30  ;;  %v3733_v10 = vadd.f32 %v10895_v26, %v10814_v22  ;;  %v4077_v44 = vand.u32 2147483647, %v10921_v8 }
 0x899   :  { %v3928_v6 = vpop.f32.mrf.mxu0  ;;  %6045 = vrcp.f32 %v10950_v54  ;;  %v10990_v43 = vor.u32 1.1754944e-38, %v4094_v15  ;;  %vm4118_vm0 = vweird.f32 %v10968_v12 }
 0x89a   :  { %v10955_v46 = vadd.f32 %v10930_v23, %v3968_v36  ;;  %6047 = vpow2.f32 %v5585_v61  ;;  %vm10984_vm15 = vcmp.eq.f32.partialorder %v4077_v44, 8.507059e+37 }
 0x89c   :  { %v4325_v3 = vmin.f32 %v10955_v46, 20.0  ;;  %vm4309_vm14 = vcmp.gt.f32.partialorder %v10955_v46, 20.0 }
 0x89d   :  { %v3850_v40 = vpop.f32.mrf.mxu2 }
 0x89e   :  { %v6044_v30 = vpop.eup %6043  ;;  %v4342_v7 = vmul.f32 1.442695, %v4325_v3  ;;  %v3851_v36 = vadd.f32 %v3850_v40, %v10782_v27  ;;  %v5586_v27 = vmul.f32 -1.442695, %v3733_v10 }
 0x89f   :  { %v4372_v5 = vadd.f32 1.0, %v6044_v30  ;;  %v4375_v3 = vmul.f32 -0.5, %v6044_v30  ;;  %v10977_v61 = vpop.eup %6045  ;;  %v4378_v34 = vand.u32 2147483647, %v6044_v30 }
 0x8a0   :  { %6049 = vpow2.f32 %v4342_v7  ;;  %v3969_v22 = vadd.f32 %v3925_v31, %v3851_v36  ;;  %5609 = vmatmul.msk.f32.gmra.mxu2 %vm4717_vm10, %v12780_v25  ;;  %v4080_v25 = vor.u32 1.1754944e-38, %v4079_v53  ;;  %v4086_v31 = vmul.f32 %v10948_v18, %v4085_v24  ;;  %v6048_v44 = vpop.eup %6047 }
 0x8a1   :  { %v10974_v40 = vpop.f32.mrf.mxu0  ;;  %6051 = vlog2.f32 %v4372_v5  ;;  %v4072_v5 = vadd.f32 %v10940_v47, %v4071_v14  ;;  %v4376_v36 = vadd.f32 1.0, %v4375_v3  ;;  %v4099_v53 = vmul.f32 %v10977_v61, %v10950_v54 }
 0x8a2   :  { %v10980_v38 = vadd.f32 %v10930_v23, %v3969_v22  ;;  %6053 = vrcp.f32 %v10968_v12  ;;  %v4107_v24 = vand.u32 2147483647, %v10950_v54  ;;  %v3734_v14 = vadd.f32 %v10895_v26, %v10822_v17 }
 0x8a3   :  { %6055 = vpow2.f32 %v5586_v27  ;;  %v11014_v4 = vadd.f32 %v10948_v18, %v4086_v31  ;;  %v4377_v56 = vmul.f32 %v6044_v30, %v4376_v36  ;;  %v11023_v41 = vadd.f32 1.0, %v6048_v44 }
 0x8a4   :  { %v4326_v10 = vmin.f32 %v10980_v38, 20.0  ;;  %v4100_v31 = vsub.f32 1.0, %v4099_v53  ;;  %vm4379_vm3 = vcmp.lt.f32.partialorder %v4378_v34, 0.0004427343  ;;  %v5587_v55 = vmul.f32 -1.442695, %v3734_v14 }
 0x8a5   :  { %v3853_v22 = vpop.f32.mrf.mxu2  ;;  %v11039_v30 = vor.u32 1.1754944e-38, %v4109_v19  ;;  %vm4104_vm6 = vweird.f32 %v10977_v61  ;;  %v4091_v19 = vsel %vm11045_vm2, %v10948_v18, %v11014_v4  ;;  %v3735_v3 = vadd.f32 %v10895_v26, %v10832_v29 }
 0x8a6   :  { %v10999_v15 = vpop.eup %6049  ;;  %v4344_v21 = vmul.f32 1.442695, %v4326_v10  ;;  %v3854_v37 = vadd.f32 %v3853_v22, %v10788_v33  ;;  %v4076_v33 = vsel %vm11009_vm8, %v10940_v47, %v4072_v5  ;;  %v12785_v22 = vld [vmem:[#allocation13_spill] sm:$0xff]  ;;  %vm11080_vm7 = vcmp.eq.f32.partialorder %v4107_v24, 8.507059e+37 }
 0x8a7   :  { %v6052_v27 = vpop.eup %6051  ;;  %v4381_v58 = vadd.f32 1.0, %v10999_v15  ;;  %v4384_v17 = vmul.f32 -0.5, %v10999_v15  ;;  %v4081_v5 = vsel %vm10984_vm15, %v4080_v25, %v4076_v33  ;;  %v4387_v25 = vand.u32 2147483647, %v10999_v15  ;;  %vm11114_vm15 = vmor %vm4103_vm13, %vm4104_vm6 }
 0x8a8   :  { %6057 = vpow2.f32 %v4344_v21  ;;  %v3970_v10 = vadd.f32 %v3928_v6, %v3854_v37  ;;  %5610 = vmatmul.msk.f32.gmra.mxu2 %vm4717_vm10, %v12785_v22  ;;  %v4374_v8 = vmul.f32 0.6931472, %v6052_v27  ;;  %v11027_v63 = vpop.eup %6053  ;;  %v3609_v27 = vadd.f32 %v10824_v45, %v10840_v57  ;;  %v12791_v22 = vld [vmem:[#allocation18_spill] sm:$0xff] }
 0x8a9   :  { %v11025_v50 = vpop.f32.mrf.mxu0  ;;  %6059 = vlog2.f32 %v4381_v58  ;;  %v6056_v47 = vpop.eup %6055  ;;  %v4385_v58 = vadd.f32 1.0, %v4384_v17  ;;  %v4114_v7 = vmul.f32 %v11027_v63, %v10968_v12  ;;  %v4122_v57 = vand.u32 2147483647, %v10968_v12 }
 0x8aa   :  { %v11033_v6 = vadd.f32 %v10930_v23, %v3970_v10  ;;  %v4380_v21 = vsel %vm4379_vm3, %v4377_v56, %v4374_v8  ;;  %6061 = vrcp.f32 %v11023_v41  ;;  %v11068_v53 = vadd.f32 1.0, %v6056_v47 }
 0x8ab   :  { %v4516_v2 = vsel %vm4308_vm12, %v10938_v9, %v4380_v21  ;;  %v4101_v9 = vmul.f32 %v10977_v61, %v4100_v31  ;;  %6063 = vpow2.f32 %v5587_v55  ;;  %v4386_v33 = vmul.f32 %v10999_v15, %v4385_v58 }
 0x8ac   :  { %v4327_v36 = vmin.f32 %v11033_v6, 20.0  ;;  %v11059_v56 = vmul.f32 %v4516_v2, %v4081_v5  ;;  %v4115_v45 = vsub.f32 1.0, %v4114_v7  ;;  %vm4388_vm11 = vcmp.lt.f32.partialorder %v4387_v25, 0.0004427343  ;;  %v11101_v2 = vpop.f32.mrf.mxu3 }
 0x8ad   :  { %v3856_v49 = vpop.f32.mrf.mxu2  ;;  %v4102_v24 = vadd.f32 %v10977_v61, %v4101_v9  ;;  %v5588_v21 = vmul.f32 -1.442695, %v3735_v3  ;;  %v3715_v47 = vadd.f32 %v10970_v42, %v3609_v27  ;;  %v4096_v34 = vsel %vm11035_vm5, %v10990_v43, %v4091_v19 }
 0x8ae   :  { %12790 = vst [vmem:[#allocation82_spill] sm:$0xff] %v11059_v56  ;;  %v11066_v44 = vpop.eup %6057  ;;  %v4346_v14 = vmul.f32 1.442695, %v4327_v36  ;;  %v3857_v4 = vadd.f32 %v3856_v49, %v10796_v52  ;;  %v4116_v42 = vmul.f32 %v11027_v63, %v4115_v45  ;;  %vm4119_vm4 = vweird.f32 %v11027_v63 }
 0x8af   :  { %v6060_v18 = vpop.eup %6059  ;;  %v4390_v17 = vadd.f32 1.0, %v11066_v44  ;;  %v4393_v52 = vmul.f32 -0.5, %v11066_v44  ;;  %v4124_v43 = vand.u32 2147483648, %v10968_v12  ;;  %v4396_v37 = vand.u32 2147483647, %v11066_v44  ;;  %vm11160_vm5 = vmor %vm4118_vm0, %vm4119_vm4 }
 0x8b0   :  { %6065 = vpow2.f32 %v4346_v14  ;;  %v3971_v10 = vadd.f32 %v10974_v40, %v3857_v4  ;;  %5611 = vmatmul.msk.f32.gmra.mxu2 %vm4717_vm10, %v12791_v22  ;;  %v4383_v29 = vmul.f32 0.6931472, %v6060_v18  ;;  %v11093_v31 = vpop.eup %6061  ;;  %v4106_v18 = vsel %vm11114_vm15, %v10977_v61, %v4102_v24 }
 0x8b1   :  { %v11085_v8 = vpop.f32.mrf.mxu0  ;;  %6067 = vlog2.f32 %v4390_v17  ;;  %v6064_v5 = vpop.eup %6063  ;;  %v4394_v49 = vadd.f32 1.0, %v4393_v52  ;;  %v4129_v4 = vmul.f32 %v11093_v31, %v11023_v41  ;;  %v3736_v54 = vadd.f32 %v10895_v26, %v3715_v47 }
 0x8b2   :  { %v11090_v40 = vadd.f32 %v10930_v23, %v3971_v10  ;;  %v4389_v15 = vsel %vm4388_vm11, %v4386_v33, %v4383_v29  ;;  %6069 = vrcp.f32 %v11068_v53  ;;  %v12797_v10 = vld [vmem:[#allocation22_spill] sm:$0xff]  ;;  %v4117_v29 = vadd.f32 %v11027_v63, %v4116_v42 }
 0x8b3   :  { %v4517_v58 = vsel %vm4309_vm14, %v10955_v46, %v4389_v15  ;;  %6071 = vpow2.f32 %v5588_v21  ;;  %v4395_v22 = vmul.f32 %v11066_v44, %v4394_v49  ;;  %v4111_v61 = vsel %vm11080_vm7, %v11039_v30, %v4106_v18 }
 0x8b4   :  { %v4328_v36 = vmin.f32 %v11090_v40, 20.0  ;;  %v11105_v7 = vmul.f32 %v4517_v58, %v4096_v34  ;;  %vm4397_vm9 = vcmp.lt.f32.partialorder %v4396_v37, 0.0004427343  ;;  %v11138_v24 = vadd.f32 1.0, %v6064_v5  ;;  %v11165_v46 = vpop.f32.mrf.mxu3 }
 0x8b5   :  { %v3859_v9 = vpop.f32.mrf.mxu2  ;;  %vm4310_vm8 = vcmp.gt.f32.partialorder %v10980_v38, 20.0  ;;  %v5589_v15 = vmul.f32 -1.442695, %v3736_v54  ;;  %v4130_v21 = vsub.f32 1.0, %v4129_v4  ;;  %vm11146_vm3 = vcmp.eq.f32.partialorder %v4122_v57, 8.507059e+37 }
 0x8b6   :  { %12794 = vst [vmem:[#allocation80_spill] sm:$0xff] %v11105_v7  ;;  %v6066_v19 = vpop.eup %6065  ;;  %v4348_v25 = vmul.f32 1.442695, %v4328_v36  ;;  %v3860_v14 = vadd.f32 %v3859_v9, %v10804_v13  ;;  %v4125_v55 = vor.u32 1.1754944e-38, %v4124_v43  ;;  %vm4133_vm12 = vweird.f32 %v11023_v41 }
 0x8b7   :  { %v6068_v3 = vpop.eup %6067  ;;  %v4399_v27 = vadd.f32 1.0, %v6066_v19  ;;  %v4402_v17 = vmul.f32 -0.5, %v6066_v19  ;;  %v4137_v42 = vand.u32 2147483647, %v11023_v41  ;;  %v4405_v57 = vand.u32 2147483647, %v6066_v19 }
 0x8b8   :  { %6073 = vpow2.f32 %v4348_v25  ;;  %v3972_v33 = vadd.f32 %v11025_v50, %v3860_v14  ;;  %5612 = vmatmul.msk.f32.gmra.mxu2 %vm4717_vm10, %v12797_v10  ;;  %v4392_v13 = vmul.f32 0.6931472, %v6068_v3  ;;  %v11136_v45 = vpop.eup %6069  ;;  %v4121_v14 = vsel %vm11160_vm5, %v11027_v63, %v4117_v29 }
 0x8b9   :  { %v11130_v52 = vpop.f32.mrf.mxu0  ;;  %6075 = vlog2.f32 %v4399_v27  ;;  %v4403_v47 = vadd.f32 1.0, %v4402_v17  ;;  %v6072_v36 = vpop.eup %6071  ;;  %v4144_v9 = vmul.f32 %v11136_v45, %v11068_v53  ;;  %v4131_v12 = vmul.f32 %v11093_v31, %v4130_v21  ;;  %v12803_v27 = vld [vmem:[#allocation26_spill] sm:$0xff] }
 0x8ba   :  { %v11142_v50 = vadd.f32 %v10930_v23, %v3972_v33  ;;  %v4398_v44 = vsel %vm4397_vm9, %v4395_v22, %v4392_v13  ;;  %6077 = vrcp.f32 %v11138_v24  ;;  %v4139_v13 = vand.u32 2147483648, %v11023_v41  ;;  %v12809_v41 = vld [vmem:[#allocation29_spill] sm:$0xff] }
 0x8bb   :  { %v4518_v34 = vsel %vm4310_vm8, %v10980_v38, %v4398_v44  ;;  %6079 = vpow2.f32 %v5589_v15  ;;  %v4404_v3 = vmul.f32 %v6066_v19, %v4403_v47  ;;  %vm4406_vm2 = vcmp.lt.f32.partialorder %v4405_v57, 0.0004427343 }
 0x8bc   :  { %v4329_v58 = vmin.f32 %v11142_v50, 20.0  ;;  %v11150_v5 = vmul.f32 %v4518_v34, %v4111_v61  ;;  %v11178_v63 = vadd.f32 1.0, %v6072_v36  ;;  %vm4311_vm13 = vcmp.gt.f32.partialorder %v11033_v6, 20.0 }
 0x8bd   :  { %v3862_v49 = vpop.f32.mrf.mxu2  ;;  %v4132_v22 = vadd.f32 %v11093_v31, %v4131_v12  ;;  %vm4134_vm6 = vweird.f32 %v11093_v31  ;;  %v4126_v29 = vsel %vm11146_vm3, %v4125_v55, %v4121_v14  ;;  %vm11192_vm7 = vcmp.eq.f32.partialorder %v4137_v42, 8.507059e+37 }
 0x8be   :  { %12800 = vst [vmem:[#allocation60_spill] sm:$0xff] %v11150_v5  ;;  %v6074_v43 = vpop.eup %6073  ;;  %v4350_v37 = vmul.f32 1.442695, %v4329_v58  ;;  %v3863_v25 = vadd.f32 %v3862_v49, %v10812_v39  ;;  %v4145_v39 = vsub.f32 1.0, %v4144_v9  ;;  %v4152_v30 = vand.u32 2147483647, %v11068_v53  ;;  %vm11207_vm11 = vmor %vm4133_vm12, %vm4134_vm6 }
 0x8bf   :  { %v6076_v4 = vpop.eup %6075  ;;  %v4408_v18 = vadd.f32 1.0, %v6074_v43  ;;  %v4411_v17 = vmul.f32 -0.5, %v6074_v43  ;;  %v4140_v55 = vor.u32 1.1754944e-38, %v4139_v13  ;;  %v4414_v9 = vand.u32 2147483647, %v6074_v43 }
 0x8c0   :  { %6081 = vpow2.f32 %v4350_v37  ;;  %v3973_v54 = vadd.f32 %v11085_v8, %v3863_v25  ;;  %5613 = vmatmul.msk.f32.gmra.mxu2 %vm4717_vm10, %v12803_v27  ;;  %v4401_v33 = vmul.f32 0.6931472, %v6076_v4  ;;  %v11189_v44 = vpop.eup %6077  ;;  %v4146_v49 = vmul.f32 %v11136_v45, %v4145_v39 }
 0x8c1   :  { %v11175_v10 = vpop.f32.mrf.mxu0  ;;  %6083 = vlog2.f32 %v4408_v18  ;;  %v4412_v47 = vadd.f32 1.0, %v4411_v17  ;;  %v6080_v58 = vpop.eup %6079  ;;  %v4154_v57 = vand.u32 2147483648, %v11068_v53  ;;  %v4159_v14 = vmul.f32 %v11189_v44, %v11138_v24 }
 0x8c2   :  { %v11182_v19 = vadd.f32 %v10930_v23, %v3973_v54  ;;  %v4407_v8 = vsel %vm4406_vm2, %v4404_v3, %v4401_v33  ;;  %6085 = vrcp.f32 %v11178_v63  ;;  %v11216_v18 = vpop.f32.mrf.mxu3  ;;  %v4147_v33 = vadd.f32 %v11136_v45, %v4146_v49 }
 0x8c3   :  { %v4519_v61 = vsel %vm4311_vm13, %v11033_v6, %v4407_v8  ;;  %v4413_v27 = vmul.f32 %v6074_v43, %v4412_v47  ;;  %vm4149_vm14 = vweird.f32 %v11136_v45  ;;  %vm4415_vm0 = vcmp.lt.f32.partialorder %v4414_v9, 0.0004427343 }
 0x8c4   :  { %v4330_v15 = vmin.f32 %v11182_v19, 20.0  ;;  %v11196_v34 = vmul.f32 %v4519_v61, %v4126_v29  ;;  %v11225_v39 = vadd.f32 1.0, %v6080_v58  ;;  %vm4312_vm4 = vcmp.gt.f32.partialorder %v11090_v40, 20.0 }
 0x8c5   :  { %v3865_v36 = vpop.f32.mrf.mxu2  ;;  %v4160_v13 = vsub.f32 1.0, %v4159_v14  ;;  %vm11238_vm15 = vcmp.eq.f32.partialorder %v4152_v30, 8.507059e+37  ;;  %v3612_v58 = vadd.f32 %v10834_v11, %v10850_v20  ;;  %v4167_v21 = vand.u32 2147483647, %v11138_v24 }
 0x8c6   :  { %12806 = vst [vmem:[#allocation9_spill] sm:$0xff] %v11196_v34  ;;  %v6082_v6 = vpop.eup %6081  ;;  %v4352_v38 = vmul.f32 1.442695, %v4330_v15  ;;  %v3866_v42 = vadd.f32 %v3865_v36, %v10820_v32  ;;  %v4136_v32 = vsel %vm11207_vm11, %v11093_v31, %v4132_v22  ;;  %v4155_v49 = vor.u32 1.1754944e-38, %v4154_v57 }
 0x8c7   :  { %v6084_v25 = vpop.eup %6083  ;;  %v4417_v4 = vadd.f32 1.0, %v6082_v6  ;;  %v4420_v12 = vmul.f32 -0.5, %v6082_v6  ;;  %v4141_v43 = vsel %vm11192_vm7, %v4140_v55, %v4136_v32  ;;  %vm4313_vm3 = vcmp.gt.f32.partialorder %v11142_v50, 20.0 }
 0x8c8   :  { %6087 = vpow2.f32 %v4352_v38  ;;  %v3974_v3 = vadd.f32 %v11130_v52, %v3866_v42  ;;  %5614 = vmatmul.msk.f32.gmra.mxu2 %vm4717_vm10, %v12809_v41  ;;  %v4410_v54 = vmul.f32 0.6931472, %v6084_v25  ;;  %v11234_v29 = vpop.eup %6085  ;;  %vm4148_vm10 = vweird.f32 %v11068_v53 }
 0x8c9   :  { %v11221_v17 = vpop.f32.mrf.mxu0  ;;  %6089 = vlog2.f32 %v4417_v4  ;;  %v4421_v8 = vadd.f32 1.0, %v4420_v12  ;;  %vm11249_vm9 = vmor %vm4148_vm10, %vm4149_vm14  ;;  %v4423_v53 = vand.u32 2147483647, %v6082_v6  ;;  %v4174_v38 = vmul.f32 %v11234_v29, %v11178_v63 }
 0x8ca   :  { %v11229_v31 = vadd.f32 %v10930_v23, %v3974_v3  ;;  %v4416_v52 = vsel %vm4415_vm0, %v4413_v27, %v4410_v54  ;;  %6091 = vrcp.f32 %v11225_v39  ;;  %v4151_v11 = vsel %vm11249_vm9, %v11136_v45, %v4147_v33  ;;  %v11264_v45 = vpop.f32.mrf.mxu3 }
 0x8cb   :  { %v4520_v22 = vsel %vm4312_vm4, %v11090_v40, %v4416_v52  ;;  %v4161_v42 = vmul.f32 %v11189_v44, %v4160_v13  ;;  %v4422_v25 = vmul.f32 %v6082_v6, %v4421_v8  ;;  %v3716_v12 = vadd.f32 %v11029_v16, %v3612_v58 }
 0x8cc   :  { %v4331_v61 = vmin.f32 %v11229_v31, 20.0  ;;  %v11242_v47 = vmul.f32 %v4520_v22, %v4141_v43  ;;  %vm4424_vm8 = vcmp.lt.f32.partialorder %v4423_v53, 0.0004427343  ;;  %vm4164_vm12 = vweird.f32 %v11189_v44 }
 0x8cd   :  { %v3868_v36 = vpop.f32.mrf.mxu2  ;;  %v4162_v41 = vadd.f32 %v11189_v44, %v4161_v42  ;;  %v4156_v16 = vsel %vm11238_vm15, %v4155_v49, %v4151_v11  ;;  %v3737_v8 = vadd.f32 %v10895_v26, %v3716_v12  ;;  %vm4163_vm5 = vweird.f32 %v11138_v24 }
 0x8ce   :  { %12812 = vst [vmem:[#allocation64_spill] sm:$0xff] %v11242_v47  ;;  %v6088_v30 = vpop.eup %6087  ;;  %v4354_v55 = vmul.f32 1.442695, %v4331_v61  ;;  %v3869_v9 = vadd.f32 %v3868_v36, %v10830_v59  ;;  %v4169_v59 = vand.u32 2147483648, %v11138_v24  ;;  %vm11286_vm2 = vcmp.eq.f32.partialorder %v4167_v21, 8.507059e+37  ;;  %vm11294_vm13 = vmor %vm4163_vm5, %vm4164_vm12 }
 0x8cf   :  { %v6090_v20 = vpop.eup %6089  ;;  %v4426_v37 = vadd.f32 1.0, %v6088_v30  ;;  %v4429_v14 = vmul.f32 -0.5, %v6088_v30  ;;  %v4432_v61 = vand.u32 2147483647, %v6088_v30  ;;  %v4182_v58 = vand.u32 2147483647, %v11178_v63 }
 0x8d0   :  { %6093 = vpow2.f32 %v4354_v55  ;;  %v3975_v57 = vadd.f32 %v11175_v10, %v3869_v9  ;;  %v4419_v4 = vmul.f32 0.6931472, %v6090_v20  ;;  %v4175_v10 = vsub.f32 1.0, %v4174_v38  ;;  %v11277_v27 = vpop.eup %6091 }
 0x8d1   :  { %6095 = vlog2.f32 %v4426_v37  ;;  %v11271_v3 = vpop.f32.mrf.mxu0  ;;  %v4430_v52 = vadd.f32 1.0, %v4429_v14  ;;  %v4184_v36 = vand.u32 2147483648, %v11178_v63  ;;  %v4170_v49 = vor.u32 1.1754944e-38, %v4169_v59 }
 0x8d2   :  { %v11268_v32 = vadd.f32 %v10930_v23, %v3975_v57  ;;  %v4425_v6 = vsel %vm4424_vm8, %v4422_v25, %v4419_v4  ;;  %v4189_v24 = vmul.f32 %v11277_v27, %v11225_v39  ;;  %v4176_v21 = vmul.f32 %v11234_v29, %v4175_v10  ;;  %v3701_v12 = vpop.f32.mrf.mxu3 }
 0x8d3   :  { %v4521_v54 = vsel %vm4313_vm3, %v11142_v50, %v4425_v6  ;;  %v4166_v9 = vsel %vm11294_vm13, %v11189_v44, %v4162_v41  ;;  %v4431_v38 = vmul.f32 %v6088_v30, %v4430_v52  ;;  %v5590_v42 = vmul.f32 -1.442695, %v3737_v8  ;;  %v12825_v52 = vld [vmem:[#allocation93_spill] sm:$0xff]  ;;  %v12826_v8 = vld [vmem:[#allocation71_spill] sm:$0xff] }
 0x8d4   :  { %v4332_v33 = vmin.f32 %v11268_v32, 20.0  ;;  %v11280_v13 = vmul.f32 %v4521_v54, %v4156_v16  ;;  %v3615_v37 = vadd.f32 %v10844_v35, %v10860_v48  ;;  %vm4433_vm6 = vcmp.lt.f32.partialorder %v4432_v61, 0.0004427343 }
 0x8d5   :  { %v11283_v43 = vpop.f32.mrf.mxu2  ;;  %v3618_v25 = vadd.f32 %v10854_v28, %v10870_v0  ;;  %vm4314_vm7 = vcmp.gt.f32.partialorder %v11182_v19, 20.0  ;;  %vm4179_vm11 = vweird.f32 %v11234_v29  ;;  %v4190_v14 = vsub.f32 1.0, %v4189_v24 }
 0x8d6   :  { %12815 = vst [vmem:[#allocation67_spill] sm:$0xff] %v11280_v13  ;;  %v6094_v15 = vpop.eup %6093  ;;  %v4356_v50 = vmul.f32 1.442695, %v4332_v33  ;;  %v4177_v44 = vadd.f32 %v11234_v29, %v4176_v21  ;;  %v4171_v30 = vsel %vm11286_vm2, %v4170_v49, %v4166_v9  ;;  %v3717_v59 = vadd.f32 %v11101_v2, %v3615_v37 }
 0x8d7   :  { %v6096_v53 = vpop.eup %6095  ;;  %v4435_v55 = vadd.f32 1.0, %v6094_v15  ;;  %v4438_v11 = vmul.f32 -0.5, %v6094_v15  ;;  %v3621_v28 = vadd.f32 %v10864_v1, %v10880_v51  ;;  %vm4178_vm14 = vweird.f32 %v11178_v63 }
 0x8d8   :  { %6097 = vpow2.f32 %v4356_v50  ;;  %v4428_v20 = vmul.f32 0.6931472, %v6096_v53  ;;  %v4441_v10 = vand.u32 2147483647, %v6094_v15  ;;  %vm11327_vm0 = vmor %vm4178_vm14, %vm4179_vm11  ;;  %vm11331_vm4 = vcmp.eq.f32.partialorder %v4182_v58, 8.507059e+37 }
 0x8d9   :  { %6099 = vlog2.f32 %v4435_v55  ;;  %v4439_v35 = vadd.f32 1.0, %v4438_v11  ;;  %v11321_v6 = vpop.f32.mrf.mxu0  ;;  %v4185_v1 = vor.u32 1.1754944e-38, %v4184_v36  ;;  %v3624_v63 = vadd.f32 %v10874_v60, %v10897_v62 }
 0x8da   :  { %v4434_v57 = vsel %vm4433_vm6, %v4431_v38, %v4428_v20  ;;  %6101 = vpow2.f32 %v5590_v42  ;;  %v4191_v54 = vmul.f32 %v11277_v27, %v4190_v14  ;;  %v3627_v22 = vadd.f32 %v12826_v8, %v12825_v52  ;;  %v12828_v38 = vld [vmem:[#allocation5_spill] sm:$0xff] }
 0x8db   :  { %v4522_v4 = vsel %vm4314_vm7, %v11182_v19, %v4434_v57  ;;  %v3718_v19 = vadd.f32 %v11165_v46, %v3618_v25  ;;  %v4181_v46 = vsel %vm11327_vm0, %v11234_v29, %v4177_v44  ;;  %v4440_v58 = vmul.f32 %v6094_v15, %v4439_v35  ;;  %v12829_v42 = vld [vmem:[#allocation61_spill] sm:$0xff]  ;;  %v3704_v57 = vpop.f32.mrf.mxu3 }
 0x8dc   :  { %v11314_v48 = vmul.f32 %v4522_v4, %v4171_v30  ;;  %v3738_v40 = vadd.f32 %v10895_v26, %v3717_v59  ;;  %v3719_v36 = vadd.f32 %v11216_v18, %v3621_v28  ;;  %vm4442_vm10 = vcmp.lt.f32.partialorder %v4441_v10, 0.0004427343 }
 0x8dd   :  { %v11319_v0 = vpop.f32.mrf.mxu2  ;;  %vm4315_vm15 = vcmp.gt.f32.partialorder %v11229_v31, 20.0  ;;  %vm4194_vm9 = vweird.f32 %v11277_v27  ;;  %v4199_v60 = vand.u32 2147483648, %v11225_v39  ;;  %v3739_v29 = vadd.f32 %v10895_v26, %v3718_v19 }
 0x8de   :  { %12820 = vst [vmem:[#allocation65_spill] sm:$0xff] %v11314_v48  ;;  %v6098_v41 = vpop.eup %6097  ;;  %v3720_v49 = vadd.f32 %v11264_v45, %v3624_v63  ;;  %v4186_v15 = vsel %vm11331_vm4, %v4185_v1, %v4181_v46  ;;  %v3721_v18 = vadd.f32 %v3701_v12, %v3627_v22  ;;  %v4192_v21 = vadd.f32 %v11277_v27, %v4191_v54 }
 0x8df   :  { %v6100_v51 = vpop.eup %6099  ;;  %v4444_v33 = vadd.f32 1.0, %v6098_v41  ;;  %v4447_v61 = vmul.f32 -0.5, %v6098_v41  ;;  %v5591_v11 = vmul.f32 -1.442695, %v3738_v40  ;;  %v3740_v20 = vadd.f32 %v10895_v26, %v3719_v36 }
 0x8e0   :  { %v4437_v50 = vmul.f32 0.6931472, %v6100_v51  ;;  %v6102_v24 = vpop.eup %6101  ;;  %v3630_v37 = vadd.f32 %v12829_v42, %v12828_v38  ;;  %v4450_v45 = vand.u32 2147483647, %v6098_v41  ;;  %vm4193_vm8 = vweird.f32 %v11225_v39  ;;  %v12835_v38 = vld [vmem:[#allocation54_spill] sm:$0xff] }
 0x8e1   :  { %6103 = vlog2.f32 %v4444_v33  ;;  %v4448_v55 = vadd.f32 1.0, %v4447_v61  ;;  %v5592_v44 = vmul.f32 -1.442695, %v3739_v29  ;;  %v3741_v30 = vadd.f32 %v10895_v26, %v3720_v49  ;;  %v3955_v4 = vpop.f32.mrf.mxu0  ;;  %vm11364_vm3 = vmor %vm4193_vm8, %vm4194_vm9 }
 0x8e2   :  { %v4443_v62 = vsel %vm4442_vm10, %v4440_v58, %v4437_v50  ;;  %v4200_v35 = vor.u32 1.1754944e-38, %v4199_v60  ;;  %v3742_v59 = vadd.f32 %v10895_v26, %v3721_v18  ;;  %v4196_v28 = vsel %vm11364_vm3, %v11277_v27, %v4192_v21  ;;  %v12832_v60 = vld [vmem:[#allocation12_spill] sm:$0xff] }
 0x8e3   :  { %v4523_v53 = vsel %vm4315_vm15, %v11229_v31, %v4443_v62  ;;  %v4197_v31 = vand.u32 2147483647, %v11225_v39  ;;  %v4449_v39 = vmul.f32 %v6098_v41, %v4448_v55  ;;  %6105 = vpow2.f32 %v5591_v11 }
 0x8e4   :  { %v11354_v9 = vmul.f32 %v4523_v53, %v4186_v15  ;;  %v5593_v19 = vmul.f32 -1.442695, %v3740_v20  ;;  %v3722_v16 = vadd.f32 %v3704_v57, %v3630_v37  ;;  %vm4451_vm12 = vcmp.lt.f32.partialorder %v4450_v45, 0.0004427343  ;;  %v12833_v15 = vld [vmem:[#allocation7_spill] sm:$0xff] }
 0x8e5   :  { %v3877_v25 = vpop.f32.mrf.mxu2  ;;  %v11372_v2 = vadd.f32 1.0, %v6102_v24  ;;  %vm4316_vm5 = vcmp.gt.f32.partialorder %v11268_v32, 20.0  ;;  %vm4198_vm2 = vcmp.eq.f32.partialorder %v4197_v31, 8.507059e+37  ;;  %6107 = vpow2.f32 %v5592_v44  ;;  %v12834_v24 = vld [vmem:[#allocation69_spill] sm:$0xff]  ;;  %v12836_v45 = vld [vmem:[#allocation55_spill] sm:$0xff] }
 0x8e6   :  { %12827 = vst [vmem:[#allocation77_spill] sm:$0xff] %v11354_v9  ;;  %v5594_v51 = vmul.f32 -1.442695, %v3741_v30  ;;  %v4201_v63 = vsel %vm4198_vm2, %v4200_v35, %v4196_v28  ;;  %v5595_v33 = vmul.f32 -1.442695, %v3742_v59  ;;  %6109 = vpow2.f32 %v5593_v19  ;;  %v12837_v28 = vld [vmem:[#allocation78_spill] sm:$0xff] }
 0x8e7   :  { %v6104_v14 = vpop.eup %6103  ;;  %v3743_v27 = vadd.f32 %v10895_v26, %v3722_v16  ;;  %6111 = vrcp.f32 %v11372_v2  ;;  %v3878_v18 = vadd.f32 %v3877_v25, %v12834_v24  ;;  %v3875_v42 = vadd.f32 %v11319_v0, %v12835_v38 }
 0x8e8   :  { %v4446_v10 = vmul.f32 0.6931472, %v6104_v14  ;;  %6113 = vpow2.f32 %v5594_v51  ;;  %v3872_v57 = vadd.f32 %v11283_v43, %v12836_v45 }
 0x8e9   :  { %v6106_v52 = vpop.eup %6105  ;;  %6115 = vpow2.f32 %v5595_v33  ;;  %v5596_v22 = vmul.f32 -1.442695, %v3743_v27  ;;  %v3958_v61 = vpop.f32.mrf.mxu0  ;;  %v3978_v31 = vadd.f32 %v11321_v6, %v3878_v18  ;;  %v3977_v0 = vadd.f32 %v11271_v3, %v3875_v42 }
 0x8ea   :  { %v4452_v1 = vsel %vm4451_vm12, %v4449_v39, %v4446_v10  ;;  %v11380_v50 = vadd.f32 1.0, %v6106_v52  ;;  %v3976_v59 = vadd.f32 %v11221_v17, %v3872_v57 }
 0x8eb   :  { %v4524_v54 = vsel %vm4316_vm5, %v11268_v32, %v4452_v1  ;;  %v6108_v8 = vpop.eup %6107  ;;  %6117 = vpow2.f32 %v5596_v22  ;;  %v11423_v39 = vadd.f32 %v10930_v23, %v3978_v31 }
 0x8ec   :  { %v11376_v46 = vmul.f32 %v4524_v54, %v4201_v63  ;;  %v6110_v58 = vpop.eup %6109  ;;  %v11384_v32 = vadd.f32 1.0, %v6108_v8  ;;  %6119 = vrcp.f32 %v11380_v50  ;;  %v11432_v63 = vadd.f32 %v10930_v23, %v3977_v0 }
 0x8ed   :  { %v3880_v41 = vpop.f32.mrf.mxu2  ;;  %v11382_v40 = vpop.eup %6111  ;;  %v11388_v49 = vadd.f32 1.0, %v6110_v58 }
 0x8ee   :  { %v6114_v36 = vpop.eup %6113  ;;  %v3881_v26 = vadd.f32 %v3880_v41, %v12832_v60  ;;  %6121 = vrcp.f32 %v11384_v32  ;;  %v4204_v11 = vmul.f32 %v11382_v40, %v11372_v2  ;;  %v11442_v41 = vadd.f32 %v10930_v23, %v3976_v59 }
 0x8ef   :  { %v6116_v29 = vpop.eup %6115  ;;  %v11393_v21 = vadd.f32 1.0, %v6114_v36  ;;  %6123 = vrcp.f32 %v11388_v49  ;;  %vm4253_vm13 = vweird.f32 %v11388_v49  ;;  %v12858_v9 = vand.u32 2147483647, %v11388_v49 }
 0x8f0   :  { %v11397_v20 = vadd.f32 1.0, %v6116_v29  ;;  %v3979_v37 = vadd.f32 %v3955_v4, %v3881_v26  ;;  %v4205_v12 = vsub.f32 1.0, %v4204_v11  ;;  %v4333_v38 = vmin.f32 %v11442_v41, 20.0 }
 0x8f1   :  { %v6118_v25 = vpop.eup %6117  ;;  %v3961_v44 = vpop.f32.mrf.mxu0  ;;  %6125 = vrcp.f32 %v11393_v21  ;;  %vm4268_vm7 = vweird.f32 %v11393_v21 }
 0x8f2   :  { %v11408_v30 = vpop.eup %6119  ;;  %6127 = vrcp.f32 %v11397_v20  ;;  %v11414_v4 = vadd.f32 %v10930_v23, %v3979_v37  ;;  %v11418_v6 = vadd.f32 1.0, %v6118_v25  ;;  %v4206_v51 = vmul.f32 %v11382_v40, %v4205_v12  ;;  %v12838_v37 = vld [vmem:[#allocation10_spill] sm:$0xff] }
 0x8f3   :  { %v4219_v3 = vmul.f32 %v11408_v30, %v11380_v50  ;;  %vm4283_vm14 = vweird.f32 %v11397_v20 }
 0x8f4   :  { %v11416_v35 = vpop.eup %6121  ;;  %v4336_v17 = vmin.f32 %v11414_v4, 20.0  ;;  %6129 = vrcp.f32 %v11418_v6  ;;  %vm4298_vm15 = vweird.f32 %v11418_v6 }
 0x8f5   :  { %v3883_v62 = vpop.f32.mrf.mxu2  ;;  %v11428_v16 = vpop.eup %6123  ;;  %v4234_v54 = vmul.f32 %v11416_v35, %v11384_v32  ;;  %v4220_v60 = vsub.f32 1.0, %v4219_v3  ;;  %v4358_v3 = vmul.f32 1.442695, %v4333_v38  ;;  %vm4239_vm2 = vweird.f32 %v11416_v35 }
 0x8f6   :  { %v3884_v53 = vadd.f32 %v3883_v62, %v12833_v15  ;;  %v4249_v36 = vmul.f32 %v11428_v16, %v11388_v49  ;;  %v4334_v15 = vmin.f32 %v11432_v63, 20.0  ;;  %vm4254_vm6 = vweird.f32 %v11428_v16 }
 0x8f7   :  { %v11438_v27 = vpop.eup %6125  ;;  %v4235_v11 = vsub.f32 1.0, %v4234_v54  ;;  %vm11526_vm4 = vmor %vm4253_vm13, %vm4254_vm6  ;;  %vm4238_vm13 = vweird.f32 %v11384_v32 }
 0x8f8   :  { %v3980_v55 = vadd.f32 %v3958_v61, %v3884_v53  ;;  %v11448_v22 = vpop.eup %6127  ;;  %v4335_v61 = vmin.f32 %v11423_v39, 20.0  ;;  %v4364_v53 = vmul.f32 1.442695, %v4336_v17  ;;  %v4250_v31 = vsub.f32 1.0, %v4249_v36 }
 0x8f9   :  { %v3964_v18 = vpop.f32.mrf.mxu0  ;;  %v4279_v57 = vmul.f32 %v11448_v22, %v11397_v20  ;;  %vm4269_vm11 = vweird.f32 %v11438_v27  ;;  %vm4284_vm0 = vweird.f32 %v11448_v22 }
 0x8fa   :  { %v11406_v14 = vadd.f32 %v10930_v23, %v3980_v55  ;;  %v4264_v55 = vmul.f32 %v11438_v27, %v11393_v21  ;;  %v4362_v25 = vmul.f32 1.442695, %v4335_v61  ;;  %v11467_v12 = vpop.eup %6129  ;;  %vm11552_vm9 = vmor %vm4268_vm7, %vm4269_vm11  ;;  %vm4224_vm7 = vweird.f32 %v11408_v30 }
 0x8fb   :  { %v4280_v17 = vsub.f32 1.0, %v4279_v57  ;;  %v4294_v61 = vmul.f32 %v11467_v12, %v11418_v6  ;;  %v4287_v57 = vand.u32 2147483647, %v11397_v20  ;;  %vm4299_vm8 = vweird.f32 %v11467_v12  ;;  %vm11563_vm3 = vmor %vm4283_vm14, %vm4284_vm0 }
 0x8fc   :  { %v4337_v19 = vmin.f32 %v11406_v14, 20.0  ;;  %vm11590_vm5 = vmor %vm4298_vm15, %vm4299_vm8  ;;  %vm11632_vm14 = vcmp.eq.f32.partialorder %v12858_v9, 8.507059e+37  ;;  %vm4223_vm0 = vweird.f32 %v11380_v50 }
 0x8fd   :  { %v3886_v43 = vpop.f32.mrf.mxu2  ;;  %vm11536_vm10 = vcmp.eq.f32.partialorder %v4287_v57, 8.507059e+37 }
 0x8fe   :  { %v3887_v10 = vadd.f32 %v3886_v43, %v12837_v28  ;;  %v4366_v58 = vmul.f32 1.442695, %v4337_v19  ;;  %v4259_v43 = vand.u32 2147483648, %v11388_v49  ;;  %v4360_v28 = vmul.f32 1.442695, %v4334_v15 }
 0x8ff   :  { %v4236_v19 = vmul.f32 %v11416_v35, %v4235_v11 }
 0x900   :  { %v3981_v1 = vadd.f32 %v3961_v44, %v3887_v10  ;;  %6131 = vpow2.f32 %v4366_v58  ;;  %v4221_v44 = vmul.f32 %v11408_v30, %v4220_v60  ;;  %v4265_v10 = vsub.f32 1.0, %v4264_v55 }
 0x901   :  { %v4251_v58 = vmul.f32 %v11428_v16, %v4250_v31  ;;  %v11487_v15 = vor.u32 1.1754944e-38, %v4259_v43  ;;  %v11494_v55 = vadd.f32 %v11416_v35, %v4236_v19 }
 0x902   :  { %v11445_v52 = vadd.f32 %v10930_v23, %v3981_v1  ;;  %v11457_v23 = vadd.f32 %v11382_v40, %v4206_v51  ;;  %v6203_v1 = vld [vmem:[%s11949_s15 + $0x2] ss:$0 sm:$0xff]  ;;  %v11482_v36 = vadd.f32 %v11408_v30, %v4221_v44  ;;  %v4289_v44 = vand.u32 2147483648, %v11397_v20 }
 0x903   :  { %v11505_v31 = vadd.f32 %v11428_v16, %v4251_v58 }
 0x904   :  { %v4338_v26 = vmin.f32 %v11445_v52, 20.0  ;;  %v4290_v33 = vor.u32 1.1754944e-38, %v4289_v44 }
 0x905   :  { %v3889_v24 = vpop.f32.mrf.mxu2 }
 0x906   :  { %v4368_v42 = vmul.f32 1.442695, %v4338_v26  ;;  %v3890_v45 = vadd.f32 %v3889_v24, %v12838_v37  ;;  %v4266_v24 = vmul.f32 %v11438_v27, %v4265_v10 }
 0x908   :  { %6133 = vpow2.f32 %v4368_v42  ;;  %v3982_v0 = vadd.f32 %v3964_v18, %v3890_v45  ;;  %v4274_v18 = vand.u32 2147483648, %v11393_v21  ;;  %v4281_v42 = vmul.f32 %v11448_v22, %v4280_v17 }
 0x909   :  { %6135 = vpow2.f32 %v4364_v53  ;;  %v11489_v53 = vpop.eup %6131  ;;  %v4295_v45 = vsub.f32 1.0, %v4294_v61 }
 0x90a   :  { %v11475_v51 = vadd.f32 %v6203_v1, %v3982_v0  ;;  %6137 = vpow2.f32 %v4362_v25  ;;  %v11516_v10 = vor.u32 1.1754944e-38, %v4274_v18  ;;  %v4489_v19 = vadd.f32 1.0, %v11489_v53  ;;  %v12896_v1 = vld [vmem:[#allocation86_spill] sm:$0xff] }
 0x90b   :  { %6139 = vpow2.f32 %v4360_v28  ;;  %v11513_v28 = vadd.f32 %v11438_v27, %v4266_v24  ;;  %v4492_v44 = vmul.f32 -0.5, %v11489_v53 }
 0x90c   :  { %v4339_v60 = vmin.f32 %v11475_v51, 20.0  ;;  %6141 = vpow2.f32 %v4358_v3  ;;  %v4282_v3 = vadd.f32 %v11448_v22, %v4281_v42  ;;  %v4302_v42 = vand.u32 2147483647, %v11418_v6 }
 0x90d   :  { %v4493_v24 = vadd.f32 1.0, %v4492_v44 }
 0x90e   :  { %v11496_v11 = vpop.eup %6133  ;;  %v4370_v38 = vmul.f32 1.442695, %v4339_v60  ;;  %v4296_v60 = vmul.f32 %v11467_v12, %v4295_v45  ;;  %v4286_v29 = vsel %vm11563_vm3, %v11448_v22, %v4282_v3  ;;  %vm11579_vm12 = vcmp.eq.f32.partialorder %v4302_v42, 8.507059e+37 }
 0x90f   :  { %v11500_v37 = vpop.eup %6135  ;;  %v4498_v25 = vadd.f32 1.0, %v11496_v11  ;;  %v4501_v54 = vmul.f32 -0.5, %v11496_v11  ;;  %vm4322_vm3 = vcmp.gt.f32.partialorder %v11445_v52, 20.0 }
 0x910   :  { %6143 = vpow2.f32 %v4370_v38  ;;  %v11510_v43 = vpop.eup %6137  ;;  %v4480_v17 = vadd.f32 1.0, %v11500_v37  ;;  %v4297_v18 = vadd.f32 %v11467_v12, %v4296_v60 }
 0x911   :  { %v11531_v61 = vpop.eup %6139  ;;  %6145 = vlog2.f32 %v4498_v25  ;;  %v4471_v57 = vadd.f32 1.0, %v11510_v43  ;;  %v4304_v25 = vand.u32 2147483648, %v11418_v6  ;;  %v4504_v6 = vand.u32 2147483647, %v11496_v11 }
 0x912   :  { %v11544_v38 = vpop.eup %6141  ;;  %6147 = vlog2.f32 %v4489_v19  ;;  %v4462_v20 = vadd.f32 1.0, %v11531_v61  ;;  %v4465_v60 = vmul.f32 -0.5, %v11531_v61  ;;  %v4301_v7 = vsel %vm11590_vm5, %v11467_v12, %v4297_v18 }
 0x913   :  { %v11533_v58 = vpop.f32.mrf.mxu2  ;;  %6149 = vlog2.f32 %v4480_v17  ;;  %v4453_v26 = vadd.f32 1.0, %v11544_v38  ;;  %v4456_v0 = vmul.f32 -0.5, %v11544_v38  ;;  %v4305_v3 = vor.u32 1.1754944e-38, %v4304_v25 }
 0x914   :  { %12841 = vst [vmem:[#allocation70_spill] sm:$0xff] %v11533_v58  ;;  %6151 = vlog2.f32 %v4471_v57  ;;  %v4483_v17 = vmul.f32 -0.5, %v11500_v37  ;;  %v11596_v58 = vsel %vm11536_vm10, %v4290_v33, %v4286_v29  ;;  %v4502_v57 = vadd.f32 1.0, %v4501_v54 }
 0x915   :  { %v4474_v25 = vmul.f32 -0.5, %v11510_v43  ;;  %v11606_v5 = vadd.f32 1.0, %v4456_v0  ;;  %v4466_v12 = vadd.f32 1.0, %v4465_v60  ;;  %vm11622_vm11 = vcmp.lt.f32.partialorder %v4504_v6, 0.0004427343 }
 0x916   :  { %v6144_v62 = vpop.eup %6143  ;;  %v4484_v47 = vadd.f32 1.0, %v4483_v17  ;;  %v4503_v42 = vmul.f32 %v11496_v11, %v4502_v57  ;;  %v4306_v17 = vsel %vm11579_vm12, %v4305_v3, %v4301_v7  ;;  %vm4209_vm10 = vweird.f32 %v11382_v40 }
 0x917   :  { %v4507_v59 = vadd.f32 1.0, %v6144_v62  ;;  %v4510_v19 = vmul.f32 -0.5, %v6144_v62  ;;  %v6146_v22 = vpop.eup %6145  ;;  %v4513_v34 = vand.u32 2147483647, %v6144_v62  ;;  %v4475_v44 = vadd.f32 1.0, %v4474_v25 }
 0x918   :  { %v4500_v54 = vmul.f32 0.6931472, %v6146_v22  ;;  %v4477_v22 = vand.u32 2147483647, %v11510_v43  ;;  %vm4323_vm12 = vcmp.gt.f32.partialorder %v11475_v51, 20.0 }
 0x919   :  { %6153 = vlog2.f32 %v4507_v59  ;;  %v6148_v59 = vpop.eup %6147  ;;  %v4511_v29 = vadd.f32 1.0, %v4510_v19  ;;  %vm4514_vm15 = vcmp.lt.f32.partialorder %v4513_v34, 0.0004427343 }
 0x91a   :  { %6155 = vlog2.f32 %v4462_v20  ;;  %v6150_v33 = vpop.eup %6149  ;;  %v4468_v20 = vand.u32 2147483647, %v11531_v61  ;;  %v4491_v19 = vmul.f32 0.6931472, %v6148_v59  ;;  %v4506_v25 = vsel %vm11622_vm11, %v4503_v42, %v4500_v54 }
 0x91b   :  { %v11599_v56 = vpop.f32.mrf.mxu2  ;;  %6157 = vlog2.f32 %v4453_v26  ;;  %v6152_v18 = vpop.eup %6151  ;;  %v12853_v26 = vand.u32 2147483647, %v11393_v21  ;;  %v4482_v11 = vmul.f32 0.6931472, %v6150_v33  ;;  %v4486_v21 = vand.u32 2147483647, %v11500_v37 }
 0x91c   :  { %12852 = vst [vmem:[#allocation51_spill] sm:$0xff] %v11599_v56  ;;  %v4495_v56 = vand.u32 2147483647, %v11489_v53  ;;  %v4512_v48 = vmul.f32 %v6144_v62, %v4511_v29  ;;  %v4494_v59 = vmul.f32 %v11489_v53, %v4493_v24  ;;  %v4485_v62 = vmul.f32 %v11500_v37, %v4484_v47  ;;  %v12892_v37 = vld [vmem:[#allocation82_spill] sm:$0xff] }
 0x91d   :  { %vm11614_vm6 = vcmp.eq.f32.partialorder %v12853_v26, 8.507059e+37  ;;  %v4473_v3 = vmul.f32 0.6931472, %v6152_v18  ;;  %v12863_v53 = vand.u32 2147483647, %v11384_v32  ;;  %vm4208_vm11 = vweird.f32 %v11372_v2  ;;  %v6209_v18 = vld [vmem:[%s11950_s5] sm:$0xff] }
 0x91e   :  { %vm11638_vm8 = vcmp.lt.f32.partialorder %v4495_v56, 0.0004427343  ;;  %v4530_v47 = vsel %vm4322_vm3, %v11445_v52, %v4506_v25  ;;  %vm11658_vm1 = vcmp.lt.f32.partialorder %v4486_v21, 0.0004427343  ;;  %v4476_v54 = vmul.f32 %v11510_v43, %v4475_v44 }
 0x91f   :  { %v6154_v13 = vpop.eup %6153  ;;  %v4497_v49 = vsel %vm11638_vm8, %v4494_v59, %v4491_v19  ;;  %vm11649_vm5 = vcmp.eq.f32.partialorder %v12863_v53, 8.507059e+37  ;;  %v4488_v29 = vsel %vm11658_vm1, %v4485_v62, %v4482_v11  ;;  %vm11667_vm8 = vcmp.lt.f32.partialorder %v4477_v22, 0.0004427343  ;;  %vm11678_vm1 = vmor %vm4238_vm13, %vm4239_vm2  ;;  %v6205_v62 = vld [vmem:[%s11950_s5 + $0x28] sm:$0xff] }
 0x920   :  { %v6156_v57 = vpop.eup %6155  ;;  %v4509_v26 = vmul.f32 0.6931472, %v6154_v13  ;;  %vm4320_vm3 = vcmp.gt.f32.partialorder %v11414_v4, 20.0  ;;  %v4546_v42 = vmul.f32 %v4530_v47, %v11596_v58  ;;  %v4467_v19 = vmul.f32 %v11531_v61, %v4466_v12  ;;  %v12887_v13 = vld [vmem:[#allocation67_spill] sm:$0xff]  ;;  %v12890_v53 = vld [vmem:[#allocation60_spill] sm:$0xff] }
 0x921   :  { %v6158_v7 = vpop.eup %6157  ;;  %v12872_v44 = vsel %vm11552_vm9, %v11438_v27, %v11513_v28  ;;  %v4528_v22 = vsel %vm4320_vm3, %v11414_v4, %v4488_v29  ;;  %vm11698_vm2 = vcmp.lt.f32.partialorder %v4468_v20, 0.0004427343  ;;  %vm4319_vm13 = vcmp.gt.f32.partialorder %v11423_v39, 20.0  ;;  %vm11722_vm9 = vmor %vm4223_vm0, %vm4224_vm7 }
 0x922   :  { %v4515_v9 = vsel %vm4514_vm15, %v4512_v48, %v4509_v26  ;;  %v4464_v48 = vmul.f32 0.6931472, %v6156_v57  ;;  %vm4321_vm15 = vcmp.gt.f32.partialorder %v11406_v14, 20.0  ;;  %v4455_v52 = vmul.f32 0.6931472, %v6158_v7  ;;  %vm4210_vm7 = vmor %vm4208_vm11, %vm4209_vm10  ;;  %v12885_v7 = vld [vmem:[#allocation77_spill] sm:$0xff] }
 0x923   :  { %v11654_v56 = vpop.f32.mrf.mxu2  ;;  %v4531_v34 = vsel %vm4323_vm12, %v11475_v51, %v4515_v9  ;;  %v4529_v24 = vsel %vm4321_vm15, %v11406_v14, %v4497_v49  ;;  %v4459_v51 = vand.u32 2147483647, %v11544_v38  ;;  %v4479_v14 = vsel %vm11667_vm8, %v4476_v54, %v4473_v3  ;;  %v12888_v9 = vld [vmem:[#allocation64_spill] sm:$0xff]  ;;  %v12889_v49 = vld [vmem:[#allocation9_spill] sm:$0xff] }
 0x924   :  { %v4547_v33 = vmul.f32 %v4531_v34, %v4306_v17  ;;  %v4276_v58 = vsel %vm11614_vm6, %v11516_v10, %v12872_v44  ;;  %v4241_v17 = vsel %vm11678_vm1, %v11416_v35, %v11494_v55  ;;  %v4470_v27 = vsel %vm11698_vm2, %v4467_v19, %v4464_v48  ;;  %v6206_v34 = vld [vmem:[%s11950_s5 + $0x30] sm:$0xff]  ;;  %v6208_v54 = vld [vmem:[%s11950_s5 + $0x38] sm:$0xff] }
 0x925   :  { %v4545_v61 = vmul.f32 %v4529_v24, %v4276_v58  ;;  %v4458_v28 = vmul.f32 %v11544_v38, %v11606_v5  ;;  %v12875_v4 = vsel %vm11526_vm4, %v11428_v16, %v11505_v31  ;;  %v12876_v55 = vand.u32 2147483648, %v11384_v32 }
 0x926   :  { %4548 = vmatpush.msra.mxu3 %v4547_v33  ;;  %v4261_v35 = vsel %vm11632_vm14, %v11487_v15, %v12875_v4  ;;  %v4527_v45 = vsel %vm4319_vm13, %v11423_v39, %v4479_v14  ;;  %vm11726_vm6 = vcmp.lt.f32.partialorder %v4459_v51, 0.0004427343  ;;  %vm4318_vm4 = vcmp.gt.f32.partialorder %v11432_v63, 20.0  ;;  %v6207_v33 = vld [vmem:[%s11950_s5 + $0x10] sm:$0xff]  ;;  %v12894_v14 = vld [vmem:[#allocation51_spill] sm:$0xff] }
 0x927   :  { %v4245_v10 = vor.u32 1.1754944e-38, %v12876_v55  ;;  %v4544_v16 = vmul.f32 %v4528_v22, %v4261_v35  ;;  %v4226_v32 = vsel %vm11722_vm9, %v11408_v30, %v11482_v36  ;;  %v4461_v39 = vsel %vm11726_vm6, %v4458_v28, %v4455_v52  ;;  %v12893_v52 = vld [vmem:[#allocation70_spill] sm:$0xff] }
 0x928   :  { %4549 = vmatpush.msra.mxu3 %v4546_v42  ;;  %v12881_v38 = vand.u32 2147483648, %v11380_v50  ;;  %v4526_v12 = vsel %vm4318_vm4, %v11432_v63, %v4470_v27  ;;  %vm4317_vm14 = vcmp.gt.f32.partialorder %v11442_v41, 20.0  ;;  %v12882_v36 = vand.u32 2147483647, %v11380_v50  ;;  %v6210_v42 = vld [vmem:[%s11950_s5 + $0x18] sm:$0xff] }
 0x929   :  { %v4246_v31 = vsel %vm11649_vm5, %v4245_v10, %v4241_v17  ;;  %v4211_v0 = vsel %vm4210_vm7, %v11382_v40, %v11457_v23  ;;  %v12883_v21 = vand.u32 2147483648, %v11372_v2  ;;  %v4525_v63 = vsel %vm4317_vm14, %v11442_v41, %v4461_v39  ;;  %v6204_v40 = vld [vmem:[%s11950_s5 + $0x20] sm:$0xff]  ;;  %v12886_v41 = vld [vmem:[#allocation65_spill] sm:$0xff] }
 0x92a   :  { %4550 = vmatpush.msra.mxu3 %v4545_v61  ;;  %v4230_v20 = vor.u32 1.1754944e-38, %v12881_v38  ;;  %v4543_v30 = vmul.f32 %v4527_v45, %v4246_v31  ;;  %vm4228_vm0 = vcmp.eq.f32.partialorder %v12882_v36, 8.507059e+37  ;;  %v12884_v25 = vand.u32 2147483647, %v11372_v2  ;;  %v12895_v45 = vld [vmem:[#allocation52_spill] sm:$0xff]  ;;  %v12898_v38 = vld [vmem:[#allocation79_spill] sm:$0xff] }
 0x92b   :  { %v4772_v15 = vpop.f32.mrf.mxu2  ;;  %v4215_v57 = vor.u32 1.1754944e-38, %v12883_v21  ;;  %v4789_v29 = vmul.f32 %v6207_v33, %v11654_v56  ;;  %v4787_v51 = vmul.f32 %v6209_v18, %v12893_v52  ;;  %v6211_v56 = vld [vmem:[%s11950_s5 + $0x8] sm:$0xff]  ;;  %v12899_v36 = vld [vmem:[#allocation62_spill] sm:$0xff]  ;;  %vm12904_vm12 = vcmask 523264  }
 0x92c   :  { %4551 = vmatpush.msra.mxu3 %v4544_v16  ;;  %v4231_v11 = vsel %vm4228_vm0, %v4230_v20, %v4226_v32  ;;  %vm4213_vm10 = vcmp.eq.f32.partialorder %v12884_v25, 8.507059e+37  ;;  %v4790_v43 = vmul.f32 %v6210_v42, %v4772_v15  ;;  %v4788_v19 = vmul.f32 %v6211_v56, %v12894_v14  ;;  %v12897_v32 = vld [vmem:[#allocation63_spill] sm:$0xff]  ;;  %vm12905_vm15 = vmmov %vm12904_vm12 }
 0x92d   :  { %v4542_v26 = vmul.f32 %v4526_v12, %v4231_v11  ;;  %v4216_v59 = vsel %vm4213_vm10, %v4215_v57, %v4211_v0  ;;  %v12900_v21 = vld [vmem:[#allocation11_spill] sm:$0xff]  ;;  %vm5020_vm13 = vcmask 1024  }
 0x92e   :  { %4552 = vmatpush.msra.mxu3 %v4543_v30  ;;  %v4541_v8 = vmul.f32 %v4525_v63, %v4216_v59 }
 0x930   :  { %4553 = vmatpush.msra.mxu3 %v4542_v26  ;;  %v12901_v26 = vld [vmem:[#allocation68_spill] sm:$0xff] }
 0x932   :  { %4554 = vmatpush.msra.mxu3 %v4541_v8  ;;  %v12902_v8 = vld [vmem:[#allocation6_spill] sm:$0xff] }
 0x933   :  { %v4775_v50 = vpop.f32.mrf.mxu2 }
 0x934   :  { %v4791_v23 = vmul.f32 %v6204_v40, %v4775_v50  ;;  %4555 = vmatpush.msra.mxu3 %v11376_v46  ;;  %v12891_v46 = vld [vmem:[#allocation80_spill] sm:$0xff] }
 0x936   :  { %4817 = vperm.xlu0 %5760, %v4791_v23   ;;  %4556 = vmatpush.msra.mxu3 %v12885_v7 }
 0x938   :  { %4557 = vmatpush.msra.mxu3 %v12886_v41 }
 0x93a   :  { %4558 = vmatpush.msra.mxu3 %v12887_v13 }
 0x93b   :  { %v4778_v2 = vpop.f32.mrf.mxu2 }
 0x93c   :  { %v4792_v3 = vmul.f32 %v6205_v62, %v4778_v2  ;;  %4559 = vmatpush.msra.mxu3 %v12888_v9  ;;  %v12903_v2 = vld [vmem:[#allocation72_spill] sm:$0xff]  ;;  %v4884_v62 = vld [vmem:[%s11952_s16 + $0x38] sm:$0xff] }
 0x93d   :  { %4900 = vmatpush.msra.mxu0 %v4884_v62  ;;  %v4882_v9 = vld [vmem:[%s11952_s16 + $0x28] sm:$0xff]  ;;  %v4983_v62 = vld [vmem:[%s11955_s20 + $0x18] sm:$0xff] }
 0x93e   :  { %4822 = vperm.xlu2 %5762, %v4792_v3   ;;  %4560 = vmatpush.msra.mxu3 %v12889_v49  ;;  %v4883_v3 = vld [vmem:[%s11952_s16 + $0x30] sm:$0xff]  ;;  %v4881_v49 = vld [vmem:[%s11952_s16 + $0x20] sm:$0xff] }
 0x93f   :  { %4901 = vmatpush.msra.mxu0 %v4883_v3  ;;  %v4982_v3 = vld [vmem:[%s11955_s20 + $0x10] sm:$0xff] }
 0x940   :  { %4561 = vmatpush.msra.mxu3 %v12890_v53  ;;  %v4880_v53 = vld [vmem:[%s11952_s16 + $0x18] sm:$0xff] }
 0x941   :  { %4902 = vmatpush.msra.mxu0 %v4882_v9  ;;  %v4981_v9 = vld [vmem:[%s11955_s20 + $0x8] sm:$0xff] }
 0x942   :  { %4562 = vmatpush.msra.mxu3 %v12891_v46  ;;  %v4879_v46 = vld [vmem:[%s11952_s16 + $0x10] sm:$0xff] }
 0x943   :  { %v4781_v6 = vpop.f32.mrf.mxu2  ;;  %4903 = vmatpush.msra.mxu0 %v4881_v49  ;;  %v4980_v49 = vld [vmem:[%s11955_s20] sm:$0xff] }
 0x944   :  { %v4793_v47 = vmul.f32 %v6206_v34, %v4781_v6  ;;  %4563 = vmatpush.msra.mxu3 %v12892_v37  ;;  %v4878_v6 = vld [vmem:[%s11952_s16 + $0x8] sm:$0xff]  ;;  %v4877_v34 = vld [vmem:[%s11952_s16] sm:$0xff]  ;;  %v4940_v37 = vld [vmem:[%s11953_s18 + $0x70] sm:$0xff] }
 0x945   :  { %5701 = vmatmul.lmr.bf16.vlgmr.msra.gmra.8.mxu3  ;;  %4904 = vmatpush.msra.mxu0 %v4880_v53  ;;  %v27_v53 = vstv %s11956_s21 }
 0x946   :  { %4827 = vperm.xlu0 %5760, %v4793_v47   ;;  %v4941_v47 = vld [vmem:[%s11953_s18 + $0x78] sm:$0xff]  ;;  %28 = vst [vmem:[#allocation2] sm:$0x1] %v27_v53 }
 0x947   :  { %4905 = vmatpush.msra.mxu0 %v4879_v46  ;;  %4946 = vmatpush.msra.mxu1 %v4941_v47  ;;  %v5771_v46 = vld [vmem:[%s11954_s19] ss:$0 sm:$0xff] }
 0x949   :  { %4906 = vmatpush.msra.mxu0 %v4878_v6  ;;  %4947 = vmatpush.msra.mxu1 %v4940_v37 }
 0x94b   :  { %v4784_v48 = vpop.f32.mrf.mxu2  ;;  %4907 = vmatpush.msra.mxu0 %v4877_v34 }
 0x94c   :  { %v4794_v24 = vmul.f32 %v6208_v54, %v4784_v48 }
 0x94d   :  { %5702 = vmatmul.lmr.bf16.gmra.8.mxu3 }
 0x94e   :  { %4807 = vperm.xlu0 %5760, %v4789_v29   ;;  %4832 = vperm.xlu2 %5762, %v4794_v24  }
 0x955   :  { %5703 = vmatmul.lmr.bf16.gmra.8.mxu3 }
 0x956   :  { %4797 = vperm.xlu0 %5760, %v4787_v51   ;;  %4812 = vperm.xlu2 %5762, %v4790_v43  }
 0x95d   :  { %5704 = vmatmul.lmr.bf16.gmra.8.mxu3 }
 0x95e   :  { %4802 = vperm.xlu2 %5762, %v4788_v19  }
 0x965   :  { %5705 = vmatmul.lmr.bf16.gmra.8.mxu3 }
 0x96d   :  { %5706 = vmatmul.lmr.bf16.gmra.8.mxu3 }
 0x975   :  { %5707 = vmatmul.lmr.bf16.gmra.8.mxu3 }
 0x97d   :  { %5708 = vmatmul.lmr.bf16.gmra.8.mxu3 }
 0x998   :  { %v4823_v27 = vpop.permute.xlu2 %4822 }
 0x9a8   :  { %v4818_v28 = vpop.permute.xlu0 %4817  ;;  %v4833_v35 = vpop.permute.xlu2 %4832 }
 0x9b0   :  { %v4813_v31 = vpop.permute.xlu2 %4812 }
 0x9b8   :  { %v4828_v55 = vpop.permute.xlu0 %4827  ;;  %v4803_v23 = vpop.permute.xlu2 %4802 }
 0x9c0   :  { %v4808_v30 = vpop.permute.xlu0 %4807 }
 0x9c8   :  { %v4565_v44 = vpop.f32.mrf.mxu3  ;;  %v4798_v41 = vpop.permute.xlu0 %4797 }
 0x9c9   :  { %v4589_v50 = vadd.f32 %v4565_v44, %v12902_v8  ;;  %v4939_v44 = vld [vmem:[%s11953_s18 + $0x68] sm:$0xff]  ;;  %v4991_v8 = vld [vmem:[%s11955_s20 + $0x58] sm:$0xff] }
 0x9ca   :  { %4948 = vmatpush.msra.mxu1 %v4939_v44 }
 0x9cb   :  { %v4835_v13 = vmul.f32 %v4798_v41, %v4589_v50  ;;  %v4990_v50 = vld [vmem:[%s11955_s20 + $0x50] sm:$0xff] }
 0x9cc   :  { %v4986_v41 = vld [vmem:[%s11955_s20 + $0x30] sm:$0xff] }
 0x9d0   :  { %v4568_v58 = vpop.f32.mrf.mxu3 }
 0x9d1   :  { %v4590_v25 = vadd.f32 %v4568_v58, %v12901_v26  ;;  %v4938_v58 = vld [vmem:[%s11953_s18 + $0x60] sm:$0xff] }
 0x9d2   :  { %4949 = vmatpush.msra.mxu1 %v4938_v58 }
 0x9d3   :  { %v4836_v7 = vmul.f32 %v4803_v23, %v4590_v25  ;;  %v4993_v25 = vld [vmem:[%s11955_s20 + $0x68] sm:$0xff]  ;;  %v4988_v23 = vld [vmem:[%s11955_s20 + $0x40] sm:$0xff] }
 0x9d8   :  { %v4571_v22 = vpop.f32.mrf.mxu3 }
 0x9d9   :  { %v4591_v57 = vadd.f32 %v4571_v22, %v12900_v21  ;;  %v4937_v22 = vld [vmem:[%s11953_s18 + $0x58] sm:$0xff] }
 0x9da   :  { %4950 = vmatpush.msra.mxu1 %v4937_v22 }
 0x9db   :  { %v4837_v40 = vmul.f32 %v4808_v30, %v4591_v57 }
 0x9e0   :  { %v4574_v17 = vpop.f32.mrf.mxu3 }
 0x9e1   :  { %v4592_v0 = vadd.f32 %v4574_v17, %v12899_v36  ;;  %v4936_v17 = vld [vmem:[%s11953_s18 + $0x50] sm:$0xff] }
 0x9e2   :  { %4951 = vmatpush.msra.mxu1 %v4936_v17 }
 0x9e3   :  { %v4838_v59 = vmul.f32 %v4813_v31, %v4592_v0 }
 0x9e8   :  { %v4577_v60 = vpop.f32.mrf.mxu3 }
 0x9e9   :  { %v4593_v20 = vadd.f32 %v4577_v60, %v12898_v38  ;;  %v4935_v60 = vld [vmem:[%s11953_s18 + $0x48] sm:$0xff] }
 0x9ea   :  { %4952 = vmatpush.msra.mxu1 %v4935_v60 }
 0x9eb   :  { %v4839_v63 = vmul.f32 %v4818_v28, %v4593_v20  ;;  %v4932_v28 = vld [vmem:[%s11953_s18 + $0x30] sm:$0xff] }
 0x9f0   :  { %v4580_v61 = vpop.f32.mrf.mxu3 }
 0x9f1   :  { %v4594_v39 = vadd.f32 %v4580_v61, %v12897_v32  ;;  %v4934_v61 = vld [vmem:[%s11953_s18 + $0x40] sm:$0xff] }
 0x9f2   :  { %4953 = vmatpush.msra.mxu1 %v4934_v61  ;;  %v5770_v32 = vld [vmem:[%s11951_s17] ss:$0 sm:$0xff] }
 0x9f3   :  { %v4840_v11 = vmul.f32 %v4823_v27, %v4594_v39  ;;  %v4933_v27 = vld [vmem:[%s11953_s18 + $0x38] sm:$0xff] }
 0x9f4   :  { %4954 = vmatpush.msra.mxu1 %v4933_v27 }
 0x9f6   :  { %4955 = vmatpush.msra.mxu1 %v4932_v28 }
 0x9f8   :  { %v4583_v4 = vpop.f32.mrf.mxu3 }
 0x9f9   :  { %v4595_v5 = vadd.f32 %v4583_v4, %v12895_v45  ;;  %v4931_v4 = vld [vmem:[%s11953_s18 + $0x28] sm:$0xff] }
 0x9fa   :  { %4956 = vmatpush.msra.mxu1 %v4931_v4  ;;  %v4927_v45 = vld [vmem:[%s11953_s18 + $0x8] sm:$0xff] }
 0x9fb   :  { %v4841_v12 = vmul.f32 %v4828_v55, %v4595_v5  ;;  %v4929_v55 = vld [vmem:[%s11953_s18 + $0x18] sm:$0xff]  ;;  %v4926_v5 = vld [vmem:[%s11953_s18] sm:$0xff] }
 0xa00   :  { %v4586_v10 = vpop.f32.mrf.mxu3 }
 0xa01   :  { %v4596_v16 = vadd.f32 %v4586_v10, %v12896_v1  ;;  %v4928_v10 = vld [vmem:[%s11953_s18 + $0x10] sm:$0xff]  ;;  %v4995_v1 = vld [vmem:[%s11955_s20 + $0x78] sm:$0xff] }
 0xa03   :  { %v4842_v15 = vmul.f32 %v4833_v35, %v4596_v16  ;;  %v4930_v35 = vld [vmem:[%s11953_s18 + $0x20] sm:$0xff]  ;;  %v4994_v16 = vld [vmem:[%s11955_s20 + $0x70] sm:$0xff] }
 0xa04   :  { %4957 = vmatpush.msra.mxu1 %v4930_v35 }
 0xa05   :  { %4851 = vmatpush.msra.mxu3 %v4842_v15 }
 0xa06   :  { %4958 = vmatpush.msra.mxu1 %v4929_v55 }
 0xa07   :  { %4852 = vmatpush.msra.mxu3 %v4841_v12 }
 0xa08   :  { %4959 = vmatpush.msra.mxu1 %v4928_v10 }
 0xa09   :  { %4853 = vmatpush.msra.mxu3 %v4840_v11 }
 0xa0a   :  { %4960 = vmatpush.msra.mxu1 %v4927_v45 }
 0xa0b   :  { %4854 = vmatpush.msra.mxu3 %v4839_v63 }
 0xa0c   :  { %4961 = vmatpush.msra.mxu1 %v4926_v5 }
 0xa0d   :  { %4855 = vmatpush.msra.mxu3 %v4838_v59  ;;  %v4992_v59 = vld [vmem:[%s11955_s20 + $0x60] sm:$0xff] }
 0xa0f   :  { %4856 = vmatpush.msra.mxu3 %v4837_v40  ;;  %v4989_v40 = vld [vmem:[%s11955_s20 + $0x48] sm:$0xff] }
 0xa11   :  { %4857 = vmatpush.msra.mxu3 %v4836_v7  ;;  %v4987_v7 = vld [vmem:[%s11955_s20 + $0x38] sm:$0xff] }
 0xa13   :  { %4858 = vmatpush.msra.mxu3 %v4835_v13  ;;  %v4985_v13 = vld [vmem:[%s11955_s20 + $0x28] sm:$0xff] }
 0xa14   :  { %5615 = vmatmul.msk.f32.vlgmr.msra.gmra.mxu3 %vm12904_vm12, %v12903_v2  ;;  %v4984_v2 = vld [vmem:[%s11955_s20 + $0x20] sm:$0xff] }
 0xa15   :  { %5000 = vmatpush.msra.mxu3 %v4995_v1 }
 0xa17   :  { %5001 = vmatpush.msra.mxu3 %v4994_v16 }
 0xa19   :  { %5002 = vmatpush.msra.mxu3 %v4993_v25 }
 0xa1b   :  { %5003 = vmatpush.msra.mxu3 %v4992_v59 }
 0xa1d   :  { %5004 = vmatpush.msra.mxu3 %v4991_v8 }
 0xa1f   :  { %5005 = vmatpush.msra.mxu3 %v4990_v50 }
 0xa21   :  { %5006 = vmatpush.msra.mxu3 %v4989_v40 }
 0xa23   :  { %5007 = vmatpush.msra.mxu3 %v4988_v23 }
 0xa25   :  { %5008 = vmatpush.msra.mxu3 %v4987_v7 }
 0xa27   :  { %5009 = vmatpush.msra.mxu3 %v4986_v41 }
 0xa29   :  { %5010 = vmatpush.msra.mxu3 %v4985_v13 }
 0xa2b   :  { %5011 = vmatpush.msra.mxu3 %v4984_v2 }
 0xa2d   :  { %5012 = vmatpush.msra.mxu3 %v4983_v62 }
 0xa2f   :  { %5013 = vmatpush.msra.mxu3 %v4982_v3 }
 0xa31   :  { %5014 = vmatpush.msra.mxu3 %v4981_v9 }
 0xa33   :  { %5015 = vmatpush.msra.mxu3 %v4980_v49 }
 0xa97   :  { %v4860_v48 = vpop.f32.mrf.mxu3 }
 0xa98   :  { %v4864_v33 = vmin.f32 %v4860_v48, 20.0  ;;  %vm4863_vm11 = vcmp.gt.f32.partialorder %v4860_v48, 20.0 }
 0xa9a   :  { %v4865_v29 = vmul.f32 1.442695, %v4864_v33 }
 0xa9c   :  { %6159 = vpow2.f32 %v4865_v29 }
 0xaa2   :  { %v6160_v54 = vpop.eup %6159 }
 0xaa3   :  { %v4867_v24 = vadd.f32 1.0, %v6160_v54  ;;  %v4870_v18 = vmul.f32 -0.5, %v6160_v54  ;;  %v4873_v51 = vand.u32 2147483647, %v6160_v54 }
 0xaa5   :  { %6161 = vlog2.f32 %v4867_v24  ;;  %v4871_v52 = vadd.f32 1.0, %v4870_v18  ;;  %vm4874_vm5 = vcmp.lt.f32.partialorder %v4873_v51, 0.0004427343 }
 0xaa7   :  { %v4872_v56 = vmul.f32 %v6160_v54, %v4871_v52 }
 0xaab   :  { %v6162_v42 = vpop.eup %6161 }
 0xaac   :  { %v4869_v43 = vmul.f32 0.6931472, %v6162_v42 }
 0xaae   :  { %v4875_v14 = vsel %vm4874_vm5, %v4872_v56, %v4869_v43  ;;  %v5772_v56 = vld [vmem:[#allocation2] ss:$0 sm:$0xff] }
 0xaaf   :  { %v4876_v19 = vsel %vm4863_vm11, %v4860_v48, %v4875_v14 }
 0xab0   :  { %5616 = vmatmul.msk.f32.vlgmr.msra.gmra.mxu0 %vm12905_vm15, %v4876_v19 }
 0xb2d   :  { %v4909_v39 = vpop.f32.mrf.mxu0 }
 0xb2e   :  { %v4910_v15 = vadd.f32 %v5770_v32, %v4909_v39 }
 0xb30   :  { %v4913_v31 = vmin.f32 %v4910_v15, 20.0  ;;  %vm4912_vm3 = vcmp.gt.f32.partialorder %v4910_v15, 20.0 }
 0xb32   :  { %v4914_v38 = vmul.f32 1.442695, %v4913_v31 }
 0xb34   :  { %6163 = vpow2.f32 %v4914_v38 }
 0xb3a   :  { %v6164_v20 = vpop.eup %6163 }
 0xb3b   :  { %v4916_v12 = vadd.f32 1.0, %v6164_v20  ;;  %v4919_v30 = vmul.f32 -0.5, %v6164_v20  ;;  %v4922_v0 = vand.u32 2147483647, %v6164_v20 }
 0xb3d   :  { %6165 = vlog2.f32 %v4916_v12  ;;  %v4920_v36 = vadd.f32 1.0, %v4919_v30  ;;  %vm4923_vm8 = vcmp.lt.f32.partialorder %v4922_v0, 0.0004427343 }
 0xb3f   :  { %v4921_v57 = vmul.f32 %v6164_v20, %v4920_v36 }
 0xb43   :  { %v6166_v11 = vpop.eup %6165 }
 0xb44   :  { %v4918_v21 = vmul.f32 0.6931472, %v6166_v11 }
 0xb46   :  { %v4924_v63 = vsel %vm4923_vm8, %v4921_v57, %v4918_v21 }
 0xb47   :  { %v4925_v26 = vsel %vm4912_vm3, %v4910_v15, %v4924_v63 }
 0xb48   :  { %4962 = vmatmul.f32.vlgmr.msra.gmra.mxu1 %v4925_v26 }
 0xbc5   :  { %v4963_v6 = vpop.f32.mrf.mxu1 }
 0xbc6   :  { %v4964_v34 = vadd.f32 %v5771_v46, %v4963_v6 }
 0xbc8   :  { %v4967_v47 = vmin.f32 %v4964_v34, 20.0  ;;  %vm4966_vm2 = vcmp.gt.f32.partialorder %v4964_v34, 20.0 }
 0xbca   :  { %v4968_v37 = vmul.f32 1.442695, %v4967_v47 }
 0xbcc   :  { %6167 = vpow2.f32 %v4968_v37 }
 0xbd2   :  { %v6168_v48 = vpop.eup %6167 }
 0xbd3   :  { %v4970_v33 = vadd.f32 1.0, %v6168_v48  ;;  %v4973_v29 = vmul.f32 -0.5, %v6168_v48  ;;  %v4976_v24 = vand.u32 2147483647, %v6168_v48 }
 0xbd5   :  { %6169 = vlog2.f32 %v4970_v33  ;;  %v4974_v54 = vadd.f32 1.0, %v4973_v29  ;;  %vm4977_vm1 = vcmp.lt.f32.partialorder %v4976_v24, 0.0004427343 }
 0xbd7   :  { %v4975_v51 = vmul.f32 %v6168_v48, %v4974_v54 }
 0xbdb   :  { %v6170_v18 = vpop.eup %6169 }
 0xbdc   :  { %v4972_v52 = vmul.f32 0.6931472, %v6170_v18 }
 0xbde   :  { %v4978_v42 = vsel %vm4977_vm1, %v4975_v51, %v4972_v52 }
 0xbdf   :  { %v4979_v43 = vsel %vm4966_vm2, %v4964_v34, %v4978_v42 }
 0xbe0   :  { %5016 = vmatmul.f32.vlgmr.msra.gmra.mxu3 %v4979_v43 }
 0xc63   :  { %v5017_v14 = vpop.f32.mrf.mxu3 }
 0xc64   :  { %v5018_v19 = vadd.f32 %v5772_v56, %v5017_v14 }
 0xc66   :  { %5021 = vst.msk [vmem:[%s11957_s22] sm:$0x3] %vm5020_vm13, %v5018_v19 }

</bundles_post_ra>
